<compile_context>
chip_gen: v6e
topology: v6e:2x2x1
jax: 0.10.0
libtpu: 0.0.40
codegen_flags: <defaults>
</compile_context>

<pallas_src>
import functools

import numpy as np
import jax
import jax.numpy as jnp
from jax.experimental import pallas as pl
from jax.experimental.pallas import tpu as pltpu


def _round_up(x, m):
    return (x + m - 1) // m * m


@functools.lru_cache(maxsize=None)
def _vmem_limit():
    """Generation-dependent VMEM budget: ~96 MiB on v5e/v6e, ~48 MiB on v7x."""
    default = 64 * 1024 * 1024
    try:
        cap = int(getattr(pltpu.get_tpu_info(), "vmem_capacity_bytes", default))
    except Exception:
        cap = default
    return int(min(cap * 3 // 4, 100 * 1024 * 1024))


# --------------------------------------------------------------------------
# 1x1 conv / linear: single full-K block, bias + ReLU fused, bf16 in/out
# --------------------------------------------------------------------------
def _linear_kernel(x_ref, w_ref, b_ref, o_ref, *, activation):
    out = jnp.dot(x_ref[...], w_ref[...],
                  preferred_element_type=jnp.float32) + b_ref[...]
    if activation == "relu":
        out = jnp.maximum(out, 0.0)
    o_ref[...] = out.astype(o_ref.dtype)


def pallas_linear(x, w, b, activation=None, out_dtype=jnp.bfloat16):
    """x:[M,K] @ w:[K,N] + b (optional ReLU).  bf16 MXU operands, f32 math."""
    M, K = x.shape
    N = w.shape[1]
    # K is 32/64 everywhere in this model -> one full-K block, no accumulator.
    # TODO(synk): reintroduce a K grid axis + f32 VMEM accumulator for K >~ 2048.
    tm = min(256, M)
    Mp = _round_up(M, tm)
    if N % 128 == 0:
        tn = min(N, 512)
        while N % tn:
            tn -= 128
    else:
        tn = N  # full-dim last block: legal without 128 padding, no XLA slice
    xb = x.astype(jnp.bfloat16)
    if Mp != M:
        xb = jnp.pad(xb, ((0, Mp - M), (0, 0)))
    out = pl.pallas_call(
        functools.partial(_linear_kernel, activation=activation),
        out_shape=jax.ShapeDtypeStruct((Mp, N), out_dtype),
        grid=(Mp // tm, N // tn),
        in_specs=[pl.BlockSpec((tm, K), lambda i, j: (i, 0)),
                  pl.BlockSpec((K, tn), lambda i, j: (0, j)),
                  pl.BlockSpec((1, tn), lambda i, j: (0, j))],
        out_specs=pl.BlockSpec((tm, tn), lambda i, j: (i, j)),
        compiler_params=pltpu.CompilerParams(
            dimension_semantics=("parallel", "parallel"),
            vmem_limit_bytes=_vmem_limit()),
    )(xb, w.astype(jnp.bfloat16), b.reshape(1, N).astype(jnp.float32))
    return out if Mp == M else out[:M]


def conv1x1_nhwc(x, w, b, activation=None, out_dtype=jnp.bfloat16):
    B, H, W, Cin = x.shape
    Cout = w.shape[1]
    y = pallas_linear(x.reshape(B * H * W, Cin), w, b,
                      activation=activation, out_dtype=out_dtype)
    return y.reshape(B, H, W, Cout)


# --------------------------------------------------------------------------
# Direct 3x3 / stride-2 / pad-1 convolution (NHWC, parity-decomposed input)
# --------------------------------------------------------------------------
def _conv3x3s2_kernel(xf_ref, w_ref, b_ref, o_ref, *, Ho, Wo, relu):
    # xf_ref : [1, 4, Lpad, Cin]  flattened parity planes (bf16)
    # w_ref  : [9, Cin, Cout]     per-tap weights (bf16)
    # b_ref  : [1, Cout]          bias (f32)
    # o_ref  : [1, Ho, Wo, Cout]  bf16 output (no junk column, no XLA post-slice)
    nrows = Ho * (Wo + 1)
    cout = w_ref.shape[-1]
    acc = jnp.zeros((nrows, cout), jnp.float32)        # vreg accumulator
    for i in range(3):
        for j in range(3):
            par = (i % 2) * 2 + (j % 2)
            base = (i // 2) * (Wo + 1) + (j // 2)
            xt = xf_ref[0, par, pl.ds(base, nrows), :]  # [nrows, Cin]
            acc = acc + jnp.dot(xt, w_ref[i * 3 + j],
                                preferred_element_type=jnp.float32)
    res = acc + b_ref[...]
    if relu:
        res = jnp.maximum(res, 0.0)
    res = res.astype(o_ref.dtype)
    for h in range(Ho):                                 # drop the padding column
        o_ref[0, h] = res[h * (Wo + 1):h * (Wo + 1) + Wo, :]


def conv3x3_s2_nhwc(x, w_taps, b, *, relu=True):
    """3x3 stride-2 pad-1 conv.  x:[B,H,W,Cin], w_taps:[9,Cin,Cout], b:[1,Cout]."""
    B, H, W, Cin = x.shape
    assert H % 2 == 0 and W % 2 == 0
    Cout = w_taps.shape[-1]
    Ho, Wo = H // 2, W // 2

    # Space-to-depth parity decomposition in XLA (no im2col blow-up): every
    # tap becomes a contiguous, unit-stride row window inside the kernel.
    xp = jnp.pad(x, ((0, 0), (1, 1), (1, 1), (0, 0)))
    parities = [xp[:, pi::2, pj::2, :] for pi in (0, 1) for pj in (0, 1)]
    xpar = jnp.stack(parities, axis=1)                  # [B,4,Ho+1,Wo+1,Cin]
    L = (Ho + 1) * (Wo + 1)
    Lpad = _round_up(L + Wo + 2, 8)
    xparf = jnp.pad(xpar.reshape(B, 4, L, Cin),
                    ((0, 0), (0, 0), (0, Lpad - L), (0, 0))).astype(jnp.bfloat16)

    out = pl.pallas_call(
        functools.partial(_conv3x3s2_kernel, Ho=Ho, Wo=Wo, relu=relu),
        out_shape=jax.ShapeDtypeStruct((B, Ho, Wo, Cout), jnp.bfloat16),
        grid=(B,),
        in_specs=[
            pl.BlockSpec((1, 4, Lpad, Cin), lambda bi: (bi, 0, 0, 0)),
            pl.BlockSpec((9, Cin, Cout), lambda bi: (0, 0, 0)),
            pl.BlockSpec((1, Cout), lambda bi: (0, 0)),
        ],
        out_specs=pl.BlockSpec((1, Ho, Wo, Cout), lambda bi: (bi, 0, 0, 0)),
        compiler_params=pltpu.CompilerParams(
            dimension_semantics=("parallel",),
            vmem_limit_bytes=_vmem_limit()),
    )(xparf, w_taps, b)
    # TODO(synk): for large images add a row-tiling grid axis (with halo) so the
    #             per-batch block fits v7x's 64 MiB VMEM and feeds both TCs.
    return out


# --------------------------------------------------------------------------
# Fused FPN lateral 1x1 conv + nearest 2x upsample-add (no HBM upsample)
# --------------------------------------------------------------------------
def _lateral_upadd_kernel(c_ref, w_ref, b_ref, res_ref, s_ref, o_ref):
    # c_ref:[1,Pf,Cin]  w_ref:[Cin,Cout]  b_ref:[1,Cout]
    # res_ref:[1,Pc,Cout] (coarse)  s_ref:[Pf,Pc] 0/1 selection  o_ref:[1,Pf,Cout]
    lat = jnp.dot(c_ref[0], w_ref[...],
                  preferred_element_type=jnp.float32) + b_ref[...]
    up = jnp.dot(s_ref[...], res_ref[0], preferred_element_type=jnp.float32)
    o_ref[0] = (lat + up).astype(o_ref.dtype)


def _upsample_matrix(Hf, Wf, Hc, Wc):
    """Constant 0/1 matrix S with (S @ coarse_flat) == nearest 2x upsample."""
    pf = np.arange(Hf * Wf)
    src = (pf // Wf // 2) * Wc + (pf % Wf) // 2
    sel = (src[:, None] == np.arange(Hc * Wc)[None, :]).astype(np.float32)
    return jnp.asarray(sel, dtype=jnp.bfloat16)


def lateral_upadd(c_fine, w, b, coarse):
    B, Hf, Wf, Cin = c_fine.shape
    Cout = w.shape[1]
    _, Hc, Wc, _ = coarse.shape
    Pf, Pc = Hf * Wf, Hc * Wc
    S = _upsample_matrix(Hf, Wf, Hc, Wc)
    # TODO(synk): PyTorch FPN typically uses bilinear interpolation; nearest is
    #             used here.  For large images, replace the selection matmul by
    #             a row-tiled grid whose residual BlockSpec index_map does the
    #             2x row duplication.
    out = pl.pallas_call(
        _lateral_upadd_kernel,
        out_shape=jax.ShapeDtypeStruct((B, Pf, Cout), jnp.bfloat16),
        grid=(B,),
        in_specs=[pl.BlockSpec((1, Pf, Cin), lambda bi: (bi, 0, 0)),
                  pl.BlockSpec((Cin, Cout), lambda bi: (0, 0)),
                  pl.BlockSpec((1, Cout), lambda bi: (0, 0)),
                  pl.BlockSpec((1, Pc, Cout), lambda bi: (bi, 0, 0)),
                  pl.BlockSpec((Pf, Pc), lambda bi: (0, 0))],
        out_specs=pl.BlockSpec((1, Pf, Cout), lambda bi: (bi, 0, 0)),
        compiler_params=pltpu.CompilerParams(
            dimension_semantics=("parallel",),
            vmem_limit_bytes=_vmem_limit()),
    )(c_fine.reshape(B, Pf, Cin), w, b.reshape(1, Cout).astype(jnp.float32),
      coarse.reshape(B, Pc, Cout), S)
    return out.reshape(B, Hf, Wf, Cout)


# --------------------------------------------------------------------------
# Fully-fused 1-layer Mask2Former decoder kernel (grid over batch)
# --------------------------------------------------------------------------
# Row indices inside the packed bias / LayerNorm table.
(_B_CAQ, _B_CAKV, _B_CAO, _B_SAQKV, _B_SAO, _B_FFN1, _B_FFN2,
 _B_CLS, _B_ME1, _B_ME2, _B_ME3,
 _LN0_G, _LN0_B, _LN1_G, _LN1_B, _LN2_G, _LN2_B) = range(17)
_NUM_VEC_ROWS = 17


def _decoder_kernel(qe_ref, mem_ref, mf_ref, vec_ref,
                    caq_w, cakv_w, cao_w, saqkv_w, sao_w,
                    ffn1_w, ffn2_w, cls_w, me1_w, me2_w, me3_w,
                    logits_ref, masks_ref, *, nheads, eps):
    D = qe_ref.shape[-1]
    dh = D // nheads
    scale = 1.0 / float(dh) ** 0.5

    def vrow(idx, width):                       # packed bias / LN table row
        return vec_ref[pl.ds(idx, 1), pl.ds(0, width)]

    def mm(x, w_ref, bidx):                     # bf16 MXU, f32 accumulate
        w = w_ref[...]
        return (jnp.dot(x.astype(jnp.bfloat16), w,
                        preferred_element_type=jnp.float32)
                + vrow(bidx, w.shape[-1]))

    def layernorm(x, gi, bi):                   # f32 math (v5e-safe)
        mu = jnp.mean(x, axis=-1, keepdims=True)
        xc = x - mu
        var = jnp.mean(xc * xc, axis=-1, keepdims=True)
        return xc * jax.lax.rsqrt(var + eps) * vrow(gi, D) + vrow(bi, D)

    def mha_oproj(q, k, v, wo_ref, obidx):
        # Output projection decomposed over heads: no cross-lane concat.
        acc = jnp.zeros((q.shape[0], D), jnp.float32)
        for h in range(nheads):                 # static unroll
            sl = slice(h * dh, (h + 1) * dh)
            qh = q[:, sl].astype(jnp.bfloat16)
            kh = k[:, sl].astype(jnp.bfloat16)
            vh = v[:, sl].astype(jnp.bfloat16)
            s = jnp.dot(qh, kh.T, preferred_element_type=jnp.float32) * scale
            s = s - jnp.max(s, axis=-1, keepdims=True)
            e = jnp.exp(s)
            pr = e * pl.reciprocal(jnp.sum(e, axis=-1, keepdims=True), approx=True)
            oh = jnp.dot(pr.astype(jnp.bfloat16), vh,
                         preferred_element_type=jnp.float32)        # [Q, dh]
            woh = wo_ref[pl.ds(h * dh, dh), :]                      # [dh, D]
            acc = acc + jnp.dot(oh.astype(jnp.bfloat16), woh,
                                preferred_element_type=jnp.float32)
        return acc + vrow(obidx, D)

    tgt = qe_ref[...].astype(jnp.float32)       # [Q, D]
    memory = mem_ref[0]                         # [S, D] bf16

    # cross-attention (queries attend to pixel memory)
    q = mm(tgt, caq_w, _B_CAQ)
    kv = mm(memory, cakv_w, _B_CAKV)
    att = mha_oproj(q, kv[:, :D], kv[:, D:], cao_w, _B_CAO)
    tgt = layernorm(tgt + att, _LN0_G, _LN0_B)

    # self-attention among queries (fused QKV projection)
    qkv = mm(tgt, saqkv_w, _B_SAQKV)
    att = mha_oproj(qkv[:, :D], qkv[:, D:2 * D], qkv[:, 2 * D:], sao_w, _B_SAO)
    tgt = layernorm(tgt + att, _LN1_G, _LN1_B)

    # feed-forward
    ff = mm(jnp.maximum(mm(tgt, ffn1_w, _B_FFN1), 0.0), ffn2_w, _B_FFN2)
    tgt = layernorm(tgt + ff, _LN2_G, _LN2_B)

    # heads: separate lane-aligned class head and 3-layer mask-embed MLP
    logits_ref[0] = mm(tgt, cls_w, _B_CLS)
    me = jnp.maximum(mm(tgt, me1_w, _B_ME1), 0.0)
    me = jnp.maximum(mm(me, me2_w, _B_ME2), 0.0)
    mask_embed = mm(me, me3_w, _B_ME3).astype(jnp.bfloat16)          # [Q, MD]

    mf = mf_ref[0]                                                    # [P, MD]
    masks_ref[0] = jax.lax.dot_general(
        mask_embed, mf, dimension_numbers=(((1,), (1,)), ((), ())),
        preferred_element_type=jnp.float32)                           # [Q, P]


def mask2former_decoder(p, memory, mask_feat, *, nheads, num_classes):
    B, S, D = memory.shape
    P, MD = mask_feat.shape[1], mask_feat.shape[2]
    Q = p["query_embed"].shape[0]
    C1 = num_classes + 1

    weight_mats = [p["ca_q_w"], p["ca_kv_w"], p["ca_o_w"], p["sa_qkv_w"],
                   p["sa_o_w"], p["ffn1_w"], p["ffn2_w"], p["cls_w"],
                   p["me1_w"], p["me2_w"], p["me3_w"]]

    in_specs = ([pl.BlockSpec((Q, D), lambda b: (0, 0)),
                 pl.BlockSpec((1, S, D), lambda b: (b, 0, 0)),
                 pl.BlockSpec((1, P, MD), lambda b: (b, 0, 0)),
                 pl.BlockSpec(p["dec_vecs"].shape, lambda b: (0, 0))]
                + [pl.BlockSpec(wm.shape, lambda b: (0, 0)) for wm in weight_mats])

    logits, masks = pl.pallas_call(
        functools.partial(_decoder_kernel, nheads=nheads, eps=1e-5),
        out_shape=(jax.ShapeDtypeStruct((B, Q, C1), jnp.float32),
                   jax.ShapeDtypeStruct((B, Q, P), jnp.float32)),
        grid=(B,),
        in_specs=in_specs,
        out_specs=(pl.BlockSpec((1, Q, C1), lambda b: (b, 0, 0)),
                   pl.BlockSpec((1, Q, P), lambda b: (b, 0, 0))),
        compiler_params=pltpu.CompilerParams(
            dimension_semantics=("parallel",),
            vmem_limit_bytes=_vmem_limit()),
    )(p["query_embed"], memory, mask_feat, p["dec_vecs"], *weight_mats)
    return logits, masks


# --------------------------------------------------------------------------
# Parameter initialization (deterministic, PyTorch-like fan-in uniform)
# --------------------------------------------------------------------------
def init_params(key, num_classes, hidden_dim, num_queries, nheads,
                dim_feedforward, mask_dim):
    D, F, Q, MD = hidden_dim, dim_feedforward, num_queries, mask_dim
    C1 = num_classes + 1
    keys = jax.random.split(key, 32)
    p = {}

    def lin(k, fi, fo):
        k1, k2 = jax.random.split(k)
        s = 1.0 / float(fi) ** 0.5
        return (jax.random.uniform(k1, (fi, fo), jnp.float32, -s, s),
                jax.random.uniform(k2, (fo,), jnp.float32, -s, s))

    def conv3(k, cin, cout):
        k1, k2 = jax.random.split(k)
        s = 1.0 / float(cin * 9) ** 0.5
        w = jax.random.uniform(k1, (9, cin, cout), jnp.float32, -s, s)
        b = jax.random.uniform(k2, (cout,), jnp.float32, -s, s)
        return w.astype(jnp.bfloat16), b.reshape(1, cout)

    # --- EFPN backbone ---
    p["conv1_w"], p["conv1_b"] = conv3(keys[0], 3, D)
    p["conv2_w"], p["conv2_b"] = conv3(keys[1], D, D)
    p["conv3_w"], p["conv3_b"] = conv3(keys[2], D, D)
    for i, name in enumerate(("lat1", "lat2", "lat3")):
        w, b = lin(keys[3 + i], D, D)
        p[f"{name}_w"] = w.astype(jnp.bfloat16)           # pre-cast once
        p[f"{name}_b"] = b.reshape(1, D)
    w, b = lin(keys[6], D, MD)
    p["mask_w"], p["mask_b"] = w.astype(jnp.bfloat16), b.reshape(1, MD)

    # --- Mask2Former decoder (dec_layers = 1) ---
    p["query_embed"] = 0.02 * jax.random.normal(keys[7], (Q, D), jnp.float32)
    names_dims = [("ca_q", D, D), ("ca_kv", D, 2 * D), ("ca_o", D, D),
                  ("sa_qkv", D, 3 * D), ("sa_o", D, D),
                  ("ffn1", D, F), ("ffn2", F, D),
                  ("cls", D, C1), ("me1", D, D), ("me2", D, D), ("me3", D, MD)]
    bias_rows = []
    for i, (nm, fi, fo) in enumerate(names_dims):
        w, b = lin(keys[8 + i], fi, fo)
        p[f"{nm}_w"] = w.astype(jnp.bfloat16)
        bias_rows.append(b)
    for _ in range(3):                                    # LayerNorm gamma/beta
        bias_rows.append(jnp.ones((D,), jnp.float32))
        bias_rows.append(jnp.zeros((D,), jnp.float32))
    assert len(bias_rows) == _NUM_VEC_ROWS

    vw = _round_up(max(3 * D, F, C1, MD, D), 128)
    nr = _round_up(_NUM_VEC_ROWS, 8)
    packed = jnp.zeros((nr, vw), jnp.float32)
    for i, r in enumerate(bias_rows):
        packed = packed.at[i, :r.shape[0]].set(r)
    p["dec_vecs"] = packed
    return p


# --------------------------------------------------------------------------
# Model forward (= ExtendedMask2Former.forward)
# --------------------------------------------------------------------------
def efpn_forward(p, x_nhwc):
    c1 = conv3x3_s2_nhwc(x_nhwc, p["conv1_w"], p["conv1_b"], relu=True)
    c2 = conv3x3_s2_nhwc(c1, p["conv2_w"], p["conv2_b"], relu=True)
    c3 = conv3x3_s2_nhwc(c2, p["conv3_w"], p["conv3_b"], relu=True)
    p3 = conv1x1_nhwc(c3, p["lat3_w"], p["lat3_b"])
    p2 = lateral_upadd(c2, p["lat2_w"], p["lat2_b"], p3)   # fused 1x1 + 2x up-add
    p1 = lateral_upadd(c1, p["lat1_w"], p["lat1_b"], p2)
    masks = conv1x1_nhwc(p1, p["mask_w"], p["mask_b"])      # [B, H/2, W/2, mask_dim]
    return [p1, p2, p3], masks


def extended_mask2former_forward(params, image, *, hidden_dim, nheads, num_classes):
    # image enters NCHW (PyTorch layout); one NHWC transpose + bf16 cast at the
    # boundary, then bf16 end-to-end until the decoder's f32 outputs.
    x = jnp.transpose(image, (0, 2, 3, 1)).astype(jnp.bfloat16)
    (p1, p2, p3), mask_features = efpn_forward(params, x)
    assert p3.shape[-1] == hidden_dim

    B, h3, w3, D = p3.shape
    memory = p3.reshape(B, h3 * w3, D)                     # coarsest level as memory
    Bm, Hm, Wm, MD = mask_features.shape
    mf = mask_features.reshape(Bm, Hm * Wm, MD)

    logits, masks_flat = mask2former_decoder(params, memory, mf,
                                             nheads=nheads,
                                             num_classes=num_classes)
    return {"pred_logits": logits,
            "pred_masks": masks_flat.reshape(B, -1, Hm, Wm)}


# --------------------------------------------------------------------------
if __name__ == "__main__":
    num_classes = 5
    hidden_dim = 32
    num_queries = 8
    nheads = 4
    dim_feedforward = 64
    mask_dim = 16

    key = jax.random.PRNGKey(0)
    pkey, xkey = jax.random.split(key)
    params = init_params(pkey, num_classes, hidden_dim, num_queries, nheads,
                         dim_feedforward, mask_dim)
    image = jax.random.normal(xkey, (2, 3, 32, 32), jnp.float32)   # NCHW

    fwd = jax.jit(functools.partial(extended_mask2former_forward,
                                    hidden_dim=hidden_dim, nheads=nheads,
                                    num_classes=num_classes))
    out = fwd(params, image)
    jax.block_until_ready(out)

    assert out["pred_logits"].shape == (2, num_queries, num_classes + 1)
    assert out["pred_masks"].shape == (2, num_queries, 16, 16)
    print("KERNEL_OK")
</pallas_src>

<mosaic_0001>
module attributes {stable_mosaic.version = 11 : i64} {
  func.func @_conv3x3s2_kernel(%arg0: i32, %arg1: memref<1x4x312x3xbf16, #tpu.memory_space<vmem>>, %arg2: memref<9x3x32xbf16, #tpu.memory_space<vmem>>, %arg3: memref<1x32xf32, #tpu.memory_space<vmem>>, %arg4: memref<1x16x16x32xbf16, #tpu.memory_space<vmem>>) attributes {dimension_semantics = [#tpu.dimension_semantics<parallel>], iteration_bounds = array<i64: 2>, scalar_prefetch = 0 : i64, scratch_operands = 0 : i64, tpu.core_type = #tpu.core_type<tc>, window_params = [{transform_indices = @transform_0, window_bounds = array<i64: 1, 4, 312, 3>}, {pipeline_mode = #tpu.pipeline_mode<synchronous>, transform_indices = @transform_1, window_bounds = array<i64: 9, 3, 32>}, {pipeline_mode = #tpu.pipeline_mode<synchronous>, transform_indices = @transform_2, window_bounds = array<i64: 1, 32>}, {transform_indices = @transform_3, window_bounds = array<i64: 1, 16, 16, 32>}]} {
    %cst = arith.constant 0.000000e+00 : f32
    %0 = vector.broadcast %cst : f32 to vector<272x32xf32>
    %c0 = arith.constant 0 : index
    %c0_0 = arith.constant 0 : index
    %c0_1 = arith.constant 0 : index
    %c0_2 = arith.constant 0 : index
    %1 = vector.load %arg1[%c0, %c0_0, %c0_1, %c0_2] : memref<1x4x312x3xbf16, #tpu.memory_space<vmem>>, vector<1x1x272x3xbf16>
    %2 = vector.shape_cast %1 : vector<1x1x272x3xbf16> to vector<272x3xbf16>
    %c0_3 = arith.constant 0 : index
    %c0_4 = arith.constant 0 : index
    %c0_5 = arith.constant 0 : index
    %3 = vector.load %arg2[%c0_3, %c0_4, %c0_5] : memref<9x3x32xbf16, #tpu.memory_space<vmem>>, vector<1x3x32xbf16>
    %4 = vector.shape_cast %3 : vector<1x3x32xbf16> to vector<3x32xbf16>
    %cst_6 = arith.constant dense<0.000000e+00> : vector<272x32xf32>
    %5 = tpu.matmul %2, %4, %cst_6 {dimension_numbers = #tpu.dot_dimension_numbers<[1], [0], [0], [1], [0, 0, 1, 1], [], []>} : vector<272x3xbf16>, vector<3x32xbf16>, vector<272x32xf32> -> vector<272x32xf32>
    %6 = arith.addf %0, %5 : vector<272x32xf32>
    %c0_7 = arith.constant 0 : index
    %c1 = arith.constant 1 : index
    %c0_8 = arith.constant 0 : index
    %c0_9 = arith.constant 0 : index
    %7 = vector.load %arg1[%c0_7, %c1, %c0_8, %c0_9] : memref<1x4x312x3xbf16, #tpu.memory_space<vmem>>, vector<1x1x272x3xbf16>
    %8 = vector.shape_cast %7 : vector<1x1x272x3xbf16> to vector<272x3xbf16>
    %c1_10 = arith.constant 1 : index
    %c0_11 = arith.constant 0 : index
    %c0_12 = arith.constant 0 : index
    %9 = vector.load %arg2[%c1_10, %c0_11, %c0_12] : memref<9x3x32xbf16, #tpu.memory_space<vmem>>, vector<1x3x32xbf16>
    %10 = vector.shape_cast %9 : vector<1x3x32xbf16> to vector<3x32xbf16>
    %cst_13 = arith.constant dense<0.000000e+00> : vector<272x32xf32>
    %11 = tpu.matmul %8, %10, %cst_13 {dimension_numbers = #tpu.dot_dimension_numbers<[1], [0], [0], [1], [0, 0, 1, 1], [], []>} : vector<272x3xbf16>, vector<3x32xbf16>, vector<272x32xf32> -> vector<272x32xf32>
    %12 = arith.addf %6, %11 : vector<272x32xf32>
    %c0_14 = arith.constant 0 : index
    %c0_15 = arith.constant 0 : index
    %c1_16 = arith.constant 1 : index
    %c0_17 = arith.constant 0 : index
    %13 = vector.load %arg1[%c0_14, %c0_15, %c1_16, %c0_17] : memref<1x4x312x3xbf16, #tpu.memory_space<vmem>>, vector<1x1x272x3xbf16>
    %14 = vector.shape_cast %13 : vector<1x1x272x3xbf16> to vector<272x3xbf16>
    %c2 = arith.constant 2 : index
    %c0_18 = arith.constant 0 : index
    %c0_19 = arith.constant 0 : index
    %15 = vector.load %arg2[%c2, %c0_18, %c0_19] : memref<9x3x32xbf16, #tpu.memory_space<vmem>>, vector<1x3x32xbf16>
    %16 = vector.shape_cast %15 : vector<1x3x32xbf16> to vector<3x32xbf16>
    %cst_20 = arith.constant dense<0.000000e+00> : vector<272x32xf32>
    %17 = tpu.matmul %14, %16, %cst_20 {dimension_numbers = #tpu.dot_dimension_numbers<[1], [0], [0], [1], [0, 0, 1, 1], [], []>} : vector<272x3xbf16>, vector<3x32xbf16>, vector<272x32xf32> -> vector<272x32xf32>
    %18 = arith.addf %12, %17 : vector<272x32xf32>
    %c0_21 = arith.constant 0 : index
    %c2_22 = arith.constant 2 : index
    %c0_23 = arith.constant 0 : index
    %c0_24 = arith.constant 0 : index
    %19 = vector.load %arg1[%c0_21, %c2_22, %c0_23, %c0_24] : memref<1x4x312x3xbf16, #tpu.memory_space<vmem>>, vector<1x1x272x3xbf16>
    %20 = vector.shape_cast %19 : vector<1x1x272x3xbf16> to vector<272x3xbf16>
    %c3 = arith.constant 3 : index
    %c0_25 = arith.constant 0 : index
    %c0_26 = arith.constant 0 : index
    %21 = vector.load %arg2[%c3, %c0_25, %c0_26] : memref<9x3x32xbf16, #tpu.memory_space<vmem>>, vector<1x3x32xbf16>
    %22 = vector.shape_cast %21 : vector<1x3x32xbf16> to vector<3x32xbf16>
    %cst_27 = arith.constant dense<0.000000e+00> : vector<272x32xf32>
    %23 = tpu.matmul %20, %22, %cst_27 {dimension_numbers = #tpu.dot_dimension_numbers<[1], [0], [0], [1], [0, 0, 1, 1], [], []>} : vector<272x3xbf16>, vector<3x32xbf16>, vector<272x32xf32> -> vector<272x32xf32>
    %24 = arith.addf %18, %23 : vector<272x32xf32>
    %c0_28 = arith.constant 0 : index
    %c3_29 = arith.constant 3 : index
    %c0_30 = arith.constant 0 : index
    %c0_31 = arith.constant 0 : index
    %25 = vector.load %arg1[%c0_28, %c3_29, %c0_30, %c0_31] : memref<1x4x312x3xbf16, #tpu.memory_space<vmem>>, vector<1x1x272x3xbf16>
    %26 = vector.shape_cast %25 : vector<1x1x272x3xbf16> to vector<272x3xbf16>
    %c4 = arith.constant 4 : index
    %c0_32 = arith.constant 0 : index
    %c0_33 = arith.constant 0 : index
    %27 = vector.load %arg2[%c4, %c0_32, %c0_33] : memref<9x3x32xbf16, #tpu.memory_space<vmem>>, vector<1x3x32xbf16>
    %28 = vector.shape_cast %27 : vector<1x3x32xbf16> to vector<3x32xbf16>
    %cst_34 = arith.constant dense<0.000000e+00> : vector<272x32xf32>
    %29 = tpu.matmul %26, %28, %cst_34 {dimension_numbers = #tpu.dot_dimension_numbers<[1], [0], [0], [1], [0, 0, 1, 1], [], []>} : vector<272x3xbf16>, vector<3x32xbf16>, vector<272x32xf32> -> vector<272x32xf32>
    %30 = arith.addf %24, %29 : vector<272x32xf32>
    %c0_35 = arith.constant 0 : index
    %c2_36 = arith.constant 2 : index
    %c1_37 = arith.constant 1 : index
    %c0_38 = arith.constant 0 : index
    %31 = vector.load %arg1[%c0_35, %c2_36, %c1_37, %c0_38] : memref<1x4x312x3xbf16, #tpu.memory_space<vmem>>, vector<1x1x272x3xbf16>
    %32 = vector.shape_cast %31 : vector<1x1x272x3xbf16> to vector<272x3xbf16>
    %c5 = arith.constant 5 : index
    %c0_39 = arith.constant 0 : index
    %c0_40 = arith.constant 0 : index
    %33 = vector.load %arg2[%c5, %c0_39, %c0_40] : memref<9x3x32xbf16, #tpu.memory_space<vmem>>, vector<1x3x32xbf16>
    %34 = vector.shape_cast %33 : vector<1x3x32xbf16> to vector<3x32xbf16>
    %cst_41 = arith.constant dense<0.000000e+00> : vector<272x32xf32>
    %35 = tpu.matmul %32, %34, %cst_41 {dimension_numbers = #tpu.dot_dimension_numbers<[1], [0], [0], [1], [0, 0, 1, 1], [], []>} : vector<272x3xbf16>, vector<3x32xbf16>, vector<272x32xf32> -> vector<272x32xf32>
    %36 = arith.addf %30, %35 : vector<272x32xf32>
    %c0_42 = arith.constant 0 : index
    %c0_43 = arith.constant 0 : index
    %c17 = arith.constant 17 : index
    %c0_44 = arith.constant 0 : index
    %37 = vector.load %arg1[%c0_42, %c0_43, %c17, %c0_44] : memref<1x4x312x3xbf16, #tpu.memory_space<vmem>>, vector<1x1x272x3xbf16>
    %38 = vector.shape_cast %37 : vector<1x1x272x3xbf16> to vector<272x3xbf16>
    %c6 = arith.constant 6 : index
    %c0_45 = arith.constant 0 : index
    %c0_46 = arith.constant 0 : index
    %39 = vector.load %arg2[%c6, %c0_45, %c0_46] : memref<9x3x32xbf16, #tpu.memory_space<vmem>>, vector<1x3x32xbf16>
    %40 = vector.shape_cast %39 : vector<1x3x32xbf16> to vector<3x32xbf16>
    %cst_47 = arith.constant dense<0.000000e+00> : vector<272x32xf32>
    %41 = tpu.matmul %38, %40, %cst_47 {dimension_numbers = #tpu.dot_dimension_numbers<[1], [0], [0], [1], [0, 0, 1, 1], [], []>} : vector<272x3xbf16>, vector<3x32xbf16>, vector<272x32xf32> -> vector<272x32xf32>
    %42 = arith.addf %36, %41 : vector<272x32xf32>
    %c0_48 = arith.constant 0 : index
    %c1_49 = arith.constant 1 : index
    %c17_50 = arith.constant 17 : index
    %c0_51 = arith.constant 0 : index
    %43 = vector.load %arg1[%c0_48, %c1_49, %c17_50, %c0_51] : memref<1x4x312x3xbf16, #tpu.memory_space<vmem>>, vector<1x1x272x3xbf16>
    %44 = vector.shape_cast %43 : vector<1x1x272x3xbf16> to vector<272x3xbf16>
    %c7 = arith.constant 7 : index
    %c0_52 = arith.constant 0 : index
    %c0_53 = arith.constant 0 : index
    %45 = vector.load %arg2[%c7, %c0_52, %c0_53] : memref<9x3x32xbf16, #tpu.memory_space<vmem>>, vector<1x3x32xbf16>
    %46 = vector.shape_cast %45 : vector<1x3x32xbf16> to vector<3x32xbf16>
    %cst_54 = arith.constant dense<0.000000e+00> : vector<272x32xf32>
    %47 = tpu.matmul %44, %46, %cst_54 {dimension_numbers = #tpu.dot_dimension_numbers<[1], [0], [0], [1], [0, 0, 1, 1], [], []>} : vector<272x3xbf16>, vector<3x32xbf16>, vector<272x32xf32> -> vector<272x32xf32>
    %48 = arith.addf %42, %47 : vector<272x32xf32>
    %c0_55 = arith.constant 0 : index
    %c0_56 = arith.constant 0 : index
    %c18 = arith.constant 18 : index
    %c0_57 = arith.constant 0 : index
    %49 = vector.load %arg1[%c0_55, %c0_56, %c18, %c0_57] : memref<1x4x312x3xbf16, #tpu.memory_space<vmem>>, vector<1x1x272x3xbf16>
    %50 = vector.shape_cast %49 : vector<1x1x272x3xbf16> to vector<272x3xbf16>
    %c8 = arith.constant 8 : index
    %c0_58 = arith.constant 0 : index
    %c0_59 = arith.constant 0 : index
    %51 = vector.load %arg2[%c8, %c0_58, %c0_59] : memref<9x3x32xbf16, #tpu.memory_space<vmem>>, vector<1x3x32xbf16>
    %52 = vector.shape_cast %51 : vector<1x3x32xbf16> to vector<3x32xbf16>
    %cst_60 = arith.constant dense<0.000000e+00> : vector<272x32xf32>
    %53 = tpu.matmul %50, %52, %cst_60 {dimension_numbers = #tpu.dot_dimension_numbers<[1], [0], [0], [1], [0, 0, 1, 1], [], []>} : vector<272x3xbf16>, vector<3x32xbf16>, vector<272x32xf32> -> vector<272x32xf32>
    %54 = arith.addf %48, %53 : vector<272x32xf32>
    %c0_61 = arith.constant 0 : index
    %c0_62 = arith.constant 0 : index
    %55 = vector.load %arg3[%c0_61, %c0_62] : memref<1x32xf32, #tpu.memory_space<vmem>>, vector<1x32xf32>
    %56 = vector.broadcast %55 : vector<1x32xf32> to vector<272x32xf32>
    %57 = arith.addf %54, %56 : vector<272x32xf32>
    %cst_63 = arith.constant 0.000000e+00 : f32
    %58 = vector.broadcast %cst_63 : f32 to vector<272x32xf32>
    %59 = arith.maximumf %57, %58 : vector<272x32xf32>
    %60 = arith.truncf %59 : vector<272x32xf32> to vector<272x32xbf16>
    %61 = vector.extract_strided_slice %60 {offsets = [0, 0], sizes = [16, 32], strides = [1, 1]} : vector<272x32xbf16> to vector<16x32xbf16>
    %c0_64 = arith.constant 0 : index
    %c0_65 = arith.constant 0 : index
    %c0_66 = arith.constant 0 : index
    %c0_67 = arith.constant 0 : index
    %62 = vector.load %arg4[%c0_64, %c0_65, %c0_66, %c0_67] : memref<1x16x16x32xbf16, #tpu.memory_space<vmem>>, vector<1x1x16x32xbf16>
    %63 = vector.shape_cast %62 : vector<1x1x16x32xbf16> to vector<16x32xbf16>
    %64 = vector.shape_cast %61 : vector<16x32xbf16> to vector<1x1x16x32xbf16>
    tpu.vector_store %arg4[%c0_64, %c0_65, %c0_66, %c0_67], %64 {strides = array<i32>} : memref<1x16x16x32xbf16, #tpu.memory_space<vmem>>, vector<1x1x16x32xbf16>,
    %65 = vector.extract_strided_slice %60 {offsets = [17, 0], sizes = [16, 32], strides = [1, 1]} : vector<272x32xbf16> to vector<16x32xbf16>
    %c0_68 = arith.constant 0 : index
    %c1_69 = arith.constant 1 : index
    %c0_70 = arith.constant 0 : index
    %c0_71 = arith.constant 0 : index
    %66 = vector.load %arg4[%c0_68, %c1_69, %c0_70, %c0_71] : memref<1x16x16x32xbf16, #tpu.memory_space<vmem>>, vector<1x1x16x32xbf16>
    %67 = vector.shape_cast %66 : vector<1x1x16x32xbf16> to vector<16x32xbf16>
    %68 = vector.shape_cast %65 : vector<16x32xbf16> to vector<1x1x16x32xbf16>
    tpu.vector_store %arg4[%c0_68, %c1_69, %c0_70, %c0_71], %68 {strides = array<i32>} : memref<1x16x16x32xbf16, #tpu.memory_space<vmem>>, vector<1x1x16x32xbf16>,
    %69 = vector.extract_strided_slice %60 {offsets = [34, 0], sizes = [16, 32], strides = [1, 1]} : vector<272x32xbf16> to vector<16x32xbf16>
    %c0_72 = arith.constant 0 : index
    %c2_73 = arith.constant 2 : index
    %c0_74 = arith.constant 0 : index
    %c0_75 = arith.constant 0 : index
    %70 = vector.load %arg4[%c0_72, %c2_73, %c0_74, %c0_75] : memref<1x16x16x32xbf16, #tpu.memory_space<vmem>>, vector<1x1x16x32xbf16>
    %71 = vector.shape_cast %70 : vector<1x1x16x32xbf16> to vector<16x32xbf16>
    %72 = vector.shape_cast %69 : vector<16x32xbf16> to vector<1x1x16x32xbf16>
    tpu.vector_store %arg4[%c0_72, %c2_73, %c0_74, %c0_75], %72 {strides = array<i32>} : memref<1x16x16x32xbf16, #tpu.memory_space<vmem>>, vector<1x1x16x32xbf16>,
    %73 = vector.extract_strided_slice %60 {offsets = [51, 0], sizes = [16, 32], strides = [1, 1]} : vector<272x32xbf16> to vector<16x32xbf16>
    %c0_76 = arith.constant 0 : index
    %c3_77 = arith.constant 3 : index
    %c0_78 = arith.constant 0 : index
    %c0_79 = arith.constant 0 : index
    %74 = vector.load %arg4[%c0_76, %c3_77, %c0_78, %c0_79] : memref<1x16x16x32xbf16, #tpu.memory_space<vmem>>, vector<1x1x16x32xbf16>
    %75 = vector.shape_cast %74 : vector<1x1x16x32xbf16> to vector<16x32xbf16>
    %76 = vector.shape_cast %73 : vector<16x32xbf16> to vector<1x1x16x32xbf16>
    tpu.vector_store %arg4[%c0_76, %c3_77, %c0_78, %c0_79], %76 {strides = array<i32>} : memref<1x16x16x32xbf16, #tpu.memory_space<vmem>>, vector<1x1x16x32xbf16>,
    %77 = vector.extract_strided_slice %60 {offsets = [68, 0], sizes = [16, 32], strides = [1, 1]} : vector<272x32xbf16> to vector<16x32xbf16>
    %c0_80 = arith.constant 0 : index
    %c4_81 = arith.constant 4 : index
    %c0_82 = arith.constant 0 : index
    %c0_83 = arith.constant 0 : index
    %78 = vector.load %arg4[%c0_80, %c4_81, %c0_82, %c0_83] : memref<1x16x16x32xbf16, #tpu.memory_space<vmem>>, vector<1x1x16x32xbf16>
    %79 = vector.shape_cast %78 : vector<1x1x16x32xbf16> to vector<16x32xbf16>
    %80 = vector.shape_cast %77 : vector<16x32xbf16> to vector<1x1x16x32xbf16>
    tpu.vector_store %arg4[%c0_80, %c4_81, %c0_82, %c0_83], %80 {strides = array<i32>} : memref<1x16x16x32xbf16, #tpu.memory_space<vmem>>, vector<1x1x16x32xbf16>,
    %81 = vector.extract_strided_slice %60 {offsets = [85, 0], sizes = [16, 32], strides = [1, 1]} : vector<272x32xbf16> to vector<16x32xbf16>
    %c0_84 = arith.constant 0 : index
    %c5_85 = arith.constant 5 : index
    %c0_86 = arith.constant 0 : index
    %c0_87 = arith.constant 0 : index
    %82 = vector.load %arg4[%c0_84, %c5_85, %c0_86, %c0_87] : memref<1x16x16x32xbf16, #tpu.memory_space<vmem>>, vector<1x1x16x32xbf16>
    %83 = vector.shape_cast %82 : vector<1x1x16x32xbf16> to vector<16x32xbf16>
    %84 = vector.shape_cast %81 : vector<16x32xbf16> to vector<1x1x16x32xbf16>
    tpu.vector_store %arg4[%c0_84, %c5_85, %c0_86, %c0_87], %84 {strides = array<i32>} : memref<1x16x16x32xbf16, #tpu.memory_space<vmem>>, vector<1x1x16x32xbf16>,
    %85 = vector.extract_strided_slice %60 {offsets = [102, 0], sizes = [16, 32], strides = [1, 1]} : vector<272x32xbf16> to vector<16x32xbf16>
    %c0_88 = arith.constant 0 : index
    %c6_89 = arith.constant 6 : index
    %c0_90 = arith.constant 0 : index
    %c0_91 = arith.constant 0 : index
    %86 = vector.load %arg4[%c0_88, %c6_89, %c0_90, %c0_91] : memref<1x16x16x32xbf16, #tpu.memory_space<vmem>>, vector<1x1x16x32xbf16>
    %87 = vector.shape_cast %86 : vector<1x1x16x32xbf16> to vector<16x32xbf16>
    %88 = vector.shape_cast %85 : vector<16x32xbf16> to vector<1x1x16x32xbf16>
    tpu.vector_store %arg4[%c0_88, %c6_89, %c0_90, %c0_91], %88 {strides = array<i32>} : memref<1x16x16x32xbf16, #tpu.memory_space<vmem>>, vector<1x1x16x32xbf16>,
    %89 = vector.extract_strided_slice %60 {offsets = [119, 0], sizes = [16, 32], strides = [1, 1]} : vector<272x32xbf16> to vector<16x32xbf16>
    %c0_92 = arith.constant 0 : index
    %c7_93 = arith.constant 7 : index
    %c0_94 = arith.constant 0 : index
    %c0_95 = arith.constant 0 : index
    %90 = vector.load %arg4[%c0_92, %c7_93, %c0_94, %c0_95] : memref<1x16x16x32xbf16, #tpu.memory_space<vmem>>, vector<1x1x16x32xbf16>
    %91 = vector.shape_cast %90 : vector<1x1x16x32xbf16> to vector<16x32xbf16>
    %92 = vector.shape_cast %89 : vector<16x32xbf16> to vector<1x1x16x32xbf16>
    tpu.vector_store %arg4[%c0_92, %c7_93, %c0_94, %c0_95], %92 {strides = array<i32>} : memref<1x16x16x32xbf16, #tpu.memory_space<vmem>>, vector<1x1x16x32xbf16>,
    %93 = vector.extract_strided_slice %60 {offsets = [136, 0], sizes = [16, 32], strides = [1, 1]} : vector<272x32xbf16> to vector<16x32xbf16>
    %c0_96 = arith.constant 0 : index
    %c8_97 = arith.constant 8 : index
    %c0_98 = arith.constant 0 : index
    %c0_99 = arith.constant 0 : index
    %94 = vector.load %arg4[%c0_96, %c8_97, %c0_98, %c0_99] : memref<1x16x16x32xbf16, #tpu.memory_space<vmem>>, vector<1x1x16x32xbf16>
    %95 = vector.shape_cast %94 : vector<1x1x16x32xbf16> to vector<16x32xbf16>
    %96 = vector.shape_cast %93 : vector<16x32xbf16> to vector<1x1x16x32xbf16>
    tpu.vector_store %arg4[%c0_96, %c8_97, %c0_98, %c0_99], %96 {strides = array<i32>} : memref<1x16x16x32xbf16, #tpu.memory_space<vmem>>, vector<1x1x16x32xbf16>,
    %97 = vector.extract_strided_slice %60 {offsets = [153, 0], sizes = [16, 32], strides = [1, 1]} : vector<272x32xbf16> to vector<16x32xbf16>
    %c0_100 = arith.constant 0 : index
    %c9 = arith.constant 9 : index
    %c0_101 = arith.constant 0 : index
    %c0_102 = arith.constant 0 : index
    %98 = vector.load %arg4[%c0_100, %c9, %c0_101, %c0_102] : memref<1x16x16x32xbf16, #tpu.memory_space<vmem>>, vector<1x1x16x32xbf16>
    %99 = vector.shape_cast %98 : vector<1x1x16x32xbf16> to vector<16x32xbf16>
    %100 = vector.shape_cast %97 : vector<16x32xbf16> to vector<1x1x16x32xbf16>
    tpu.vector_store %arg4[%c0_100, %c9, %c0_101, %c0_102], %100 {strides = array<i32>} : memref<1x16x16x32xbf16, #tpu.memory_space<vmem>>, vector<1x1x16x32xbf16>,
    %101 = vector.extract_strided_slice %60 {offsets = [170, 0], sizes = [16, 32], strides = [1, 1]} : vector<272x32xbf16> to vector<16x32xbf16>
    %c0_103 = arith.constant 0 : index
    %c10 = arith.constant 10 : index
    %c0_104 = arith.constant 0 : index
    %c0_105 = arith.constant 0 : index
    %102 = vector.load %arg4[%c0_103, %c10, %c0_104, %c0_105] : memref<1x16x16x32xbf16, #tpu.memory_space<vmem>>, vector<1x1x16x32xbf16>
    %103 = vector.shape_cast %102 : vector<1x1x16x32xbf16> to vector<16x32xbf16>
    %104 = vector.shape_cast %101 : vector<16x32xbf16> to vector<1x1x16x32xbf16>
    tpu.vector_store %arg4[%c0_103, %c10, %c0_104, %c0_105], %104 {strides = array<i32>} : memref<1x16x16x32xbf16, #tpu.memory_space<vmem>>, vector<1x1x16x32xbf16>,
    %105 = vector.extract_strided_slice %60 {offsets = [187, 0], sizes = [16, 32], strides = [1, 1]} : vector<272x32xbf16> to vector<16x32xbf16>
    %c0_106 = arith.constant 0 : index
    %c11 = arith.constant 11 : index
    %c0_107 = arith.constant 0 : index
    %c0_108 = arith.constant 0 : index
    %106 = vector.load %arg4[%c0_106, %c11, %c0_107, %c0_108] : memref<1x16x16x32xbf16, #tpu.memory_space<vmem>>, vector<1x1x16x32xbf16>
    %107 = vector.shape_cast %106 : vector<1x1x16x32xbf16> to vector<16x32xbf16>
    %108 = vector.shape_cast %105 : vector<16x32xbf16> to vector<1x1x16x32xbf16>
    tpu.vector_store %arg4[%c0_106, %c11, %c0_107, %c0_108], %108 {strides = array<i32>} : memref<1x16x16x32xbf16, #tpu.memory_space<vmem>>, vector<1x1x16x32xbf16>,
    %109 = vector.extract_strided_slice %60 {offsets = [204, 0], sizes = [16, 32], strides = [1, 1]} : vector<272x32xbf16> to vector<16x32xbf16>
    %c0_109 = arith.constant 0 : index
    %c12 = arith.constant 12 : index
    %c0_110 = arith.constant 0 : index
    %c0_111 = arith.constant 0 : index
    %110 = vector.load %arg4[%c0_109, %c12, %c0_110, %c0_111] : memref<1x16x16x32xbf16, #tpu.memory_space<vmem>>, vector<1x1x16x32xbf16>
    %111 = vector.shape_cast %110 : vector<1x1x16x32xbf16> to vector<16x32xbf16>
    %112 = vector.shape_cast %109 : vector<16x32xbf16> to vector<1x1x16x32xbf16>
    tpu.vector_store %arg4[%c0_109, %c12, %c0_110, %c0_111], %112 {strides = array<i32>} : memref<1x16x16x32xbf16, #tpu.memory_space<vmem>>, vector<1x1x16x32xbf16>,
    %113 = vector.extract_strided_slice %60 {offsets = [221, 0], sizes = [16, 32], strides = [1, 1]} : vector<272x32xbf16> to vector<16x32xbf16>
    %c0_112 = arith.constant 0 : index
    %c13 = arith.constant 13 : index
    %c0_113 = arith.constant 0 : index
    %c0_114 = arith.constant 0 : index
    %114 = vector.load %arg4[%c0_112, %c13, %c0_113, %c0_114] : memref<1x16x16x32xbf16, #tpu.memory_space<vmem>>, vector<1x1x16x32xbf16>
    %115 = vector.shape_cast %114 : vector<1x1x16x32xbf16> to vector<16x32xbf16>
    %116 = vector.shape_cast %113 : vector<16x32xbf16> to vector<1x1x16x32xbf16>
    tpu.vector_store %arg4[%c0_112, %c13, %c0_113, %c0_114], %116 {strides = array<i32>} : memref<1x16x16x32xbf16, #tpu.memory_space<vmem>>, vector<1x1x16x32xbf16>,
    %117 = vector.extract_strided_slice %60 {offsets = [238, 0], sizes = [16, 32], strides = [1, 1]} : vector<272x32xbf16> to vector<16x32xbf16>
    %c0_115 = arith.constant 0 : index
    %c14 = arith.constant 14 : index
    %c0_116 = arith.constant 0 : index
    %c0_117 = arith.constant 0 : index
    %118 = vector.load %arg4[%c0_115, %c14, %c0_116, %c0_117] : memref<1x16x16x32xbf16, #tpu.memory_space<vmem>>, vector<1x1x16x32xbf16>
    %119 = vector.shape_cast %118 : vector<1x1x16x32xbf16> to vector<16x32xbf16>
    %120 = vector.shape_cast %117 : vector<16x32xbf16> to vector<1x1x16x32xbf16>
    tpu.vector_store %arg4[%c0_115, %c14, %c0_116, %c0_117], %120 {strides = array<i32>} : memref<1x16x16x32xbf16, #tpu.memory_space<vmem>>, vector<1x1x16x32xbf16>,
    %121 = vector.extract_strided_slice %60 {offsets = [255, 0], sizes = [16, 32], strides = [1, 1]} : vector<272x32xbf16> to vector<16x32xbf16>
    %c0_118 = arith.constant 0 : index
    %c15 = arith.constant 15 : index
    %c0_119 = arith.constant 0 : index
    %c0_120 = arith.constant 0 : index
    %122 = vector.load %arg4[%c0_118, %c15, %c0_119, %c0_120] : memref<1x16x16x32xbf16, #tpu.memory_space<vmem>>, vector<1x1x16x32xbf16>
    %123 = vector.shape_cast %122 : vector<1x1x16x32xbf16> to vector<16x32xbf16>
    %124 = vector.shape_cast %121 : vector<16x32xbf16> to vector<1x1x16x32xbf16>
    tpu.vector_store %arg4[%c0_118, %c15, %c0_119, %c0_120], %124 {strides = array<i32>} : memref<1x16x16x32xbf16, #tpu.memory_space<vmem>>, vector<1x1x16x32xbf16>,
    return
  }
  func.func @transform_0(%arg0: i32) -> (i32, i32, i32, i32) {
    %c0_i32 = arith.constant 0 : i32
    %c0_i32_0 = arith.constant 0 : i32
    %c0_i32_1 = arith.constant 0 : i32
    %c0_i32_2 = arith.constant 0 : i32
    return %arg0, %c0_i32, %c0_i32_0, %c0_i32_1 : i32, i32, i32, i32
  }
  func.func @transform_1(%arg0: i32) -> (i32, i32, i32) {
    %c0_i32 = arith.constant 0 : i32
    %c0_i32_0 = arith.constant 0 : i32
    %c0_i32_1 = arith.constant 0 : i32
    %c0_i32_2 = arith.constant 0 : i32
    return %c0_i32, %c0_i32_0, %c0_i32_1 : i32, i32, i32
  }
  func.func @transform_2(%arg0: i32) -> (i32, i32) {
    %c0_i32 = arith.constant 0 : i32
    %c0_i32_0 = arith.constant 0 : i32
    %c0_i32_1 = arith.constant 0 : i32
    return %c0_i32, %c0_i32_0 : i32, i32
  }
  func.func @transform_3(%arg0: i32) -> (i32, i32, i32, i32) {
    %c0_i32 = arith.constant 0 : i32
    %c0_i32_0 = arith.constant 0 : i32
    %c0_i32_1 = arith.constant 0 : i32
    %c0_i32_2 = arith.constant 0 : i32
    return %arg0, %c0_i32, %c0_i32_0, %c0_i32_1 : i32, i32, i32, i32
  }
}

module attributes {stable_mosaic.version = 11 : i64} {
  func.func @_conv3x3s2_kernel(%arg0: i32, %arg1: memref<1x4x96x32xbf16, #tpu.memory_space<vmem>>, %arg2: memref<9x32x32xbf16, #tpu.memory_space<vmem>>, %arg3: memref<1x32xf32, #tpu.memory_space<vmem>>, %arg4: memref<1x8x8x32xbf16, #tpu.memory_space<vmem>>) attributes {dimension_semantics = [#tpu.dimension_semantics<parallel>], iteration_bounds = array<i64: 2>, scalar_prefetch = 0 : i64, scratch_operands = 0 : i64, tpu.core_type = #tpu.core_type<tc>, window_params = [{transform_indices = @transform_0, window_bounds = array<i64: 1, 4, 96, 32>}, {pipeline_mode = #tpu.pipeline_mode<synchronous>, transform_indices = @transform_1, window_bounds = array<i64: 9, 32, 32>}, {pipeline_mode = #tpu.pipeline_mode<synchronous>, transform_indices = @transform_2, window_bounds = array<i64: 1, 32>}, {transform_indices = @transform_3, window_bounds = array<i64: 1, 8, 8, 32>}]} {
    %cst = arith.constant 0.000000e+00 : f32
    %0 = vector.broadcast %cst : f32 to vector<72x32xf32>
    %c0 = arith.constant 0 : index
    %c0_0 = arith.constant 0 : index
    %c0_1 = arith.constant 0 : index
    %c0_2 = arith.constant 0 : index
    %1 = vector.load %arg1[%c0, %c0_0, %c0_1, %c0_2] : memref<1x4x96x32xbf16, #tpu.memory_space<vmem>>, vector<1x1x72x32xbf16>
    %2 = vector.shape_cast %1 : vector<1x1x72x32xbf16> to vector<72x32xbf16>
    %c0_3 = arith.constant 0 : index
    %c0_4 = arith.constant 0 : index
    %c0_5 = arith.constant 0 : index
    %3 = vector.load %arg2[%c0_3, %c0_4, %c0_5] : memref<9x32x32xbf16, #tpu.memory_space<vmem>>, vector<1x32x32xbf16>
    %4 = vector.shape_cast %3 : vector<1x32x32xbf16> to vector<32x32xbf16>
    %cst_6 = arith.constant dense<0.000000e+00> : vector<72x32xf32>
    %5 = tpu.matmul %2, %4, %cst_6 {dimension_numbers = #tpu.dot_dimension_numbers<[1], [0], [0], [1], [0, 0, 1, 1], [], []>} : vector<72x32xbf16>, vector<32x32xbf16>, vector<72x32xf32> -> vector<72x32xf32>
    %6 = arith.addf %0, %5 : vector<72x32xf32>
    %c0_7 = arith.constant 0 : index
    %c1 = arith.constant 1 : index
    %c0_8 = arith.constant 0 : index
    %c0_9 = arith.constant 0 : index
    %7 = vector.load %arg1[%c0_7, %c1, %c0_8, %c0_9] : memref<1x4x96x32xbf16, #tpu.memory_space<vmem>>, vector<1x1x72x32xbf16>
    %8 = vector.shape_cast %7 : vector<1x1x72x32xbf16> to vector<72x32xbf16>
    %c1_10 = arith.constant 1 : index
    %c0_11 = arith.constant 0 : index
    %c0_12 = arith.constant 0 : index
    %9 = vector.load %arg2[%c1_10, %c0_11, %c0_12] : memref<9x32x32xbf16, #tpu.memory_space<vmem>>, vector<1x32x32xbf16>
    %10 = vector.shape_cast %9 : vector<1x32x32xbf16> to vector<32x32xbf16>
    %cst_13 = arith.constant dense<0.000000e+00> : vector<72x32xf32>
    %11 = tpu.matmul %8, %10, %cst_13 {dimension_numbers = #tpu.dot_dimension_numbers<[1], [0], [0], [1], [0, 0, 1, 1], [], []>} : vector<72x32xbf16>, vector<32x32xbf16>, vector<72x32xf32> -> vector<72x32xf32>
    %12 = arith.addf %6, %11 : vector<72x32xf32>
    %c0_14 = arith.constant 0 : index
    %c0_15 = arith.constant 0 : index
    %c1_16 = arith.constant 1 : index
    %c0_17 = arith.constant 0 : index
    %13 = vector.load %arg1[%c0_14, %c0_15, %c1_16, %c0_17] : memref<1x4x96x32xbf16, #tpu.memory_space<vmem>>, vector<1x1x72x32xbf16>
    %14 = vector.shape_cast %13 : vector<1x1x72x32xbf16> to vector<72x32xbf16>
    %c2 = arith.constant 2 : index
    %c0_18 = arith.constant 0 : index
    %c0_19 = arith.constant 0 : index
    %15 = vector.load %arg2[%c2, %c0_18, %c0_19] : memref<9x32x32xbf16, #tpu.memory_space<vmem>>, vector<1x32x32xbf16>
    %16 = vector.shape_cast %15 : vector<1x32x32xbf16> to vector<32x32xbf16>
    %cst_20 = arith.constant dense<0.000000e+00> : vector<72x32xf32>
    %17 = tpu.matmul %14, %16, %cst_20 {dimension_numbers = #tpu.dot_dimension_numbers<[1], [0], [0], [1], [0, 0, 1, 1], [], []>} : vector<72x32xbf16>, vector<32x32xbf16>, vector<72x32xf32> -> vector<72x32xf32>
    %18 = arith.addf %12, %17 : vector<72x32xf32>
    %c0_21 = arith.constant 0 : index
    %c2_22 = arith.constant 2 : index
    %c0_23 = arith.constant 0 : index
    %c0_24 = arith.constant 0 : index
    %19 = vector.load %arg1[%c0_21, %c2_22, %c0_23, %c0_24] : memref<1x4x96x32xbf16, #tpu.memory_space<vmem>>, vector<1x1x72x32xbf16>
    %20 = vector.shape_cast %19 : vector<1x1x72x32xbf16> to vector<72x32xbf16>
    %c3 = arith.constant 3 : index
    %c0_25 = arith.constant 0 : index
    %c0_26 = arith.constant 0 : index
    %21 = vector.load %arg2[%c3, %c0_25, %c0_26] : memref<9x32x32xbf16, #tpu.memory_space<vmem>>, vector<1x32x32xbf16>
    %22 = vector.shape_cast %21 : vector<1x32x32xbf16> to vector<32x32xbf16>
    %cst_27 = arith.constant dense<0.000000e+00> : vector<72x32xf32>
    %23 = tpu.matmul %20, %22, %cst_27 {dimension_numbers = #tpu.dot_dimension_numbers<[1], [0], [0], [1], [0, 0, 1, 1], [], []>} : vector<72x32xbf16>, vector<32x32xbf16>, vector<72x32xf32> -> vector<72x32xf32>
    %24 = arith.addf %18, %23 : vector<72x32xf32>
    %c0_28 = arith.constant 0 : index
    %c3_29 = arith.constant 3 : index
    %c0_30 = arith.constant 0 : index
    %c0_31 = arith.constant 0 : index
    %25 = vector.load %arg1[%c0_28, %c3_29, %c0_30, %c0_31] : memref<1x4x96x32xbf16, #tpu.memory_space<vmem>>, vector<1x1x72x32xbf16>
    %26 = vector.shape_cast %25 : vector<1x1x72x32xbf16> to vector<72x32xbf16>
    %c4 = arith.constant 4 : index
    %c0_32 = arith.constant 0 : index
    %c0_33 = arith.constant 0 : index
    %27 = vector.load %arg2[%c4, %c0_32, %c0_33] : memref<9x32x32xbf16, #tpu.memory_space<vmem>>, vector<1x32x32xbf16>
    %28 = vector.shape_cast %27 : vector<1x32x32xbf16> to vector<32x32xbf16>
    %cst_34 = arith.constant dense<0.000000e+00> : vector<72x32xf32>
    %29 = tpu.matmul %26, %28, %cst_34 {dimension_numbers = #tpu.dot_dimension_numbers<[1], [0], [0], [1], [0, 0, 1, 1], [], []>} : vector<72x32xbf16>, vector<32x32xbf16>, vector<72x32xf32> -> vector<72x32xf32>
    %30 = arith.addf %24, %29 : vector<72x32xf32>
    %c0_35 = arith.constant 0 : index
    %c2_36 = arith.constant 2 : index
    %c1_37 = arith.constant 1 : index
    %c0_38 = arith.constant 0 : index
    %31 = vector.load %arg1[%c0_35, %c2_36, %c1_37, %c0_38] : memref<1x4x96x32xbf16, #tpu.memory_space<vmem>>, vector<1x1x72x32xbf16>
    %32 = vector.shape_cast %31 : vector<1x1x72x32xbf16> to vector<72x32xbf16>
    %c5 = arith.constant 5 : index
    %c0_39 = arith.constant 0 : index
    %c0_40 = arith.constant 0 : index
    %33 = vector.load %arg2[%c5, %c0_39, %c0_40] : memref<9x32x32xbf16, #tpu.memory_space<vmem>>, vector<1x32x32xbf16>
    %34 = vector.shape_cast %33 : vector<1x32x32xbf16> to vector<32x32xbf16>
    %cst_41 = arith.constant dense<0.000000e+00> : vector<72x32xf32>
    %35 = tpu.matmul %32, %34, %cst_41 {dimension_numbers = #tpu.dot_dimension_numbers<[1], [0], [0], [1], [0, 0, 1, 1], [], []>} : vector<72x32xbf16>, vector<32x32xbf16>, vector<72x32xf32> -> vector<72x32xf32>
    %36 = arith.addf %30, %35 : vector<72x32xf32>
    %c0_42 = arith.constant 0 : index
    %c0_43 = arith.constant 0 : index
    %c9 = arith.constant 9 : index
    %c0_44 = arith.constant 0 : index
    %37 = vector.load %arg1[%c0_42, %c0_43, %c9, %c0_44] : memref<1x4x96x32xbf16, #tpu.memory_space<vmem>>, vector<1x1x72x32xbf16>
    %38 = vector.shape_cast %37 : vector<1x1x72x32xbf16> to vector<72x32xbf16>
    %c6 = arith.constant 6 : index
    %c0_45 = arith.constant 0 : index
    %c0_46 = arith.constant 0 : index
    %39 = vector.load %arg2[%c6, %c0_45, %c0_46] : memref<9x32x32xbf16, #tpu.memory_space<vmem>>, vector<1x32x32xbf16>
    %40 = vector.shape_cast %39 : vector<1x32x32xbf16> to vector<32x32xbf16>
    %cst_47 = arith.constant dense<0.000000e+00> : vector<72x32xf32>
    %41 = tpu.matmul %38, %40, %cst_47 {dimension_numbers = #tpu.dot_dimension_numbers<[1], [0], [0], [1], [0, 0, 1, 1], [], []>} : vector<72x32xbf16>, vector<32x32xbf16>, vector<72x32xf32> -> vector<72x32xf32>
    %42 = arith.addf %36, %41 : vector<72x32xf32>
    %c0_48 = arith.constant 0 : index
    %c1_49 = arith.constant 1 : index
    %c9_50 = arith.constant 9 : index
    %c0_51 = arith.constant 0 : index
    %43 = vector.load %arg1[%c0_48, %c1_49, %c9_50, %c0_51] : memref<1x4x96x32xbf16, #tpu.memory_space<vmem>>, vector<1x1x72x32xbf16>
    %44 = vector.shape_cast %43 : vector<1x1x72x32xbf16> to vector<72x32xbf16>
    %c7 = arith.constant 7 : index
    %c0_52 = arith.constant 0 : index
    %c0_53 = arith.constant 0 : index
    %45 = vector.load %arg2[%c7, %c0_52, %c0_53] : memref<9x32x32xbf16, #tpu.memory_space<vmem>>, vector<1x32x32xbf16>
    %46 = vector.shape_cast %45 : vector<1x32x32xbf16> to vector<32x32xbf16>
    %cst_54 = arith.constant dense<0.000000e+00> : vector<72x32xf32>
    %47 = tpu.matmul %44, %46, %cst_54 {dimension_numbers = #tpu.dot_dimension_numbers<[1], [0], [0], [1], [0, 0, 1, 1], [], []>} : vector<72x32xbf16>, vector<32x32xbf16>, vector<72x32xf32> -> vector<72x32xf32>
    %48 = arith.addf %42, %47 : vector<72x32xf32>
    %c0_55 = arith.constant 0 : index
    %c0_56 = arith.constant 0 : index
    %c10 = arith.constant 10 : index
    %c0_57 = arith.constant 0 : index
    %49 = vector.load %arg1[%c0_55, %c0_56, %c10, %c0_57] : memref<1x4x96x32xbf16, #tpu.memory_space<vmem>>, vector<1x1x72x32xbf16>
    %50 = vector.shape_cast %49 : vector<1x1x72x32xbf16> to vector<72x32xbf16>
    %c8 = arith.constant 8 : index
    %c0_58 = arith.constant 0 : index
    %c0_59 = arith.constant 0 : index
    %51 = vector.load %arg2[%c8, %c0_58, %c0_59] : memref<9x32x32xbf16, #tpu.memory_space<vmem>>, vector<1x32x32xbf16>
    %52 = vector.shape_cast %51 : vector<1x32x32xbf16> to vector<32x32xbf16>
    %cst_60 = arith.constant dense<0.000000e+00> : vector<72x32xf32>
    %53 = tpu.matmul %50, %52, %cst_60 {dimension_numbers = #tpu.dot_dimension_numbers<[1], [0], [0], [1], [0, 0, 1, 1], [], []>} : vector<72x32xbf16>, vector<32x32xbf16>, vector<72x32xf32> -> vector<72x32xf32>
    %54 = arith.addf %48, %53 : vector<72x32xf32>
    %c0_61 = arith.constant 0 : index
    %c0_62 = arith.constant 0 : index
    %55 = vector.load %arg3[%c0_61, %c0_62] : memref<1x32xf32, #tpu.memory_space<vmem>>, vector<1x32xf32>
    %56 = vector.broadcast %55 : vector<1x32xf32> to vector<72x32xf32>
    %57 = arith.addf %54, %56 : vector<72x32xf32>
    %cst_63 = arith.constant 0.000000e+00 : f32
    %58 = vector.broadcast %cst_63 : f32 to vector<72x32xf32>
    %59 = arith.maximumf %57, %58 : vector<72x32xf32>
    %60 = arith.truncf %59 : vector<72x32xf32> to vector<72x32xbf16>
    %61 = vector.extract_strided_slice %60 {offsets = [0, 0], sizes = [8, 32], strides = [1, 1]} : vector<72x32xbf16> to vector<8x32xbf16>
    %c0_64 = arith.constant 0 : index
    %c0_65 = arith.constant 0 : index
    %c0_66 = arith.constant 0 : index
    %c0_67 = arith.constant 0 : index
    %62 = vector.load %arg4[%c0_64, %c0_65, %c0_66, %c0_67] : memref<1x8x8x32xbf16, #tpu.memory_space<vmem>>, vector<1x1x8x32xbf16>
    %63 = vector.shape_cast %62 : vector<1x1x8x32xbf16> to vector<8x32xbf16>
    %64 = vector.shape_cast %61 : vector<8x32xbf16> to vector<1x1x8x32xbf16>
    tpu.vector_store %arg4[%c0_64, %c0_65, %c0_66, %c0_67], %64 {strides = array<i32>} : memref<1x8x8x32xbf16, #tpu.memory_space<vmem>>, vector<1x1x8x32xbf16>,
    %65 = vector.extract_strided_slice %60 {offsets = [9, 0], sizes = [8, 32], strides = [1, 1]} : vector<72x32xbf16> to vector<8x32xbf16>
    %c0_68 = arith.constant 0 : index
    %c1_69 = arith.constant 1 : index
    %c0_70 = arith.constant 0 : index
    %c0_71 = arith.constant 0 : index
    %66 = vector.load %arg4[%c0_68, %c1_69, %c0_70, %c0_71] : memref<1x8x8x32xbf16, #tpu.memory_space<vmem>>, vector<1x1x8x32xbf16>
    %67 = vector.shape_cast %66 : vector<1x1x8x32xbf16> to vector<8x32xbf16>
    %68 = vector.shape_cast %65 : vector<8x32xbf16> to vector<1x1x8x32xbf16>
    tpu.vector_store %arg4[%c0_68, %c1_69, %c0_70, %c0_71], %68 {strides = array<i32>} : memref<1x8x8x32xbf16, #tpu.memory_space<vmem>>, vector<1x1x8x32xbf16>,
    %69 = vector.extract_strided_slice %60 {offsets = [18, 0], sizes = [8, 32], strides = [1, 1]} : vector<72x32xbf16> to vector<8x32xbf16>
    %c0_72 = arith.constant 0 : index
    %c2_73 = arith.constant 2 : index
    %c0_74 = arith.constant 0 : index
    %c0_75 = arith.constant 0 : index
    %70 = vector.load %arg4[%c0_72, %c2_73, %c0_74, %c0_75] : memref<1x8x8x32xbf16, #tpu.memory_space<vmem>>, vector<1x1x8x32xbf16>
    %71 = vector.shape_cast %70 : vector<1x1x8x32xbf16> to vector<8x32xbf16>
    %72 = vector.shape_cast %69 : vector<8x32xbf16> to vector<1x1x8x32xbf16>
    tpu.vector_store %arg4[%c0_72, %c2_73, %c0_74, %c0_75], %72 {strides = array<i32>} : memref<1x8x8x32xbf16, #tpu.memory_space<vmem>>, vector<1x1x8x32xbf16>,
    %73 = vector.extract_strided_slice %60 {offsets = [27, 0], sizes = [8, 32], strides = [1, 1]} : vector<72x32xbf16> to vector<8x32xbf16>
    %c0_76 = arith.constant 0 : index
    %c3_77 = arith.constant 3 : index
    %c0_78 = arith.constant 0 : index
    %c0_79 = arith.constant 0 : index
    %74 = vector.load %arg4[%c0_76, %c3_77, %c0_78, %c0_79] : memref<1x8x8x32xbf16, #tpu.memory_space<vmem>>, vector<1x1x8x32xbf16>
    %75 = vector.shape_cast %74 : vector<1x1x8x32xbf16> to vector<8x32xbf16>
    %76 = vector.shape_cast %73 : vector<8x32xbf16> to vector<1x1x8x32xbf16>
    tpu.vector_store %arg4[%c0_76, %c3_77, %c0_78, %c0_79], %76 {strides = array<i32>} : memref<1x8x8x32xbf16, #tpu.memory_space<vmem>>, vector<1x1x8x32xbf16>,
    %77 = vector.extract_strided_slice %60 {offsets = [36, 0], sizes = [8, 32], strides = [1, 1]} : vector<72x32xbf16> to vector<8x32xbf16>
    %c0_80 = arith.constant 0 : index
    %c4_81 = arith.constant 4 : index
    %c0_82 = arith.constant 0 : index
    %c0_83 = arith.constant 0 : index
    %78 = vector.load %arg4[%c0_80, %c4_81, %c0_82, %c0_83] : memref<1x8x8x32xbf16, #tpu.memory_space<vmem>>, vector<1x1x8x32xbf16>
    %79 = vector.shape_cast %78 : vector<1x1x8x32xbf16> to vector<8x32xbf16>
    %80 = vector.shape_cast %77 : vector<8x32xbf16> to vector<1x1x8x32xbf16>
    tpu.vector_store %arg4[%c0_80, %c4_81, %c0_82, %c0_83], %80 {strides = array<i32>} : memref<1x8x8x32xbf16, #tpu.memory_space<vmem>>, vector<1x1x8x32xbf16>,
    %81 = vector.extract_strided_slice %60 {offsets = [45, 0], sizes = [8, 32], strides = [1, 1]} : vector<72x32xbf16> to vector<8x32xbf16>
    %c0_84 = arith.constant 0 : index
    %c5_85 = arith.constant 5 : index
    %c0_86 = arith.constant 0 : index
    %c0_87 = arith.constant 0 : index
    %82 = vector.load %arg4[%c0_84, %c5_85, %c0_86, %c0_87] : memref<1x8x8x32xbf16, #tpu.memory_space<vmem>>, vector<1x1x8x32xbf16>
    %83 = vector.shape_cast %82 : vector<1x1x8x32xbf16> to vector<8x32xbf16>
    %84 = vector.shape_cast %81 : vector<8x32xbf16> to vector<1x1x8x32xbf16>
    tpu.vector_store %arg4[%c0_84, %c5_85, %c0_86, %c0_87], %84 {strides = array<i32>} : memref<1x8x8x32xbf16, #tpu.memory_space<vmem>>, vector<1x1x8x32xbf16>,
    %85 = vector.extract_strided_slice %60 {offsets = [54, 0], sizes = [8, 32], strides = [1, 1]} : vector<72x32xbf16> to vector<8x32xbf16>
    %c0_88 = arith.constant 0 : index
    %c6_89 = arith.constant 6 : index
    %c0_90 = arith.constant 0 : index
    %c0_91 = arith.constant 0 : index
    %86 = vector.load %arg4[%c0_88, %c6_89, %c0_90, %c0_91] : memref<1x8x8x32xbf16, #tpu.memory_space<vmem>>, vector<1x1x8x32xbf16>
    %87 = vector.shape_cast %86 : vector<1x1x8x32xbf16> to vector<8x32xbf16>
    %88 = vector.shape_cast %85 : vector<8x32xbf16> to vector<1x1x8x32xbf16>
    tpu.vector_store %arg4[%c0_88, %c6_89, %c0_90, %c0_91], %88 {strides = array<i32>} : memref<1x8x8x32xbf16, #tpu.memory_space<vmem>>, vector<1x1x8x32xbf16>,
    %89 = vector.extract_strided_slice %60 {offsets = [63, 0], sizes = [8, 32], strides = [1, 1]} : vector<72x32xbf16> to vector<8x32xbf16>
    %c0_92 = arith.constant 0 : index
    %c7_93 = arith.constant 7 : index
    %c0_94 = arith.constant 0 : index
    %c0_95 = arith.constant 0 : index
    %90 = vector.load %arg4[%c0_92, %c7_93, %c0_94, %c0_95] : memref<1x8x8x32xbf16, #tpu.memory_space<vmem>>, vector<1x1x8x32xbf16>
    %91 = vector.shape_cast %90 : vector<1x1x8x32xbf16> to vector<8x32xbf16>
    %92 = vector.shape_cast %89 : vector<8x32xbf16> to vector<1x1x8x32xbf16>
    tpu.vector_store %arg4[%c0_92, %c7_93, %c0_94, %c0_95], %92 {strides = array<i32>} : memref<1x8x8x32xbf16, #tpu.memory_space<vmem>>, vector<1x1x8x32xbf16>,
    return
  }
  func.func @transform_0(%arg0: i32) -> (i32, i32, i32, i32) {
    %c0_i32 = arith.constant 0 : i32
    %c0_i32_0 = arith.constant 0 : i32
    %c0_i32_1 = arith.constant 0 : i32
    %c0_i32_2 = arith.constant 0 : i32
    return %arg0, %c0_i32, %c0_i32_0, %c0_i32_1 : i32, i32, i32, i32
  }
  func.func @transform_1(%arg0: i32) -> (i32, i32, i32) {
    %c0_i32 = arith.constant 0 : i32
    %c0_i32_0 = arith.constant 0 : i32
    %c0_i32_1 = arith.constant 0 : i32
    %c0_i32_2 = arith.constant 0 : i32
    return %c0_i32, %c0_i32_0, %c0_i32_1 : i32, i32, i32
  }
  func.func @transform_2(%arg0: i32) -> (i32, i32) {
    %c0_i32 = arith.constant 0 : i32
    %c0_i32_0 = arith.constant 0 : i32
    %c0_i32_1 = arith.constant 0 : i32
    return %c0_i32, %c0_i32_0 : i32, i32
  }
  func.func @transform_3(%arg0: i32) -> (i32, i32, i32, i32) {
    %c0_i32 = arith.constant 0 : i32
    %c0_i32_0 = arith.constant 0 : i32
    %c0_i32_1 = arith.constant 0 : i32
    %c0_i32_2 = arith.constant 0 : i32
    return %arg0, %c0_i32, %c0_i32_0, %c0_i32_1 : i32, i32, i32, i32
  }
}

module attributes {stable_mosaic.version = 11 : i64} {
  func.func @_conv3x3s2_kernel(%arg0: i32, %arg1: memref<1x4x32x32xbf16, #tpu.memory_space<vmem>>, %arg2: memref<9x32x32xbf16, #tpu.memory_space<vmem>>, %arg3: memref<1x32xf32, #tpu.memory_space<vmem>>, %arg4: memref<1x4x4x32xbf16, #tpu.memory_space<vmem>>) attributes {dimension_semantics = [#tpu.dimension_semantics<parallel>], iteration_bounds = array<i64: 2>, scalar_prefetch = 0 : i64, scratch_operands = 0 : i64, tpu.core_type = #tpu.core_type<tc>, window_params = [{transform_indices = @transform_0, window_bounds = array<i64: 1, 4, 32, 32>}, {pipeline_mode = #tpu.pipeline_mode<synchronous>, transform_indices = @transform_1, window_bounds = array<i64: 9, 32, 32>}, {pipeline_mode = #tpu.pipeline_mode<synchronous>, transform_indices = @transform_2, window_bounds = array<i64: 1, 32>}, {transform_indices = @transform_3, window_bounds = array<i64: 1, 4, 4, 32>}]} {
    %cst = arith.constant 0.000000e+00 : f32
    %0 = vector.broadcast %cst : f32 to vector<20x32xf32>
    %c0 = arith.constant 0 : index
    %c0_0 = arith.constant 0 : index
    %c0_1 = arith.constant 0 : index
    %c0_2 = arith.constant 0 : index
    %1 = vector.load %arg1[%c0, %c0_0, %c0_1, %c0_2] : memref<1x4x32x32xbf16, #tpu.memory_space<vmem>>, vector<1x1x20x32xbf16>
    %2 = vector.shape_cast %1 : vector<1x1x20x32xbf16> to vector<20x32xbf16>
    %c0_3 = arith.constant 0 : index
    %c0_4 = arith.constant 0 : index
    %c0_5 = arith.constant 0 : index
    %3 = vector.load %arg2[%c0_3, %c0_4, %c0_5] : memref<9x32x32xbf16, #tpu.memory_space<vmem>>, vector<1x32x32xbf16>
    %4 = vector.shape_cast %3 : vector<1x32x32xbf16> to vector<32x32xbf16>
    %cst_6 = arith.constant dense<0.000000e+00> : vector<20x32xf32>
    %5 = tpu.matmul %2, %4, %cst_6 {dimension_numbers = #tpu.dot_dimension_numbers<[1], [0], [0], [1], [0, 0, 1, 1], [], []>} : vector<20x32xbf16>, vector<32x32xbf16>, vector<20x32xf32> -> vector<20x32xf32>
    %6 = arith.addf %0, %5 : vector<20x32xf32>
    %c0_7 = arith.constant 0 : index
    %c1 = arith.constant 1 : index
    %c0_8 = arith.constant 0 : index
    %c0_9 = arith.constant 0 : index
    %7 = vector.load %arg1[%c0_7, %c1, %c0_8, %c0_9] : memref<1x4x32x32xbf16, #tpu.memory_space<vmem>>, vector<1x1x20x32xbf16>
    %8 = vector.shape_cast %7 : vector<1x1x20x32xbf16> to vector<20x32xbf16>
    %c1_10 = arith.constant 1 : index
    %c0_11 = arith.constant 0 : index
    %c0_12 = arith.constant 0 : index
    %9 = vector.load %arg2[%c1_10, %c0_11, %c0_12] : memref<9x32x32xbf16, #tpu.memory_space<vmem>>, vector<1x32x32xbf16>
    %10 = vector.shape_cast %9 : vector<1x32x32xbf16> to vector<32x32xbf16>
    %cst_13 = arith.constant dense<0.000000e+00> : vector<20x32xf32>
    %11 = tpu.matmul %8, %10, %cst_13 {dimension_numbers = #tpu.dot_dimension_numbers<[1], [0], [0], [1], [0, 0, 1, 1], [], []>} : vector<20x32xbf16>, vector<32x32xbf16>, vector<20x32xf32> -> vector<20x32xf32>
    %12 = arith.addf %6, %11 : vector<20x32xf32>
    %c0_14 = arith.constant 0 : index
    %c0_15 = arith.constant 0 : index
    %c1_16 = arith.constant 1 : index
    %c0_17 = arith.constant 0 : index
    %13 = vector.load %arg1[%c0_14, %c0_15, %c1_16, %c0_17] : memref<1x4x32x32xbf16, #tpu.memory_space<vmem>>, vector<1x1x20x32xbf16>
    %14 = vector.shape_cast %13 : vector<1x1x20x32xbf16> to vector<20x32xbf16>
    %c2 = arith.constant 2 : index
    %c0_18 = arith.constant 0 : index
    %c0_19 = arith.constant 0 : index
    %15 = vector.load %arg2[%c2, %c0_18, %c0_19] : memref<9x32x32xbf16, #tpu.memory_space<vmem>>, vector<1x32x32xbf16>
    %16 = vector.shape_cast %15 : vector<1x32x32xbf16> to vector<32x32xbf16>
    %cst_20 = arith.constant dense<0.000000e+00> : vector<20x32xf32>
    %17 = tpu.matmul %14, %16, %cst_20 {dimension_numbers = #tpu.dot_dimension_numbers<[1], [0], [0], [1], [0, 0, 1, 1], [], []>} : vector<20x32xbf16>, vector<32x32xbf16>, vector<20x32xf32> -> vector<20x32xf32>
    %18 = arith.addf %12, %17 : vector<20x32xf32>
    %c0_21 = arith.constant 0 : index
    %c2_22 = arith.constant 2 : index
    %c0_23 = arith.constant 0 : index
    %c0_24 = arith.constant 0 : index
    %19 = vector.load %arg1[%c0_21, %c2_22, %c0_23, %c0_24] : memref<1x4x32x32xbf16, #tpu.memory_space<vmem>>, vector<1x1x20x32xbf16>
    %20 = vector.shape_cast %19 : vector<1x1x20x32xbf16> to vector<20x32xbf16>
    %c3 = arith.constant 3 : index
    %c0_25 = arith.constant 0 : index
    %c0_26 = arith.constant 0 : index
    %21 = vector.load %arg2[%c3, %c0_25, %c0_26] : memref<9x32x32xbf16, #tpu.memory_space<vmem>>, vector<1x32x32xbf16>
    %22 = vector.shape_cast %21 : vector<1x32x32xbf16> to vector<32x32xbf16>
    %cst_27 = arith.constant dense<0.000000e+00> : vector<20x32xf32>
    %23 = tpu.matmul %20, %22, %cst_27 {dimension_numbers = #tpu.dot_dimension_numbers<[1], [0], [0], [1], [0, 0, 1, 1], [], []>} : vector<20x32xbf16>, vector<32x32xbf16>, vector<20x32xf32> -> vector<20x32xf32>
    %24 = arith.addf %18, %23 : vector<20x32xf32>
    %c0_28 = arith.constant 0 : index
    %c3_29 = arith.constant 3 : index
    %c0_30 = arith.constant 0 : index
    %c0_31 = arith.constant 0 : index
    %25 = vector.load %arg1[%c0_28, %c3_29, %c0_30, %c0_31] : memref<1x4x32x32xbf16, #tpu.memory_space<vmem>>, vector<1x1x20x32xbf16>
    %26 = vector.shape_cast %25 : vector<1x1x20x32xbf16> to vector<20x32xbf16>
    %c4 = arith.constant 4 : index
    %c0_32 = arith.constant 0 : index
    %c0_33 = arith.constant 0 : index
    %27 = vector.load %arg2[%c4, %c0_32, %c0_33] : memref<9x32x32xbf16, #tpu.memory_space<vmem>>, vector<1x32x32xbf16>
    %28 = vector.shape_cast %27 : vector<1x32x32xbf16> to vector<32x32xbf16>
    %cst_34 = arith.constant dense<0.000000e+00> : vector<20x32xf32>
    %29 = tpu.matmul %26, %28, %cst_34 {dimension_numbers = #tpu.dot_dimension_numbers<[1], [0], [0], [1], [0, 0, 1, 1], [], []>} : vector<20x32xbf16>, vector<32x32xbf16>, vector<20x32xf32> -> vector<20x32xf32>
    %30 = arith.addf %24, %29 : vector<20x32xf32>
    %c0_35 = arith.constant 0 : index
    %c2_36 = arith.constant 2 : index
    %c1_37 = arith.constant 1 : index
    %c0_38 = arith.constant 0 : index
    %31 = vector.load %arg1[%c0_35, %c2_36, %c1_37, %c0_38] : memref<1x4x32x32xbf16, #tpu.memory_space<vmem>>, vector<1x1x20x32xbf16>
    %32 = vector.shape_cast %31 : vector<1x1x20x32xbf16> to vector<20x32xbf16>
    %c5 = arith.constant 5 : index
    %c0_39 = arith.constant 0 : index
    %c0_40 = arith.constant 0 : index
    %33 = vector.load %arg2[%c5, %c0_39, %c0_40] : memref<9x32x32xbf16, #tpu.memory_space<vmem>>, vector<1x32x32xbf16>
    %34 = vector.shape_cast %33 : vector<1x32x32xbf16> to vector<32x32xbf16>
    %cst_41 = arith.constant dense<0.000000e+00> : vector<20x32xf32>
    %35 = tpu.matmul %32, %34, %cst_41 {dimension_numbers = #tpu.dot_dimension_numbers<[1], [0], [0], [1], [0, 0, 1, 1], [], []>} : vector<20x32xbf16>, vector<32x32xbf16>, vector<20x32xf32> -> vector<20x32xf32>
    %36 = arith.addf %30, %35 : vector<20x32xf32>
    %c0_42 = arith.constant 0 : index
    %c0_43 = arith.constant 0 : index
    %c5_44 = arith.constant 5 : index
    %c0_45 = arith.constant 0 : index
    %37 = vector.load %arg1[%c0_42, %c0_43, %c5_44, %c0_45] : memref<1x4x32x32xbf16, #tpu.memory_space<vmem>>, vector<1x1x20x32xbf16>
    %38 = vector.shape_cast %37 : vector<1x1x20x32xbf16> to vector<20x32xbf16>
    %c6 = arith.constant 6 : index
    %c0_46 = arith.constant 0 : index
    %c0_47 = arith.constant 0 : index
    %39 = vector.load %arg2[%c6, %c0_46, %c0_47] : memref<9x32x32xbf16, #tpu.memory_space<vmem>>, vector<1x32x32xbf16>
    %40 = vector.shape_cast %39 : vector<1x32x32xbf16> to vector<32x32xbf16>
    %cst_48 = arith.constant dense<0.000000e+00> : vector<20x32xf32>
    %41 = tpu.matmul %38, %40, %cst_48 {dimension_numbers = #tpu.dot_dimension_numbers<[1], [0], [0], [1], [0, 0, 1, 1], [], []>} : vector<20x32xbf16>, vector<32x32xbf16>, vector<20x32xf32> -> vector<20x32xf32>
    %42 = arith.addf %36, %41 : vector<20x32xf32>
    %c0_49 = arith.constant 0 : index
    %c1_50 = arith.constant 1 : index
    %c5_51 = arith.constant 5 : index
    %c0_52 = arith.constant 0 : index
    %43 = vector.load %arg1[%c0_49, %c1_50, %c5_51, %c0_52] : memref<1x4x32x32xbf16, #tpu.memory_space<vmem>>, vector<1x1x20x32xbf16>
    %44 = vector.shape_cast %43 : vector<1x1x20x32xbf16> to vector<20x32xbf16>
    %c7 = arith.constant 7 : index
    %c0_53 = arith.constant 0 : index
    %c0_54 = arith.constant 0 : index
    %45 = vector.load %arg2[%c7, %c0_53, %c0_54] : memref<9x32x32xbf16, #tpu.memory_space<vmem>>, vector<1x32x32xbf16>
    %46 = vector.shape_cast %45 : vector<1x32x32xbf16> to vector<32x32xbf16>
    %cst_55 = arith.constant dense<0.000000e+00> : vector<20x32xf32>
    %47 = tpu.matmul %44, %46, %cst_55 {dimension_numbers = #tpu.dot_dimension_numbers<[1], [0], [0], [1], [0, 0, 1, 1], [], []>} : vector<20x32xbf16>, vector<32x32xbf16>, vector<20x32xf32> -> vector<20x32xf32>
    %48 = arith.addf %42, %47 : vector<20x32xf32>
    %c0_56 = arith.constant 0 : index
    %c0_57 = arith.constant 0 : index
    %c6_58 = arith.constant 6 : index
    %c0_59 = arith.constant 0 : index
    %49 = vector.load %arg1[%c0_56, %c0_57, %c6_58, %c0_59] : memref<1x4x32x32xbf16, #tpu.memory_space<vmem>>, vector<1x1x20x32xbf16>
    %50 = vector.shape_cast %49 : vector<1x1x20x32xbf16> to vector<20x32xbf16>
    %c8 = arith.constant 8 : index
    %c0_60 = arith.constant 0 : index
    %c0_61 = arith.constant 0 : index
    %51 = vector.load %arg2[%c8, %c0_60, %c0_61] : memref<9x32x32xbf16, #tpu.memory_space<vmem>>, vector<1x32x32xbf16>
    %52 = vector.shape_cast %51 : vector<1x32x32xbf16> to vector<32x32xbf16>
    %cst_62 = arith.constant dense<0.000000e+00> : vector<20x32xf32>
    %53 = tpu.matmul %50, %52, %cst_62 {dimension_numbers = #tpu.dot_dimension_numbers<[1], [0], [0], [1], [0, 0, 1, 1], [], []>} : vector<20x32xbf16>, vector<32x32xbf16>, vector<20x32xf32> -> vector<20x32xf32>
    %54 = arith.addf %48, %53 : vector<20x32xf32>
    %c0_63 = arith.constant 0 : index
    %c0_64 = arith.constant 0 : index
    %55 = vector.load %arg3[%c0_63, %c0_64] : memref<1x32xf32, #tpu.memory_space<vmem>>, vector<1x32xf32>
    %56 = vector.broadcast %55 : vector<1x32xf32> to vector<20x32xf32>
    %57 = arith.addf %54, %56 : vector<20x32xf32>
    %cst_65 = arith.constant 0.000000e+00 : f32
    %58 = vector.broadcast %cst_65 : f32 to vector<20x32xf32>
    %59 = arith.maximumf %57, %58 : vector<20x32xf32>
    %60 = arith.truncf %59 : vector<20x32xf32> to vector<20x32xbf16>
    %61 = vector.extract_strided_slice %60 {offsets = [0, 0], sizes = [4, 32], strides = [1, 1]} : vector<20x32xbf16> to vector<4x32xbf16>
    %c0_66 = arith.constant 0 : index
    %c0_67 = arith.constant 0 : index
    %c0_68 = arith.constant 0 : index
    %c0_69 = arith.constant 0 : index
    %62 = vector.load %arg4[%c0_66, %c0_67, %c0_68, %c0_69] : memref<1x4x4x32xbf16, #tpu.memory_space<vmem>>, vector<1x1x4x32xbf16>
    %63 = vector.shape_cast %62 : vector<1x1x4x32xbf16> to vector<4x32xbf16>
    %64 = vector.shape_cast %61 : vector<4x32xbf16> to vector<1x1x4x32xbf16>
    tpu.vector_store %arg4[%c0_66, %c0_67, %c0_68, %c0_69], %64 {strides = array<i32>} : memref<1x4x4x32xbf16, #tpu.memory_space<vmem>>, vector<1x1x4x32xbf16>,
    %65 = vector.extract_strided_slice %60 {offsets = [5, 0], sizes = [4, 32], strides = [1, 1]} : vector<20x32xbf16> to vector<4x32xbf16>
    %c0_70 = arith.constant 0 : index
    %c1_71 = arith.constant 1 : index
    %c0_72 = arith.constant 0 : index
    %c0_73 = arith.constant 0 : index
    %66 = vector.load %arg4[%c0_70, %c1_71, %c0_72, %c0_73] : memref<1x4x4x32xbf16, #tpu.memory_space<vmem>>, vector<1x1x4x32xbf16>
    %67 = vector.shape_cast %66 : vector<1x1x4x32xbf16> to vector<4x32xbf16>
    %68 = vector.shape_cast %65 : vector<4x32xbf16> to vector<1x1x4x32xbf16>
    tpu.vector_store %arg4[%c0_70, %c1_71, %c0_72, %c0_73], %68 {strides = array<i32>} : memref<1x4x4x32xbf16, #tpu.memory_space<vmem>>, vector<1x1x4x32xbf16>,
    %69 = vector.extract_strided_slice %60 {offsets = [10, 0], sizes = [4, 32], strides = [1, 1]} : vector<20x32xbf16> to vector<4x32xbf16>
    %c0_74 = arith.constant 0 : index
    %c2_75 = arith.constant 2 : index
    %c0_76 = arith.constant 0 : index
    %c0_77 = arith.constant 0 : index
    %70 = vector.load %arg4[%c0_74, %c2_75, %c0_76, %c0_77] : memref<1x4x4x32xbf16, #tpu.memory_space<vmem>>, vector<1x1x4x32xbf16>
    %71 = vector.shape_cast %70 : vector<1x1x4x32xbf16> to vector<4x32xbf16>
    %72 = vector.shape_cast %69 : vector<4x32xbf16> to vector<1x1x4x32xbf16>
    tpu.vector_store %arg4[%c0_74, %c2_75, %c0_76, %c0_77], %72 {strides = array<i32>} : memref<1x4x4x32xbf16, #tpu.memory_space<vmem>>, vector<1x1x4x32xbf16>,
    %73 = vector.extract_strided_slice %60 {offsets = [15, 0], sizes = [4, 32], strides = [1, 1]} : vector<20x32xbf16> to vector<4x32xbf16>
    %c0_78 = arith.constant 0 : index
    %c3_79 = arith.constant 3 : index
    %c0_80 = arith.constant 0 : index
    %c0_81 = arith.constant 0 : index
    %74 = vector.load %arg4[%c0_78, %c3_79, %c0_80, %c0_81] : memref<1x4x4x32xbf16, #tpu.memory_space<vmem>>, vector<1x1x4x32xbf16>
    %75 = vector.shape_cast %74 : vector<1x1x4x32xbf16> to vector<4x32xbf16>
    %76 = vector.shape_cast %73 : vector<4x32xbf16> to vector<1x1x4x32xbf16>
    tpu.vector_store %arg4[%c0_78, %c3_79, %c0_80, %c0_81], %76 {strides = array<i32>} : memref<1x4x4x32xbf16, #tpu.memory_space<vmem>>, vector<1x1x4x32xbf16>,
    return
  }
  func.func @transform_0(%arg0: i32) -> (i32, i32, i32, i32) {
    %c0_i32 = arith.constant 0 : i32
    %c0_i32_0 = arith.constant 0 : i32
    %c0_i32_1 = arith.constant 0 : i32
    %c0_i32_2 = arith.constant 0 : i32
    return %arg0, %c0_i32, %c0_i32_0, %c0_i32_1 : i32, i32, i32, i32
  }
  func.func @transform_1(%arg0: i32) -> (i32, i32, i32) {
    %c0_i32 = arith.constant 0 : i32
    %c0_i32_0 = arith.constant 0 : i32
    %c0_i32_1 = arith.constant 0 : i32
    %c0_i32_2 = arith.constant 0 : i32
    return %c0_i32, %c0_i32_0, %c0_i32_1 : i32, i32, i32
  }
  func.func @transform_2(%arg0: i32) -> (i32, i32) {
    %c0_i32 = arith.constant 0 : i32
    %c0_i32_0 = arith.constant 0 : i32
    %c0_i32_1 = arith.constant 0 : i32
    return %c0_i32, %c0_i32_0 : i32, i32
  }
  func.func @transform_3(%arg0: i32) -> (i32, i32, i32, i32) {
    %c0_i32 = arith.constant 0 : i32
    %c0_i32_0 = arith.constant 0 : i32
    %c0_i32_1 = arith.constant 0 : i32
    %c0_i32_2 = arith.constant 0 : i32
    return %arg0, %c0_i32, %c0_i32_0, %c0_i32_1 : i32, i32, i32, i32
  }
}

module attributes {stable_mosaic.version = 11 : i64} {
  func.func @_linear_kernel(%arg0: i32, %arg1: i32, %arg2: memref<32x32xbf16, #tpu.memory_space<vmem>>, %arg3: memref<32x32xbf16, #tpu.memory_space<vmem>>, %arg4: memref<1x32xf32, #tpu.memory_space<vmem>>, %arg5: memref<32x32xbf16, #tpu.memory_space<vmem>>) attributes {dimension_semantics = [#tpu.dimension_semantics<parallel>, #tpu.dimension_semantics<parallel>], iteration_bounds = array<i64: 1, 1>, scalar_prefetch = 0 : i64, scratch_operands = 0 : i64, tpu.core_type = #tpu.core_type<tc>, window_params = [{transform_indices = @transform_0, window_bounds = array<i64: 32, 32>}, {transform_indices = @transform_1, window_bounds = array<i64: 32, 32>}, {transform_indices = @transform_2, window_bounds = array<i64: 1, 32>}, {transform_indices = @transform_3, window_bounds = array<i64: 32, 32>}]} {
    %c0 = arith.constant 0 : index
    %c0_0 = arith.constant 0 : index
    %0 = vector.load %arg2[%c0, %c0_0] : memref<32x32xbf16, #tpu.memory_space<vmem>>, vector<32x32xbf16>
    %c0_1 = arith.constant 0 : index
    %c0_2 = arith.constant 0 : index
    %1 = vector.load %arg3[%c0_1, %c0_2] : memref<32x32xbf16, #tpu.memory_space<vmem>>, vector<32x32xbf16>
    %cst = arith.constant dense<0.000000e+00> : vector<32x32xf32>
    %2 = tpu.matmul %0, %1, %cst {dimension_numbers = #tpu.dot_dimension_numbers<[1], [0], [0], [1], [0, 0, 1, 1], [], []>} : vector<32x32xbf16>, vector<32x32xbf16>, vector<32x32xf32> -> vector<32x32xf32>
    %c0_3 = arith.constant 0 : index
    %c0_4 = arith.constant 0 : index
    %3 = vector.load %arg4[%c0_3, %c0_4] : memref<1x32xf32, #tpu.memory_space<vmem>>, vector<1x32xf32>
    %4 = vector.broadcast %3 : vector<1x32xf32> to vector<32x32xf32>
    %5 = arith.addf %2, %4 : vector<32x32xf32>
    %6 = arith.truncf %5 : vector<32x32xf32> to vector<32x32xbf16>
    %c0_5 = arith.constant 0 : index
    %c0_6 = arith.constant 0 : index
    %7 = vector.load %arg5[%c0_5, %c0_6] : memref<32x32xbf16, #tpu.memory_space<vmem>>, vector<32x32xbf16>
    tpu.vector_store %arg5[%c0_5, %c0_6], %6 {strides = array<i32>} : memref<32x32xbf16, #tpu.memory_space<vmem>>, vector<32x32xbf16>,
    return
  }
  func.func @transform_0(%arg0: i32, %arg1: i32) -> (i32, i32) {
    %c0_i32 = arith.constant 0 : i32
    %c0_i32_0 = arith.constant 0 : i32
    return %arg0, %c0_i32 : i32, i32
  }
  func.func @transform_1(%arg0: i32, %arg1: i32) -> (i32, i32) {
    %c0_i32 = arith.constant 0 : i32
    %c0_i32_0 = arith.constant 0 : i32
    return %c0_i32, %arg1 : i32, i32
  }
  func.func @transform_2(%arg0: i32, %arg1: i32) -> (i32, i32) {
    %c0_i32 = arith.constant 0 : i32
    %c0_i32_0 = arith.constant 0 : i32
    return %c0_i32, %arg1 : i32, i32
  }
  func.func @transform_3(%arg0: i32, %arg1: i32) -> (i32, i32) {
    %c0_i32 = arith.constant 0 : i32
    return %arg0, %arg1 : i32, i32
  }
}

module attributes {stable_mosaic.version = 11 : i64} {
  func.func @_lateral_upadd_kernel(%arg0: i32, %arg1: memref<1x64x32xbf16, #tpu.memory_space<vmem>>, %arg2: memref<32x32xbf16, #tpu.memory_space<vmem>>, %arg3: memref<1x32xf32, #tpu.memory_space<vmem>>, %arg4: memref<1x16x32xbf16, #tpu.memory_space<vmem>>, %arg5: memref<64x16xbf16, #tpu.memory_space<vmem>>, %arg6: memref<1x64x32xbf16, #tpu.memory_space<vmem>>) attributes {dimension_semantics = [#tpu.dimension_semantics<parallel>], iteration_bounds = array<i64: 2>, scalar_prefetch = 0 : i64, scratch_operands = 0 : i64, tpu.core_type = #tpu.core_type<tc>, window_params = [{transform_indices = @transform_0, window_bounds = array<i64: 1, 64, 32>}, {pipeline_mode = #tpu.pipeline_mode<synchronous>, transform_indices = @transform_1, window_bounds = array<i64: 32, 32>}, {pipeline_mode = #tpu.pipeline_mode<synchronous>, transform_indices = @transform_2, window_bounds = array<i64: 1, 32>}, {transform_indices = @transform_3, window_bounds = array<i64: 1, 16, 32>}, {pipeline_mode = #tpu.pipeline_mode<synchronous>, transform_indices = @transform_4, window_bounds = array<i64: 64, 16>}, {transform_indices = @transform_5, window_bounds = array<i64: 1, 64, 32>}]} {
    %c0 = arith.constant 0 : index
    %c0_0 = arith.constant 0 : index
    %c0_1 = arith.constant 0 : index
    %0 = vector.load %arg1[%c0, %c0_0, %c0_1] : memref<1x64x32xbf16, #tpu.memory_space<vmem>>, vector<1x64x32xbf16>
    %1 = vector.shape_cast %0 : vector<1x64x32xbf16> to vector<64x32xbf16>
    %c0_2 = arith.constant 0 : index
    %c0_3 = arith.constant 0 : index
    %2 = vector.load %arg2[%c0_2, %c0_3] : memref<32x32xbf16, #tpu.memory_space<vmem>>, vector<32x32xbf16>
    %cst = arith.constant dense<0.000000e+00> : vector<64x32xf32>
    %3 = tpu.matmul %1, %2, %cst {dimension_numbers = #tpu.dot_dimension_numbers<[1], [0], [0], [1], [0, 0, 1, 1], [], []>} : vector<64x32xbf16>, vector<32x32xbf16>, vector<64x32xf32> -> vector<64x32xf32>
    %c0_4 = arith.constant 0 : index
    %c0_5 = arith.constant 0 : index
    %4 = vector.load %arg3[%c0_4, %c0_5] : memref<1x32xf32, #tpu.memory_space<vmem>>, vector<1x32xf32>
    %5 = vector.broadcast %4 : vector<1x32xf32> to vector<64x32xf32>
    %6 = arith.addf %3, %5 : vector<64x32xf32>
    %c0_6 = arith.constant 0 : index
    %c0_7 = arith.constant 0 : index
    %7 = vector.load %arg5[%c0_6, %c0_7] : memref<64x16xbf16, #tpu.memory_space<vmem>>, vector<64x16xbf16>
    %c0_8 = arith.constant 0 : index
    %c0_9 = arith.constant 0 : index
    %c0_10 = arith.constant 0 : index
    %8 = vector.load %arg4[%c0_8, %c0_9, %c0_10] : memref<1x16x32xbf16, #tpu.memory_space<vmem>>, vector<1x16x32xbf16>
    %9 = vector.shape_cast %8 : vector<1x16x32xbf16> to vector<16x32xbf16>
    %cst_11 = arith.constant dense<0.000000e+00> : vector<64x32xf32>
    %10 = tpu.matmul %7, %9, %cst_11 {dimension_numbers = #tpu.dot_dimension_numbers<[1], [0], [0], [1], [0, 0, 1, 1], [], []>} : vector<64x16xbf16>, vector<16x32xbf16>, vector<64x32xf32> -> vector<64x32xf32>
    %11 = arith.addf %6, %10 : vector<64x32xf32>
    %12 = arith.truncf %11 : vector<64x32xf32> to vector<64x32xbf16>
    %c0_12 = arith.constant 0 : index
    %c0_13 = arith.constant 0 : index
    %c0_14 = arith.constant 0 : index
    %13 = vector.load %arg6[%c0_12, %c0_13, %c0_14] : memref<1x64x32xbf16, #tpu.memory_space<vmem>>, vector<1x64x32xbf16>
    %14 = vector.shape_cast %13 : vector<1x64x32xbf16> to vector<64x32xbf16>
    %15 = vector.shape_cast %12 : vector<64x32xbf16> to vector<1x64x32xbf16>
    tpu.vector_store %arg6[%c0_12, %c0_13, %c0_14], %15 {strides = array<i32>} : memref<1x64x32xbf16, #tpu.memory_space<vmem>>, vector<1x64x32xbf16>,
    return
  }
  func.func @transform_0(%arg0: i32) -> (i32, i32, i32) {
    %c0_i32 = arith.constant 0 : i32
    %c0_i32_0 = arith.constant 0 : i32
    %c0_i32_1 = arith.constant 0 : i32
    return %arg0, %c0_i32, %c0_i32_0 : i32, i32, i32
  }
  func.func @transform_1(%arg0: i32) -> (i32, i32) {
    %c0_i32 = arith.constant 0 : i32
    %c0_i32_0 = arith.constant 0 : i32
    %c0_i32_1 = arith.constant 0 : i32
    return %c0_i32, %c0_i32_0 : i32, i32
  }
  func.func @transform_2(%arg0: i32) -> (i32, i32) {
    %c0_i32 = arith.constant 0 : i32
    %c0_i32_0 = arith.constant 0 : i32
    %c0_i32_1 = arith.constant 0 : i32
    return %c0_i32, %c0_i32_0 : i32, i32
  }
  func.func @transform_3(%arg0: i32) -> (i32, i32, i32) {
    %c0_i32 = arith.constant 0 : i32
    %c0_i32_0 = arith.constant 0 : i32
    %c0_i32_1 = arith.constant 0 : i32
    return %arg0, %c0_i32, %c0_i32_0 : i32, i32, i32
  }
  func.func @transform_4(%arg0: i32) -> (i32, i32) {
    %c0_i32 = arith.constant 0 : i32
    %c0_i32_0 = arith.constant 0 : i32
    %c0_i32_1 = arith.constant 0 : i32
    return %c0_i32, %c0_i32_0 : i32, i32
  }
  func.func @transform_5(%arg0: i32) -> (i32, i32, i32) {
    %c0_i32 = arith.constant 0 : i32
    %c0_i32_0 = arith.constant 0 : i32
    %c0_i32_1 = arith.constant 0 : i32
    return %arg0, %c0_i32, %c0_i32_0 : i32, i32, i32
  }
}

module attributes {stable_mosaic.version = 11 : i64} {
  func.func @_lateral_upadd_kernel(%arg0: i32, %arg1: memref<1x256x32xbf16, #tpu.memory_space<vmem>>, %arg2: memref<32x32xbf16, #tpu.memory_space<vmem>>, %arg3: memref<1x32xf32, #tpu.memory_space<vmem>>, %arg4: memref<1x64x32xbf16, #tpu.memory_space<vmem>>, %arg5: memref<256x64xbf16, #tpu.memory_space<vmem>>, %arg6: memref<1x256x32xbf16, #tpu.memory_space<vmem>>) attributes {dimension_semantics = [#tpu.dimension_semantics<parallel>], iteration_bounds = array<i64: 2>, scalar_prefetch = 0 : i64, scratch_operands = 0 : i64, tpu.core_type = #tpu.core_type<tc>, window_params = [{transform_indices = @transform_0, window_bounds = array<i64: 1, 256, 32>}, {pipeline_mode = #tpu.pipeline_mode<synchronous>, transform_indices = @transform_1, window_bounds = array<i64: 32, 32>}, {pipeline_mode = #tpu.pipeline_mode<synchronous>, transform_indices = @transform_2, window_bounds = array<i64: 1, 32>}, {transform_indices = @transform_3, window_bounds = array<i64: 1, 64, 32>}, {pipeline_mode = #tpu.pipeline_mode<synchronous>, transform_indices = @transform_4, window_bounds = array<i64: 256, 64>}, {transform_indices = @transform_5, window_bounds = array<i64: 1, 256, 32>}]} {
    %c0 = arith.constant 0 : index
    %c0_0 = arith.constant 0 : index
    %c0_1 = arith.constant 0 : index
    %0 = vector.load %arg1[%c0, %c0_0, %c0_1] : memref<1x256x32xbf16, #tpu.memory_space<vmem>>, vector<1x256x32xbf16>
    %1 = vector.shape_cast %0 : vector<1x256x32xbf16> to vector<256x32xbf16>
    %c0_2 = arith.constant 0 : index
    %c0_3 = arith.constant 0 : index
    %2 = vector.load %arg2[%c0_2, %c0_3] : memref<32x32xbf16, #tpu.memory_space<vmem>>, vector<32x32xbf16>
    %cst = arith.constant dense<0.000000e+00> : vector<256x32xf32>
    %3 = tpu.matmul %1, %2, %cst {dimension_numbers = #tpu.dot_dimension_numbers<[1], [0], [0], [1], [0, 0, 1, 1], [], []>} : vector<256x32xbf16>, vector<32x32xbf16>, vector<256x32xf32> -> vector<256x32xf32>
    %c0_4 = arith.constant 0 : index
    %c0_5 = arith.constant 0 : index
    %4 = vector.load %arg3[%c0_4, %c0_5] : memref<1x32xf32, #tpu.memory_space<vmem>>, vector<1x32xf32>
    %5 = vector.broadcast %4 : vector<1x32xf32> to vector<256x32xf32>
    %6 = arith.addf %3, %5 : vector<256x32xf32>
    %c0_6 = arith.constant 0 : index
    %c0_7 = arith.constant 0 : index
    %7 = vector.load %arg5[%c0_6, %c0_7] : memref<256x64xbf16, #tpu.memory_space<vmem>>, vector<256x64xbf16>
    %c0_8 = arith.constant 0 : index
    %c0_9 = arith.constant 0 : index
    %c0_10 = arith.constant 0 : index
    %8 = vector.load %arg4[%c0_8, %c0_9, %c0_10] : memref<1x64x32xbf16, #tpu.memory_space<vmem>>, vector<1x64x32xbf16>
    %9 = vector.shape_cast %8 : vector<1x64x32xbf16> to vector<64x32xbf16>
    %cst_11 = arith.constant dense<0.000000e+00> : vector<256x32xf32>
    %10 = tpu.matmul %7, %9, %cst_11 {dimension_numbers = #tpu.dot_dimension_numbers<[1], [0], [0], [1], [0, 0, 1, 1], [], []>} : vector<256x64xbf16>, vector<64x32xbf16>, vector<256x32xf32> -> vector<256x32xf32>
    %11 = arith.addf %6, %10 : vector<256x32xf32>
    %12 = arith.truncf %11 : vector<256x32xf32> to vector<256x32xbf16>
    %c0_12 = arith.constant 0 : index
    %c0_13 = arith.constant 0 : index
    %c0_14 = arith.constant 0 : index
    %13 = vector.load %arg6[%c0_12, %c0_13, %c0_14] : memref<1x256x32xbf16, #tpu.memory_space<vmem>>, vector<1x256x32xbf16>
    %14 = vector.shape_cast %13 : vector<1x256x32xbf16> to vector<256x32xbf16>
    %15 = vector.shape_cast %12 : vector<256x32xbf16> to vector<1x256x32xbf16>
    tpu.vector_store %arg6[%c0_12, %c0_13, %c0_14], %15 {strides = array<i32>} : memref<1x256x32xbf16, #tpu.memory_space<vmem>>, vector<1x256x32xbf16>,
    return
  }
  func.func @transform_0(%arg0: i32) -> (i32, i32, i32) {
    %c0_i32 = arith.constant 0 : i32
    %c0_i32_0 = arith.constant 0 : i32
    %c0_i32_1 = arith.constant 0 : i32
    return %arg0, %c0_i32, %c0_i32_0 : i32, i32, i32
  }
  func.func @transform_1(%arg0: i32) -> (i32, i32) {
    %c0_i32 = arith.constant 0 : i32
    %c0_i32_0 = arith.constant 0 : i32
    %c0_i32_1 = arith.constant 0 : i32
    return %c0_i32, %c0_i32_0 : i32, i32
  }
  func.func @transform_2(%arg0: i32) -> (i32, i32) {
    %c0_i32 = arith.constant 0 : i32
    %c0_i32_0 = arith.constant 0 : i32
    %c0_i32_1 = arith.constant 0 : i32
    return %c0_i32, %c0_i32_0 : i32, i32
  }
  func.func @transform_3(%arg0: i32) -> (i32, i32, i32) {
    %c0_i32 = arith.constant 0 : i32
    %c0_i32_0 = arith.constant 0 : i32
    %c0_i32_1 = arith.constant 0 : i32
    return %arg0, %c0_i32, %c0_i32_0 : i32, i32, i32
  }
  func.func @transform_4(%arg0: i32) -> (i32, i32) {
    %c0_i32 = arith.constant 0 : i32
    %c0_i32_0 = arith.constant 0 : i32
    %c0_i32_1 = arith.constant 0 : i32
    return %c0_i32, %c0_i32_0 : i32, i32
  }
  func.func @transform_5(%arg0: i32) -> (i32, i32, i32) {
    %c0_i32 = arith.constant 0 : i32
    %c0_i32_0 = arith.constant 0 : i32
    %c0_i32_1 = arith.constant 0 : i32
    return %arg0, %c0_i32, %c0_i32_0 : i32, i32, i32
  }
}

module attributes {stable_mosaic.version = 11 : i64} {
  func.func @_linear_kernel(%arg0: i32, %arg1: i32, %arg2: memref<256x32xbf16, #tpu.memory_space<vmem>>, %arg3: memref<32x16xbf16, #tpu.memory_space<vmem>>, %arg4: memref<1x16xf32, #tpu.memory_space<vmem>>, %arg5: memref<256x16xbf16, #tpu.memory_space<vmem>>) attributes {dimension_semantics = [#tpu.dimension_semantics<parallel>, #tpu.dimension_semantics<parallel>], iteration_bounds = array<i64: 2, 1>, scalar_prefetch = 0 : i64, scratch_operands = 0 : i64, tpu.core_type = #tpu.core_type<tc>, window_params = [{transform_indices = @transform_0, window_bounds = array<i64: 256, 32>}, {transform_indices = @transform_1, window_bounds = array<i64: 32, 16>}, {transform_indices = @transform_2, window_bounds = array<i64: 1, 16>}, {transform_indices = @transform_3, window_bounds = array<i64: 256, 16>}]} {
    %c0 = arith.constant 0 : index
    %c0_0 = arith.constant 0 : index
    %0 = vector.load %arg2[%c0, %c0_0] : memref<256x32xbf16, #tpu.memory_space<vmem>>, vector<256x32xbf16>
    %c0_1 = arith.constant 0 : index
    %c0_2 = arith.constant 0 : index
    %1 = vector.load %arg3[%c0_1, %c0_2] : memref<32x16xbf16, #tpu.memory_space<vmem>>, vector<32x16xbf16>
    %cst = arith.constant dense<0.000000e+00> : vector<256x16xf32>
    %2 = tpu.matmul %0, %1, %cst {dimension_numbers = #tpu.dot_dimension_numbers<[1], [0], [0], [1], [0, 0, 1, 1], [], []>} : vector<256x32xbf16>, vector<32x16xbf16>, vector<256x16xf32> -> vector<256x16xf32>
    %c0_3 = arith.constant 0 : index
    %c0_4 = arith.constant 0 : index
    %3 = vector.load %arg4[%c0_3, %c0_4] : memref<1x16xf32, #tpu.memory_space<vmem>>, vector<1x16xf32>
    %4 = vector.broadcast %3 : vector<1x16xf32> to vector<256x16xf32>
    %5 = arith.addf %2, %4 : vector<256x16xf32>
    %6 = arith.truncf %5 : vector<256x16xf32> to vector<256x16xbf16>
    %c0_5 = arith.constant 0 : index
    %c0_6 = arith.constant 0 : index
    %7 = vector.load %arg5[%c0_5, %c0_6] : memref<256x16xbf16, #tpu.memory_space<vmem>>, vector<256x16xbf16>
    tpu.vector_store %arg5[%c0_5, %c0_6], %6 {strides = array<i32>} : memref<256x16xbf16, #tpu.memory_space<vmem>>, vector<256x16xbf16>,
    return
  }
  func.func @transform_0(%arg0: i32, %arg1: i32) -> (i32, i32) {
    %c0_i32 = arith.constant 0 : i32
    %c0_i32_0 = arith.constant 0 : i32
    return %arg0, %c0_i32 : i32, i32
  }
  func.func @transform_1(%arg0: i32, %arg1: i32) -> (i32, i32) {
    %c0_i32 = arith.constant 0 : i32
    %c0_i32_0 = arith.constant 0 : i32
    return %c0_i32, %arg1 : i32, i32
  }
  func.func @transform_2(%arg0: i32, %arg1: i32) -> (i32, i32) {
    %c0_i32 = arith.constant 0 : i32
    %c0_i32_0 = arith.constant 0 : i32
    return %c0_i32, %arg1 : i32, i32
  }
  func.func @transform_3(%arg0: i32, %arg1: i32) -> (i32, i32) {
    %c0_i32 = arith.constant 0 : i32
    return %arg0, %arg1 : i32, i32
  }
}

module attributes {stable_mosaic.version = 11 : i64} {
  func.func @_decoder_kernel(%arg0: i32, %arg1: memref<8x32xf32, #tpu.memory_space<vmem>>, %arg2: memref<1x16x32xbf16, #tpu.memory_space<vmem>>, %arg3: memref<1x256x16xbf16, #tpu.memory_space<vmem>>, %arg4: memref<24x128xf32, #tpu.memory_space<vmem>>, %arg5: memref<32x32xbf16, #tpu.memory_space<vmem>>, %arg6: memref<32x64xbf16, #tpu.memory_space<vmem>>, %arg7: memref<32x32xbf16, #tpu.memory_space<vmem>>, %arg8: memref<32x96xbf16, #tpu.memory_space<vmem>>, %arg9: memref<32x32xbf16, #tpu.memory_space<vmem>>, %arg10: memref<32x64xbf16, #tpu.memory_space<vmem>>, %arg11: memref<64x32xbf16, #tpu.memory_space<vmem>>, %arg12: memref<32x6xbf16, #tpu.memory_space<vmem>>, %arg13: memref<32x32xbf16, #tpu.memory_space<vmem>>, %arg14: memref<32x32xbf16, #tpu.memory_space<vmem>>, %arg15: memref<32x16xbf16, #tpu.memory_space<vmem>>, %arg16: memref<1x8x6xf32, #tpu.memory_space<vmem>>, %arg17: memref<1x8x256xf32, #tpu.memory_space<vmem>>) attributes {dimension_semantics = [#tpu.dimension_semantics<parallel>], iteration_bounds = array<i64: 2>, scalar_prefetch = 0 : i64, scratch_operands = 0 : i64, tpu.core_type = #tpu.core_type<tc>, window_params = [{pipeline_mode = #tpu.pipeline_mode<synchronous>, transform_indices = @transform_0, window_bounds = array<i64: 8, 32>}, {transform_indices = @transform_1, window_bounds = array<i64: 1, 16, 32>}, {transform_indices = @transform_2, window_bounds = array<i64: 1, 256, 16>}, {pipeline_mode = #tpu.pipeline_mode<synchronous>, transform_indices = @transform_3, window_bounds = array<i64: 24, 128>}, {pipeline_mode = #tpu.pipeline_mode<synchronous>, transform_indices = @transform_4, window_bounds = array<i64: 32, 32>}, {pipeline_mode = #tpu.pipeline_mode<synchronous>, transform_indices = @transform_5, window_bounds = array<i64: 32, 64>}, {pipeline_mode = #tpu.pipeline_mode<synchronous>, transform_indices = @transform_6, window_bounds = array<i64: 32, 32>}, {pipeline_mode = #tpu.pipeline_mode<synchronous>, transform_indices = @transform_7, window_bounds = array<i64: 32, 96>}, {pipeline_mode = #tpu.pipeline_mode<synchronous>, transform_indices = @transform_8, window_bounds = array<i64: 32, 32>}, {pipeline_mode = #tpu.pipeline_mode<synchronous>, transform_indices = @transform_9, window_bounds = array<i64: 32, 64>}, {pipeline_mode = #tpu.pipeline_mode<synchronous>, transform_indices = @transform_10, window_bounds = array<i64: 64, 32>}, {pipeline_mode = #tpu.pipeline_mode<synchronous>, transform_indices = @transform_11, window_bounds = array<i64: 32, 6>}, {pipeline_mode = #tpu.pipeline_mode<synchronous>, transform_indices = @transform_12, window_bounds = array<i64: 32, 32>}, {pipeline_mode = #tpu.pipeline_mode<synchronous>, transform_indices = @transform_13, window_bounds = array<i64: 32, 32>}, {pipeline_mode = #tpu.pipeline_mode<synchronous>, transform_indices = @transform_14, window_bounds = array<i64: 32, 16>}, {transform_indices = @transform_15, window_bounds = array<i64: 1, 8, 6>}, {transform_indices = @transform_16, window_bounds = array<i64: 1, 8, 256>}]} {
    %c0 = arith.constant 0 : index
    %c0_0 = arith.constant 0 : index
    %0 = vector.load %arg1[%c0, %c0_0] : memref<8x32xf32, #tpu.memory_space<vmem>>, vector<8x32xf32>
    %c0_1 = arith.constant 0 : index
    %c0_2 = arith.constant 0 : index
    %c0_3 = arith.constant 0 : index
    %1 = vector.load %arg2[%c0_1, %c0_2, %c0_3] : memref<1x16x32xbf16, #tpu.memory_space<vmem>>, vector<1x16x32xbf16>
    %2 = vector.shape_cast %1 : vector<1x16x32xbf16> to vector<16x32xbf16>
    %c0_4 = arith.constant 0 : index
    %c0_5 = arith.constant 0 : index
    %3 = vector.load %arg5[%c0_4, %c0_5] : memref<32x32xbf16, #tpu.memory_space<vmem>>, vector<32x32xbf16>
    %4 = arith.truncf %0 : vector<8x32xf32> to vector<8x32xbf16>
    %cst = arith.constant dense<0.000000e+00> : vector<8x32xf32>
    %5 = tpu.matmul %4, %3, %cst {dimension_numbers = #tpu.dot_dimension_numbers<[1], [0], [0], [1], [0, 0, 1, 1], [], []>} : vector<8x32xbf16>, vector<32x32xbf16>, vector<8x32xf32> -> vector<8x32xf32>
    %c0_6 = arith.constant 0 : index
    %c0_7 = arith.constant 0 : index
    %6 = vector.load %arg4[%c0_6, %c0_7] : memref<24x128xf32, #tpu.memory_space<vmem>>, vector<1x32xf32>
    %7 = vector.broadcast %6 : vector<1x32xf32> to vector<8x32xf32>
    %8 = arith.addf %5, %7 : vector<8x32xf32>
    %c0_8 = arith.constant 0 : index
    %c0_9 = arith.constant 0 : index
    %9 = vector.load %arg6[%c0_8, %c0_9] : memref<32x64xbf16, #tpu.memory_space<vmem>>, vector<32x64xbf16>
    %cst_10 = arith.constant dense<0.000000e+00> : vector<16x64xf32>
    %10 = tpu.matmul %2, %9, %cst_10 {dimension_numbers = #tpu.dot_dimension_numbers<[1], [0], [0], [1], [0, 0, 1, 1], [], []>} : vector<16x32xbf16>, vector<32x64xbf16>, vector<16x64xf32> -> vector<16x64xf32>
    %c1 = arith.constant 1 : index
    %c0_11 = arith.constant 0 : index
    %11 = vector.load %arg4[%c1, %c0_11] : memref<24x128xf32, #tpu.memory_space<vmem>>, vector<1x64xf32>
    %12 = vector.broadcast %11 : vector<1x64xf32> to vector<16x64xf32>
    %13 = arith.addf %10, %12 : vector<16x64xf32>
    %14 = vector.extract_strided_slice %13 {offsets = [0, 0], sizes = [16, 32], strides = [1, 1]} : vector<16x64xf32> to vector<16x32xf32>
    %15 = vector.extract_strided_slice %13 {offsets = [0, 32], sizes = [16, 32], strides = [1, 1]} : vector<16x64xf32> to vector<16x32xf32>
    %cst_12 = arith.constant 0.000000e+00 : f32
    %16 = vector.broadcast %cst_12 : f32 to vector<8x32xf32>
    %17 = vector.extract_strided_slice %8 {offsets = [0, 0], sizes = [8, 8], strides = [1, 1]} : vector<8x32xf32> to vector<8x8xf32>
    %18 = arith.truncf %17 : vector<8x8xf32> to vector<8x8xbf16>
    %19 = vector.extract_strided_slice %14 {offsets = [0, 0], sizes = [16, 8], strides = [1, 1]} : vector<16x32xf32> to vector<16x8xf32>
    %20 = arith.truncf %19 : vector<16x8xf32> to vector<16x8xbf16>
    %21 = vector.extract_strided_slice %15 {offsets = [0, 0], sizes = [16, 8], strides = [1, 1]} : vector<16x32xf32> to vector<16x8xf32>
    %22 = arith.truncf %21 : vector<16x8xf32> to vector<16x8xbf16>
    %23 = tpu.transpose %20, [1, 0] : vector<16x8xbf16> -> vector<8x16xbf16>
    %cst_13 = arith.constant dense<0.000000e+00> : vector<8x16xf32>
    %24 = tpu.matmul %18, %23, %cst_13 {dimension_numbers = #tpu.dot_dimension_numbers<[1], [0], [0], [1], [0, 0, 1, 1], [], []>} : vector<8x8xbf16>, vector<8x16xbf16>, vector<8x16xf32> -> vector<8x16xf32>
    %cst_14 = arith.constant 0.353553385 : f32
    %25 = vector.broadcast %cst_14 : f32 to vector<8x16xf32>
    %26 = arith.mulf %24, %25 : vector<8x16xf32>
    %cst_15 = arith.constant dense<0xFF800000> : vector<8xf32>
    %27 = vector.multi_reduction <maximumf>, %26, %cst_15 [1] : vector<8x16xf32> to vector<8xf32>
    %28 = vector.shape_cast %27 : vector<8xf32> to vector<8x1xf32>
    %29 = vector.broadcast %28 : vector<8x1xf32> to vector<8x16xf32>
    %30 = arith.subf %26, %29 : vector<8x16xf32>
    %31 = math.exp %30 : vector<8x16xf32>
    %cst_16 = arith.constant dense<0.000000e+00> : vector<8xf32>
    %32 = vector.multi_reduction <add>, %31, %cst_16 [1] : vector<8x16xf32> to vector<8xf32>
    %33 = vector.shape_cast %32 : vector<8xf32> to vector<8x1xf32>
    %34 = tpu.reciprocal %33 {approx = true} : vector<8x1xf32> -> vector<8x1xf32>
    %35 = vector.broadcast %34 : vector<8x1xf32> to vector<8x16xf32>
    %36 = arith.mulf %31, %35 : vector<8x16xf32>
    %37 = arith.truncf %36 : vector<8x16xf32> to vector<8x16xbf16>
    %cst_17 = arith.constant dense<0.000000e+00> : vector<8x8xf32>
    %38 = tpu.matmul %37, %22, %cst_17 {dimension_numbers = #tpu.dot_dimension_numbers<[1], [0], [0], [1], [0, 0, 1, 1], [], []>} : vector<8x16xbf16>, vector<16x8xbf16>, vector<8x8xf32> -> vector<8x8xf32>
    %c0_18 = arith.constant 0 : index
    %c0_19 = arith.constant 0 : index
    %39 = vector.load %arg7[%c0_18, %c0_19] : memref<32x32xbf16, #tpu.memory_space<vmem>>, vector<8x32xbf16>
    %40 = arith.truncf %38 : vector<8x8xf32> to vector<8x8xbf16>
    %cst_20 = arith.constant dense<0.000000e+00> : vector<8x32xf32>
    %41 = tpu.matmul %40, %39, %cst_20 {dimension_numbers = #tpu.dot_dimension_numbers<[1], [0], [0], [1], [0, 0, 1, 1], [], []>} : vector<8x8xbf16>, vector<8x32xbf16>, vector<8x32xf32> -> vector<8x32xf32>
    %42 = arith.addf %16, %41 : vector<8x32xf32>
    %43 = vector.extract_strided_slice %8 {offsets = [0, 8], sizes = [8, 8], strides = [1, 1]} : vector<8x32xf32> to vector<8x8xf32>
    %44 = arith.truncf %43 : vector<8x8xf32> to vector<8x8xbf16>
    %45 = vector.extract_strided_slice %14 {offsets = [0, 8], sizes = [16, 8], strides = [1, 1]} : vector<16x32xf32> to vector<16x8xf32>
    %46 = arith.truncf %45 : vector<16x8xf32> to vector<16x8xbf16>
    %47 = vector.extract_strided_slice %15 {offsets = [0, 8], sizes = [16, 8], strides = [1, 1]} : vector<16x32xf32> to vector<16x8xf32>
    %48 = arith.truncf %47 : vector<16x8xf32> to vector<16x8xbf16>
    %49 = tpu.transpose %46, [1, 0] : vector<16x8xbf16> -> vector<8x16xbf16>
    %cst_21 = arith.constant dense<0.000000e+00> : vector<8x16xf32>
    %50 = tpu.matmul %44, %49, %cst_21 {dimension_numbers = #tpu.dot_dimension_numbers<[1], [0], [0], [1], [0, 0, 1, 1], [], []>} : vector<8x8xbf16>, vector<8x16xbf16>, vector<8x16xf32> -> vector<8x16xf32>
    %cst_22 = arith.constant 0.353553385 : f32
    %51 = vector.broadcast %cst_22 : f32 to vector<8x16xf32>
    %52 = arith.mulf %50, %51 : vector<8x16xf32>
    %cst_23 = arith.constant dense<0xFF800000> : vector<8xf32>
    %53 = vector.multi_reduction <maximumf>, %52, %cst_23 [1] : vector<8x16xf32> to vector<8xf32>
    %54 = vector.shape_cast %53 : vector<8xf32> to vector<8x1xf32>
    %55 = vector.broadcast %54 : vector<8x1xf32> to vector<8x16xf32>
    %56 = arith.subf %52, %55 : vector<8x16xf32>
    %57 = math.exp %56 : vector<8x16xf32>
    %cst_24 = arith.constant dense<0.000000e+00> : vector<8xf32>
    %58 = vector.multi_reduction <add>, %57, %cst_24 [1] : vector<8x16xf32> to vector<8xf32>
    %59 = vector.shape_cast %58 : vector<8xf32> to vector<8x1xf32>
    %60 = tpu.reciprocal %59 {approx = true} : vector<8x1xf32> -> vector<8x1xf32>
    %61 = vector.broadcast %60 : vector<8x1xf32> to vector<8x16xf32>
    %62 = arith.mulf %57, %61 : vector<8x16xf32>
    %63 = arith.truncf %62 : vector<8x16xf32> to vector<8x16xbf16>
    %cst_25 = arith.constant dense<0.000000e+00> : vector<8x8xf32>
    %64 = tpu.matmul %63, %48, %cst_25 {dimension_numbers = #tpu.dot_dimension_numbers<[1], [0], [0], [1], [0, 0, 1, 1], [], []>} : vector<8x16xbf16>, vector<16x8xbf16>, vector<8x8xf32> -> vector<8x8xf32>
    %c8 = arith.constant 8 : index
    %c0_26 = arith.constant 0 : index
    %65 = vector.load %arg7[%c8, %c0_26] : memref<32x32xbf16, #tpu.memory_space<vmem>>, vector<8x32xbf16>
    %66 = arith.truncf %64 : vector<8x8xf32> to vector<8x8xbf16>
    %cst_27 = arith.constant dense<0.000000e+00> : vector<8x32xf32>
    %67 = tpu.matmul %66, %65, %cst_27 {dimension_numbers = #tpu.dot_dimension_numbers<[1], [0], [0], [1], [0, 0, 1, 1], [], []>} : vector<8x8xbf16>, vector<8x32xbf16>, vector<8x32xf32> -> vector<8x32xf32>
    %68 = arith.addf %42, %67 : vector<8x32xf32>
    %69 = vector.extract_strided_slice %8 {offsets = [0, 16], sizes = [8, 8], strides = [1, 1]} : vector<8x32xf32> to vector<8x8xf32>
    %70 = arith.truncf %69 : vector<8x8xf32> to vector<8x8xbf16>
    %71 = vector.extract_strided_slice %14 {offsets = [0, 16], sizes = [16, 8], strides = [1, 1]} : vector<16x32xf32> to vector<16x8xf32>
    %72 = arith.truncf %71 : vector<16x8xf32> to vector<16x8xbf16>
    %73 = vector.extract_strided_slice %15 {offsets = [0, 16], sizes = [16, 8], strides = [1, 1]} : vector<16x32xf32> to vector<16x8xf32>
    %74 = arith.truncf %73 : vector<16x8xf32> to vector<16x8xbf16>
    %75 = tpu.transpose %72, [1, 0] : vector<16x8xbf16> -> vector<8x16xbf16>
    %cst_28 = arith.constant dense<0.000000e+00> : vector<8x16xf32>
    %76 = tpu.matmul %70, %75, %cst_28 {dimension_numbers = #tpu.dot_dimension_numbers<[1], [0], [0], [1], [0, 0, 1, 1], [], []>} : vector<8x8xbf16>, vector<8x16xbf16>, vector<8x16xf32> -> vector<8x16xf32>
    %cst_29 = arith.constant 0.353553385 : f32
    %77 = vector.broadcast %cst_29 : f32 to vector<8x16xf32>
    %78 = arith.mulf %76, %77 : vector<8x16xf32>
    %cst_30 = arith.constant dense<0xFF800000> : vector<8xf32>
    %79 = vector.multi_reduction <maximumf>, %78, %cst_30 [1] : vector<8x16xf32> to vector<8xf32>
    %80 = vector.shape_cast %79 : vector<8xf32> to vector<8x1xf32>
    %81 = vector.broadcast %80 : vector<8x1xf32> to vector<8x16xf32>
    %82 = arith.subf %78, %81 : vector<8x16xf32>
    %83 = math.exp %82 : vector<8x16xf32>
    %cst_31 = arith.constant dense<0.000000e+00> : vector<8xf32>
    %84 = vector.multi_reduction <add>, %83, %cst_31 [1] : vector<8x16xf32> to vector<8xf32>
    %85 = vector.shape_cast %84 : vector<8xf32> to vector<8x1xf32>
    %86 = tpu.reciprocal %85 {approx = true} : vector<8x1xf32> -> vector<8x1xf32>
    %87 = vector.broadcast %86 : vector<8x1xf32> to vector<8x16xf32>
    %88 = arith.mulf %83, %87 : vector<8x16xf32>
    %89 = arith.truncf %88 : vector<8x16xf32> to vector<8x16xbf16>
    %cst_32 = arith.constant dense<0.000000e+00> : vector<8x8xf32>
    %90 = tpu.matmul %89, %74, %cst_32 {dimension_numbers = #tpu.dot_dimension_numbers<[1], [0], [0], [1], [0, 0, 1, 1], [], []>} : vector<8x16xbf16>, vector<16x8xbf16>, vector<8x8xf32> -> vector<8x8xf32>
    %c16 = arith.constant 16 : index
    %c0_33 = arith.constant 0 : index
    %91 = vector.load %arg7[%c16, %c0_33] : memref<32x32xbf16, #tpu.memory_space<vmem>>, vector<8x32xbf16>
    %92 = arith.truncf %90 : vector<8x8xf32> to vector<8x8xbf16>
    %cst_34 = arith.constant dense<0.000000e+00> : vector<8x32xf32>
    %93 = tpu.matmul %92, %91, %cst_34 {dimension_numbers = #tpu.dot_dimension_numbers<[1], [0], [0], [1], [0, 0, 1, 1], [], []>} : vector<8x8xbf16>, vector<8x32xbf16>, vector<8x32xf32> -> vector<8x32xf32>
    %94 = arith.addf %68, %93 : vector<8x32xf32>
    %95 = vector.extract_strided_slice %8 {offsets = [0, 24], sizes = [8, 8], strides = [1, 1]} : vector<8x32xf32> to vector<8x8xf32>
    %96 = arith.truncf %95 : vector<8x8xf32> to vector<8x8xbf16>
    %97 = vector.extract_strided_slice %14 {offsets = [0, 24], sizes = [16, 8], strides = [1, 1]} : vector<16x32xf32> to vector<16x8xf32>
    %98 = arith.truncf %97 : vector<16x8xf32> to vector<16x8xbf16>
    %99 = vector.extract_strided_slice %15 {offsets = [0, 24], sizes = [16, 8], strides = [1, 1]} : vector<16x32xf32> to vector<16x8xf32>
    %100 = arith.truncf %99 : vector<16x8xf32> to vector<16x8xbf16>
    %101 = tpu.transpose %98, [1, 0] : vector<16x8xbf16> -> vector<8x16xbf16>
    %cst_35 = arith.constant dense<0.000000e+00> : vector<8x16xf32>
    %102 = tpu.matmul %96, %101, %cst_35 {dimension_numbers = #tpu.dot_dimension_numbers<[1], [0], [0], [1], [0, 0, 1, 1], [], []>} : vector<8x8xbf16>, vector<8x16xbf16>, vector<8x16xf32> -> vector<8x16xf32>
    %cst_36 = arith.constant 0.353553385 : f32
    %103 = vector.broadcast %cst_36 : f32 to vector<8x16xf32>
    %104 = arith.mulf %102, %103 : vector<8x16xf32>
    %cst_37 = arith.constant dense<0xFF800000> : vector<8xf32>
    %105 = vector.multi_reduction <maximumf>, %104, %cst_37 [1] : vector<8x16xf32> to vector<8xf32>
    %106 = vector.shape_cast %105 : vector<8xf32> to vector<8x1xf32>
    %107 = vector.broadcast %106 : vector<8x1xf32> to vector<8x16xf32>
    %108 = arith.subf %104, %107 : vector<8x16xf32>
    %109 = math.exp %108 : vector<8x16xf32>
    %cst_38 = arith.constant dense<0.000000e+00> : vector<8xf32>
    %110 = vector.multi_reduction <add>, %109, %cst_38 [1] : vector<8x16xf32> to vector<8xf32>
    %111 = vector.shape_cast %110 : vector<8xf32> to vector<8x1xf32>
    %112 = tpu.reciprocal %111 {approx = true} : vector<8x1xf32> -> vector<8x1xf32>
    %113 = vector.broadcast %112 : vector<8x1xf32> to vector<8x16xf32>
    %114 = arith.mulf %109, %113 : vector<8x16xf32>
    %115 = arith.truncf %114 : vector<8x16xf32> to vector<8x16xbf16>
    %cst_39 = arith.constant dense<0.000000e+00> : vector<8x8xf32>
    %116 = tpu.matmul %115, %100, %cst_39 {dimension_numbers = #tpu.dot_dimension_numbers<[1], [0], [0], [1], [0, 0, 1, 1], [], []>} : vector<8x16xbf16>, vector<16x8xbf16>, vector<8x8xf32> -> vector<8x8xf32>
    %c24 = arith.constant 24 : index
    %c0_40 = arith.constant 0 : index
    %117 = vector.load %arg7[%c24, %c0_40] : memref<32x32xbf16, #tpu.memory_space<vmem>>, vector<8x32xbf16>
    %118 = arith.truncf %116 : vector<8x8xf32> to vector<8x8xbf16>
    %cst_41 = arith.constant dense<0.000000e+00> : vector<8x32xf32>
    %119 = tpu.matmul %118, %117, %cst_41 {dimension_numbers = #tpu.dot_dimension_numbers<[1], [0], [0], [1], [0, 0, 1, 1], [], []>} : vector<8x8xbf16>, vector<8x32xbf16>, vector<8x32xf32> -> vector<8x32xf32>
    %120 = arith.addf %94, %119 : vector<8x32xf32>
    %c2 = arith.constant 2 : index
    %c0_42 = arith.constant 0 : index
    %121 = vector.load %arg4[%c2, %c0_42] : memref<24x128xf32, #tpu.memory_space<vmem>>, vector<1x32xf32>
    %122 = vector.broadcast %121 : vector<1x32xf32> to vector<8x32xf32>
    %123 = arith.addf %120, %122 : vector<8x32xf32>
    %124 = arith.addf %0, %123 : vector<8x32xf32>
    %cst_43 = arith.constant dense<0.000000e+00> : vector<8xf32>
    %125 = vector.multi_reduction <add>, %124, %cst_43 [1] : vector<8x32xf32> to vector<8xf32>
    %126 = vector.shape_cast %125 : vector<8xf32> to vector<8x1xf32>
    %cst_44 = arith.constant 3.200000e+01 : f32
    %127 = vector.broadcast %cst_44 : f32 to vector<8x1xf32>
    %128 = arith.divf %126, %127 : vector<8x1xf32>
    %129 = vector.broadcast %128 : vector<8x1xf32> to vector<8x32xf32>
    %130 = arith.subf %124, %129 : vector<8x32xf32>
    %131 = arith.mulf %130, %130 : vector<8x32xf32>
    %cst_45 = arith.constant dense<0.000000e+00> : vector<8xf32>
    %132 = vector.multi_reduction <add>, %131, %cst_45 [1] : vector<8x32xf32> to vector<8xf32>
    %133 = vector.shape_cast %132 : vector<8xf32> to vector<8x1xf32>
    %cst_46 = arith.constant 3.200000e+01 : f32
    %134 = vector.broadcast %cst_46 : f32 to vector<8x1xf32>
    %135 = arith.divf %133, %134 : vector<8x1xf32>
    %cst_47 = arith.constant 9.99999974E-6 : f32
    %136 = vector.broadcast %cst_47 : f32 to vector<8x1xf32>
    %137 = arith.addf %135, %136 : vector<8x1xf32>
    %138 = math.rsqrt %137 : vector<8x1xf32>
    %139 = vector.broadcast %138 : vector<8x1xf32> to vector<8x32xf32>
    %140 = arith.mulf %130, %139 : vector<8x32xf32>
    %c11 = arith.constant 11 : index
    %c0_48 = arith.constant 0 : index
    %141 = vector.load %arg4[%c11, %c0_48] : memref<24x128xf32, #tpu.memory_space<vmem>>, vector<1x32xf32>
    %142 = vector.broadcast %141 : vector<1x32xf32> to vector<8x32xf32>
    %143 = arith.mulf %140, %142 : vector<8x32xf32>
    %c12 = arith.constant 12 : index
    %c0_49 = arith.constant 0 : index
    %144 = vector.load %arg4[%c12, %c0_49] : memref<24x128xf32, #tpu.memory_space<vmem>>, vector<1x32xf32>
    %145 = vector.broadcast %144 : vector<1x32xf32> to vector<8x32xf32>
    %146 = arith.addf %143, %145 : vector<8x32xf32>
    %c0_50 = arith.constant 0 : index
    %c0_51 = arith.constant 0 : index
    %147 = vector.load %arg8[%c0_50, %c0_51] : memref<32x96xbf16, #tpu.memory_space<vmem>>, vector<32x96xbf16>
    %148 = arith.truncf %146 : vector<8x32xf32> to vector<8x32xbf16>
    %cst_52 = arith.constant dense<0.000000e+00> : vector<8x96xf32>
    %149 = tpu.matmul %148, %147, %cst_52 {dimension_numbers = #tpu.dot_dimension_numbers<[1], [0], [0], [1], [0, 0, 1, 1], [], []>} : vector<8x32xbf16>, vector<32x96xbf16>, vector<8x96xf32> -> vector<8x96xf32>
    %c3 = arith.constant 3 : index
    %c0_53 = arith.constant 0 : index
    %150 = vector.load %arg4[%c3, %c0_53] : memref<24x128xf32, #tpu.memory_space<vmem>>, vector<1x96xf32>
    %151 = vector.broadcast %150 : vector<1x96xf32> to vector<8x96xf32>
    %152 = arith.addf %149, %151 : vector<8x96xf32>
    %153 = vector.extract_strided_slice %152 {offsets = [0, 0], sizes = [8, 32], strides = [1, 1]} : vector<8x96xf32> to vector<8x32xf32>
    %154 = vector.extract_strided_slice %152 {offsets = [0, 32], sizes = [8, 32], strides = [1, 1]} : vector<8x96xf32> to vector<8x32xf32>
    %155 = vector.extract_strided_slice %152 {offsets = [0, 64], sizes = [8, 32], strides = [1, 1]} : vector<8x96xf32> to vector<8x32xf32>
    %cst_54 = arith.constant 0.000000e+00 : f32
    %156 = vector.broadcast %cst_54 : f32 to vector<8x32xf32>
    %157 = vector.extract_strided_slice %153 {offsets = [0, 0], sizes = [8, 8], strides = [1, 1]} : vector<8x32xf32> to vector<8x8xf32>
    %158 = arith.truncf %157 : vector<8x8xf32> to vector<8x8xbf16>
    %159 = vector.extract_strided_slice %154 {offsets = [0, 0], sizes = [8, 8], strides = [1, 1]} : vector<8x32xf32> to vector<8x8xf32>
    %160 = arith.truncf %159 : vector<8x8xf32> to vector<8x8xbf16>
    %161 = vector.extract_strided_slice %155 {offsets = [0, 0], sizes = [8, 8], strides = [1, 1]} : vector<8x32xf32> to vector<8x8xf32>
    %162 = arith.truncf %161 : vector<8x8xf32> to vector<8x8xbf16>
    %163 = tpu.transpose %160, [1, 0] : vector<8x8xbf16> -> vector<8x8xbf16>
    %cst_55 = arith.constant dense<0.000000e+00> : vector<8x8xf32>
    %164 = tpu.matmul %158, %163, %cst_55 {dimension_numbers = #tpu.dot_dimension_numbers<[1], [0], [0], [1], [0, 0, 1, 1], [], []>} : vector<8x8xbf16>, vector<8x8xbf16>, vector<8x8xf32> -> vector<8x8xf32>
    %cst_56 = arith.constant 0.353553385 : f32
    %165 = vector.broadcast %cst_56 : f32 to vector<8x8xf32>
    %166 = arith.mulf %164, %165 : vector<8x8xf32>
    %cst_57 = arith.constant dense<0xFF800000> : vector<8xf32>
    %167 = vector.multi_reduction <maximumf>, %166, %cst_57 [1] : vector<8x8xf32> to vector<8xf32>
    %168 = vector.shape_cast %167 : vector<8xf32> to vector<8x1xf32>
    %169 = vector.broadcast %168 : vector<8x1xf32> to vector<8x8xf32>
    %170 = arith.subf %166, %169 : vector<8x8xf32>
    %171 = math.exp %170 : vector<8x8xf32>
    %cst_58 = arith.constant dense<0.000000e+00> : vector<8xf32>
    %172 = vector.multi_reduction <add>, %171, %cst_58 [1] : vector<8x8xf32> to vector<8xf32>
    %173 = vector.shape_cast %172 : vector<8xf32> to vector<8x1xf32>
    %174 = tpu.reciprocal %173 {approx = true} : vector<8x1xf32> -> vector<8x1xf32>
    %175 = vector.broadcast %174 : vector<8x1xf32> to vector<8x8xf32>
    %176 = arith.mulf %171, %175 : vector<8x8xf32>
    %177 = arith.truncf %176 : vector<8x8xf32> to vector<8x8xbf16>
    %cst_59 = arith.constant dense<0.000000e+00> : vector<8x8xf32>
    %178 = tpu.matmul %177, %162, %cst_59 {dimension_numbers = #tpu.dot_dimension_numbers<[1], [0], [0], [1], [0, 0, 1, 1], [], []>} : vector<8x8xbf16>, vector<8x8xbf16>, vector<8x8xf32> -> vector<8x8xf32>
    %c0_60 = arith.constant 0 : index
    %c0_61 = arith.constant 0 : index
    %179 = vector.load %arg9[%c0_60, %c0_61] : memref<32x32xbf16, #tpu.memory_space<vmem>>, vector<8x32xbf16>
    %180 = arith.truncf %178 : vector<8x8xf32> to vector<8x8xbf16>
    %cst_62 = arith.constant dense<0.000000e+00> : vector<8x32xf32>
    %181 = tpu.matmul %180, %179, %cst_62 {dimension_numbers = #tpu.dot_dimension_numbers<[1], [0], [0], [1], [0, 0, 1, 1], [], []>} : vector<8x8xbf16>, vector<8x32xbf16>, vector<8x32xf32> -> vector<8x32xf32>
    %182 = arith.addf %156, %181 : vector<8x32xf32>
    %183 = vector.extract_strided_slice %153 {offsets = [0, 8], sizes = [8, 8], strides = [1, 1]} : vector<8x32xf32> to vector<8x8xf32>
    %184 = arith.truncf %183 : vector<8x8xf32> to vector<8x8xbf16>
    %185 = vector.extract_strided_slice %154 {offsets = [0, 8], sizes = [8, 8], strides = [1, 1]} : vector<8x32xf32> to vector<8x8xf32>
    %186 = arith.truncf %185 : vector<8x8xf32> to vector<8x8xbf16>
    %187 = vector.extract_strided_slice %155 {offsets = [0, 8], sizes = [8, 8], strides = [1, 1]} : vector<8x32xf32> to vector<8x8xf32>
    %188 = arith.truncf %187 : vector<8x8xf32> to vector<8x8xbf16>
    %189 = tpu.transpose %186, [1, 0] : vector<8x8xbf16> -> vector<8x8xbf16>
    %cst_63 = arith.constant dense<0.000000e+00> : vector<8x8xf32>
    %190 = tpu.matmul %184, %189, %cst_63 {dimension_numbers = #tpu.dot_dimension_numbers<[1], [0], [0], [1], [0, 0, 1, 1], [], []>} : vector<8x8xbf16>, vector<8x8xbf16>, vector<8x8xf32> -> vector<8x8xf32>
    %cst_64 = arith.constant 0.353553385 : f32
    %191 = vector.broadcast %cst_64 : f32 to vector<8x8xf32>
    %192 = arith.mulf %190, %191 : vector<8x8xf32>
    %cst_65 = arith.constant dense<0xFF800000> : vector<8xf32>
    %193 = vector.multi_reduction <maximumf>, %192, %cst_65 [1] : vector<8x8xf32> to vector<8xf32>
    %194 = vector.shape_cast %193 : vector<8xf32> to vector<8x1xf32>
    %195 = vector.broadcast %194 : vector<8x1xf32> to vector<8x8xf32>
    %196 = arith.subf %192, %195 : vector<8x8xf32>
    %197 = math.exp %196 : vector<8x8xf32>
    %cst_66 = arith.constant dense<0.000000e+00> : vector<8xf32>
    %198 = vector.multi_reduction <add>, %197, %cst_66 [1] : vector<8x8xf32> to vector<8xf32>
    %199 = vector.shape_cast %198 : vector<8xf32> to vector<8x1xf32>
    %200 = tpu.reciprocal %199 {approx = true} : vector<8x1xf32> -> vector<8x1xf32>
    %201 = vector.broadcast %200 : vector<8x1xf32> to vector<8x8xf32>
    %202 = arith.mulf %197, %201 : vector<8x8xf32>
    %203 = arith.truncf %202 : vector<8x8xf32> to vector<8x8xbf16>
    %cst_67 = arith.constant dense<0.000000e+00> : vector<8x8xf32>
    %204 = tpu.matmul %203, %188, %cst_67 {dimension_numbers = #tpu.dot_dimension_numbers<[1], [0], [0], [1], [0, 0, 1, 1], [], []>} : vector<8x8xbf16>, vector<8x8xbf16>, vector<8x8xf32> -> vector<8x8xf32>
    %c8_68 = arith.constant 8 : index
    %c0_69 = arith.constant 0 : index
    %205 = vector.load %arg9[%c8_68, %c0_69] : memref<32x32xbf16, #tpu.memory_space<vmem>>, vector<8x32xbf16>
    %206 = arith.truncf %204 : vector<8x8xf32> to vector<8x8xbf16>
    %cst_70 = arith.constant dense<0.000000e+00> : vector<8x32xf32>
    %207 = tpu.matmul %206, %205, %cst_70 {dimension_numbers = #tpu.dot_dimension_numbers<[1], [0], [0], [1], [0, 0, 1, 1], [], []>} : vector<8x8xbf16>, vector<8x32xbf16>, vector<8x32xf32> -> vector<8x32xf32>
    %208 = arith.addf %182, %207 : vector<8x32xf32>
    %209 = vector.extract_strided_slice %153 {offsets = [0, 16], sizes = [8, 8], strides = [1, 1]} : vector<8x32xf32> to vector<8x8xf32>
    %210 = arith.truncf %209 : vector<8x8xf32> to vector<8x8xbf16>
    %211 = vector.extract_strided_slice %154 {offsets = [0, 16], sizes = [8, 8], strides = [1, 1]} : vector<8x32xf32> to vector<8x8xf32>
    %212 = arith.truncf %211 : vector<8x8xf32> to vector<8x8xbf16>
    %213 = vector.extract_strided_slice %155 {offsets = [0, 16], sizes = [8, 8], strides = [1, 1]} : vector<8x32xf32> to vector<8x8xf32>
    %214 = arith.truncf %213 : vector<8x8xf32> to vector<8x8xbf16>
    %215 = tpu.transpose %212, [1, 0] : vector<8x8xbf16> -> vector<8x8xbf16>
    %cst_71 = arith.constant dense<0.000000e+00> : vector<8x8xf32>
    %216 = tpu.matmul %210, %215, %cst_71 {dimension_numbers = #tpu.dot_dimension_numbers<[1], [0], [0], [1], [0, 0, 1, 1], [], []>} : vector<8x8xbf16>, vector<8x8xbf16>, vector<8x8xf32> -> vector<8x8xf32>
    %cst_72 = arith.constant 0.353553385 : f32
    %217 = vector.broadcast %cst_72 : f32 to vector<8x8xf32>
    %218 = arith.mulf %216, %217 : vector<8x8xf32>
    %cst_73 = arith.constant dense<0xFF800000> : vector<8xf32>
    %219 = vector.multi_reduction <maximumf>, %218, %cst_73 [1] : vector<8x8xf32> to vector<8xf32>
    %220 = vector.shape_cast %219 : vector<8xf32> to vector<8x1xf32>
    %221 = vector.broadcast %220 : vector<8x1xf32> to vector<8x8xf32>
    %222 = arith.subf %218, %221 : vector<8x8xf32>
    %223 = math.exp %222 : vector<8x8xf32>
    %cst_74 = arith.constant dense<0.000000e+00> : vector<8xf32>
    %224 = vector.multi_reduction <add>, %223, %cst_74 [1] : vector<8x8xf32> to vector<8xf32>
    %225 = vector.shape_cast %224 : vector<8xf32> to vector<8x1xf32>
    %226 = tpu.reciprocal %225 {approx = true} : vector<8x1xf32> -> vector<8x1xf32>
    %227 = vector.broadcast %226 : vector<8x1xf32> to vector<8x8xf32>
    %228 = arith.mulf %223, %227 : vector<8x8xf32>
    %229 = arith.truncf %228 : vector<8x8xf32> to vector<8x8xbf16>
    %cst_75 = arith.constant dense<0.000000e+00> : vector<8x8xf32>
    %230 = tpu.matmul %229, %214, %cst_75 {dimension_numbers = #tpu.dot_dimension_numbers<[1], [0], [0], [1], [0, 0, 1, 1], [], []>} : vector<8x8xbf16>, vector<8x8xbf16>, vector<8x8xf32> -> vector<8x8xf32>
    %c16_76 = arith.constant 16 : index
    %c0_77 = arith.constant 0 : index
    %231 = vector.load %arg9[%c16_76, %c0_77] : memref<32x32xbf16, #tpu.memory_space<vmem>>, vector<8x32xbf16>
    %232 = arith.truncf %230 : vector<8x8xf32> to vector<8x8xbf16>
    %cst_78 = arith.constant dense<0.000000e+00> : vector<8x32xf32>
    %233 = tpu.matmul %232, %231, %cst_78 {dimension_numbers = #tpu.dot_dimension_numbers<[1], [0], [0], [1], [0, 0, 1, 1], [], []>} : vector<8x8xbf16>, vector<8x32xbf16>, vector<8x32xf32> -> vector<8x32xf32>
    %234 = arith.addf %208, %233 : vector<8x32xf32>
    %235 = vector.extract_strided_slice %153 {offsets = [0, 24], sizes = [8, 8], strides = [1, 1]} : vector<8x32xf32> to vector<8x8xf32>
    %236 = arith.truncf %235 : vector<8x8xf32> to vector<8x8xbf16>
    %237 = vector.extract_strided_slice %154 {offsets = [0, 24], sizes = [8, 8], strides = [1, 1]} : vector<8x32xf32> to vector<8x8xf32>
    %238 = arith.truncf %237 : vector<8x8xf32> to vector<8x8xbf16>
    %239 = vector.extract_strided_slice %155 {offsets = [0, 24], sizes = [8, 8], strides = [1, 1]} : vector<8x32xf32> to vector<8x8xf32>
    %240 = arith.truncf %239 : vector<8x8xf32> to vector<8x8xbf16>
    %241 = tpu.transpose %238, [1, 0] : vector<8x8xbf16> -> vector<8x8xbf16>
    %cst_79 = arith.constant dense<0.000000e+00> : vector<8x8xf32>
    %242 = tpu.matmul %236, %241, %cst_79 {dimension_numbers = #tpu.dot_dimension_numbers<[1], [0], [0], [1], [0, 0, 1, 1], [], []>} : vector<8x8xbf16>, vector<8x8xbf16>, vector<8x8xf32> -> vector<8x8xf32>
    %cst_80 = arith.constant 0.353553385 : f32
    %243 = vector.broadcast %cst_80 : f32 to vector<8x8xf32>
    %244 = arith.mulf %242, %243 : vector<8x8xf32>
    %cst_81 = arith.constant dense<0xFF800000> : vector<8xf32>
    %245 = vector.multi_reduction <maximumf>, %244, %cst_81 [1] : vector<8x8xf32> to vector<8xf32>
    %246 = vector.shape_cast %245 : vector<8xf32> to vector<8x1xf32>
    %247 = vector.broadcast %246 : vector<8x1xf32> to vector<8x8xf32>
    %248 = arith.subf %244, %247 : vector<8x8xf32>
    %249 = math.exp %248 : vector<8x8xf32>
    %cst_82 = arith.constant dense<0.000000e+00> : vector<8xf32>
    %250 = vector.multi_reduction <add>, %249, %cst_82 [1] : vector<8x8xf32> to vector<8xf32>
    %251 = vector.shape_cast %250 : vector<8xf32> to vector<8x1xf32>
    %252 = tpu.reciprocal %251 {approx = true} : vector<8x1xf32> -> vector<8x1xf32>
    %253 = vector.broadcast %252 : vector<8x1xf32> to vector<8x8xf32>
    %254 = arith.mulf %249, %253 : vector<8x8xf32>
    %255 = arith.truncf %254 : vector<8x8xf32> to vector<8x8xbf16>
    %cst_83 = arith.constant dense<0.000000e+00> : vector<8x8xf32>
    %256 = tpu.matmul %255, %240, %cst_83 {dimension_numbers = #tpu.dot_dimension_numbers<[1], [0], [0], [1], [0, 0, 1, 1], [], []>} : vector<8x8xbf16>, vector<8x8xbf16>, vector<8x8xf32> -> vector<8x8xf32>
    %c24_84 = arith.constant 24 : index
    %c0_85 = arith.constant 0 : index
    %257 = vector.load %arg9[%c24_84, %c0_85] : memref<32x32xbf16, #tpu.memory_space<vmem>>, vector<8x32xbf16>
    %258 = arith.truncf %256 : vector<8x8xf32> to vector<8x8xbf16>
    %cst_86 = arith.constant dense<0.000000e+00> : vector<8x32xf32>
    %259 = tpu.matmul %258, %257, %cst_86 {dimension_numbers = #tpu.dot_dimension_numbers<[1], [0], [0], [1], [0, 0, 1, 1], [], []>} : vector<8x8xbf16>, vector<8x32xbf16>, vector<8x32xf32> -> vector<8x32xf32>
    %260 = arith.addf %234, %259 : vector<8x32xf32>
    %c4 = arith.constant 4 : index
    %c0_87 = arith.constant 0 : index
    %261 = vector.load %arg4[%c4, %c0_87] : memref<24x128xf32, #tpu.memory_space<vmem>>, vector<1x32xf32>
    %262 = vector.broadcast %261 : vector<1x32xf32> to vector<8x32xf32>
    %263 = arith.addf %260, %262 : vector<8x32xf32>
    %264 = arith.addf %146, %263 : vector<8x32xf32>
    %cst_88 = arith.constant dense<0.000000e+00> : vector<8xf32>
    %265 = vector.multi_reduction <add>, %264, %cst_88 [1] : vector<8x32xf32> to vector<8xf32>
    %266 = vector.shape_cast %265 : vector<8xf32> to vector<8x1xf32>
    %cst_89 = arith.constant 3.200000e+01 : f32
    %267 = vector.broadcast %cst_89 : f32 to vector<8x1xf32>
    %268 = arith.divf %266, %267 : vector<8x1xf32>
    %269 = vector.broadcast %268 : vector<8x1xf32> to vector<8x32xf32>
    %270 = arith.subf %264, %269 : vector<8x32xf32>
    %271 = arith.mulf %270, %270 : vector<8x32xf32>
    %cst_90 = arith.constant dense<0.000000e+00> : vector<8xf32>
    %272 = vector.multi_reduction <add>, %271, %cst_90 [1] : vector<8x32xf32> to vector<8xf32>
    %273 = vector.shape_cast %272 : vector<8xf32> to vector<8x1xf32>
    %cst_91 = arith.constant 3.200000e+01 : f32
    %274 = vector.broadcast %cst_91 : f32 to vector<8x1xf32>
    %275 = arith.divf %273, %274 : vector<8x1xf32>
    %cst_92 = arith.constant 9.99999974E-6 : f32
    %276 = vector.broadcast %cst_92 : f32 to vector<8x1xf32>
    %277 = arith.addf %275, %276 : vector<8x1xf32>
    %278 = math.rsqrt %277 : vector<8x1xf32>
    %279 = vector.broadcast %278 : vector<8x1xf32> to vector<8x32xf32>
    %280 = arith.mulf %270, %279 : vector<8x32xf32>
    %c13 = arith.constant 13 : index
    %c0_93 = arith.constant 0 : index
    %281 = vector.load %arg4[%c13, %c0_93] : memref<24x128xf32, #tpu.memory_space<vmem>>, vector<1x32xf32>
    %282 = vector.broadcast %281 : vector<1x32xf32> to vector<8x32xf32>
    %283 = arith.mulf %280, %282 : vector<8x32xf32>
    %c14 = arith.constant 14 : index
    %c0_94 = arith.constant 0 : index
    %284 = vector.load %arg4[%c14, %c0_94] : memref<24x128xf32, #tpu.memory_space<vmem>>, vector<1x32xf32>
    %285 = vector.broadcast %284 : vector<1x32xf32> to vector<8x32xf32>
    %286 = arith.addf %283, %285 : vector<8x32xf32>
    %c0_95 = arith.constant 0 : index
    %c0_96 = arith.constant 0 : index
    %287 = vector.load %arg10[%c0_95, %c0_96] : memref<32x64xbf16, #tpu.memory_space<vmem>>, vector<32x64xbf16>
    %288 = arith.truncf %286 : vector<8x32xf32> to vector<8x32xbf16>
    %cst_97 = arith.constant dense<0.000000e+00> : vector<8x64xf32>
    %289 = tpu.matmul %288, %287, %cst_97 {dimension_numbers = #tpu.dot_dimension_numbers<[1], [0], [0], [1], [0, 0, 1, 1], [], []>} : vector<8x32xbf16>, vector<32x64xbf16>, vector<8x64xf32> -> vector<8x64xf32>
    %c5 = arith.constant 5 : index
    %c0_98 = arith.constant 0 : index
    %290 = vector.load %arg4[%c5, %c0_98] : memref<24x128xf32, #tpu.memory_space<vmem>>, vector<1x64xf32>
    %291 = vector.broadcast %290 : vector<1x64xf32> to vector<8x64xf32>
    %292 = arith.addf %289, %291 : vector<8x64xf32>
    %cst_99 = arith.constant 0.000000e+00 : f32
    %293 = vector.broadcast %cst_99 : f32 to vector<8x64xf32>
    %294 = arith.maximumf %292, %293 : vector<8x64xf32>
    %c0_100 = arith.constant 0 : index
    %c0_101 = arith.constant 0 : index
    %295 = vector.load %arg11[%c0_100, %c0_101] : memref<64x32xbf16, #tpu.memory_space<vmem>>, vector<64x32xbf16>
    %296 = arith.truncf %294 : vector<8x64xf32> to vector<8x64xbf16>
    %cst_102 = arith.constant dense<0.000000e+00> : vector<8x32xf32>
    %297 = tpu.matmul %296, %295, %cst_102 {dimension_numbers = #tpu.dot_dimension_numbers<[1], [0], [0], [1], [0, 0, 1, 1], [], []>} : vector<8x64xbf16>, vector<64x32xbf16>, vector<8x32xf32> -> vector<8x32xf32>
    %c6 = arith.constant 6 : index
    %c0_103 = arith.constant 0 : index
    %298 = vector.load %arg4[%c6, %c0_103] : memref<24x128xf32, #tpu.memory_space<vmem>>, vector<1x32xf32>
    %299 = vector.broadcast %298 : vector<1x32xf32> to vector<8x32xf32>
    %300 = arith.addf %297, %299 : vector<8x32xf32>
    %301 = arith.addf %286, %300 : vector<8x32xf32>
    %cst_104 = arith.constant dense<0.000000e+00> : vector<8xf32>
    %302 = vector.multi_reduction <add>, %301, %cst_104 [1] : vector<8x32xf32> to vector<8xf32>
    %303 = vector.shape_cast %302 : vector<8xf32> to vector<8x1xf32>
    %cst_105 = arith.constant 3.200000e+01 : f32
    %304 = vector.broadcast %cst_105 : f32 to vector<8x1xf32>
    %305 = arith.divf %303, %304 : vector<8x1xf32>
    %306 = vector.broadcast %305 : vector<8x1xf32> to vector<8x32xf32>
    %307 = arith.subf %301, %306 : vector<8x32xf32>
    %308 = arith.mulf %307, %307 : vector<8x32xf32>
    %cst_106 = arith.constant dense<0.000000e+00> : vector<8xf32>
    %309 = vector.multi_reduction <add>, %308, %cst_106 [1] : vector<8x32xf32> to vector<8xf32>
    %310 = vector.shape_cast %309 : vector<8xf32> to vector<8x1xf32>
    %cst_107 = arith.constant 3.200000e+01 : f32
    %311 = vector.broadcast %cst_107 : f32 to vector<8x1xf32>
    %312 = arith.divf %310, %311 : vector<8x1xf32>
    %cst_108 = arith.constant 9.99999974E-6 : f32
    %313 = vector.broadcast %cst_108 : f32 to vector<8x1xf32>
    %314 = arith.addf %312, %313 : vector<8x1xf32>
    %315 = math.rsqrt %314 : vector<8x1xf32>
    %316 = vector.broadcast %315 : vector<8x1xf32> to vector<8x32xf32>
    %317 = arith.mulf %307, %316 : vector<8x32xf32>
    %c15 = arith.constant 15 : index
    %c0_109 = arith.constant 0 : index
    %318 = vector.load %arg4[%c15, %c0_109] : memref<24x128xf32, #tpu.memory_space<vmem>>, vector<1x32xf32>
    %319 = vector.broadcast %318 : vector<1x32xf32> to vector<8x32xf32>
    %320 = arith.mulf %317, %319 : vector<8x32xf32>
    %c16_110 = arith.constant 16 : index
    %c0_111 = arith.constant 0 : index
    %321 = vector.load %arg4[%c16_110, %c0_111] : memref<24x128xf32, #tpu.memory_space<vmem>>, vector<1x32xf32>
    %322 = vector.broadcast %321 : vector<1x32xf32> to vector<8x32xf32>
    %323 = arith.addf %320, %322 : vector<8x32xf32>
    %c0_112 = arith.constant 0 : index
    %c0_113 = arith.constant 0 : index
    %324 = vector.load %arg12[%c0_112, %c0_113] : memref<32x6xbf16, #tpu.memory_space<vmem>>, vector<32x6xbf16>
    %325 = arith.truncf %323 : vector<8x32xf32> to vector<8x32xbf16>
    %cst_114 = arith.constant dense<0.000000e+00> : vector<8x6xf32>
    %326 = tpu.matmul %325, %324, %cst_114 {dimension_numbers = #tpu.dot_dimension_numbers<[1], [0], [0], [1], [0, 0, 1, 1], [], []>} : vector<8x32xbf16>, vector<32x6xbf16>, vector<8x6xf32> -> vector<8x6xf32>
    %c7 = arith.constant 7 : index
    %c0_115 = arith.constant 0 : index
    %327 = vector.load %arg4[%c7, %c0_115] : memref<24x128xf32, #tpu.memory_space<vmem>>, vector<1x6xf32>
    %328 = vector.broadcast %327 : vector<1x6xf32> to vector<8x6xf32>
    %329 = arith.addf %326, %328 : vector<8x6xf32>
    %c0_116 = arith.constant 0 : index
    %c0_117 = arith.constant 0 : index
    %c0_118 = arith.constant 0 : index
    %330 = vector.load %arg16[%c0_116, %c0_117, %c0_118] : memref<1x8x6xf32, #tpu.memory_space<vmem>>, vector<1x8x6xf32>
    %331 = vector.shape_cast %330 : vector<1x8x6xf32> to vector<8x6xf32>
    %332 = vector.shape_cast %329 : vector<8x6xf32> to vector<1x8x6xf32>
    tpu.vector_store %arg16[%c0_116, %c0_117, %c0_118], %332 {strides = array<i32>} : memref<1x8x6xf32, #tpu.memory_space<vmem>>, vector<1x8x6xf32>,
    %c0_119 = arith.constant 0 : index
    %c0_120 = arith.constant 0 : index
    %333 = vector.load %arg13[%c0_119, %c0_120] : memref<32x32xbf16, #tpu.memory_space<vmem>>, vector<32x32xbf16>
    %334 = arith.truncf %323 : vector<8x32xf32> to vector<8x32xbf16>
    %cst_121 = arith.constant dense<0.000000e+00> : vector<8x32xf32>
    %335 = tpu.matmul %334, %333, %cst_121 {dimension_numbers = #tpu.dot_dimension_numbers<[1], [0], [0], [1], [0, 0, 1, 1], [], []>} : vector<8x32xbf16>, vector<32x32xbf16>, vector<8x32xf32> -> vector<8x32xf32>
    %c8_122 = arith.constant 8 : index
    %c0_123 = arith.constant 0 : index
    %336 = vector.load %arg4[%c8_122, %c0_123] : memref<24x128xf32, #tpu.memory_space<vmem>>, vector<1x32xf32>
    %337 = vector.broadcast %336 : vector<1x32xf32> to vector<8x32xf32>
    %338 = arith.addf %335, %337 : vector<8x32xf32>
    %cst_124 = arith.constant 0.000000e+00 : f32
    %339 = vector.broadcast %cst_124 : f32 to vector<8x32xf32>
    %340 = arith.maximumf %338, %339 : vector<8x32xf32>
    %c0_125 = arith.constant 0 : index
    %c0_126 = arith.constant 0 : index
    %341 = vector.load %arg14[%c0_125, %c0_126] : memref<32x32xbf16, #tpu.memory_space<vmem>>, vector<32x32xbf16>
    %342 = arith.truncf %340 : vector<8x32xf32> to vector<8x32xbf16>
    %cst_127 = arith.constant dense<0.000000e+00> : vector<8x32xf32>
    %343 = tpu.matmul %342, %341, %cst_127 {dimension_numbers = #tpu.dot_dimension_numbers<[1], [0], [0], [1], [0, 0, 1, 1], [], []>} : vector<8x32xbf16>, vector<32x32xbf16>, vector<8x32xf32> -> vector<8x32xf32>
    %c9 = arith.constant 9 : index
    %c0_128 = arith.constant 0 : index
    %344 = vector.load %arg4[%c9, %c0_128] : memref<24x128xf32, #tpu.memory_space<vmem>>, vector<1x32xf32>
    %345 = vector.broadcast %344 : vector<1x32xf32> to vector<8x32xf32>
    %346 = arith.addf %343, %345 : vector<8x32xf32>
    %cst_129 = arith.constant 0.000000e+00 : f32
    %347 = vector.broadcast %cst_129 : f32 to vector<8x32xf32>
    %348 = arith.maximumf %346, %347 : vector<8x32xf32>
    %c0_130 = arith.constant 0 : index
    %c0_131 = arith.constant 0 : index
    %349 = vector.load %arg15[%c0_130, %c0_131] : memref<32x16xbf16, #tpu.memory_space<vmem>>, vector<32x16xbf16>
    %350 = arith.truncf %348 : vector<8x32xf32> to vector<8x32xbf16>
    %cst_132 = arith.constant dense<0.000000e+00> : vector<8x16xf32>
    %351 = tpu.matmul %350, %349, %cst_132 {dimension_numbers = #tpu.dot_dimension_numbers<[1], [0], [0], [1], [0, 0, 1, 1], [], []>} : vector<8x32xbf16>, vector<32x16xbf16>, vector<8x16xf32> -> vector<8x16xf32>
    %c10 = arith.constant 10 : index
    %c0_133 = arith.constant 0 : index
    %352 = vector.load %arg4[%c10, %c0_133] : memref<24x128xf32, #tpu.memory_space<vmem>>, vector<1x16xf32>
    %353 = vector.broadcast %352 : vector<1x16xf32> to vector<8x16xf32>
    %354 = arith.addf %351, %353 : vector<8x16xf32>
    %355 = arith.truncf %354 : vector<8x16xf32> to vector<8x16xbf16>
    %c0_134 = arith.constant 0 : index
    %c0_135 = arith.constant 0 : index
    %c0_136 = arith.constant 0 : index
    %356 = vector.load %arg3[%c0_134, %c0_135, %c0_136] : memref<1x256x16xbf16, #tpu.memory_space<vmem>>, vector<1x256x16xbf16>
    %357 = vector.shape_cast %356 : vector<1x256x16xbf16> to vector<256x16xbf16>
    %cst_137 = arith.constant dense<0.000000e+00> : vector<8x256xf32>
    %358 = tpu.matmul %355, %357, %cst_137 {dimension_numbers = #tpu.dot_dimension_numbers<[1], [1], [0], [0], [0, 0, 1, 0], [], []>} : vector<8x16xbf16>, vector<256x16xbf16>, vector<8x256xf32> -> vector<8x256xf32>
    %c0_138 = arith.constant 0 : index
    %c0_139 = arith.constant 0 : index
    %c0_140 = arith.constant 0 : index
    %359 = vector.load %arg17[%c0_138, %c0_139, %c0_140] : memref<1x8x256xf32, #tpu.memory_space<vmem>>, vector<1x8x256xf32>
    %360 = vector.shape_cast %359 : vector<1x8x256xf32> to vector<8x256xf32>
    %361 = vector.shape_cast %358 : vector<8x256xf32> to vector<1x8x256xf32>
    tpu.vector_store %arg17[%c0_138, %c0_139, %c0_140], %361 {strides = array<i32>} : memref<1x8x256xf32, #tpu.memory_space<vmem>>, vector<1x8x256xf32>,
    return
  }
  func.func @transform_0(%arg0: i32) -> (i32, i32) {
    %c0_i32 = arith.constant 0 : i32
    %c0_i32_0 = arith.constant 0 : i32
    %c0_i32_1 = arith.constant 0 : i32
    return %c0_i32, %c0_i32_0 : i32, i32
  }
  func.func @transform_1(%arg0: i32) -> (i32, i32, i32) {
    %c0_i32 = arith.constant 0 : i32
    %c0_i32_0 = arith.constant 0 : i32
    %c0_i32_1 = arith.constant 0 : i32
    return %arg0, %c0_i32, %c0_i32_0 : i32, i32, i32
  }
  func.func @transform_2(%arg0: i32) -> (i32, i32, i32) {
    %c0_i32 = arith.constant 0 : i32
    %c0_i32_0 = arith.constant 0 : i32
    %c0_i32_1 = arith.constant 0 : i32
    return %arg0, %c0_i32, %c0_i32_0 : i32, i32, i32
  }
  func.func @transform_3(%arg0: i32) -> (i32, i32) {
    %c0_i32 = arith.constant 0 : i32
    %c0_i32_0 = arith.constant 0 : i32
    %c0_i32_1 = arith.constant 0 : i32
    return %c0_i32, %c0_i32_0 : i32, i32
  }
  func.func @transform_4(%arg0: i32) -> (i32, i32) {
    %c0_i32 = arith.constant 0 : i32
    %c0_i32_0 = arith.constant 0 : i32
    %c0_i32_1 = arith.constant 0 : i32
    return %c0_i32, %c0_i32_0 : i32, i32
  }
  func.func @transform_5(%arg0: i32) -> (i32, i32) {
    %c0_i32 = arith.constant 0 : i32
    %c0_i32_0 = arith.constant 0 : i32
    %c0_i32_1 = arith.constant 0 : i32
    return %c0_i32, %c0_i32_0 : i32, i32
  }
  func.func @transform_6(%arg0: i32) -> (i32, i32) {
    %c0_i32 = arith.constant 0 : i32
    %c0_i32_0 = arith.constant 0 : i32
    %c0_i32_1 = arith.constant 0 : i32
    return %c0_i32, %c0_i32_0 : i32, i32
  }
  func.func @transform_7(%arg0: i32) -> (i32, i32) {
    %c0_i32 = arith.constant 0 : i32
    %c0_i32_0 = arith.constant 0 : i32
    %c0_i32_1 = arith.constant 0 : i32
    return %c0_i32, %c0_i32_0 : i32, i32
  }
  func.func @transform_8(%arg0: i32) -> (i32, i32) {
    %c0_i32 = arith.constant 0 : i32
    %c0_i32_0 = arith.constant 0 : i32
    %c0_i32_1 = arith.constant 0 : i32
    return %c0_i32, %c0_i32_0 : i32, i32
  }
  func.func @transform_9(%arg0: i32) -> (i32, i32) {
    %c0_i32 = arith.constant 0 : i32
    %c0_i32_0 = arith.constant 0 : i32
    %c0_i32_1 = arith.constant 0 : i32
    return %c0_i32, %c0_i32_0 : i32, i32
  }
  func.func @transform_10(%arg0: i32) -> (i32, i32) {
    %c0_i32 = arith.constant 0 : i32
    %c0_i32_0 = arith.constant 0 : i32
    %c0_i32_1 = arith.constant 0 : i32
    return %c0_i32, %c0_i32_0 : i32, i32
  }
  func.func @transform_11(%arg0: i32) -> (i32, i32) {
    %c0_i32 = arith.constant 0 : i32
    %c0_i32_0 = arith.constant 0 : i32
    %c0_i32_1 = arith.constant 0 : i32
    return %c0_i32, %c0_i32_0 : i32, i32
  }
  func.func @transform_12(%arg0: i32) -> (i32, i32) {
    %c0_i32 = arith.constant 0 : i32
    %c0_i32_0 = arith.constant 0 : i32
    %c0_i32_1 = arith.constant 0 : i32
    return %c0_i32, %c0_i32_0 : i32, i32
  }
  func.func @transform_13(%arg0: i32) -> (i32, i32) {
    %c0_i32 = arith.constant 0 : i32
    %c0_i32_0 = arith.constant 0 : i32
    %c0_i32_1 = arith.constant 0 : i32
    return %c0_i32, %c0_i32_0 : i32, i32
  }
  func.func @transform_14(%arg0: i32) -> (i32, i32) {
    %c0_i32 = arith.constant 0 : i32
    %c0_i32_0 = arith.constant 0 : i32
    %c0_i32_1 = arith.constant 0 : i32
    return %c0_i32, %c0_i32_0 : i32, i32
  }
  func.func @transform_15(%arg0: i32) -> (i32, i32, i32) {
    %c0_i32 = arith.constant 0 : i32
    %c0_i32_0 = arith.constant 0 : i32
    %c0_i32_1 = arith.constant 0 : i32
    return %arg0, %c0_i32, %c0_i32_0 : i32, i32, i32
  }
  func.func @transform_16(%arg0: i32) -> (i32, i32, i32) {
    %c0_i32 = arith.constant 0 : i32
    %c0_i32_0 = arith.constant 0 : i32
    %c0_i32_1 = arith.constant 0 : i32
    return %arg0, %c0_i32, %c0_i32_0 : i32, i32, i32
  }
}

</mosaic_0001>

<bundles_post_ra>
// kernel: extended_mask2former_forward.9
= control target key start
LH: loop header
LB: loop body
LE: loop exit
PB: predicated region body
PF: predicated region fallthrough
CT: control target
= control target key end

     0   :  { %s2443_s12 = smov 0   ;;  %s2936_s0 = inlined_call_operand.vmem [shape: bf16[2,4,96,32], index: 0, kind: input, shape index: {}]   ;;  %s2937_s1 = inlined_call_operand.vmem [shape: bf16[9,32,32], index: 1, kind: input, shape index: {}]   ;;  %s2938_s2 = inlined_call_operand.vmem [shape: f32[1,32], index: 2, kind: input, shape index: {}]   ;;  %s2939_s3 = inlined_call_operand.vmem [shape: bf16[2,8,8,32], index: 3, kind: output, shape index: {}]  }
   0x1 LB: > { %s1838_s13 = sadd.s32 4294967295, %s2419_s12   ;;  %p1842_p0 = scmp.ge.s32.totalorder %s2419_s12, 1  ;;  %s2419_s12 = sphi %s2443_s12, %s13_s12  }
   0x2   : > { %p137_p1 = scmp.lt.s32.totalorder %s2419_s12, 3 }
   0x4   : > { %p138_p2 = pnand %p1842_p0, %p137_p1 }
   0x5   : > { %p161_p3 = scmp.lt.s32.totalorder (!%p138_p2), %s1838_s13, 1 }
   0x6   : > { %141 = sbr.rel (%p138_p2) target bundleno = 405 (0x195), region = 32 }
   0xb   : > { %v2354_v0 = vld [vmem:[%s2937_s1 + $0x18] sm:$0xff]   ;;  %v2421_v1 = vmov 0.0   ;;  %v2355_v2 = vld [vmem:[%s2937_s1 + $0x10] sm:$0xff]   ;;  %vm2422_vm0 = vmmov 0   ;;  %s2945_s13 = smov (!%p161_p3, %s1838_s13), 1  ;;  %vm235_vm1 = vcmask 261120  }
   0xc   : > { %2123 = vmatprep.subr.bf16.mxu0 %v2421_v1  ;;  %2339 = vmatprep.subr.bf16.mxu1 %v2421_v1  ;;  %s2343_s18 = smul.u32 192, %s2945_s13  ;;  %v2358_v3 = vld [vmem:[%s2937_s1 + $0x28] sm:$0xff]   ;;  %v2363_v7 = vld [vmem:[%s2937_s1 + $0x20] sm:$0xff]   ;;  %v2366_v19 = vld [vmem:[%s2937_s1 + $0x38] sm:$0xff]   ;;  %vm485_vm2 = vsmask.f32 7424 }
   0xd   : > { %2124 = vmatpush3.bf16.msra.mxu0 %v2354_v0  ;;  %2341 = vmatpush3.bf16.msra.mxu1 %v2354_v0  ;;  %v2359_v4 = vld [vmem:[%s2937_s1 + $0x8] sm:$0xff]   ;;  %v2362_v8 = vld [vmem:[%s2937_s1] sm:$0xff]   ;;  %v2375_v23 = vld [vmem:[%s2937_s1 + $0x30] sm:$0xff]   ;;  %vm1495_vm3 = vcmask 1046528   ;;  %s2051_s4 = sshll.u32 %s2945_s13, 5  ;;  %vm1643_vm4 = vcmask 257024  }
   0xe   : > { %2125 = vmatprep.subr.bf16.mxu0 %v2421_v1  ;;  %2340 = vmatprep.subr.bf16.mxu1 %v2421_v1  ;;  %s2476_s23 = scalar_lea.vmem %s2936_s0, %s2343_s18  ;;  %v2370_v24 = vld [vmem:[%s2937_s1 + $0x48] sm:$0xff]   ;;  %v2376_v31 = vld [vmem:[%s2937_s1 + $0x40] sm:$0xff]   ;;  %s2871_s7 = scalar_lea.vmem %s2939_s3, %s2051_s4  ;;  %vm1651_vm5 = vsmask.f32 3328  ;;  %vm1652_vm6 = vsmask.f32 7440 }
   0xf   : > { %2127 = vmatprep.mubr.msk.bf16.mxu0 %vm2422_vm0, %v2421_v1  ;;  %2139 = vmatprep.mubr.msk.bf16.mxu1 %vm2422_vm0, %v2421_v1  ;;  %v2356_v5 = vld [vmem:[%s2476_s23 + $0x30] sm:$0xff]   ;;  %v2357_v6 = vld [vmem:[%s2476_s23 + $0x48] sm:$0xff]   ;;  %v2360_v9 = vld [vmem:[%s2476_s23 + $0x38] sm:$0xff]   ;;  %vm1673_vm7 = vcmask 1042432   ;;  %vm1674_vm8 = vcmask 1046532   ;;  %vm1712_vm13 = vcmask 1041408  }
  0x10   : > { %v2361_v10 = vld [vmem:[%s2476_s23 + $0x50] ss:$0 sps:$4 sm:$0xff]   ;;  %v2368_v11 = vld [vmem:[%s2476_s23] sm:$0xff]   ;;  %v2369_v12 = vld [vmem:[%s2476_s23 + $0x8] sm:$0xff]   ;;  %vm1686_vm11 = vsmask.f32 2304 }
  0x11   : > { %2126 = vmatpush3.bf16.msra.mxu0 %v2355_v2  ;;  %2342 = vmatpush3.bf16.msra.mxu1 %v2355_v2  ;;  %v489_v13 = vshll.u32 %v2368_v11, 16  ;;  %v2364_v14 = vld [vmem:[%s2476_s23 + $0x40] sm:$0xff]   ;;  %v494_v16 = vshll.u32 %v2369_v12, 16  ;;  %v487_v17 = vshrl.u32 %v2368_v11, 16  ;;  %v2372_v21 = vld [vmem:[%s2476_s23 + $0x10] sm:$0xff]   ;;  %v2367_v26 = vld [vmem:[%s2476_s23 + $0x8] sm:$0xff]  }
  0x12   : > { %2171 = vmatprep.subr.bf16.mxu0 %v2421_v1  ;;  %2147 = vmatprep.subr.bf16.mxu1 %v2421_v1  ;;  %v2365_v15 = vld [vmem:[%s2476_s23] sm:$0xff]   ;;  %v502_v25 = vshll.u32 %v2372_v21, 16  ;;  %v498_v28 = vshrl.u32 %v2369_v12, 16  ;;  %v2374_v29 = vld [vmem:[%s2476_s23 + $0x18] sm:$0xff]   ;;  %v2371_v35 = vld [vmem:[%s2476_s23 + $0x10] sm:$0xff]   ;;  %v506_v36 = vshrl.u32 %v2372_v21, 16 }
  0x13   : > { %v491_v18 = vrot.slane %v489_v13, 1  ;;  %v496_v20 = vrot.slane %v494_v16, 1  ;;  %v2538_v33 = vld [vmem:[%s2476_s23 + $0x20] sm:$0x1f]   ;;  %v510_v34 = vshll.u32 %v2374_v29, 16  ;;  %v2394_v40 = vld [vmem:[%s2476_s23 + $0x68] sm:$0xff]   ;;  %vm2887_vm9 = vmor %vm1651_vm5, %vm1652_vm6 }
  0x14   : > { %2128 = vmatmul.mubr.msk.bf16.vlgmr.msra.gmra.mxu0 %vm235_vm1, %v2356_v5  ;;  %2140 = vmatmul.mubr.msk.bf16.vlgmr.msra.gmra.mxu1 %vm235_vm1, %v2357_v6  ;;  %v504_v30 = vrot.slane %v502_v25, 1  ;;  %v518_v38 = vshll.u32 %v2538_v33, 16  ;;  %v2393_v39 = vld [vmem:[%s2476_s23 + $0x60] sm:$0xff]   ;;  %v514_v42 = vshrl.u32 %v2374_v29, 16  ;;  %v973_v45 = vshll.u32 %v2394_v40, 16  ;;  %v2396_v46 = vld [vmem:[%s2476_s23 + $0x70] sm:$0xff]   ;;  %vm1675_vm10 = vmor %vm1673_vm7, %vm1674_vm8 }
  0x15   : > { %2172 = vmatpush3.bf16.msra.mxu0 %v2358_v3  ;;  %2131 = vmatprep.mubr.msk.bf16.mxu0 %vm2422_vm0, %v2421_v1  ;;  %v492_v22 = vor.u32 %v491_v18, %v487_v17  ;;  %v500_v32 = vor.u32 %v498_v28, %v496_v20  ;;  %v512_v41 = vrot.slane %v510_v34, 1  ;;  %v966_v43 = vshrl.u32 %v2393_v39, 16  ;;  %v1112_v49 = vld [vmem:[%s2476_s23 + $0x4] sm:$0xf]  ;;  %v2555_v50 = vld [vmem:[%s2476_s23 + $0xc] sm:$0xff]   ;;  %v2400_v58 = vld [vmem:[%s2476_s23 + $0x78] sm:$0xff]  }
  0x16   : > { %2143 = vmatprep.mubr.msk.bf16.mxu1 %vm2422_vm0, %v2421_v1  ;;  %2148 = vmatpush3.bf16.msra.mxu1 %v2359_v4  ;;  %v968_v44 = vshll.u32 %v2393_v39, 16  ;;  %v508_v47 = vor.u32 %v506_v36, %v504_v30  ;;  %v977_v48 = vshrl.u32 %v2394_v40, 16  ;;  %v2560_v51 = vrot.slane %v518_v38, 1  ;;  %v2563_v55 = vld [vmem:[%s2476_s23 + $0x8] sm:$0xf]  ;;  %v2373_v59 = vld [vmem:[%s2476_s23 + $0x18] sm:$0xff]  }
  0x17   : > { %2173 = vmatprep.subr.bf16.mxu0 %v2421_v1  ;;  %2149 = vmatprep.subr.bf16.mxu1 %v2421_v1  ;;  %v497_v27 = vsel %vm485_vm2, %v492_v22, %v496_v20  ;;  %v505_v37 = vsel %vm485_vm2, %v500_v32, %v504_v30  ;;  %v975_v53 = vrot.slane %v973_v45, 1  ;;  %v981_v54 = vshll.u32 %v2396_v46, 16  ;;  %v2579_v11 = vld [vmem:[%s2476_s23 + $0x14] sm:$0xff]   ;;  %v2586_v16 = vld [vmem:[%s2476_s23 + $0x1c] sm:$0xff]   ;;  %v2611_v32 = vld [vmem:[%s2476_s23 + $0x24] sm:$0x1f]  }
  0x18   : > { %v970_v52 = vrot.slane %v968_v44, 1  ;;  %v1979_v56 = vcombine.low %v1112_v49, %v2563_v55  ;;  %v1160_v57 = vshll.u32 %v2555_v50, 16  ;;  %v985_v63 = vshrl.u32 %v2396_v46, 16 }
  0x19   : > { %2174 = vmatpush3.bf16.msra.mxu0 %v2363_v7  ;;  %v979_v61 = vor.u32 %v977_v48, %v975_v53  ;;  %v983_v62 = vrot.slane %v981_v54, 1  ;;  %v989_v4 = vshll.u32 %v2400_v58, 16  ;;  %v513_v5 = vsel %vm485_vm2, %v508_v47, %v512_v41 }
  0x1a   : > { %2219 = vmatprep.subr.bf16.mxu0 %v2421_v1  ;;  %2150 = vmatpush3.bf16.msra.mxu1 %v2362_v8  ;;  %v971_v60 = vor.u32 %v970_v52, %v966_v43  ;;  %v1153_v0 = vshrl.u32 %v1979_v56, 16  ;;  %v1155_v2 = vshll.u32 %v1979_v56, 16  ;;  %v1162_v3 = vrot.slane %v1160_v57, 1  ;;  %v2409_v43 = vld [vmem:[%s2476_s23 + $0x44] sm:$0xff]   ;;  %v2411_v56 = vld [vmem:[%s2476_s23 + $0x4c] sm:$0xff]  }
  0x1b   : > { %2195 = vmatprep.subr.bf16.mxu1 %v2421_v1  ;;  %v2576_v7 = vsel %vm485_vm2, %v979_v61, %v983_v62  ;;  %v987_v8 = vor.u32 %v985_v63, %v983_v62  ;;  %v1164_v12 = vshrl.u32 %v2555_v50, 16  ;;  %v516_v13 = vor.u32 %v514_v42, %v512_v41  ;;  %v2408_v42 = vld [vmem:[%s2476_s23 + $0x3c] sm:$0xff]   ;;  %v2643_v62 = vld [vmem:[%s2476_s23 + $0x54] sm:$0x1f]  }
  0x1c   : > { %2132 = vmatmul.mubr.msk.bf16.gmra.mxu0 %vm235_vm1, %v2360_v9  ;;  %2144 = vmatmul.mubr.msk.bf16.gmra.mxu1 %vm235_vm1, %v2361_v10  ;;  %v2573_v6 = vsel %vm485_vm2, %v971_v60, %v975_v53  ;;  %v1157_v9 = vrot.slane %v1155_v2, 1  ;;  %v991_v10 = vrot.slane %v989_v4, 1  ;;  %v1168_v20 = vshll.u32 %v2579_v11, 16  ;;  %v2380_v4 = vld [vmem:[%s2937_s1 + $0x58] sm:$0xff]  }
  0x1d   : > { %2135 = vmatprep.mubr.msk.bf16.mxu0 %vm2422_vm0, %v2421_v1  ;;  %2151 = vmatprep.mubr.msk.bf16.mxu1 %vm2422_vm0, %v2421_v1  ;;  %v1180_v34 = vshrl.u32 %v2586_v16, 16  ;;  %v521_v36 = vsel %vm485_vm2, %v516_v13, %v2560_v51  ;;  %v522_v38 = vshrl.u32 %v2538_v33, 16  ;;  %v1184_v41 = vshll.u32 %v2611_v32, 16  ;;  %v2388_v13 = vld [vmem:[%s2937_s1 + $0x50] sm:$0xff]  }
  0x1e   : > { %v1158_v17 = vor.u32 %v1157_v9, %v1153_v0  ;;  %v2590_v18 = vsel %vm485_vm2, %v987_v8, %v991_v10  ;;  %v1347_v47 = vshll.u32 %v2408_v42, 16  ;;  %v1351_v48 = vshrl.u32 %v2408_v42, 16  ;;  %v2379_v0 = vld [vmem:[%s2476_s23 + $0x60] sm:$0xff]  }
  0x1f   : > { %v2629_v46 = vrot.slane %v1184_v41, 1  ;;  %v1355_v49 = vshll.u32 %v2409_v43, 16  ;;  %v1363_v61 = vshll.u32 %v2411_v56, 16  ;;  %v1367_v63 = vshrl.u32 %v2411_v56, 16 }
  0x20   : > { %v2602_v25 = vsel %vm485_vm2, %v1158_v17, %v1162_v3  ;;  %v1349_v53 = vrot.slane %v1347_v47, 1  ;;  %v1371_v8 = vshll.u32 %v2643_v62, 16  ;;  %v2382_v17 = vld [vmem:[%s2476_s23 + $0x90] sm:$0xff]   ;;  %v1375_v41 = vshrl.u32 %v2643_v62, 16 }
  0x21   : > { %v1357_v54 = vrot.slane %v1355_v49, 1  ;;  %v1503_v42 = vrot.slane %v2611_v32, 1  ;;  %vm1687_vm12 = vsmask.f32 6416  ;;  %vm1713_vm14 = vcmask 1045508  }
  0x22   : > { %v1353_v60 = vor.u32 %v1351_v48, %v1349_v53  ;;  %vm1725_vm15 = vsmask.f32 1280  ;;  %vm1752_vm5 = vcmask 1044484   ;;  %vm1764_vm8 = vsmask.f32 256 }
  0x24   : > { %2136 = vmatmul.mubr.msk.bf16.gmra.mxu0 %vm235_vm1, %v2364_v14  ;;  %2152 = vmatmul.mubr.msk.bf16.vlgmr.msra.gmra.mxu1 %vm235_vm1, %v2365_v15  ;;  %v2583_v14 = vld [vmem:[%s2476_s23 + $0x80] sm:$0x1f]   ;;  %v993_v15 = vshrl.u32 %v2400_v58, 16  ;;  %v1359_v58 = vshrl.u32 %v2409_v43, 16 }
  0x25   : > { %2175 = vmatprep.mubr.msk.bf16.mxu0 %vm2422_vm0, %v2421_v1  ;;  %2155 = vmatprep.mubr.msk.bf16.mxu1 %vm2422_vm0, %v2421_v1  ;;  %v997_v22 = vshll.u32 %v2583_v14, 16 }
  0x26   : > { %2196 = vmatpush3.bf16.msra.mxu1 %v2366_v19  ;;  %v1166_v19 = vor.u32 %v1164_v12, %v1162_v3  ;;  %v995_v21 = vor.u32 %v993_v15, %v991_v10  ;;  %v1361_v3 = vor.u32 %v1359_v58, %v1357_v54  ;;  %v2660_v12 = vrot.slane %v1371_v8, 1 }
  0x27   : > { %2197 = vmatprep.subr.bf16.mxu1 %v2421_v1  ;;  %v2605_v28 = vrot.slane %v997_v22, 1  ;;  %v2385_v22 = vld [vmem:[%s2476_s23 + $0x98] sm:$0xff]  }
  0x2a   : > { %2198 = vmatpush3.bf16.msra.mxu1 %v2375_v23  ;;  %v1172_v23 = vshrl.u32 %v2579_v11, 16 }
  0x2b   : > { %2243 = vmatprep.subr.bf16.mxu1 %v2421_v1 }
  0x2c   : > { %2176 = vmatmul.mubr.msk.bf16.vlgmr.msra.gmra.mxu0 %vm235_vm1, %v497_v27  ;;  %2156 = vmatmul.mubr.msk.bf16.gmra.mxu1 %vm235_vm1, %v2367_v26  ;;  %v1170_v26 = vrot.slane %v1168_v20, 1  ;;  %v2377_v27 = vld [vmem:[%s2476_s23 + $0x20] ss:$0 sps:$4 sm:$0xff]   ;;  %v2383_v20 = vld [vmem:[%s2937_s1 + $0x68] sm:$0xff]  }
  0x2d   : > { %2220 = vmatpush3.bf16.msra.mxu0 %v2370_v24  ;;  %2159 = vmatprep.mubr.msk.bf16.mxu1 %vm2422_vm0, %v2421_v1  ;;  %v1176_v24 = vshll.u32 %v2586_v16, 16 }
  0x2e   : > { %2179 = vmatprep.mubr.msk.bf16.mxu0 %vm2422_vm0, %v2421_v1  ;;  %2221 = vmatprep.subr.bf16.mxu0 %v2421_v1  ;;  %v2608_v30 = vsel %vm485_vm2, %v1166_v19, %v1170_v26  ;;  %v2381_v19 = vld [vmem:[%s2476_s23 + $0x68] sm:$0xff]  }
  0x2f   : > { %v1178_v29 = vrot.slane %v1176_v24, 1  ;;  %v2387_v24 = vld [vmem:[%s2476_s23 + $0xa0] sm:$0xff]  }
  0x31   : > { %2222 = vmatpush3.bf16.msra.mxu0 %v2376_v31  ;;  %v1174_v31 = vor.u32 %v1172_v23, %v1170_v26  ;;  %v1182_v40 = vor.u32 %v1180_v34, %v1178_v29  ;;  %v2384_v23 = vld [vmem:[%s2476_s23 + $0x70] sm:$0xff]   ;;  %v2386_v26 = vld [vmem:[%s2476_s23 + $0x78] sm:$0xff]  }
  0x32   : > { %2267 = vmatprep.subr.bf16.mxu0 %v2421_v1  ;;  %v2395_v34 = vld [vmem:[%s2937_s1 + $0x78] sm:$0xff]  }
  0x33   : > { %v2623_v39 = vsel %vm485_vm2, %v1174_v31, %v1178_v29  ;;  %v2638_v52 = vsel %vm485_vm2, %v1182_v40, %v2629_v46  ;;  %v2390_v29 = vld [vmem:[%s2476_s23 + $0x80] ss:$0 sps:$4 sm:$0xff]   ;;  %v2392_v31 = vld [vmem:[%s2476_s23 + $0xb0] ss:$0 sps:$4 sm:$0xff]   ;;  %v1501_v40 = vrot.slane %v2586_v16, 1  ;;  %v1377_v16 = vor.u32 %v1375_v41, %v2660_v12 }
  0x34   : > { %2180 = vmatmul.mubr.msk.bf16.gmra.mxu0 %vm235_vm1, %v505_v37  ;;  %2160 = vmatmul.mubr.msk.bf16.gmra.mxu1 %vm235_vm1, %v2371_v35  ;;  %v2407_v35 = vld [vmem:[%s2476_s23 + $0x34] sm:$0xff]   ;;  %v2619_v37 = vsel %vm485_vm2, %v995_v21, %v2605_v28  ;;  %v2389_v21 = vld [vmem:[%s2937_s1 + $0x60] sm:$0xff]  }
  0x35   : > { %2183 = vmatprep.mubr.msk.bf16.mxu0 %vm2422_vm0, %v2421_v1  ;;  %2163 = vmatprep.mubr.msk.bf16.mxu1 %vm2422_vm0, %v2421_v1  ;;  %v1340_v44 = vshrl.u32 %v2407_v35, 16  ;;  %v1342_v45 = vshll.u32 %v2407_v35, 16  ;;  %v2404_v35 = vld [vmem:[%s2937_s1 + $0x70] sm:$0xff]   ;;  %v1504_v43 = vsel %vm1495_vm3, %v1501_v40, %v1503_v42 }
  0x37   : > { %v1344_v33 = vrot.slane %v1342_v45, 1 }
  0x39   : > { %v1345_v57 = vor.u32 %v1344_v33, %v1340_v44 }
  0x3b   : > { %v2647_v2 = vsel %vm485_vm2, %v1345_v57, %v1349_v53 }
  0x3c   : > { %2184 = vmatmul.mubr.msk.bf16.gmra.mxu0 %vm235_vm1, %v513_v5  ;;  %2164 = vmatmul.mubr.msk.bf16.gmra.mxu1 %vm235_vm1, %v2373_v59  ;;  %v524_v59 = vor.u32 %v522_v38, %v2560_v51  ;;  %v2653_v5 = vsel %vm485_vm2, %v1353_v60, %v1357_v54  ;;  %v1365_v51 = vrot.slane %v1363_v61, 1  ;;  %v1497_v38 = vrot.slane %v2555_v50, 1 }
  0x3d   : > { %2187 = vmatprep.mubr.msk.bf16.mxu0 %vm2422_vm0, %v2421_v1  ;;  %2167 = vmatprep.mubr.msk.bf16.mxu1 %vm2422_vm0, %v2421_v1 }
  0x3e   : > { %v2658_v9 = vsel %vm485_vm2, %v1361_v3, %v1365_v51  ;;  %v1369_v10 = vor.u32 %v1367_v63, %v1365_v51 }
  0x40   : > { %v2672_v15 = vsel %vm485_vm2, %v1369_v10, %v2660_v12  ;;  %vm1714_vm2 = vmor %vm1712_vm13, %vm1713_vm14 }
  0x44   : > { %2188 = vmatmul.mubr.msk.bf16.gmra.mxu0 %vm235_vm1, %v521_v36  ;;  %2168 = vmatmul.mubr.msk.bf16.gmra.mxu1 %vm235_vm1, %v2377_v27  ;;  %v2391_v27 = vld [vmem:[%s2476_s23 + $0xa8] sm:$0xff]  }
  0x45   : > { %2191 = vmatprep.mubr.msk.bf16.mxu0 %vm2422_vm0, %v2421_v1  ;;  %2199 = vmatprep.mubr.msk.bf16.mxu1 %vm2422_vm0, %v2421_v1  ;;  %v2399_v36 = vld [vmem:[%s2937_s1 + $0x88] sm:$0xff]  }
  0x4c   : > { %2192 = vmatmul.mubr.msk.bf16.gmra.mxu0 %vm235_vm1, %v524_v59  ;;  %2200 = vmatmul.mubr.msk.bf16.vlgmr.msra.gmra.mxu1 %vm235_vm1, %v2379_v0 }
  0x4d   : > { %2223 = vmatprep.mubr.msk.bf16.mxu0 %vm2422_vm0, %v2421_v1  ;;  %2203 = vmatprep.mubr.msk.bf16.mxu1 %vm2422_vm0, %v2421_v1 }
  0x4e   : > { %2244 = vmatpush3.bf16.msra.mxu1 %v2380_v4 }
  0x4f   : > { %2245 = vmatprep.subr.bf16.mxu1 %v2421_v1 }
  0x52   : > { %2246 = vmatpush3.bf16.msra.mxu1 %v2388_v13 }
  0x53   : > { %2291 = vmatprep.subr.bf16.mxu1 %v2421_v1 }
  0x54   : > { %2224 = vmatmul.mubr.msk.bf16.vlgmr.msra.gmra.mxu0 %vm235_vm1, %v2382_v17  ;;  %2204 = vmatmul.mubr.msk.bf16.gmra.mxu1 %vm235_vm1, %v2381_v19 }
  0x55   : > { %2268 = vmatpush3.bf16.msra.mxu0 %v2383_v20  ;;  %2207 = vmatprep.mubr.msk.bf16.mxu1 %vm2422_vm0, %v2421_v1 }
  0x56   : > { %2227 = vmatprep.mubr.msk.bf16.mxu0 %vm2422_vm0, %v2421_v1  ;;  %2269 = vmatprep.subr.bf16.mxu0 %v2421_v1 }
  0x59   : > { %2270 = vmatpush3.bf16.msra.mxu0 %v2389_v21 }
  0x5a   : > { %2315 = vmatprep.subr.bf16.mxu0 %v2421_v1 }
  0x5c   : > { %2228 = vmatmul.mubr.msk.bf16.gmra.mxu0 %vm235_vm1, %v2385_v22  ;;  %2208 = vmatmul.mubr.msk.bf16.gmra.mxu1 %vm235_vm1, %v2384_v23 }
  0x5d   : > { %2231 = vmatprep.mubr.msk.bf16.mxu0 %vm2422_vm0, %v2421_v1  ;;  %2211 = vmatprep.mubr.msk.bf16.mxu1 %vm2422_vm0, %v2421_v1 }
  0x64   : > { %2232 = vmatmul.mubr.msk.bf16.gmra.mxu0 %vm235_vm1, %v2387_v24  ;;  %2212 = vmatmul.mubr.msk.bf16.gmra.mxu1 %vm235_vm1, %v2386_v26 }
  0x65   : > { %2235 = vmatprep.mubr.msk.bf16.mxu0 %vm2422_vm0, %v2421_v1  ;;  %2215 = vmatprep.mubr.msk.bf16.mxu1 %vm2422_vm0, %v2421_v1 }
  0x6c   : > { %2236 = vmatmul.mubr.msk.bf16.gmra.mxu0 %vm235_vm1, %v2391_v27  ;;  %2216 = vmatmul.mubr.msk.bf16.gmra.mxu1 %vm235_vm1, %v2390_v29 }
  0x6d   : > { %2239 = vmatprep.mubr.msk.bf16.mxu0 %vm2422_vm0, %v2421_v1  ;;  %2247 = vmatprep.mubr.msk.bf16.mxu1 %vm2422_vm0, %v2421_v1 }
  0x74   : > { %2240 = vmatmul.mubr.msk.bf16.gmra.mxu0 %vm235_vm1, %v2392_v31  ;;  %2248 = vmatmul.mubr.msk.bf16.vlgmr.msra.gmra.mxu1 %vm235_vm1, %v2573_v6  ;;  %v2405_v6 = vld [vmem:[%s2937_s1 + $0x80] sm:$0xff]  }
  0x75   : > { %2271 = vmatprep.mubr.msk.bf16.mxu0 %vm2422_vm0, %v2421_v1  ;;  %2251 = vmatprep.mubr.msk.bf16.mxu1 %vm2422_vm0, %v2421_v1 }
  0x76   : > { %2292 = vmatpush3.bf16.msra.mxu1 %v2395_v34 }
  0x77   : > { %2293 = vmatprep.subr.bf16.mxu1 %v2421_v1 }
  0x7a   : > { %2294 = vmatpush3.bf16.msra.mxu1 %v2404_v35 }
  0x7c   : > { %2272 = vmatmul.mubr.msk.bf16.vlgmr.msra.gmra.mxu0 %vm235_vm1, %v2602_v25  ;;  %2252 = vmatmul.mubr.msk.bf16.gmra.mxu1 %vm235_vm1, %v2576_v7  ;;  %v1001_v7 = vshrl.u32 %v2583_v14, 16  ;;  %v1188_v25 = vshrl.u32 %v2611_v32, 16 }
  0x7d   : > { %2316 = vmatpush3.bf16.msra.mxu0 %v2399_v36  ;;  %2255 = vmatprep.mubr.msk.bf16.mxu1 %vm2422_vm0, %v2421_v1 }
  0x7e   : > { %2275 = vmatprep.mubr.msk.bf16.mxu0 %vm2422_vm0, %v2421_v1  ;;  %2317 = vmatprep.subr.bf16.mxu0 %v2421_v1  ;;  %v1190_v14 = vor.u32 %v1188_v25, %v2629_v46 }
  0x81   : > { %2318 = vmatpush3.bf16.msra.mxu0 %v2405_v6 }
  0x84   : > { %2276 = vmatmul.mubr.msk.bf16.gmra.mxu0 %vm235_vm1, %v2608_v30  ;;  %2256 = vmatmul.mubr.msk.bf16.gmra.mxu1 %vm235_vm1, %v2590_v18  ;;  %v1003_v18 = vor.u32 %v1001_v7, %v2605_v28  ;;  %v1486_v30 = vld [vmem:[%s2476_s23 + $0x4] sm:$0xe] }
  0x85   : > { %2279 = vmatprep.mubr.msk.bf16.mxu0 %vm2422_vm0, %v2421_v1  ;;  %2259 = vmatprep.mubr.msk.bf16.mxu1 %vm2422_vm0, %v2421_v1 }
  0x8c   : > { %2280 = vmatmul.mubr.msk.bf16.gmra.mxu0 %vm235_vm1, %v2623_v39  ;;  %2260 = vmatmul.mubr.msk.bf16.gmra.mxu1 %vm235_vm1, %v2619_v37  ;;  %v2021_v37 = vcombine.low %v1486_v30, %v2563_v55  ;;  %v1499_v55 = vrot.slane %v2579_v11, 1 }
  0x8d   : > { %2283 = vmatprep.mubr.msk.bf16.mxu0 %vm2422_vm0, %v2421_v1  ;;  %2263 = vmatprep.mubr.msk.bf16.mxu1 %vm2422_vm0, %v2421_v1 }
  0x8e   : > { %v1496_v28 = vrot.slane %v2021_v37, 1  ;;  %v1500_v50 = vsel %vm1495_vm3, %v1497_v38, %v1499_v55  ;;  %v1502_v11 = vsel %vm1495_vm3, %v1499_v55, %v1501_v40 }
  0x90   : > { %v1498_v39 = vsel %vm1495_vm3, %v1496_v28, %v1497_v38  ;;  %vm1751_vm3 = vcmask 1040384  }
  0x91   : > { %vm1753_vm7 = vmor %vm1751_vm3, %vm1752_vm5 }
  0x94   : > { %2284 = vmatmul.mubr.msk.bf16.gmra.mxu0 %vm235_vm1, %v2638_v52  ;;  %2264 = vmatmul.mubr.msk.bf16.gmra.mxu1 %vm235_vm1, %v1003_v18 }
  0x95   : > { %2287 = vmatprep.mubr.msk.bf16.mxu0 %vm2422_vm0, %v2421_v1  ;;  %2295 = vmatprep.mubr.msk.bf16.mxu1 %vm2422_vm0, %v2421_v1 }
  0x9c   : > { %2288 = vmatmul.mubr.msk.bf16.gmra.mxu0 %vm235_vm1, %v1190_v14  ;;  %2296 = vmatmul.mubr.msk.bf16.vlgmr.msra.gmra.mxu1 %vm235_vm1, %v2647_v2 }
  0x9d   : > { %2319 = vmatprep.mubr.msk.bf16.mxu0 %vm2422_vm0, %v2421_v1  ;;  %2299 = vmatprep.mubr.msk.bf16.mxu1 %vm2422_vm0, %v2421_v1 }
  0xa4   : > { %2320 = vmatmul.mubr.msk.bf16.vlgmr.msra.gmra.mxu0 %vm235_vm1, %v1498_v39  ;;  %2300 = vmatmul.mubr.msk.bf16.gmra.mxu1 %vm235_vm1, %v2653_v5 }
  0xa5   : > { %2323 = vmatprep.mubr.msk.bf16.mxu0 %vm2422_vm0, %v2421_v1  ;;  %2303 = vmatprep.mubr.msk.bf16.mxu1 %vm2422_vm0, %v2421_v1 }
  0xac   : > { %2324 = vmatmul.mubr.msk.bf16.gmra.mxu0 %vm235_vm1, %v1500_v50  ;;  %2304 = vmatmul.mubr.msk.bf16.gmra.mxu1 %vm235_vm1, %v2658_v9 }
  0xad   : > { %2327 = vmatprep.mubr.msk.bf16.mxu0 %vm2422_vm0, %v2421_v1  ;;  %2307 = vmatprep.mubr.msk.bf16.mxu1 %vm2422_vm0, %v2421_v1 }
  0xb4   : > { %2328 = vmatmul.mubr.msk.bf16.gmra.mxu0 %vm235_vm1, %v1502_v11  ;;  %2308 = vmatmul.mubr.msk.bf16.gmra.mxu1 %vm235_vm1, %v2672_v15 }
  0xb5   : > { %2331 = vmatprep.mubr.msk.bf16.mxu0 %vm2422_vm0, %v2421_v1  ;;  %2311 = vmatprep.mubr.msk.bf16.mxu1 %vm2422_vm0, %v2421_v1 }
  0xbc   : > { %2332 = vmatmul.mubr.msk.bf16.gmra.mxu0 %vm235_vm1, %v1504_v43  ;;  %2312 = vmatmul.mubr.msk.bf16.gmra.mxu1 %vm235_vm1, %v1377_v16 }
  0xbd   : > { %2335 = vmatprep.mubr.msk.bf16.mxu0 %vm2422_vm0, %v2421_v1  ;;  %vm1726_vm0 = vsmask.f32 5392 }
  0xbe   : > { %vm1727_vm6 = vmor %vm1725_vm15, %vm1726_vm0 }
  0xc4   : > { %2336 = vmatmul.mubr.msk.bf16.gmra.mxu0 %vm235_vm1, %v1503_v42  ;;  %vm2910_vm1 = vmor %vm1686_vm11, %vm1687_vm12 }
  0xd4   : > { %v285_v44 = vpop.f32.mrf.mxu0  ;;  %v309_v45 = vpop.f32.mrf.mxu1 }
  0xd6   : > { %v2129_v46 = vpop.f32.mrf.mxu0  ;;  %v2141_v32 = vpop.f32.mrf.mxu1 }
  0xd8   : > { %v288_v47 = vpop.f32.mrf.mxu0  ;;  %v312_v48 = vpop.f32.mrf.mxu1 }
  0xda   : > { %v2130_v49 = vpop.f32.mrf.mxu0  ;;  %v2142_v33 = vpop.f32.mrf.mxu1 }
  0xdc   : > { %v293_v52 = vpop.f32.mrf.mxu0  ;;  %v317_v53 = vpop.f32.mrf.mxu1 }
  0xde   : > { %v2133_v54 = vpop.f32.mrf.mxu0  ;;  %v2145_v56 = vpop.f32.mrf.mxu1 }
  0xe0   : > { %v296_v57 = vpop.f32.mrf.mxu0  ;;  %v320_v58 = vpop.f32.mrf.mxu1 }
  0xe2   : > { %v2134_v59 = vpop.f32.mrf.mxu0  ;;  %v2146_v60 = vpop.f32.mrf.mxu1 }
  0xe4   : > { %v301_v61 = vpop.f32.mrf.mxu0  ;;  %v407_v1 = vpop.f32.mrf.mxu1 }
  0xe5   : > { %v408_v62 = vadd.f32 %v407_v1, %v285_v44 }
  0xe6   : > { %v2137_v63 = vpop.f32.mrf.mxu0  ;;  %v2153_v0 = vpop.f32.mrf.mxu1 }
  0xe8   : > { %v304_v2 = vpop.f32.mrf.mxu0  ;;  %v410_v3 = vpop.f32.mrf.mxu1 }
  0xe9   : > { %v411_v4 = vadd.f32 %v410_v3, %v288_v47 }
  0xea   : > { %v2138_v5 = vpop.f32.mrf.mxu0  ;;  %v2154_v51 = vpop.f32.mrf.mxu1 }
  0xec   : > { %v586_v8 = vpop.f32.mrf.mxu0  ;;  %v415_v9 = vpop.f32.mrf.mxu1 }
  0xed   : > { %v624_v10 = vadd.f32 %v586_v8, %v408_v62  ;;  %v416_v12 = vadd.f32 %v415_v9, %v293_v52 }
  0xee   : > { %v2177_v13 = vpop.f32.mrf.mxu0  ;;  %v2157_v15 = vpop.f32.mrf.mxu1 }
  0xf0   : > { %v589_v17 = vpop.f32.mrf.mxu0  ;;  %v418_v19 = vpop.f32.mrf.mxu1 }
  0xf1   : > { %v625_v20 = vadd.f32 %v589_v17, %v411_v4  ;;  %v419_v21 = vadd.f32 %v418_v19, %v296_v57 }
  0xf2   : > { %v2178_v22 = vpop.f32.mrf.mxu0  ;;  %v2158_v23 = vpop.f32.mrf.mxu1 }
  0xf4   : > { %v594_v24 = vpop.f32.mrf.mxu0  ;;  %v423_v26 = vpop.f32.mrf.mxu1 }
  0xf5   : > { %v626_v27 = vadd.f32 %v594_v24, %v416_v12  ;;  %v424_v29 = vadd.f32 %v423_v26, %v301_v61 }
  0xf6   : > { %v2181_v31 = vpop.f32.mrf.mxu0  ;;  %v2161_v34 = vpop.f32.mrf.mxu1 }
  0xf8   : > { %v597_v35 = vpop.f32.mrf.mxu0  ;;  %v426_v36 = vpop.f32.mrf.mxu1 }
  0xf9   : > { %v627_v6 = vadd.f32 %v597_v35, %v419_v21  ;;  %v427_v7 = vadd.f32 %v426_v36, %v304_v2 }
  0xfa   : > { %v2182_v18 = vpop.f32.mrf.mxu0  ;;  %v2162_v25 = vpop.f32.mrf.mxu1 }
  0xfc   : > { %v602_v30 = vpop.f32.mrf.mxu0  ;;  %v431_v14 = vpop.f32.mrf.mxu1 }
  0xfd   : > { %v628_v37 = vadd.f32 %v602_v30, %v424_v29  ;;  %v432_v28 = vadd.f32 %v431_v14, %v309_v45 }
  0xfe   : > { %v2185_v38 = vpop.f32.mrf.mxu0  ;;  %v2165_v39 = vpop.f32.mrf.mxu1 }
 0x100   : > { %v605_v55 = vpop.f32.mrf.mxu0  ;;  %v434_v50 = vpop.f32.mrf.mxu1 }
 0x101   : > { %v629_v40 = vadd.f32 %v605_v55, %v427_v7  ;;  %v435_v11 = vadd.f32 %v434_v50, %v312_v48 }
 0x102   : > { %v2186_v41 = vpop.f32.mrf.mxu0  ;;  %v2166_v42 = vpop.f32.mrf.mxu1 }
 0x104   : > { %v610_v16 = vpop.f32.mrf.mxu0  ;;  %v439_v43 = vpop.f32.mrf.mxu1 }
 0x105   : > { %v630_v44 = vadd.f32 %v610_v16, %v432_v28  ;;  %v440_v46 = vadd.f32 %v439_v43, %v317_v53 }
 0x106   : > { %v2189_v32 = vpop.f32.mrf.mxu0  ;;  %v2169_v47 = vpop.f32.mrf.mxu1 }
 0x108   : > { %v613_v49 = vpop.f32.mrf.mxu0  ;;  %v442_v33 = vpop.f32.mrf.mxu1 }
 0x109   : > { %v631_v52 = vadd.f32 %v613_v49, %v435_v11 }
 0x10a   : > { %v2190_v54 = vpop.f32.mrf.mxu0  ;;  %v2170_v56 = vpop.f32.mrf.mxu1 }
 0x10c   : > { %v618_v45 = vpop.f32.mrf.mxu0  ;;  %v732_v58 = vpop.f32.mrf.mxu1 }
 0x10d   : > { %v632_v57 = vadd.f32 %v618_v45, %v440_v46  ;;  %v770_v59 = vadd.f32 %v732_v58, %v624_v10 }
 0x10e   : > { %v2193_v60 = vpop.f32.mrf.mxu0  ;;  %v2201_v61 = vpop.f32.mrf.mxu1 }
 0x110   : > { %v621_v48 = vpop.f32.mrf.mxu0  ;;  %v735_v1 = vpop.f32.mrf.mxu1 }
 0x111   : > { %v771_v62 = vadd.f32 %v735_v1, %v625_v20 }
 0x112   : > { %v2194_v63 = vpop.f32.mrf.mxu0  ;;  %v2202_v0 = vpop.f32.mrf.mxu1 }
 0x114   : > { %v878_v2 = vpop.f32.mrf.mxu0  ;;  %v740_v53 = vpop.f32.mrf.mxu1 }
 0x115   : > { %v2818_v3 = vadd.f32 %v878_v2, %v770_v59  ;;  %v772_v4 = vadd.f32 %v740_v53, %v626_v27 }
 0x116   : > { %v2225_v5 = vpop.f32.mrf.mxu0  ;;  %v2205_v51 = vpop.f32.mrf.mxu1 }
 0x118   : > { %v881_v8 = vpop.f32.mrf.mxu0  ;;  %v743_v9 = vpop.f32.mrf.mxu1 }
 0x119   : > { %v2820_v12 = vadd.f32 %v881_v8, %v771_v62  ;;  %v773_v13 = vadd.f32 %v743_v9, %v627_v6 }
 0x11a   : > { %v2226_v10 = vpop.f32.mrf.mxu0  ;;  %v2206_v15 = vpop.f32.mrf.mxu1 }
 0x11c   : > { %v886_v17 = vpop.f32.mrf.mxu0  ;;  %v748_v19 = vpop.f32.mrf.mxu1 }
 0x11d   : > { %v2822_v21 = vadd.f32 %v886_v17, %v772_v4  ;;  %v774_v20 = vadd.f32 %v748_v19, %v628_v37 }
 0x11e   : > { %v2229_v22 = vpop.f32.mrf.mxu0  ;;  %v2209_v23 = vpop.f32.mrf.mxu1 }
 0x120   : > { %v889_v24 = vpop.f32.mrf.mxu0  ;;  %v751_v26 = vpop.f32.mrf.mxu1 }
 0x121   : > { %v2824_v29 = vadd.f32 %v889_v24, %v773_v13  ;;  %v775_v27 = vadd.f32 %v751_v26, %v629_v40 }
 0x122   : > { %v2230_v31 = vpop.f32.mrf.mxu0  ;;  %v2210_v34 = vpop.f32.mrf.mxu1 }
 0x124   : > { %v894_v35 = vpop.f32.mrf.mxu0  ;;  %v756_v36 = vpop.f32.mrf.mxu1 }
 0x125   : > { %v2826_v7 = vadd.f32 %v894_v35, %v774_v20  ;;  %v776_v6 = vadd.f32 %v756_v36, %v630_v44 }
 0x126   : > { %v2233_v18 = vpop.f32.mrf.mxu0  ;;  %v2213_v25 = vpop.f32.mrf.mxu1 }
 0x128   : > { %v897_v30 = vpop.f32.mrf.mxu0  ;;  %v759_v14 = vpop.f32.mrf.mxu1 }
 0x129   : > { %v2828_v28 = vadd.f32 %v897_v30, %v775_v27  ;;  %v777_v37 = vadd.f32 %v759_v14, %v631_v52 }
 0x12a   : > { %v2234_v38 = vpop.f32.mrf.mxu0  ;;  %v2214_v39 = vpop.f32.mrf.mxu1 }
 0x12c   : > { %v902_v55 = vpop.f32.mrf.mxu0  ;;  %v764_v50 = vpop.f32.mrf.mxu1 }
 0x12d   : > { %v2830_v11 = vadd.f32 %v902_v55, %v776_v6  ;;  %v778_v40 = vadd.f32 %v764_v50, %v632_v57 }
 0x12e   : > { %v2237_v41 = vpop.f32.mrf.mxu0  ;;  %v2217_v42 = vpop.f32.mrf.mxu1 }
 0x130   : > { %v905_v16 = vpop.f32.mrf.mxu0  ;;  %v767_v43 = vpop.f32.mrf.mxu1 }
 0x131   : > { %v2832_v46 = vadd.f32 %v905_v16, %v777_v37 }
 0x132   : > { %v2238_v44 = vpop.f32.mrf.mxu0  ;;  %v2218_v32 = vpop.f32.mrf.mxu1 }
 0x134   : > { %v910_v47 = vpop.f32.mrf.mxu0  ;;  %v1065_v33 = vpop.f32.mrf.mxu1 }
 0x135   : > { %v2834_v49 = vadd.f32 %v910_v47, %v778_v40  ;;  %v1103_v37 = vadd.f32 %v1065_v33, %v2818_v3 }
 0x136   : > { %v2241_v52 = vpop.f32.mrf.mxu0  ;;  %v2249_v54 = vpop.f32.mrf.mxu1 }
 0x137   : > { %v2861_v52 = vld [vmem:[%s2938_s2] ss:$0 sm:$0xff] }
 0x138   : > { %v913_v56 = vpop.f32.mrf.mxu0  ;;  %v1068_v45 = vpop.f32.mrf.mxu1 }
 0x139   : > { %v1104_v41 = vadd.f32 %v1068_v45, %v2820_v12 }
 0x13a   : > { %v2242_v58 = vpop.f32.mrf.mxu0  ;;  %v2250_v59 = vpop.f32.mrf.mxu1 }
 0x13c   : > { %v1252_v60 = vpop.f32.mrf.mxu0  ;;  %v1073_v57 = vpop.f32.mrf.mxu1 }
 0x13d   : > { %v1290_v55 = vadd.f32 %v1252_v60, %v1103_v37  ;;  %v1105_v33 = vadd.f32 %v1073_v57, %v2822_v21 }
 0x13e   : > { %v2273_v61 = vpop.f32.mrf.mxu0  ;;  %v2253_v48 = vpop.f32.mrf.mxu1 }
 0x140   : > { %v1255_v1 = vpop.f32.mrf.mxu0  ;;  %v1076_v62 = vpop.f32.mrf.mxu1 }
 0x141   : > { %v1291_v44 = vadd.f32 %v1255_v1, %v1104_v41  ;;  %v1106_v48 = vadd.f32 %v1076_v62, %v2824_v29 }
 0x142   : > { %v2274_v63 = vpop.f32.mrf.mxu0  ;;  %v2254_v0 = vpop.f32.mrf.mxu1 }
 0x144   : > { %v1260_v2 = vpop.f32.mrf.mxu0  ;;  %v2836_v53 = vpop.f32.mrf.mxu1 }
 0x145   : > { %v1292_v59 = vadd.f32 %v1260_v2, %v1105_v33 }
 0x146   : > { %v2277_v4 = vpop.f32.mrf.mxu0  ;;  %v2257_v5 = vpop.f32.mrf.mxu1 }
 0x148   : > { %v1263_v51 = vpop.f32.mrf.mxu0  ;;  %v2838_v8 = vpop.f32.mrf.mxu1 }
 0x149   : > { %v1293_v5 = vadd.f32 %v1263_v51, %v1106_v48  ;;  %v1107_v51 = vadd.f32 %v2836_v53, %v2826_v7  ;;  %v1108_v7 = vadd.f32 %v2838_v8, %v2828_v28 }
 0x14a   : > { %v2278_v9 = vpop.f32.mrf.mxu0  ;;  %v2258_v13 = vpop.f32.mrf.mxu1 }
 0x14c   : > { %v2840_v10 = vpop.f32.mrf.mxu0  ;;  %v2842_v15 = vpop.f32.mrf.mxu1 }
 0x14e   : > { %v2281_v17 = vpop.f32.mrf.mxu0  ;;  %v2261_v19 = vpop.f32.mrf.mxu1 }
 0x150   : > { %v2844_v20 = vpop.f32.mrf.mxu0  ;;  %v2846_v22 = vpop.f32.mrf.mxu1 }
 0x151   : > { %v1110_v48 = vadd.f32 %v2846_v22, %v2832_v46 }
 0x152   : > { %v2282_v23 = vpop.f32.mrf.mxu0  ;;  %v2262_v24 = vpop.f32.mrf.mxu1 }
 0x154   : > { %v2848_v26 = vpop.f32.mrf.mxu0  ;;  %v2850_v27 = vpop.f32.mrf.mxu1 }
 0x156   : > { %v2285_v31 = vpop.f32.mrf.mxu0  ;;  %v2265_v34 = vpop.f32.mrf.mxu1 }
 0x158   : > { %v2852_v35 = vpop.f32.mrf.mxu0  ;;  %v1100_v36 = vpop.f32.mrf.mxu1 }
 0x159   : > { %v1297_v46 = vadd.f32 %v2852_v35, %v1110_v48 }
 0x15a   : > { %v2286_v6 = vpop.f32.mrf.mxu0  ;;  %v2266_v18 = vpop.f32.mrf.mxu1 }
 0x15c   : > { %v2854_v25 = vpop.f32.mrf.mxu0  ;;  %v1439_v30 = vpop.f32.mrf.mxu1 }
 0x15d   : > { %v1477_v42 = vadd.f32 %v1439_v30, %v1290_v55  ;;  %v1294_v30 = vadd.f32 %v2840_v10, %v1107_v51 }
 0x15e   : > { %v2289_v14 = vpop.f32.mrf.mxu0  ;;  %v2297_v38 = vpop.f32.mrf.mxu1 }
 0x160   : > { %v1287_v39 = vpop.f32.mrf.mxu0  ;;  %v1442_v50 = vpop.f32.mrf.mxu1 }
 0x161   : > { %v1478_v54 = vadd.f32 %v1442_v50, %v1291_v44  ;;  %v1295_v44 = vadd.f32 %v2844_v20, %v1108_v7 }
 0x162   : > { %v2290_v40 = vpop.f32.mrf.mxu0  ;;  %v2298_v16 = vpop.f32.mrf.mxu1 }
 0x164   : > { %v1566_v43 = vpop.f32.mrf.mxu0  ;;  %v1447_v32 = vpop.f32.mrf.mxu1 }
 0x165   : > { %v1604_v47 = vadd.f32 %v1566_v43, %v1477_v42  ;;  %v1479_v1 = vadd.f32 %v1447_v32, %v1292_v59  ;;  %v1109_v43 = vadd.f32 %v2842_v15, %v2830_v11 }
 0x166   : > { %v2321_v3 = vpop.f32.mrf.mxu0  ;;  %v2301_v56 = vpop.f32.mrf.mxu1 }
 0x167   : > { %v1620_v12 = vadd.f32 %v2861_v52, %v1604_v47  ;;  %v1296_v56 = vadd.f32 %v2848_v26, %v1109_v43 }
 0x168   : > { %v1569_v58 = vpop.f32.mrf.mxu0  ;;  %v1450_v45 = vpop.f32.mrf.mxu1 }
 0x169   : > { %v1605_v60 = vadd.f32 %v1569_v58, %v1478_v54  ;;  %v1629_v9 = vmax.f32 %v1620_v12, 0.0  ;;  %v1480_v29 = vadd.f32 %v1450_v45, %v1293_v5 }
 0x16a   : > { %v2322_v61 = vpop.f32.mrf.mxu0  ;;  %v2302_v0 = vpop.f32.mrf.mxu1 }
 0x16b   : > { %v1621_v63 = vadd.f32 %v2861_v52, %v1605_v60 }
 0x16c   : > { %v1574_v4 = vpop.f32.mrf.mxu0  ;;  %v1455_v57 = vpop.f32.mrf.mxu1 }
 0x16d   : > { %v1630_v21 = vmax.f32 %v1621_v63, 0.0  ;;  %v1606_v13 = vadd.f32 %v1574_v4, %v1479_v1  ;;  %v1481_v53 = vadd.f32 %v1455_v57, %v1294_v30 }
 0x16e   : > { %v2325_v2 = vpop.f32.mrf.mxu0  ;;  %v2305_v23 = vpop.f32.mrf.mxu1 }
 0x16f   : > { %v1638_v62 = vpack.c.bf16 %v1630_v21, %v1629_v9  ;;  %v2052_v17 = vpack.c.bf16 %v1630_v21, %v1630_v21  ;;  %v1622_v19 = vadd.f32 %v2861_v52, %v1606_v13 }
 0x170   : > { %v1577_v24 = vpop.f32.mrf.mxu0  ;;  %v1458_v6 = vpop.f32.mrf.mxu1 }
 0x171   : > { %1644 = vst.msk [vmem:[%s2871_s7] sm:$0xf] %vm1643_vm4, %v1638_v62  ;;  %v1655_v31 = vshrl.u32 %v2052_v17, 16  ;;  %v1658_v34 = vshll.u32 %v2052_v17, 16  ;;  %v1631_v36 = vmax.f32 %v1622_v19, 0.0  ;;  %v1607_v18 = vadd.f32 %v1577_v24, %v1480_v29 }
 0x172   : > { %v2326_v14 = vpop.f32.mrf.mxu0  ;;  %v2306_v50 = vpop.f32.mrf.mxu1  ;;  %v1482_v59 = vadd.f32 %v1458_v6, %v1295_v44  ;;  %v1111_v17 = vadd.f32 %v2850_v27, %v2834_v49 }
 0x173   : > { %v1657_v37 = vrot.slane %v1655_v31, 4  ;;  %v1660_v38 = vrot.slane %v1658_v34, 5  ;;  %v2053_v39 = vpack.c.bf16 %v1631_v36, %v1631_v36  ;;  %v1623_v55 = vadd.f32 %v2861_v52, %v1607_v18 }
 0x174   : > { %v1582_v40 = vpop.f32.mrf.mxu0  ;;  %v1463_v10 = vpop.f32.mrf.mxu1  ;;  %v1298_v6 = vadd.f32 %v2854_v25, %v1111_v17 }
 0x175   : > { %v1661_v41 = vor.u32 %v1660_v38, %v1657_v37  ;;  %v1664_v42 = vshll.u32 %v2053_v39, 16  ;;  %v1632_v16 = vmax.f32 %v1623_v55, 0.0  ;;  %v1608_v28 = vadd.f32 %v1582_v40, %v1481_v53 }
 0x176   : > { %v2329_v8 = vpop.f32.mrf.mxu0  ;;  %v2309_v54 = vpop.f32.mrf.mxu1  ;;  %v2034_v58 = vrot.slane %v2053_v39, 9  ;;  %v1483_v9 = vadd.f32 %v1463_v10, %v1296_v56 }
 0x177   : > { %v1662_v47 = vrot.slane %v1661_v41, 4  ;;  %v1666_v3 = vrot.slane %v1664_v42, 5  ;;  %v2054_v33 = vpack.c.bf16 %v1632_v16, %v1632_v16  ;;  %v1624_v11 = vadd.f32 %v2861_v52, %v1608_v28 }
 0x178   : > { %v1585_v15 = vpop.f32.mrf.mxu0  ;;  %v1466_v61 = vpop.f32.mrf.mxu1 }
 0x179   : > { %v1667_v20 = vsel %vm2887_vm9, %v1662_v47, %v1666_v3  ;;  %v1678_v12 = vrot.slane %v2054_v33, 5  ;;  %v1690_v45 = vshrl.u32 %v2054_v33, 16  ;;  %v1693_v60 = vshll.u32 %v2054_v33, 16 }
 0x17a   : > { %2032 = vst.msk [vmem:[%s2871_s7 + $0x4] sm:$0xf] %vm1643_vm4, %v1667_v20  ;;  %v1633_v26 = vmax.f32 %v1624_v11, 0.0  ;;  %v1609_v1 = vadd.f32 %v1585_v15, %v1482_v59  ;;  %v2330_v63 = vpop.f32.mrf.mxu0  ;;  %v2310_v21 = vpop.f32.mrf.mxu1  ;;  %v1484_v31 = vadd.f32 %v1466_v61, %v1297_v46  ;;  %vm1765_vm9 = vsmask.f32 4368 }
 0x17b   : > { %v1679_v0 = vsel %vm1675_vm10, %v2034_v58, %v1678_v12  ;;  %v1692_v4 = vrot.slane %v1690_v45, 5  ;;  %v1695_v5 = vrot.slane %v1693_v60, 6  ;;  %vm1766_vm10 = vmor %vm1764_vm8, %vm1765_vm9 }
 0x17c   : > { %2035 = vst.msk [vmem:[%s2871_s7 + $0x8] sm:$0xf] %vm1643_vm4, %v1679_v0  ;;  %v2055_v57 = vpack.c.bf16 %v1633_v26, %v1633_v26  ;;  %v1625_v13 = vadd.f32 %v2861_v52, %v1609_v1  ;;  %v1590_v2 = vpop.f32.mrf.mxu0  ;;  %v1471_v29 = vpop.f32.mrf.mxu1 }
 0x17d   : > { %v1696_v22 = vor.u32 %v1695_v5, %v1692_v4  ;;  %v1610_v62 = vadd.f32 %v1590_v2, %v1483_v9  ;;  %v1485_v41 = vadd.f32 %v1471_v29, %v1298_v6 }
 0x17e   : > { %v1699_v19 = vshrl.u32 %v2055_v57, 16  ;;  %v1702_v23 = vshll.u32 %v2055_v57, 16  ;;  %v1634_v51 = vmax.f32 %v1625_v13, 0.0  ;;  %v2333_v24 = vpop.f32.mrf.mxu0  ;;  %v2313_v36 = vpop.f32.mrf.mxu1  ;;  %v2039_v37 = vrot.slane %v2055_v57, 10 }
 0x17f   : > { %v1626_v34 = vadd.f32 %v2861_v52, %v1610_v62  ;;  %v1697_v14 = vrot.slane %v1696_v22, 4 }
 0x180   : > { %v1701_v18 = vrot.slane %v1699_v19, 5  ;;  %v1704_v49 = vrot.slane %v1702_v23, 6  ;;  %v2056_v27 = vpack.c.bf16 %v1634_v51, %v1634_v51  ;;  %v1593_v30 = vpop.f32.mrf.mxu0  ;;  %v1474_v55 = vpop.f32.mrf.mxu1 }
 0x181   : > { %v1635_v38 = vmax.f32 %v1626_v34, 0.0  ;;  %v1611_v39 = vadd.f32 %v1593_v30, %v1484_v31 }
 0x182   : > { %v1705_v25 = vor.u32 %v1704_v49, %v1701_v18  ;;  %v1717_v50 = vrot.slane %v2056_v27, 6  ;;  %v1729_v7 = vshrl.u32 %v2056_v27, 16  ;;  %v1732_v53 = vshll.u32 %v2056_v27, 16  ;;  %v2334_v40 = vpop.f32.mrf.mxu0  ;;  %v2314_v10 = vpop.f32.mrf.mxu1 }
 0x183   : > { %v2057_v42 = vpack.c.bf16 %v1635_v38, %v1635_v38  ;;  %v1627_v16 = vadd.f32 %v2861_v52, %v1611_v39 }
 0x184   : > { %v1706_v43 = vsel %vm2910_vm1, %v1697_v14, %v1705_v25  ;;  %v1718_v44 = vsel %vm1714_vm2, %v2039_v37, %v1717_v50  ;;  %v1731_v32 = vrot.slane %v1729_v7, 6  ;;  %v1734_v28 = vrot.slane %v1732_v53, 7  ;;  %v1598_v8 = vpop.f32.mrf.mxu0 }
 0x185   : > { %2037 = vst.msk [vmem:[%s2871_s7 + $0xc] sm:$0xf] %vm1643_vm4, %v1706_v43  ;;  %2040 = vst.msk [vmem:[%s2871_s7 + $0x10] sm:$0xf] %vm1643_vm4, %v1718_v44  ;;  %v1738_v47 = vshrl.u32 %v2057_v42, 16  ;;  %v1741_v3 = vshll.u32 %v2057_v42, 16  ;;  %v1612_v56 = vadd.f32 %v1598_v8, %v1485_v41 }
 0x186   : > { %v1636_v33 = vmax.f32 %v1627_v16, 0.0  ;;  %v1735_v54 = vor.u32 %v1734_v28, %v1731_v32  ;;  %v2337_v58 = vpop.f32.mrf.mxu0  ;;  %v2044_v61 = vrot.slane %v2057_v42, 11 }
 0x187   : > { %v1740_v59 = vrot.slane %v1738_v47, 6  ;;  %v1743_v11 = vrot.slane %v1741_v3, 7  ;;  %v1628_v20 = vadd.f32 %v2861_v52, %v1612_v56 }
 0x188   : > { %v2058_v15 = vpack.c.bf16 %v1636_v33, %v1636_v33  ;;  %v1601_v12 = vpop.f32.mrf.mxu0  ;;  %v1736_v45 = vrot.slane %v1735_v54, 4 }
 0x189   : > { %v1744_v60 = vor.u32 %v1743_v11, %v1740_v59  ;;  %v1637_v26 = vmax.f32 %v1628_v20, 0.0 }
 0x18a   : > { %v1756_v48 = vrot.slane %v2058_v15, 7  ;;  %v2338_v1 = vpop.f32.mrf.mxu0  ;;  %v1768_v5 = vshrl.u32 %v2058_v15, 16 }
 0x18b   : > { %v1745_v63 = vsel %vm1727_vm6, %v1736_v45, %v1744_v60  ;;  %v2059_v4 = vpack.c.bf16 %v1637_v26, %v1637_v26 }
 0x18c   : > { %v1757_v0 = vsel %vm1753_vm7, %v2044_v61, %v1756_v48  ;;  %2042 = vst.msk [vmem:[%s2871_s7 + $0x14] sm:$0xf] %vm1643_vm4, %v1745_v63  ;;  %v2047_v57 = vrot.slane %v1768_v5, 11 }
 0x18d   : > { %2045 = vst.msk [vmem:[%s2871_s7 + $0x18] sm:$0xf] %vm1643_vm4, %v1757_v0  ;;  %v1773_v9 = vshrl.u32 %v2059_v4, 16  ;;  %v1776_v21 = vshll.u32 %v2059_v4, 16 }
 0x18f   : > { %v1775_v52 = vrot.slane %v1773_v9, 7 }
 0x191   : > { %v1778_v13 = vor.u32 %v1776_v21, %v1775_v52 }
 0x193   : > { %v1779_v2 = vsel %vm1766_vm10, %v2047_v57, %v1778_v13 }
 0x194   : > { %2048 = vst.msk [vmem:[%s2871_s7 + $0x1c] sm:$0xf] %vm1643_vm4, %v1779_v2 }
 0x195 PF: > { %s13_s12 = sadd.s32 1, %s2419_s12  }
 0x196   : > { %p10_p4 = scmp.ge.s32.totalorder %s13_s12, 4  }
 0x198   :  { %12 = sbr.rel (!%p10_p4) target bundleno = 1 (0x1), region = 80 }

// kernel: extended_mask2former_forward.11
= control target key start
LH: loop header
LB: loop body
LE: loop exit
PB: predicated region body
PF: predicated region fallthrough
CT: control target
= control target key end

     0   :  { %vm52_vm0 = vcmask 261120   ;;  %vm124_vm1 = vcmask 257024   ;;  %s211_s1 = inlined_call_operand.vmem [shape: bf16[32,32], index: 1, kind: input, shape index: {}]   ;;  %s212_s0 = inlined_call_operand.vmem [shape: bf16[32,32], index: 0, kind: input, shape index: {}]   ;;  %s213_s2 = inlined_call_operand.vmem [shape: f32[1,32], index: 2, kind: input, shape index: {}]   ;;  %s214_s3 = inlined_call_operand.vmem [shape: bf16[32,32], index: 3, kind: output, shape index: {}]  }
   0x1   :  { %v160_v0 = vld [vmem:[%s211_s1 + $0x8] sm:$0xff]   ;;  %v161_v1 = vld [vmem:[%s211_s1] sm:$0xff]  }
   0x2   :  { %152 = vmatprep.subr.bf16.mxu0 %v160_v0  ;;  %v162_v2 = vld [vmem:[%s212_s0] sm:$0xff]   ;;  %v163_v3 = vld [vmem:[%s212_s0 + $0x8] sm:$0xff]  }
   0x3   :  { %153 = vmatpush3.bf16.msra.mxu0 %v160_v0  ;;  %156 = vmatprep.mubr.msk.bf16.mxu0 %vm52_vm0, %v162_v2  ;;  %v133_v4 = vld [vmem:[%s213_s2] ss:$0 sm:$0xff] }
   0x4   :  { %154 = vmatprep.subr.bf16.mxu0 %v161_v1 }
   0x7   :  { %155 = vmatpush3.bf16.msra.mxu0 %v161_v1 }
   0xa   :  { %157 = vmatmul.mubr.msk.bf16.vlgmr.msra.gmra.mxu0 %vm52_vm0, %v163_v3 }
  0xca   :  { %v158_v5 = vpop.f32.mrf.mxu0 }
  0xcb   :  { %v102_v6 = vadd.f32 %v158_v5, %v133_v4 }
  0xcc   :  { %v93_v7 = vpop.f32.mrf.mxu0 }
  0xcd   :  { %v146_v8 = vpack.c.bf16 %v102_v6, %v102_v6  ;;  %v94_v9 = vadd.f32 %v133_v4, %v93_v7 }
  0xce   :  { %v159_v10 = vpop.f32.mrf.mxu0 }
  0xcf   :  { %127 = vst.msk [vmem:[%s214_s3 + $0x8] sm:$0xf] %vm124_vm1, %v146_v8  ;;  %v144_v11 = vpack.c.bf16 %v94_v9, %v94_v9  ;;  %v105_v12 = vadd.f32 %v159_v10, %v133_v4 }
  0xd0   :  { %v96_v13 = vpop.f32.mrf.mxu0 }
  0xd1   :  { %125 = vst.msk [vmem:[%s214_s3] sm:$0xf] %vm124_vm1, %v144_v11  ;;  %v147_v14 = vpack.c.bf16 %v105_v12, %v105_v12  ;;  %v97_v15 = vadd.f32 %v133_v4, %v96_v13 }
  0xd3   :  { %128 = vst.msk [vmem:[%s214_s3 + $0xc] sm:$0xf] %vm124_vm1, %v147_v14  ;;  %v145_v16 = vpack.c.bf16 %v97_v15, %v97_v15 }
  0xd5   :  { %126 = vst.msk [vmem:[%s214_s3 + $0x4] sm:$0xf] %vm124_vm1, %v145_v16 }

// kernel: extended_mask2former_forward.10
= control target key start
LH: loop header
LB: loop body
LE: loop exit
PB: predicated region body
PF: predicated region fallthrough
CT: control target
= control target key end

     0   :  { %s1442_s12 = smov 0   ;;  %s1570_s0 = inlined_call_operand.vmem [shape: bf16[2,4,32,32], index: 0, kind: input, shape index: {}]   ;;  %s1571_s1 = inlined_call_operand.vmem [shape: bf16[9,32,32], index: 1, kind: input, shape index: {}]   ;;  %s1572_s2 = inlined_call_operand.vmem [shape: f32[1,32], index: 2, kind: input, shape index: {}]   ;;  %s1573_s3 = inlined_call_operand.vmem [shape: bf16[2,4,4,32], index: 3, kind: output, shape index: {}]  }
   0x1 LB: > { %s1146_s13 = sadd.s32 4294967295, %s1419_s12   ;;  %p1150_p0 = scmp.ge.s32.totalorder %s1419_s12, 1  ;;  %s1419_s12 = sphi %s1442_s12, %s13_s12  }
   0x2   : > { %p137_p1 = scmp.lt.s32.totalorder %s1419_s12, 3 }
   0x4   : > { %p138_p2 = pnand %p1150_p0, %p137_p1 }
   0x5   : > { %p161_p3 = scmp.lt.s32.totalorder (!%p138_p2), %s1146_s13, 1 }
   0x6   : > { %141 = sbr.rel (%p138_p2) target bundleno = 273 (0x111), region = 32 }
   0xb   : > { %v1380_v0 = vld [vmem:[%s1571_s1 + $0x18] sm:$0xff]   ;;  %v1381_v1 = vld [vmem:[%s1571_s1 + $0x8] sm:$0xff]   ;;  %v1382_v2 = vld [vmem:[%s1571_s1 + $0x10] sm:$0xff]   ;;  %s1575_s13 = smov (!%p161_p3, %s1146_s13), 1  ;;  %vm208_vm0 = vcmask 261120   ;;  %vm914_vm3 = vcmask 1044480  }
   0xc   : > { %1299 = vmatprep.subr.bf16.mxu0 %v1380_v0  ;;  %1307 = vmatprep.subr.bf16.mxu1 %v1381_v1  ;;  %v1383_v3 = vld [vmem:[%s1571_s1] sm:$0xff]   ;;  %s1261_s22 = sshll.u32 %s1575_s13, 6  ;;  %v1388_v4 = vld [vmem:[%s1571_s1 + $0x28] sm:$0xff]   ;;  %v1389_v5 = vld [vmem:[%s1571_s1 + $0x38] sm:$0xff]   ;;  %vm346_vm1 = vsmask.f32 7424 }
   0xd   : > { %1300 = vmatpush3.bf16.msra.mxu0 %v1380_v0  ;;  %1308 = vmatpush3.bf16.msra.mxu1 %v1381_v1  ;;  %s1471_s27 = scalar_lea.vmem %s1570_s0, %s1261_s22  ;;  %v1390_v9 = vld [vmem:[%s1571_s1 + $0x20] sm:$0xff]   ;;  %v1391_v13 = vld [vmem:[%s1571_s1 + $0x30] sm:$0xff]   ;;  %v1394_v17 = vld [vmem:[%s1571_s1 + $0x48] sm:$0xff]   ;;  %vm713_vm2 = vsmask.f32 5376  ;;  %vm1046_vm4 = vcmask 1040384  }
   0xe   : > { %1301 = vmatprep.subr.bf16.mxu0 %v1382_v2  ;;  %1309 = vmatprep.subr.bf16.mxu1 %v1383_v3  ;;  %v1384_v6 = vld [vmem:[%s1471_s27 + $0x10] sm:$0xff]   ;;  %v1385_v7 = vld [vmem:[%s1471_s27] sm:$0xff]   ;;  %v1386_v8 = vld [vmem:[%s1471_s27 + $0x18] ss:$0 sps:$4 sm:$0x33]   ;;  %vm1047_vm5 = vcmask 1042434  }
   0xf   : > { %1303 = vmatprep.mubr.msk.bf16.mxu0 %vm208_vm0, %v1384_v6  ;;  %1311 = vmatprep.mubr.msk.bf16.mxu1 %vm208_vm0, %v1385_v7  ;;  %v347_v10 = vshrl.u32 %v1385_v7, 16  ;;  %v349_v11 = vshll.u32 %v1385_v7, 16  ;;  %v1387_v12 = vld [vmem:[%s1471_s27 + $0x8] ss:$0 sps:$4 sm:$0x33]   ;;  %v1393_v15 = vld [vmem:[%s1471_s27 + $0x20] sm:$0xff]   ;;  %vm1048_vm6 = vmor %vm1046_vm4, %vm1047_vm5 }
  0x10   : > { %v1392_v16 = vld [vmem:[%s1471_s27 + $0x8] ss:$0 sps:$4 sm:$0x77]   ;;  %v1396_v22 = vld [vmem:[%s1571_s1 + $0x58] sm:$0xff]   ;;  %v1397_v24 = vld [vmem:[%s1571_s1 + $0x40] sm:$0xff]   ;;  %v611_v28 = vshrl.u32 %v1393_v15, 16 }
  0x11   : > { %1302 = vmatpush3.bf16.msra.mxu0 %v1382_v2  ;;  %1310 = vmatpush3.bf16.msra.mxu1 %v1383_v3  ;;  %v351_v14 = vrot.slane %v349_v11, 1  ;;  %v354_v19 = vshll.u32 %v1392_v16, 16  ;;  %v358_v20 = vshrl.u32 %v1392_v16, 16  ;;  %v1395_v21 = vld [vmem:[%s1471_s27 + $0x28] ss:$0 sps:$4 sm:$0x33]  }
  0x12   : > { %1315 = vmatprep.subr.bf16.mxu0 %v1388_v4  ;;  %1323 = vmatprep.subr.bf16.mxu1 %v1389_v5  ;;  %v1398_v27 = vld [vmem:[%s1571_s1 + $0x50] sm:$0xff]   ;;  %v613_v30 = vshll.u32 %v1393_v15, 16  ;;  %v1402_v31 = vld [vmem:[%s1571_s1 + $0x68] sm:$0xff]   ;;  %v1400_v34 = vld [vmem:[%s1471_s27 + $0x38] ss:$0 sps:$4 sm:$0x33]  }
  0x13   : > { %v352_v18 = vor.u32 %v351_v14, %v347_v10  ;;  %v356_v23 = vrot.slane %v354_v19, 1  ;;  %v1399_v29 = vld [vmem:[%s1471_s27 + $0x30] sm:$0xff]   ;;  %v1401_v32 = vld [vmem:[%s1471_s27 + $0x28] ss:$0 sps:$4 sm:$0x77]   ;;  %v1403_v38 = vld [vmem:[%s1571_s1 + $0x78] sm:$0xff]  }
  0x14   : > { %1304 = vmatmul.mubr.msk.bf16.vlgmr.msra.gmra.mxu0 %vm208_vm0, %v1386_v8  ;;  %1312 = vmatmul.mubr.msk.bf16.vlgmr.msra.gmra.mxu1 %vm208_vm0, %v1387_v12  ;;  %v615_v33 = vrot.slane %v613_v30, 1  ;;  %v618_v36 = vshll.u32 %v1401_v32, 16  ;;  %v622_v37 = vshrl.u32 %v1401_v32, 16  ;;  %v1404_v39 = vld [vmem:[%s1571_s1 + $0x60] sm:$0xff]   ;;  %v1405_v41 = vld [vmem:[%s1571_s1 + $0x70] sm:$0xff]   ;;  %v1410_v0 = vld [vmem:[%s1571_s1 + $0x88] sm:$0xff]  }
  0x15   : > { %1316 = vmatpush3.bf16.msra.mxu0 %v1388_v4  ;;  %1324 = vmatpush3.bf16.msra.mxu1 %v1389_v5  ;;  %v357_v25 = vsel %vm346_vm1, %v352_v18, %v356_v23  ;;  %v360_v26 = vor.u32 %v358_v20, %v356_v23  ;;  %v694_v42 = vld [vmem:[%s1471_s27] sm:$0xc]  ;;  %v695_v43 = vld [vmem:[%s1471_s27 + $0x4] sm:$0xf]  ;;  %v1407_v45 = vld [vmem:[%s1471_s27 + $0x8] sm:$0x1f]  }
  0x16   : > { %1317 = vmatprep.subr.bf16.mxu0 %v1390_v9  ;;  %1327 = vmatprep.mubr.msk.bf16.mxu1 %vm208_vm0, %v1393_v15  ;;  %v616_v35 = vor.u32 %v615_v33, %v611_v28  ;;  %v620_v40 = vrot.slane %v618_v36, 1  ;;  %v1223_v44 = vcombine.low %v694_v42, %v695_v43  ;;  %v723_v50 = vshrl.u32 %v1407_v45, 16  ;;  %v1408_v52 = vld [vmem:[%s1471_s27 + $0x10] sm:$0xfc]   ;;  %v1409_v53 = vld [vmem:[%s1471_s27 + $0x18] sm:$0x1f]  }
  0x17   : > { %1325 = vmatprep.subr.bf16.mxu1 %v1391_v13  ;;  %1319 = vmatprep.mubr.msk.bf16.mxu0 %vm208_vm0, %v357_v25  ;;  %v726_v51 = vshll.u32 %v1407_v45, 16  ;;  %v820_v58 = vshrl.u32 %v1408_v52, 16  ;;  %v823_v59 = vshll.u32 %v1408_v52, 16  ;;  %v828_v60 = vshrl.u32 %v1409_v53, 16  ;;  %v1411_v6 = vld [vmem:[%s1571_s1 + $0x80] sm:$0xff]   ;;  %s1262_s4 = sshll.u32 %s1575_s13, 3 }
  0x18   : > { %v621_v46 = vsel %vm346_vm1, %v616_v35, %v620_v40  ;;  %v624_v47 = vor.u32 %v622_v37, %v620_v40  ;;  %v715_v48 = vshrl.u32 %v1223_v44, 16  ;;  %v718_v49 = vshll.u32 %v1223_v44, 16  ;;  %v905_v7 = vld [vmem:[%s1471_s27] sm:$0x8]  ;;  %s1557_s7 = scalar_lea.vmem %s1573_s3, %s1262_s4 }
  0x19   : > { %1318 = vmatpush3.bf16.msra.mxu0 %v1390_v9  ;;  %1326 = vmatpush3.bf16.msra.mxu1 %v1391_v13  ;;  %v725_v56 = vrot.slane %v723_v50, 2  ;;  %v728_v57 = vrot.slane %v726_v51, 3  ;;  %v831_v61 = vshll.u32 %v1409_v53, 16  ;;  %v822_v1 = vrot.slane %v820_v58, 2 }
  0x1a   : > { %1331 = vmatprep.subr.bf16.mxu0 %v1394_v17  ;;  %1339 = vmatprep.subr.bf16.mxu1 %v1396_v22  ;;  %v717_v54 = vrot.slane %v715_v48, 2  ;;  %v720_v55 = vrot.slane %v718_v49, 3  ;;  %v825_v2 = vrot.slane %v823_v59, 3  ;;  %v830_v3 = vrot.slane %v828_v60, 2 }
  0x1b   : > { %v729_v63 = vor.u32 %v728_v57, %v725_v56  ;;  %v833_v4 = vrot.slane %v831_v61, 3  ;;  %v1247_v10 = vcombine.low %v905_v7, %v695_v43  ;;  %v916_v11 = vrot.slane %v1407_v45, 3 }
  0x1c   : > { %1320 = vmatmul.mubr.msk.bf16.vlgmr.msra.gmra.mxu0 %vm208_vm0, %v360_v26  ;;  %1328 = vmatmul.mubr.msk.bf16.vlgmr.msra.gmra.mxu1 %vm208_vm0, %v1395_v21  ;;  %v721_v62 = vor.u32 %v720_v55, %v717_v54  ;;  %v826_v8 = vor.u32 %v825_v2, %v822_v1  ;;  %v1421_v61 = vmov 1983009808   ;;  %vm1049_vm7 = vcmask 1044484  }
  0x1d   : > { %1332 = vmatpush3.bf16.msra.mxu0 %v1394_v17  ;;  %1340 = vmatpush3.bf16.msra.mxu1 %v1396_v22  ;;  %v834_v9 = vor.u32 %v833_v4, %v830_v3  ;;  %v915_v13 = vrot.slane %v1247_v10, 3  ;;  %v1252_v4 = vld [vmem:[%s1572_s2] ss:$0 sm:$0xff]  ;;  %vm1002_vm8 = vcmask 254976   ;;  %vm1068_vm9 = vsmask.f32 256  ;;  %vm1050_vm13 = vmor %vm1048_vm6, %vm1049_vm7 }
  0x1e   : > { %1333 = vmatprep.subr.bf16.mxu0 %v1397_v24  ;;  %1341 = vmatprep.subr.bf16.mxu1 %v1398_v27  ;;  %v730_v5 = vsel %vm713_vm2, %v721_v62, %v729_v63  ;;  %v1007_v62 = vunpack.c.l.s4 %v1421_v61  ;;  %vm1069_vm10 = vsmask.f32 2312  ;;  %vm1021_vm11 = vsmask.f32 1280 }
  0x1f   : > { %1335 = vmatprep.mubr.msk.bf16.mxu0 %vm208_vm0, %v1399_v29  ;;  %1343 = vmatprep.mubr.msk.bf16.mxu1 %vm208_vm0, %v621_v46  ;;  %v835_v12 = vsel %vm713_vm2, %v826_v8, %v834_v9  ;;  %v917_v14 = vsel %vm914_vm3, %v915_v13, %v916_v11  ;;  %vm1022_vm12 = vsmask.f32 3336  ;;  %vm1051_vm14 = vcmask 1046534   ;;  %vm1070_vm15 = vmor %vm1068_vm9, %vm1069_vm10 }
  0x20   : > { %v1008_v8 = vunpack.c.0.s8 %v1007_v62  ;;  %vm1023_vm1 = vmor %vm1021_vm11, %vm1022_vm12  ;;  %vm1024_vm2 = vsmask.f32 5392  ;;  %vm1073_vm5 = vsmask.f32 6424  ;;  %vm1026_vm7 = vsmask.f32 7448 }
  0x21   : > { %1334 = vmatpush3.bf16.msra.mxu0 %v1397_v24  ;;  %1342 = vmatpush3.bf16.msra.mxu1 %v1398_v27  ;;  %vm1052_vm3 = vmor %vm1050_vm13, %vm1051_vm14 }
  0x22   : > { %1347 = vmatprep.subr.bf16.mxu0 %v1402_v31  ;;  %1355 = vmatprep.subr.bf16.mxu1 %v1403_v38  ;;  %vm1025_vm6 = vmor %vm1023_vm1, %vm1024_vm2 }
  0x23   : > { %vm1027_vm10 = vmor %vm1025_vm6, %vm1026_vm7 }
  0x24   : > { %1336 = vmatmul.mubr.msk.bf16.vlgmr.msra.gmra.mxu0 %vm208_vm0, %v1400_v34  ;;  %1344 = vmatmul.mubr.msk.bf16.vlgmr.msra.gmra.mxu1 %vm208_vm0, %v624_v47 }
  0x25   : > { %1348 = vmatpush3.bf16.msra.mxu0 %v1402_v31  ;;  %1356 = vmatpush3.bf16.msra.mxu1 %v1403_v38 }
  0x26   : > { %1349 = vmatprep.subr.bf16.mxu0 %v1404_v39  ;;  %1357 = vmatprep.subr.bf16.mxu1 %v1405_v41 }
  0x27   : > { %1351 = vmatprep.mubr.msk.bf16.mxu0 %vm208_vm0, %v730_v5  ;;  %1359 = vmatprep.mubr.msk.bf16.mxu1 %vm208_vm0, %v835_v12 }
  0x29   : > { %1350 = vmatpush3.bf16.msra.mxu0 %v1404_v39  ;;  %1358 = vmatpush3.bf16.msra.mxu1 %v1405_v41 }
  0x2a   : > { %1363 = vmatprep.subr.bf16.mxu0 %v1410_v0 }
  0x2c   : > { %1352 = vmatmul.mubr.msk.bf16.vlgmr.msra.gmra.mxu0 %vm208_vm0, %v729_v63  ;;  %1360 = vmatmul.mubr.msk.bf16.vlgmr.msra.gmra.mxu1 %vm208_vm0, %v834_v9  ;;  %v1009_v63 = vlaneseq }
  0x2d   : > { %1364 = vmatpush3.bf16.msra.mxu0 %v1410_v0  ;;  %1367 = vmatprep.mubr.msk.bf16.mxu0 %vm208_vm0, %v917_v14 }
  0x2e   : > { %1365 = vmatprep.subr.bf16.mxu0 %v1411_v6  ;;  %v1010_v9 = vshrl.u32 %v1009_v63, 7 }
  0x31   : > { %1366 = vmatpush3.bf16.msra.mxu0 %v1411_v6 }
  0x34   : > { %1368 = vmatmul.mubr.msk.bf16.vlgmr.msra.gmra.mxu0 %vm208_vm0, %v916_v11  ;;  %vm1071_vm0 = vsmask.f32 4368 }
  0x35   : > { %vm1072_vm4 = vmor %vm1070_vm15, %vm1071_vm0 }
  0x36   : > { %vm1074_vm9 = vmor %vm1072_vm4, %vm1073_vm5 }
  0xd4   : > { %v1305_v15 = vpop.f32.mrf.mxu0  ;;  %v1313_v16 = vpop.f32.mrf.mxu1 }
  0xd5   : > { %v332_v29 = vadd.f32 %v1313_v16, %v1305_v15 }
  0xd6   : > { %v249_v17 = vpop.f32.mrf.mxu0  ;;  %v323_v18 = vpop.f32.mrf.mxu1 }
  0xd7   : > { %v324_v32 = vadd.f32 %v323_v18, %v249_v17  ;;  %v1011_v17 = vsub.s32 %v1008_v8, %v1010_v9 }
  0xd8   : > { %v1306_v19 = vpop.f32.mrf.mxu0  ;;  %v1314_v20 = vpop.f32.mrf.mxu1 }
  0xda   : > { %v252_v21 = vpop.f32.mrf.mxu0  ;;  %v326_v22 = vpop.f32.mrf.mxu1 }
  0xdb   : > { %v327_v38 = vadd.f32 %v326_v22, %v252_v21 }
  0xdc   : > { %v1321_v23 = vpop.f32.mrf.mxu0  ;;  %v1329_v24 = vpop.f32.mrf.mxu1 }
  0xdd   : > { %v429_v33 = vadd.f32 %v1321_v23, %v332_v29 }
  0xde   : > { %v413_v25 = vpop.f32.mrf.mxu0  ;;  %v499_v26 = vpop.f32.mrf.mxu1 }
  0xdf   : > { %v427_v35 = vadd.f32 %v413_v25, %v324_v32  ;;  %v515_v39 = vadd.f32 %v1329_v24, %v429_v33 }
  0xe0   : > { %v1322_v27 = vpop.f32.mrf.mxu0  ;;  %v1330_v28 = vpop.f32.mrf.mxu1 }
  0xe1   : > { %v513_v42 = vadd.f32 %v499_v26, %v427_v35 }
  0xe2   : > { %v416_v30 = vpop.f32.mrf.mxu0  ;;  %v502_v31 = vpop.f32.mrf.mxu1 }
  0xe3   : > { %v428_v43 = vadd.f32 %v416_v30, %v327_v38 }
  0xe4   : > { %v1337_v34 = vpop.f32.mrf.mxu0  ;;  %v1345_v36 = vpop.f32.mrf.mxu1 }
  0xe5   : > { %v601_v44 = vadd.f32 %v1337_v34, %v515_v39  ;;  %v514_v50 = vadd.f32 %v502_v31, %v428_v43 }
  0xe6   : > { %v585_v37 = vpop.f32.mrf.mxu0  ;;  %v677_v40 = vpop.f32.mrf.mxu1 }
  0xe7   : > { %v599_v47 = vadd.f32 %v585_v37, %v513_v42  ;;  %v693_v51 = vadd.f32 %v1345_v36, %v601_v44 }
  0xe8   : > { %v1338_v41 = vpop.f32.mrf.mxu0  ;;  %v1346_v45 = vpop.f32.mrf.mxu1 }
  0xe9   : > { %v691_v53 = vadd.f32 %v677_v40, %v599_v47 }
  0xea   : > { %v588_v46 = vpop.f32.mrf.mxu0  ;;  %v680_v48 = vpop.f32.mrf.mxu1 }
  0xeb   : > { %v600_v54 = vadd.f32 %v588_v46, %v514_v50 }
  0xec   : > { %v1353_v49 = vpop.f32.mrf.mxu0  ;;  %v1361_v56 = vpop.f32.mrf.mxu1 }
  0xed   : > { %v799_v55 = vadd.f32 %v1353_v49, %v693_v51  ;;  %v692_v0 = vadd.f32 %v680_v48, %v600_v54 }
  0xee   : > { %v783_v52 = vpop.f32.mrf.mxu0  ;;  %v888_v59 = vpop.f32.mrf.mxu1 }
  0xef   : > { %v797_v58 = vadd.f32 %v783_v52, %v691_v53  ;;  %v904_v1 = vadd.f32 %v1361_v56, %v799_v55 }
  0xf0   : > { %v1354_v57 = vpop.f32.mrf.mxu0  ;;  %v1362_v2 = vpop.f32.mrf.mxu1 }
  0xf1   : > { %v902_v5 = vadd.f32 %v888_v59, %v797_v58 }
  0xf2   : > { %v786_v60 = vpop.f32.mrf.mxu0  ;;  %v891_v13 = vpop.f32.mrf.mxu1 }
  0xf3   : > { %v798_v6 = vadd.f32 %v786_v60, %v692_v0 }
  0xf4   : > { %v1369_v3 = vpop.f32.mrf.mxu0 }
  0xf5   : > { %v986_v7 = vadd.f32 %v1369_v3, %v904_v1  ;;  %v903_v15 = vadd.f32 %v891_v13, %v798_v6 }
  0xf6   : > { %v970_v10 = vpop.f32.mrf.mxu0 }
  0xf7   : > { %v996_v11 = vadd.f32 %v1252_v4, %v986_v7  ;;  %v984_v12 = vadd.f32 %v970_v10, %v902_v5 }
  0xf8   : > { %v1370_v14 = vpop.f32.mrf.mxu0 }
  0xf9   : > { %v999_v16 = vmax.f32 %v996_v11, 0.0  ;;  %v994_v20 = vadd.f32 %v1252_v4, %v984_v12 }
  0xfa   : > { %v973_v18 = vpop.f32.mrf.mxu0 }
  0xfb   : > { %v1001_v19 = vpack.c.bf16 %v999_v16, %v999_v16  ;;  %v985_v21 = vadd.f32 %v973_v18, %v903_v15  ;;  %v997_v24 = vmax.f32 %v994_v20, 0.0 }
  0xfd   : > { %v995_v22 = vadd.f32 %v1252_v4, %v985_v21  ;;  %v1067_v23 = vrot.slane %v1001_v19, %v1011_v17 }
  0xff   : > { %v998_v25 = vmax.f32 %v995_v22, 0.0  ;;  %v1081_v28 = vshrl.u32 %v1067_v23, 16  ;;  %v1084_v38 = vshll.u32 %v1067_v23, 16 }
 0x101   : > { %v1000_v26 = vpack.c.bf16 %v998_v25, %v997_v24  ;;  %v1253_v27 = vpack.c.bf16 %v998_v25, %v998_v25  ;;  %v1083_v33 = vrot.slane %v1081_v28, 7 }
 0x103   : > { %1003 = vst.msk [vmem:[%s1557_s7] sm:$0x3] %vm1002_vm8, %v1000_v26  ;;  %v1012_v29 = vrot.slane %v1000_v26, %v1011_v17  ;;  %v1019_v30 = vrot.slane %v1253_v27, %v1011_v17  ;;  %v1086_v44 = vor.u32 %v1084_v38, %v1083_v33 }
 0x105   : > { %v1020_v31 = vcombine.high %v1012_v29, %v1012_v29  ;;  %v1045_v32 = vcombine.high %v1019_v30, %v1019_v30  ;;  %v1255_v36 = vrot.slane %v1019_v30, 9  ;;  %v1038_v42 = vshll.u32 %v1019_v30, 16 }
 0x107   : > { %v1029_v34 = vshrl.u32 %v1020_v31, 16  ;;  %v1032_v35 = vshll.u32 %v1020_v31, 16  ;;  %v1055_v37 = vrot.slane %v1045_v32, 7  ;;  %v1076_v39 = vshrl.u32 %v1045_v32, 16 }
 0x108   : > { %v1040_v49 = vrot.slane %v1038_v42, 7 }
 0x109   : > { %v1031_v40 = vrot.slane %v1029_v34, 6  ;;  %v1034_v41 = vrot.slane %v1032_v35, 7  ;;  %v1056_v43 = vsel %vm1052_vm3, %v1255_v36, %v1055_v37  ;;  %v1257_v45 = vrot.slane %v1076_v39, 9 }
 0x10a   : > { %1256 = vst.msk [vmem:[%s1557_s7 + $0x4] sm:$0x3] %vm1002_vm8, %v1056_v43 }
 0x10b   : > { %v1035_v46 = vor.u32 %v1034_v41, %v1031_v40  ;;  %v1087_v47 = vsel %vm1074_vm9, %v1257_v45, %v1086_v44 }
 0x10c   : > { %1258 = vst.msk [vmem:[%s1557_s7 + $0x6] sm:$0x3] %vm1002_vm8, %v1087_v47 }
 0x10d   : > { %v1036_v48 = vrot.slane %v1035_v46, 2 }
 0x10f   : > { %v1041_v50 = vsel %vm1027_vm10, %v1036_v48, %v1040_v49 }
 0x110   : > { %1254 = vst.msk [vmem:[%s1557_s7 + $0x2] sm:$0x3] %vm1002_vm8, %v1041_v50 }
 0x111 PF: > { %s13_s12 = sadd.s32 1, %s1419_s12  }
 0x112   : > { %p10_p4 = scmp.ge.s32.totalorder %s13_s12, 4  }
 0x114   :  { %12 = sbr.rel (!%p10_p4) target bundleno = 1 (0x1), region = 76 }

// kernel: extended_mask2former_forward.8
= control target key start
LH: loop header
LB: loop body
LE: loop exit
PB: predicated region body
PF: predicated region fallthrough
CT: control target
= control target key end

     0   :  { %s6162_s12 = smov 0   ;;  %s7611_s0 = inlined_call_operand.vmem [shape: bf16[2,4,312,3], index: 0, kind: input, shape index: {}]   ;;  %s7612_s1 = inlined_call_operand.vmem [shape: bf16[9,3,32], index: 1, kind: input, shape index: {}]   ;;  %s7613_s2 = inlined_call_operand.vmem [shape: f32[1,32], index: 2, kind: input, shape index: {}]   ;;  %s7614_s3 = inlined_call_operand.vmem [shape: bf16[2,16,16,32], index: 3, kind: output, shape index: {}]  }
   0x1 LB: > { %s4590_s13 = sadd.s32 4294967295, %s6137_s12   ;;  %p4594_p0 = scmp.ge.s32.totalorder %s6137_s12, 1  ;;  %s6137_s12 = sphi %s6162_s12, %s13_s12  }
   0x2   : > { %p137_p1 = scmp.lt.s32.totalorder %s6137_s12, 3 }
   0x4   : > { %p138_p2 = pnand %p4594_p0, %p137_p1 }
   0x6   : > { %141 = sbr.rel (%p138_p2) target bundleno = 840 (0x348), region = 32 }
   0xb   : > { %v4632_v0 = vld [vmem:[%s7612_s1 + $0x2] sm:$0x3]  ;;  %vm381_vm0 = vcmask 1040384   ;;  %vm382_vm1 = vcmask 1041408   ;;  %v7615_v1 = vmov 0.0   ;;  %v6140_v2 = vmov 65535  }
   0xc   : > { %5344 = vmatprep.subr.bf16.mxu0 %v7615_v1  ;;  %5974 = vmatprep.subr.bf16.mxu1 %v7615_v1  ;;  %v383_v3 = vsel %vm381_vm0, 4294967295, %v6140_v2  ;;  %p161_p3 = scmp.lt.s32.totalorder %s4590_s13, 1  ;;  %vm6141_vm2 = vmmov 0   ;;  %v4701_v6 = vld [vmem:[%s7612_s1 + $0x4] sm:$0x3]  ;;  %vm329_vm3 = vcmask 23552  }
   0xd   : > { %v6177_v4 = vsel %vm382_vm1, %v383_v3, 0  ;;  %5346 = vmatprep.mubr.msk.bf16.mxu0 %vm6141_vm2, %v7615_v1  ;;  %5382 = vmatprep.mubr.msk.bf16.mxu1 %vm6141_vm2, %v7615_v1  ;;  %v206_v7 = vld [vmem:[%s7612_s1] sm:$0x3]  ;;  %v4771_v29 = vld [vmem:[%s7612_s1 + $0x6] sm:$0x3]  ;;  %vm3718_vm5 = vcmask 1046528  }
   0xe   : > { %v386_v5 = vand.u32 %v4632_v0, %v6177_v4  ;;  %s7650_s13 = smov (!%p161_p3, %s4590_s13), 1  ;;  %v1183_v8 = vand.u32 %v4701_v6, %v6177_v4  ;;  %v694_v10 = vand.u32 %v6177_v4, %v206_v7  ;;  %v1562_v35 = vand.u32 %v4771_v29, %v6177_v4  ;;  %v4840_v38 = vld [vmem:[%s7612_s1 + $0x8] sm:$0x3] }
   0xf   : > { %s5976_s18 = smul.u32 624, %s7650_s13  ;;  %vm990_vm4 = vsmask.f32 7424  ;;  %v1941_v45 = vand.u32 %v4840_v38, %v6177_v4  ;;  %s5147_s11 = sshll.u32 %s7650_s13, 7  ;;  %vm4110_vm6 = vcmask 257024   ;;  %vm4158_vm10 = vcmask 1042432  }
  0x10   : > { %5345 = vmatpush3.bf16.msra.mxu0 %v386_v5  ;;  %5975 = vmatpush3.bf16.msra.mxu1 %v386_v5  ;;  %s7385_s16 = scalar_lea.vmem %s7614_s3, %s5147_s11  ;;  %vm4121_vm7 = vsmask.f32 3328  ;;  %vm4122_vm8 = vsmask.f32 7440  ;;  %vm4159_vm11 = vcmask 1046532  }
  0x11   : > { %5484 = vmatprep.subr.bf16.mxu0 %v7615_v1  ;;  %5414 = vmatprep.subr.bf16.mxu1 %v7615_v1  ;;  %s6198_s23 = scalar_lea.vmem %s7611_s0, %s5976_s18  ;;  %vm7400_vm9 = vmor %vm4121_vm7, %vm4122_vm8  ;;  %vm4178_vm13 = vsmask.f32 2304  ;;  %vm4179_vm14 = vsmask.f32 6416  ;;  %vm4281_vm7 = vcmask 1044484  }
  0x12   : > { %v5988_v9 = vld [vmem:[%s6198_s23 + $0x9c] sm:$0xff]   ;;  %v5989_v11 = vld [vmem:[%s6198_s23 + $0xe4] sm:$0xff]   ;;  %v5991_v13 = vld [vmem:[%s6198_s23 + $0xec] sm:$0xff]  }
  0x13   : > { %5347 = vmatmul.mubr.msk.bf16.vlgmr.msra.gmra.mxu0 %vm329_vm3, %v5988_v9  ;;  %5383 = vmatmul.mubr.msk.bf16.vlgmr.msra.gmra.mxu1 %vm329_vm3, %v5989_v11  ;;  %v5990_v12 = vld [vmem:[%s6198_s23 + $0xa4] sm:$0xff]   ;;  %v5992_v14 = vld [vmem:[%s6198_s23 + $0xac] sm:$0xff]   ;;  %v5993_v15 = vld [vmem:[%s6198_s23 + $0xf4] sm:$0xff]  }
  0x14   : > { %5485 = vmatpush3.bf16.msra.mxu0 %v1183_v8  ;;  %5415 = vmatpush3.bf16.msra.mxu1 %v694_v10  ;;  %v5994_v16 = vld [vmem:[%s6198_s23 + $0xb4] sm:$0xff]   ;;  %v5995_v17 = vld [vmem:[%s6198_s23 + $0xfc] sm:$0xff]   ;;  %v5997_v19 = vld [vmem:[%s6198_s23 + $0x104] sm:$0xff]  }
  0x15   : > { %5350 = vmatprep.mubr.msk.bf16.mxu0 %vm6141_vm2, %v7615_v1  ;;  %5386 = vmatprep.mubr.msk.bf16.mxu1 %vm6141_vm2, %v7615_v1  ;;  %v5996_v18 = vld [vmem:[%s6198_s23 + $0xbc] sm:$0xff]   ;;  %v5998_v20 = vld [vmem:[%s6198_s23 + $0xc4] sm:$0xff]   ;;  %v5999_v21 = vld [vmem:[%s6198_s23 + $0x10c] sm:$0xff]  }
  0x16   : > { %5554 = vmatprep.subr.bf16.mxu1 %v7615_v1  ;;  %5624 = vmatprep.subr.bf16.mxu0 %v7615_v1  ;;  %v6000_v22 = vld [vmem:[%s6198_s23 + $0xcc] sm:$0xff]   ;;  %v6001_v23 = vld [vmem:[%s6198_s23 + $0x114] sm:$0xff]   ;;  %v6007_v24 = vld [vmem:[%s6198_s23] sm:$0xff]  }
  0x17   : > { %v6002_v25 = vld [vmem:[%s6198_s23 + $0xd4] sm:$0xff]   ;;  %v6003_v26 = vld [vmem:[%s6198_s23 + $0x11c] sm:$0xff]   ;;  %v6008_v27 = vld [vmem:[%s6198_s23 + $0x8] sm:$0xff]   ;;  %v994_v28 = vshll.u32 %v6007_v24, 16  ;;  %v992_v33 = vshrl.u32 %v6007_v24, 16 }
  0x18   : > { %v6004_v30 = vld [vmem:[%s6198_s23 + $0xdc] sm:$0xff]   ;;  %v999_v31 = vshll.u32 %v6008_v27, 16  ;;  %v6010_v36 = vld [vmem:[%s6198_s23 + $0x10] sm:$0xff]   ;;  %v6006_v42 = vld [vmem:[%s6198_s23 + $0x8] sm:$0xff]   ;;  %v1003_v43 = vshrl.u32 %v6008_v27, 16 }
  0x19   : > { %v6005_v32 = vld [vmem:[%s6198_s23] sm:$0xff]   ;;  %v996_v34 = vrot.slane %v994_v28, 1  ;;  %v1007_v40 = vshll.u32 %v6010_v36, 16  ;;  %v6012_v41 = vld [vmem:[%s6198_s23 + $0x18] sm:$0xff]   ;;  %v1011_v46 = vshrl.u32 %v6010_v36, 16  ;;  %v6009_v50 = vld [vmem:[%s6198_s23 + $0x10] sm:$0xff]  }
  0x1a   : > { %v1001_v37 = vrot.slane %v999_v31, 1  ;;  %v1015_v48 = vshll.u32 %v6012_v41, 16  ;;  %v6014_v51 = vld [vmem:[%s6198_s23 + $0x20] sm:$0xff]   ;;  %v1019_v54 = vshrl.u32 %v6012_v41, 16  ;;  %v6016_v57 = vld [vmem:[%s6198_s23 + $0x28] sm:$0xff]   ;;  %v6011_v58 = vld [vmem:[%s6198_s23 + $0x18] sm:$0xff]  }
  0x1b   : > { %5351 = vmatmul.mubr.msk.bf16.gmra.mxu0 %vm329_vm3, %v5990_v12  ;;  %5387 = vmatmul.mubr.msk.bf16.gmra.mxu1 %vm329_vm3, %v5991_v13  ;;  %v997_v39 = vor.u32 %v996_v34, %v992_v33  ;;  %v1009_v47 = vrot.slane %v1007_v40, 1  ;;  %v1023_v56 = vshll.u32 %v6014_v51, 16  ;;  %v1027_v61 = vshrl.u32 %v6014_v51, 16  ;;  %v6018_v0 = vld [vmem:[%s6198_s23 + $0x30] sm:$0xff]   ;;  %v6013_v2 = vld [vmem:[%s6198_s23 + $0x20] sm:$0xff]   ;;  %v6020_v9 = vld [vmem:[%s6198_s23 + $0x38] sm:$0xff]  }
  0x1c   : > { %5354 = vmatprep.mubr.msk.bf16.mxu0 %vm6141_vm2, %v7615_v1  ;;  %5390 = vmatprep.mubr.msk.bf16.mxu1 %vm6141_vm2, %v7615_v1  ;;  %v1005_v49 = vor.u32 %v1003_v43, %v1001_v37  ;;  %v1017_v53 = vrot.slane %v1015_v48, 1  ;;  %v1031_v62 = vshll.u32 %v6016_v57, 16  ;;  %v1035_v6 = vshrl.u32 %v6016_v57, 16  ;;  %v6015_v10 = vld [vmem:[%s6198_s23 + $0x28] sm:$0xff]   ;;  %v6021_v28 = vld [vmem:[%s6198_s23 + $0x40] sm:$0xff]   ;;  %v6026_v34 = vld [vmem:[%s6198_s23 + $0x50] sm:$0xff]  }
  0x1d   : > { %v1002_v44 = vsel %vm990_vm4, %v997_v39, %v1001_v37  ;;  %v1013_v55 = vor.u32 %v1011_v46, %v1009_v47  ;;  %v1025_v60 = vrot.slane %v1023_v56, 1  ;;  %v1039_v7 = vshll.u32 %v6018_v0, 16  ;;  %v6024_v27 = vld [vmem:[%s6198_s23 + $0x48] sm:$0xff]   ;;  %v6028_v41 = vld [vmem:[%s6198_s23 + $0x58] sm:$0xff]   ;;  %v6030_v48 = vld [vmem:[%s6198_s23 + $0x60] sm:$0xff]  }
  0x1e   : > { %v1010_v52 = vsel %vm990_vm4, %v1005_v49, %v1009_v47  ;;  %v1021_v63 = vor.u32 %v1019_v54, %v1017_v53  ;;  %v1033_v5 = vrot.slane %v1031_v62, 1  ;;  %v1043_v13 = vshrl.u32 %v6018_v0, 16  ;;  %v6027_v49 = vld [vmem:[%s6198_s23 + $0x58] sm:$0xff]   ;;  %v6029_v56 = vld [vmem:[%s6198_s23 + $0x60] sm:$0xff]   ;;  %v6034_v62 = vld [vmem:[%s6198_s23 + $0x70] sm:$0xff]  }
  0x1f   : > { %v1018_v59 = vsel %vm990_vm4, %v1013_v55, %v1017_v53  ;;  %v1029_v8 = vor.u32 %v1027_v61, %v1025_v60  ;;  %v1041_v12 = vrot.slane %v1039_v7, 1  ;;  %v1063_v31 = vshll.u32 %v6024_v27, 16  ;;  %v6032_v55 = vld [vmem:[%s6198_s23 + $0x68] sm:$0xff]   ;;  %v6036_v7 = vld [vmem:[%s6198_s23 + $0x78] sm:$0xff]   ;;  %vm7414_vm12 = vmor %vm4158_vm10, %vm4159_vm11 }
  0x20   : > { %v1026_v3 = vsel %vm990_vm4, %v1021_v63, %v1025_v60  ;;  %v1067_v37 = vshrl.u32 %v6024_v27, 16  ;;  %v1071_v38 = vshll.u32 %v6026_v34, 16  ;;  %v1083_v51 = vshrl.u32 %v6028_v41, 16  ;;  %v6031_v63 = vld [vmem:[%s6198_s23 + $0x68] sm:$0xff]   ;;  %vm7435_vm15 = vmor %vm4178_vm13, %vm4179_vm14 }
  0x21   : > { %v1034_v11 = vsel %vm990_vm4, %v1029_v8, %v1033_v5  ;;  %v1065_v33 = vrot.slane %v1063_v31, 1  ;;  %v6033_v8 = vld [vmem:[%s6198_s23 + $0x70] sm:$0xff]   ;;  %vm7482_vm8 = vmor %vm381_vm0, %vm4281_vm7  ;;  %vm4300_vm0 = vsmask.f32 256  ;;  %vm4301_vm10 = vsmask.f32 4368 }
  0x22   : > { %v1073_v40 = vrot.slane %v1071_v38, 1  ;;  %vm7504_vm11 = vmor %vm4300_vm0, %vm4301_vm10 }
  0x23   : > { %5355 = vmatmul.mubr.msk.bf16.gmra.mxu0 %vm329_vm3, %v5992_v14  ;;  %5391 = vmatmul.mubr.msk.bf16.gmra.mxu1 %vm329_vm3, %v5993_v15  ;;  %v1047_v14 = vshll.u32 %v6020_v9, 16  ;;  %v1037_v15 = vor.u32 %v1035_v6, %v1033_v5  ;;  %v1069_v39 = vor.u32 %v1067_v37, %v1065_v33 }
  0x24   : > { %5358 = vmatprep.mubr.msk.bf16.mxu0 %vm6141_vm2, %v7615_v1  ;;  %5394 = vmatprep.mubr.msk.bf16.mxu1 %vm6141_vm2, %v7615_v1 }
  0x25   : > { %v1074_v43 = vsel %vm990_vm4, %v1069_v39, %v1073_v40 }
  0x2b   : > { %5359 = vmatmul.mubr.msk.bf16.gmra.mxu0 %vm329_vm3, %v5994_v16  ;;  %5395 = vmatmul.mubr.msk.bf16.gmra.mxu1 %vm329_vm3, %v5995_v17  ;;  %v6017_v16 = vld [vmem:[%s6198_s23 + $0x30] sm:$0xff]   ;;  %v1042_v17 = vsel %vm990_vm4, %v1037_v15, %v1041_v12  ;;  %v6035_v15 = vld [vmem:[%s6198_s23 + $0x78] sm:$0xff]  }
  0x2c   : > { %5362 = vmatprep.mubr.msk.bf16.mxu0 %vm6141_vm2, %v7615_v1  ;;  %5398 = vmatprep.mubr.msk.bf16.mxu1 %vm6141_vm2, %v7615_v1 }
  0x33   : > { %5363 = vmatmul.mubr.msk.bf16.gmra.mxu0 %vm329_vm3, %v5996_v18  ;;  %5399 = vmatmul.mubr.msk.bf16.gmra.mxu1 %vm329_vm3, %v5997_v19  ;;  %v1049_v18 = vrot.slane %v1047_v14, 1  ;;  %v6022_v19 = vld [vmem:[%s6198_s23 + $0x40] sm:$0xff]  }
  0x34   : > { %5366 = vmatprep.mubr.msk.bf16.mxu0 %vm6141_vm2, %v7615_v1  ;;  %5402 = vmatprep.mubr.msk.bf16.mxu1 %vm6141_vm2, %v7615_v1  ;;  %v1055_v24 = vshll.u32 %v6022_v19, 16  ;;  %v6038_v14 = vld [vmem:[%s6198_s23 + $0x80] sm:$0xff]  }
  0x3b   : > { %5367 = vmatmul.mubr.msk.bf16.gmra.mxu0 %vm329_vm3, %v5998_v20  ;;  %5403 = vmatmul.mubr.msk.bf16.gmra.mxu1 %vm329_vm3, %v5999_v21  ;;  %v1045_v20 = vor.u32 %v1043_v13, %v1041_v12  ;;  %v6019_v21 = vld [vmem:[%s6198_s23 + $0x38] sm:$0xff]  }
  0x3c   : > { %5370 = vmatprep.mubr.msk.bf16.mxu0 %vm6141_vm2, %v7615_v1  ;;  %5406 = vmatprep.mubr.msk.bf16.mxu1 %vm6141_vm2, %v7615_v1 }
  0x43   : > { %5371 = vmatmul.mubr.msk.bf16.gmra.mxu0 %vm329_vm3, %v6000_v22  ;;  %5407 = vmatmul.mubr.msk.bf16.gmra.mxu1 %vm329_vm3, %v6001_v23  ;;  %v1050_v22 = vsel %vm990_vm4, %v1045_v20, %v1049_v18  ;;  %v1051_v23 = vshrl.u32 %v6020_v9, 16 }
  0x44   : > { %5374 = vmatprep.mubr.msk.bf16.mxu0 %vm6141_vm2, %v7615_v1  ;;  %5410 = vmatprep.mubr.msk.bf16.mxu1 %vm6141_vm2, %v7615_v1 }
  0x4b   : > { %5375 = vmatmul.mubr.msk.bf16.gmra.mxu0 %vm329_vm3, %v6002_v25  ;;  %5411 = vmatmul.mubr.msk.bf16.gmra.mxu1 %vm329_vm3, %v6003_v26  ;;  %v1053_v25 = vor.u32 %v1051_v23, %v1049_v18  ;;  %v1057_v26 = vrot.slane %v1055_v24, 1  ;;  %v1119_v18 = vshll.u32 %v6038_v14, 16  ;;  %v1123_v24 = vshrl.u32 %v6038_v14, 16 }
  0x4c   : > { %5378 = vmatprep.mubr.msk.bf16.mxu0 %vm6141_vm2, %v7615_v1  ;;  %5416 = vmatprep.mubr.msk.bf16.mxu1 %vm6141_vm2, %v7615_v1 }
  0x4d   : > { %v1058_v29 = vsel %vm990_vm4, %v1053_v25, %v1057_v26  ;;  %v1121_v20 = vrot.slane %v1119_v18, 1 }
  0x53   : > { %5379 = vmatmul.mubr.msk.bf16.gmra.mxu0 %vm329_vm3, %v6004_v30  ;;  %5417 = vmatmul.mubr.msk.bf16.vlgmr.msra.gmra.mxu1 %vm329_vm3, %v6005_v32  ;;  %v1059_v30 = vshrl.u32 %v6022_v19, 16 }
  0x54   : > { %5486 = vmatprep.mubr.msk.bf16.mxu0 %vm6141_vm2, %v7615_v1  ;;  %5555 = vmatpush3.bf16.msra.mxu1 %v1562_v35  ;;  %v6023_v35 = vld [vmem:[%s6198_s23 + $0x48] sm:$0xff]  }
  0x55   : > { %5420 = vmatprep.mubr.msk.bf16.mxu1 %vm6141_vm2, %v7615_v1  ;;  %5694 = vmatprep.subr.bf16.mxu1 %v7615_v1  ;;  %v1061_v32 = vor.u32 %v1059_v30, %v1057_v26 }
  0x57   : > { %v1066_v36 = vsel %vm990_vm4, %v1061_v32, %v1065_v33  ;;  %v4910_v32 = vld [vmem:[%s7612_s1 + $0xa] sm:$0x3] }
  0x58   : > { %v2463_v38 = vand.u32 %v4910_v32, %v6177_v4 }
  0x5b   : > { %5487 = vmatmul.mubr.msk.bf16.vlgmr.msra.gmra.mxu0 %vm329_vm3, %v1002_v44  ;;  %5421 = vmatmul.mubr.msk.bf16.gmra.mxu1 %vm329_vm3, %v6006_v42  ;;  %v6025_v42 = vld [vmem:[%s6198_s23 + $0x50] sm:$0xff]   ;;  %v1075_v44 = vshrl.u32 %v6026_v34, 16 }
  0x5c   : > { %5625 = vmatpush3.bf16.msra.mxu0 %v1941_v45  ;;  %5424 = vmatprep.mubr.msk.bf16.mxu1 %vm6141_vm2, %v7615_v1  ;;  %v1079_v45 = vshll.u32 %v6028_v41, 16 }
  0x5d   : > { %5490 = vmatprep.mubr.msk.bf16.mxu0 %vm6141_vm2, %v7615_v1  ;;  %5764 = vmatprep.subr.bf16.mxu0 %v7615_v1  ;;  %v1077_v46 = vor.u32 %v1075_v44, %v1073_v40 }
  0x5e   : > { %v1081_v47 = vrot.slane %v1079_v45, 1 }
  0x60   : > { %v1085_v53 = vor.u32 %v1083_v51, %v1081_v47 }
  0x63   : > { %5491 = vmatmul.mubr.msk.bf16.gmra.mxu0 %vm329_vm3, %v1010_v52  ;;  %5425 = vmatmul.mubr.msk.bf16.gmra.mxu1 %vm329_vm3, %v6009_v50  ;;  %v1082_v50 = vsel %vm990_vm4, %v1077_v46, %v1081_v47  ;;  %v1087_v52 = vshll.u32 %v6030_v48, 16  ;;  %v6042_v46 = vld [vmem:[%s6198_s23 + $0x1d4] sm:$0xff]  }
  0x64   : > { %5494 = vmatprep.mubr.msk.bf16.mxu0 %vm6141_vm2, %v7615_v1  ;;  %5428 = vmatprep.mubr.msk.bf16.mxu1 %vm6141_vm2, %v7615_v1 }
  0x65   : > { %v1089_v54 = vrot.slane %v1087_v52, 1 }
  0x67   : > { %v1090_v57 = vsel %vm990_vm4, %v1085_v53, %v1089_v54 }
  0x6b   : > { %5495 = vmatmul.mubr.msk.bf16.gmra.mxu0 %vm329_vm3, %v1018_v59  ;;  %5429 = vmatmul.mubr.msk.bf16.gmra.mxu1 %vm329_vm3, %v6011_v58  ;;  %v1091_v58 = vshrl.u32 %v6030_v48, 16  ;;  %v1095_v59 = vshll.u32 %v6032_v55, 16  ;;  %v6041_v48 = vld [vmem:[%s6198_s23 + $0x140] sm:$0xff]  }
  0x6c   : > { %5498 = vmatprep.mubr.msk.bf16.mxu0 %vm6141_vm2, %v7615_v1  ;;  %5432 = vmatprep.mubr.msk.bf16.mxu1 %vm6141_vm2, %v7615_v1 }
  0x6d   : > { %v1093_v60 = vor.u32 %v1091_v58, %v1089_v54  ;;  %v1097_v61 = vrot.slane %v1095_v59, 1  ;;  %v6043_v59 = vld [vmem:[%s6198_s23 + $0x148] sm:$0xff]  }
  0x6f   : > { %v1098_v0 = vsel %vm990_vm4, %v1093_v60, %v1097_v61 }
  0x73   : > { %5499 = vmatmul.mubr.msk.bf16.gmra.mxu0 %vm329_vm3, %v1026_v3  ;;  %5433 = vmatmul.mubr.msk.bf16.gmra.mxu1 %vm329_vm3, %v6013_v2  ;;  %v1099_v2 = vshrl.u32 %v6032_v55, 16  ;;  %v1103_v3 = vshll.u32 %v6034_v62, 16 }
  0x74   : > { %5502 = vmatprep.mubr.msk.bf16.mxu0 %vm6141_vm2, %v7615_v1  ;;  %5436 = vmatprep.mubr.msk.bf16.mxu1 %vm6141_vm2, %v7615_v1 }
  0x75   : > { %v1101_v5 = vor.u32 %v1099_v2, %v1097_v61  ;;  %v1105_v6 = vrot.slane %v1103_v3, 1 }
  0x77   : > { %v1106_v9 = vsel %vm990_vm4, %v1101_v5, %v1105_v6  ;;  %v6046_v5 = vld [vmem:[%s6198_s23 + $0x1e4] sm:$0xff]  }
  0x7b   : > { %5503 = vmatmul.mubr.msk.bf16.gmra.mxu0 %vm329_vm3, %v1034_v11  ;;  %5437 = vmatmul.mubr.msk.bf16.gmra.mxu1 %vm329_vm3, %v6015_v10  ;;  %v1107_v10 = vshrl.u32 %v6034_v62, 16  ;;  %v1111_v11 = vshll.u32 %v6036_v7, 16 }
  0x7c   : > { %5506 = vmatprep.mubr.msk.bf16.mxu0 %vm6141_vm2, %v7615_v1  ;;  %5440 = vmatprep.mubr.msk.bf16.mxu1 %vm6141_vm2, %v7615_v1 }
  0x7d   : > { %v1109_v12 = vor.u32 %v1107_v10, %v1105_v6  ;;  %v1113_v13 = vrot.slane %v1111_v11, 1 }
  0x83   : > { %5507 = vmatmul.mubr.msk.bf16.gmra.mxu0 %vm329_vm3, %v1042_v17  ;;  %5441 = vmatmul.mubr.msk.bf16.gmra.mxu1 %vm329_vm3, %v6017_v16  ;;  %v1114_v16 = vsel %vm990_vm4, %v1109_v12, %v1113_v13  ;;  %v1115_v17 = vshrl.u32 %v6036_v7, 16  ;;  %v6045_v7 = vld [vmem:[%s6198_s23 + $0x150] sm:$0xff]  }
  0x84   : > { %5510 = vmatprep.mubr.msk.bf16.mxu0 %vm6141_vm2, %v7615_v1  ;;  %5444 = vmatprep.mubr.msk.bf16.mxu1 %vm6141_vm2, %v7615_v1 }
  0x85   : > { %v1117_v19 = vor.u32 %v1115_v17, %v1113_v13  ;;  %v6047_v17 = vld [vmem:[%s6198_s23 + $0x158] sm:$0xff]  }
  0x87   : > { %v1122_v23 = vsel %vm990_vm4, %v1117_v19, %v1121_v20 }
  0x8b   : > { %5511 = vmatmul.mubr.msk.bf16.gmra.mxu0 %vm329_vm3, %v1050_v22  ;;  %5445 = vmatmul.mubr.msk.bf16.gmra.mxu1 %vm329_vm3, %v6019_v21  ;;  %v6039_v21 = vld [vmem:[%s6198_s23 + $0x88] ss:$0 sps:$4 sm:$0x11]   ;;  %v6037_v22 = vld [vmem:[%s6198_s23 + $0x80] sm:$0xff]  }
  0x8c   : > { %5514 = vmatprep.mubr.msk.bf16.mxu0 %vm6141_vm2, %v7615_v1  ;;  %5448 = vmatprep.mubr.msk.bf16.mxu1 %vm6141_vm2, %v7615_v1  ;;  %v1127_v25 = vshll.u32 %v6039_v21, 16 }
  0x93   : > { %5515 = vmatmul.mubr.msk.bf16.gmra.mxu0 %vm329_vm3, %v1058_v29  ;;  %5449 = vmatmul.mubr.msk.bf16.gmra.mxu1 %vm329_vm3, %v6021_v28  ;;  %v1125_v28 = vor.u32 %v1123_v24, %v1121_v20  ;;  %v1129_v29 = vrot.slane %v1127_v25, 1  ;;  %v6050_v25 = vld [vmem:[%s6198_s23 + $0x1f4] sm:$0xff]  }
  0x94   : > { %5518 = vmatprep.mubr.msk.bf16.mxu0 %vm6141_vm2, %v7615_v1  ;;  %5452 = vmatprep.mubr.msk.bf16.mxu1 %vm6141_vm2, %v7615_v1 }
  0x9b   : > { %5519 = vmatmul.mubr.msk.bf16.gmra.mxu0 %vm329_vm3, %v1066_v36  ;;  %5453 = vmatmul.mubr.msk.bf16.gmra.mxu1 %vm329_vm3, %v6023_v35  ;;  %v1130_v35 = vsel %vm990_vm4, %v1125_v28, %v1129_v29  ;;  %v6040_v36 = vld [vmem:[%s6198_s23 + $0x138] sm:$0xff]   ;;  %v6049_v29 = vld [vmem:[%s6198_s23 + $0x160] sm:$0xff]  }
  0x9c   : > { %5522 = vmatprep.mubr.msk.bf16.mxu0 %vm6141_vm2, %v7615_v1  ;;  %5456 = vmatprep.mubr.msk.bf16.mxu1 %vm6141_vm2, %v7615_v1 }
  0xa3   : > { %5523 = vmatmul.mubr.msk.bf16.gmra.mxu0 %vm329_vm3, %v1074_v43  ;;  %5457 = vmatmul.mubr.msk.bf16.gmra.mxu1 %vm329_vm3, %v6025_v42  ;;  %v4946_v43 = vld [vmem:[%s7612_s1 + $0xc] sm:$0x3] }
  0xa4   : > { %5526 = vmatprep.mubr.msk.bf16.mxu0 %vm6141_vm2, %v7615_v1  ;;  %5460 = vmatprep.mubr.msk.bf16.mxu1 %vm6141_vm2, %v7615_v1 }
  0xab   : > { %5527 = vmatmul.mubr.msk.bf16.gmra.mxu0 %vm329_vm3, %v1082_v50  ;;  %5461 = vmatmul.mubr.msk.bf16.gmra.mxu1 %vm329_vm3, %v6027_v49  ;;  %v2985_v49 = vand.u32 %v4946_v43, %v6177_v4  ;;  %v6051_v43 = vld [vmem:[%s6198_s23 + $0x168] sm:$0xff]  }
  0xac   : > { %5530 = vmatprep.mubr.msk.bf16.mxu0 %vm6141_vm2, %v7615_v1  ;;  %5464 = vmatprep.mubr.msk.bf16.mxu1 %vm6141_vm2, %v7615_v1 }
  0xb3   : > { %5531 = vmatmul.mubr.msk.bf16.gmra.mxu0 %vm329_vm3, %v1090_v57  ;;  %5465 = vmatmul.mubr.msk.bf16.gmra.mxu1 %vm329_vm3, %v6029_v56  ;;  %v6044_v57 = vld [vmem:[%s6198_s23 + $0x1dc] sm:$0xff]  }
  0xb4   : > { %5534 = vmatprep.mubr.msk.bf16.mxu0 %vm6141_vm2, %v7615_v1  ;;  %5468 = vmatprep.mubr.msk.bf16.mxu1 %vm6141_vm2, %v7615_v1 }
  0xbb   : > { %5535 = vmatmul.mubr.msk.bf16.gmra.mxu0 %vm329_vm3, %v1098_v0  ;;  %5469 = vmatmul.mubr.msk.bf16.gmra.mxu1 %vm329_vm3, %v6031_v63 }
  0xbc   : > { %5538 = vmatprep.mubr.msk.bf16.mxu0 %vm6141_vm2, %v7615_v1  ;;  %5472 = vmatprep.mubr.msk.bf16.mxu1 %vm6141_vm2, %v7615_v1 }
  0xc3   : > { %5539 = vmatmul.mubr.msk.bf16.gmra.mxu0 %vm329_vm3, %v1106_v9  ;;  %5473 = vmatmul.mubr.msk.bf16.gmra.mxu1 %vm329_vm3, %v6033_v8 }
  0xc4   : > { %5542 = vmatprep.mubr.msk.bf16.mxu0 %vm6141_vm2, %v7615_v1  ;;  %5476 = vmatprep.mubr.msk.bf16.mxu1 %vm6141_vm2, %v7615_v1 }
  0xcb   : > { %5543 = vmatmul.mubr.msk.bf16.gmra.mxu0 %vm329_vm3, %v1114_v16  ;;  %5477 = vmatmul.mubr.msk.bf16.gmra.mxu1 %vm329_vm3, %v6035_v15  ;;  %v6048_v15 = vld [vmem:[%s6198_s23 + $0x1ec] sm:$0xff]  }
  0xcc   : > { %5546 = vmatprep.mubr.msk.bf16.mxu0 %vm6141_vm2, %v7615_v1  ;;  %5480 = vmatprep.mubr.msk.bf16.mxu1 %vm6141_vm2, %v7615_v1 }
  0xd3   : > { %v6426_v26 = vpop.f32.mrf.mxu0  ;;  %5547 = vmatmul.mubr.msk.bf16.gmra.mxu0 %vm329_vm3, %v1122_v23  ;;  %v6429_v27 = vpop.f32.mrf.mxu1  ;;  %5481 = vmatmul.mubr.msk.bf16.gmra.mxu1 %vm329_vm3, %v6037_v22 }
  0xd4   : > { %5550 = vmatprep.mubr.msk.bf16.mxu0 %vm6141_vm2, %v7615_v1  ;;  %5556 = vmatprep.mubr.msk.bf16.mxu1 %vm6141_vm2, %v7615_v1 }
  0xd5   : > { %v5348_v30 = vpop.f32.mrf.mxu0  ;;  %v5384_v31 = vpop.f32.mrf.mxu1 }
  0xd7   : > { %v6439_v33 = vpop.f32.mrf.mxu0  ;;  %v6441_v34 = vpop.f32.mrf.mxu1 }
  0xd9   : > { %v5349_v37 = vpop.f32.mrf.mxu0  ;;  %v5385_v39 = vpop.f32.mrf.mxu1 }
  0xda   : > { %v6052_v39 = vld [vmem:[%s6198_s23 + $0x1fc] sm:$0xff]  }
  0xdb   : > { %v6446_v40 = vpop.f32.mrf.mxu0  ;;  %5551 = vmatmul.mubr.msk.bf16.gmra.mxu0 %vm329_vm3, %v1130_v35  ;;  %v6449_v41 = vpop.f32.mrf.mxu1  ;;  %5557 = vmatmul.mubr.msk.bf16.vlgmr.msra.gmra.mxu1 %vm329_vm3, %v6040_v36 }
  0xdc   : > { %5626 = vmatprep.mubr.msk.bf16.mxu0 %vm6141_vm2, %v7615_v1  ;;  %5695 = vmatpush3.bf16.msra.mxu1 %v2463_v38 }
  0xdd   : > { %v5352_v42 = vpop.f32.mrf.mxu0  ;;  %5560 = vmatprep.mubr.msk.bf16.mxu1 %vm6141_vm2, %v7615_v1  ;;  %v5388_v44 = vpop.f32.mrf.mxu1  ;;  %5834 = vmatprep.subr.bf16.mxu1 %v7615_v1 }
  0xdf   : > { %v6460_v45 = vpop.f32.mrf.mxu0  ;;  %v6463_v47 = vpop.f32.mrf.mxu1 }
  0xe1   : > { %v5353_v50 = vpop.f32.mrf.mxu0  ;;  %v5389_v51 = vpop.f32.mrf.mxu1 }
  0xe3   : > { %v6467_v52 = vpop.f32.mrf.mxu0  ;;  %5627 = vmatmul.mubr.msk.bf16.vlgmr.msra.gmra.mxu0 %vm329_vm3, %v6042_v46  ;;  %v6470_v53 = vpop.f32.mrf.mxu1  ;;  %5561 = vmatmul.mubr.msk.bf16.gmra.mxu1 %vm329_vm3, %v6041_v48 }
  0xe4   : > { %5765 = vmatpush3.bf16.msra.mxu0 %v2985_v49  ;;  %5564 = vmatprep.mubr.msk.bf16.mxu1 %vm6141_vm2, %v7615_v1 }
  0xe5   : > { %v5356_v54 = vpop.f32.mrf.mxu0  ;;  %5630 = vmatprep.mubr.msk.bf16.mxu0 %vm6141_vm2, %v7615_v1  ;;  %v5392_v55 = vpop.f32.mrf.mxu1  ;;  %5904 = vmatprep.subr.bf16.mxu0 %v7615_v1 }
  0xe6   : > { %v6054_v55 = vld [vmem:[%s6198_s23 + $0x204] sm:$0xff]  }
  0xe7   : > { %v6478_v56 = vpop.f32.mrf.mxu0  ;;  %v6481_v58 = vpop.f32.mrf.mxu1 }
  0xe9   : > { %v5357_v60 = vpop.f32.mrf.mxu0  ;;  %v5393_v61 = vpop.f32.mrf.mxu1 }
  0xeb   : > { %v6484_v62 = vpop.f32.mrf.mxu0  ;;  %5631 = vmatmul.mubr.msk.bf16.gmra.mxu0 %vm329_vm3, %v6044_v57  ;;  %v6487_v63 = vpop.f32.mrf.mxu1  ;;  %5565 = vmatmul.mubr.msk.bf16.gmra.mxu1 %vm329_vm3, %v6043_v59  ;;  %v6053_v59 = vld [vmem:[%s6198_s23 + $0x170] sm:$0xff]  }
  0xec   : > { %5634 = vmatprep.mubr.msk.bf16.mxu0 %vm6141_vm2, %v7615_v1  ;;  %5568 = vmatprep.mubr.msk.bf16.mxu1 %vm6141_vm2, %v7615_v1 }
  0xed   : > { %v5360_v0 = vpop.f32.mrf.mxu0  ;;  %v5396_v2 = vpop.f32.mrf.mxu1 }
  0xef   : > { %v6494_v3 = vpop.f32.mrf.mxu0  ;;  %v6497_v6 = vpop.f32.mrf.mxu1 }
  0xf1   : > { %v5361_v8 = vpop.f32.mrf.mxu0  ;;  %v5397_v9 = vpop.f32.mrf.mxu1 }
  0xf3   : > { %v6500_v10 = vpop.f32.mrf.mxu0  ;;  %5635 = vmatmul.mubr.msk.bf16.gmra.mxu0 %vm329_vm3, %v6046_v5  ;;  %v6503_v11 = vpop.f32.mrf.mxu1  ;;  %5569 = vmatmul.mubr.msk.bf16.gmra.mxu1 %vm329_vm3, %v6045_v7 }
  0xf4   : > { %5638 = vmatprep.mubr.msk.bf16.mxu0 %vm6141_vm2, %v7615_v1  ;;  %5572 = vmatprep.mubr.msk.bf16.mxu1 %vm6141_vm2, %v7615_v1 }
  0xf5   : > { %v5364_v12 = vpop.f32.mrf.mxu0  ;;  %v5400_v13 = vpop.f32.mrf.mxu1 }
  0xf6   : > { %v6056_v12 = vld [vmem:[%s6198_s23 + $0x20c] sm:$0xff]  }
  0xf7   : > { %v6510_v14 = vpop.f32.mrf.mxu0  ;;  %v6513_v16 = vpop.f32.mrf.mxu1 }
  0xf9   : > { %v5365_v18 = vpop.f32.mrf.mxu0  ;;  %v5401_v19 = vpop.f32.mrf.mxu1 }
  0xfb   : > { %v6516_v20 = vpop.f32.mrf.mxu0  ;;  %5639 = vmatmul.mubr.msk.bf16.gmra.mxu0 %vm329_vm3, %v6048_v15  ;;  %v6519_v21 = vpop.f32.mrf.mxu1  ;;  %5573 = vmatmul.mubr.msk.bf16.gmra.mxu1 %vm329_vm3, %v6047_v17  ;;  %v6055_v15 = vld [vmem:[%s6198_s23 + $0x178] sm:$0xff]  }
  0xfc   : > { %5642 = vmatprep.mubr.msk.bf16.mxu0 %vm6141_vm2, %v7615_v1  ;;  %5576 = vmatprep.mubr.msk.bf16.mxu1 %vm6141_vm2, %v7615_v1 }
  0xfd   : > { %v5368_v22 = vpop.f32.mrf.mxu0  ;;  %v5404_v23 = vpop.f32.mrf.mxu1 }
  0xff   : > { %v6526_v24 = vpop.f32.mrf.mxu0  ;;  %v6529_v28 = vpop.f32.mrf.mxu1 }
 0x101   : > { %v5369_v30 = vpop.f32.mrf.mxu0  ;;  %v5405_v31 = vpop.f32.mrf.mxu1 }
 0x102   : > { %v6058_v31 = vld [vmem:[%s6198_s23 + $0x214] sm:$0xff]  }
 0x103   : > { %v6532_v32 = vpop.f32.mrf.mxu0  ;;  %5643 = vmatmul.mubr.msk.bf16.gmra.mxu0 %vm329_vm3, %v6050_v25  ;;  %v6535_v35 = vpop.f32.mrf.mxu1  ;;  %5577 = vmatmul.mubr.msk.bf16.gmra.mxu1 %vm329_vm3, %v6049_v29 }
 0x104   : > { %5646 = vmatprep.mubr.msk.bf16.mxu0 %vm6141_vm2, %v7615_v1  ;;  %5580 = vmatprep.mubr.msk.bf16.mxu1 %vm6141_vm2, %v7615_v1 }
 0x105   : > { %v5372_v36 = vpop.f32.mrf.mxu0  ;;  %v5408_v37 = vpop.f32.mrf.mxu1 }
 0x107   : > { %v6542_v38 = vpop.f32.mrf.mxu0  ;;  %v6545_v42 = vpop.f32.mrf.mxu1 }
 0x109   : > { %v5373_v44 = vpop.f32.mrf.mxu0  ;;  %v5409_v46 = vpop.f32.mrf.mxu1 }
 0x10b   : > { %v6548_v48 = vpop.f32.mrf.mxu0  ;;  %5647 = vmatmul.mubr.msk.bf16.gmra.mxu0 %vm329_vm3, %v6052_v39  ;;  %v6551_v49 = vpop.f32.mrf.mxu1  ;;  %5581 = vmatmul.mubr.msk.bf16.gmra.mxu1 %vm329_vm3, %v6051_v43  ;;  %v6057_v39 = vld [vmem:[%s6198_s23 + $0x180] sm:$0xff]  }
 0x10c   : > { %5650 = vmatprep.mubr.msk.bf16.mxu0 %vm6141_vm2, %v7615_v1  ;;  %5584 = vmatprep.mubr.msk.bf16.mxu1 %vm6141_vm2, %v7615_v1 }
 0x10d   : > { %v5376_v50 = vpop.f32.mrf.mxu0  ;;  %v5412_v51 = vpop.f32.mrf.mxu1 }
 0x10f   : > { %v6558_v54 = vpop.f32.mrf.mxu0  ;;  %v6561_v57 = vpop.f32.mrf.mxu1 }
 0x111   : > { %v5377_v60 = vpop.f32.mrf.mxu0  ;;  %v5413_v61 = vpop.f32.mrf.mxu1 }
 0x112   : > { %v6060_v61 = vld [vmem:[%s6198_s23 + $0x21c] sm:$0xff]  }
 0x113   : > { %v6564_v0 = vpop.f32.mrf.mxu0  ;;  %5651 = vmatmul.mubr.msk.bf16.gmra.mxu0 %vm329_vm3, %v6054_v55  ;;  %v730_v2 = vpop.f32.mrf.mxu1  ;;  %5585 = vmatmul.mubr.msk.bf16.gmra.mxu1 %vm329_vm3, %v6053_v59 }
 0x114   : > { %5654 = vmatprep.mubr.msk.bf16.mxu0 %vm6141_vm2, %v7615_v1  ;;  %v731_v5 = vadd.f32 %v730_v2, %v6426_v26  ;;  %5588 = vmatprep.mubr.msk.bf16.mxu1 %vm6141_vm2, %v7615_v1 }
 0x115   : > { %v5380_v7 = vpop.f32.mrf.mxu0  ;;  %v5418_v8 = vpop.f32.mrf.mxu1 }
 0x116   : > { %v6059_v7 = vld [vmem:[%s6198_s23 + $0x188] sm:$0xff]  }
 0x117   : > { %v6573_v9 = vpop.f32.mrf.mxu0  ;;  %v733_v13 = vpop.f32.mrf.mxu1 }
 0x118   : > { %v734_v17 = vadd.f32 %v733_v13, %v6439_v33 }
 0x119   : > { %v5381_v18 = vpop.f32.mrf.mxu0  ;;  %v5419_v19 = vpop.f32.mrf.mxu1 }
 0x11b   : > { %v1219_v22 = vpop.f32.mrf.mxu0  ;;  %5655 = vmatmul.mubr.msk.bf16.gmra.mxu0 %vm329_vm3, %v6056_v12  ;;  %v738_v26 = vpop.f32.mrf.mxu1  ;;  %5589 = vmatmul.mubr.msk.bf16.gmra.mxu1 %vm329_vm3, %v6055_v15 }
 0x11c   : > { %v6579_v23 = vadd.f32 %v1219_v22, %v731_v5  ;;  %5658 = vmatprep.mubr.msk.bf16.mxu0 %vm6141_vm2, %v7615_v1  ;;  %v739_v25 = vadd.f32 %v738_v26, %v6446_v40  ;;  %5592 = vmatprep.mubr.msk.bf16.mxu1 %vm6141_vm2, %v7615_v1  ;;  %v6062_v26 = vld [vmem:[%s6198_s23 + $0x224] sm:$0xff]  }
 0x11d   : > { %v5488_v29 = vpop.f32.mrf.mxu0  ;;  %v5422_v33 = vpop.f32.mrf.mxu1 }
 0x11e   : > { %v6061_v33 = vld [vmem:[%s6198_s23 + $0x190] sm:$0xff]  }
 0x11f   : > { %v1222_v30 = vpop.f32.mrf.mxu0  ;;  %v741_v36 = vpop.f32.mrf.mxu1 }
 0x120   : > { %v6588_v37 = vadd.f32 %v1222_v30, %v734_v17  ;;  %v742_v43 = vadd.f32 %v741_v36, %v6460_v45 }
 0x121   : > { %v5489_v44 = vpop.f32.mrf.mxu0  ;;  %v5423_v46 = vpop.f32.mrf.mxu1 }
 0x123   : > { %v1227_v50 = vpop.f32.mrf.mxu0  ;;  %5659 = vmatmul.mubr.msk.bf16.gmra.mxu0 %vm329_vm3, %v6058_v31  ;;  %v746_v40 = vpop.f32.mrf.mxu1  ;;  %5593 = vmatmul.mubr.msk.bf16.gmra.mxu1 %vm329_vm3, %v6057_v39 }
 0x124   : > { %v6593_v51 = vadd.f32 %v1227_v50, %v739_v25  ;;  %5662 = vmatprep.mubr.msk.bf16.mxu0 %vm6141_vm2, %v7615_v1  ;;  %v747_v55 = vadd.f32 %v746_v40, %v6467_v52  ;;  %5596 = vmatprep.mubr.msk.bf16.mxu1 %vm6141_vm2, %v7615_v1  ;;  %v6064_v40 = vld [vmem:[%s6198_s23 + $0x22c] sm:$0xff]  }
 0x125   : > { %v5492_v59 = vpop.f32.mrf.mxu0  ;;  %v5426_v45 = vpop.f32.mrf.mxu1 }
 0x126   : > { %v6063_v45 = vld [vmem:[%s6198_s23 + $0x198] sm:$0xff]  }
 0x127   : > { %v1230_v60 = vpop.f32.mrf.mxu0  ;;  %v749_v2 = vpop.f32.mrf.mxu1 }
 0x128   : > { %v6602_v5 = vadd.f32 %v1230_v60, %v742_v43  ;;  %v750_v8 = vadd.f32 %v749_v2, %v6478_v56 }
 0x129   : > { %v5493_v12 = vpop.f32.mrf.mxu0  ;;  %v5427_v13 = vpop.f32.mrf.mxu1 }
 0x12b   : > { %v1235_v15 = vpop.f32.mrf.mxu0  ;;  %5663 = vmatmul.mubr.msk.bf16.gmra.mxu0 %vm329_vm3, %v6060_v61  ;;  %v754_v52 = vpop.f32.mrf.mxu1  ;;  %5597 = vmatmul.mubr.msk.bf16.gmra.mxu1 %vm329_vm3, %v6059_v7 }
 0x12c   : > { %v6607_v17 = vadd.f32 %v1235_v15, %v747_v55  ;;  %5666 = vmatprep.mubr.msk.bf16.mxu0 %vm6141_vm2, %v7615_v1  ;;  %v755_v18 = vadd.f32 %v754_v52, %v6484_v62  ;;  %5600 = vmatprep.mubr.msk.bf16.mxu1 %vm6141_vm2, %v7615_v1  ;;  %v6066_v52 = vld [vmem:[%s6198_s23 + $0x234] sm:$0xff]  }
 0x12d   : > { %v5496_v19 = vpop.f32.mrf.mxu0  ;;  %v5430_v56 = vpop.f32.mrf.mxu1 }
 0x12e   : > { %v6065_v56 = vld [vmem:[%s6198_s23 + $0x1a0] sm:$0xff]  }
 0x12f   : > { %v1238_v22 = vpop.f32.mrf.mxu0  ;;  %v757_v25 = vpop.f32.mrf.mxu1 }
 0x130   : > { %v6616_v29 = vadd.f32 %v1238_v22, %v750_v8  ;;  %v758_v30 = vadd.f32 %v757_v25, %v6494_v3 }
 0x131   : > { %v5497_v31 = vpop.f32.mrf.mxu0  ;;  %v5431_v36 = vpop.f32.mrf.mxu1 }
 0x133   : > { %v1243_v39 = vpop.f32.mrf.mxu0  ;;  %5667 = vmatmul.mubr.msk.bf16.gmra.mxu0 %vm329_vm3, %v6062_v26  ;;  %v762_v62 = vpop.f32.mrf.mxu1  ;;  %5601 = vmatmul.mubr.msk.bf16.gmra.mxu1 %vm329_vm3, %v6061_v33 }
 0x134   : > { %v6621_v43 = vadd.f32 %v1243_v39, %v755_v18  ;;  %5670 = vmatprep.mubr.msk.bf16.mxu0 %vm6141_vm2, %v7615_v1  ;;  %v763_v44 = vadd.f32 %v762_v62, %v6500_v10  ;;  %5604 = vmatprep.mubr.msk.bf16.mxu1 %vm6141_vm2, %v7615_v1  ;;  %v6068_v62 = vld [vmem:[%s6198_s23 + $0x23c] sm:$0xff]  }
 0x135   : > { %v5500_v46 = vpop.f32.mrf.mxu0  ;;  %v5434_v3 = vpop.f32.mrf.mxu1 }
 0x136   : > { %v6067_v3 = vld [vmem:[%s6198_s23 + $0x1a8] sm:$0xff]  }
 0x137   : > { %v1246_v50 = vpop.f32.mrf.mxu0  ;;  %v765_v55 = vpop.f32.mrf.mxu1 }
 0x138   : > { %v6630_v59 = vadd.f32 %v1246_v50, %v758_v30  ;;  %v766_v60 = vadd.f32 %v765_v55, %v6510_v14 }
 0x139   : > { %v5501_v61 = vpop.f32.mrf.mxu0  ;;  %v5435_v2 = vpop.f32.mrf.mxu1 }
 0x13b   : > { %v1251_v7 = vpop.f32.mrf.mxu0  ;;  %5671 = vmatmul.mubr.msk.bf16.gmra.mxu0 %vm329_vm3, %v6064_v40  ;;  %v770_v10 = vpop.f32.mrf.mxu1  ;;  %5605 = vmatmul.mubr.msk.bf16.gmra.mxu1 %vm329_vm3, %v6063_v45 }
 0x13c   : > { %v6635_v8 = vadd.f32 %v1251_v7, %v763_v44  ;;  %5674 = vmatprep.mubr.msk.bf16.mxu0 %vm6141_vm2, %v7615_v1  ;;  %v771_v12 = vadd.f32 %v770_v10, %v6516_v20  ;;  %5608 = vmatprep.mubr.msk.bf16.mxu1 %vm6141_vm2, %v7615_v1  ;;  %v6070_v10 = vld [vmem:[%s6198_s23 + $0x244] sm:$0xff]  }
 0x13d   : > { %v5504_v13 = vpop.f32.mrf.mxu0  ;;  %v5438_v14 = vpop.f32.mrf.mxu1 }
 0x13e   : > { %v6069_v14 = vld [vmem:[%s6198_s23 + $0x1b0] sm:$0xff]  }
 0x13f   : > { %v1254_v15 = vpop.f32.mrf.mxu0  ;;  %v773_v18 = vpop.f32.mrf.mxu1 }
 0x140   : > { %v6644_v19 = vadd.f32 %v1254_v15, %v766_v60  ;;  %v774_v22 = vadd.f32 %v773_v18, %v6526_v24  ;;  %v6074_v18 = vld [vmem:[%s6198_s23 + $0x138] sm:$0xff]  }
 0x141   : > { %v5505_v26 = vpop.f32.mrf.mxu0  ;;  %v5439_v25 = vpop.f32.mrf.mxu1 }
 0x142   : > { %v2668_v25 = vld [vmem:[%s6198_s23 + $0x8] sm:$0xf] }
 0x143   : > { %v1259_v33 = vpop.f32.mrf.mxu0  ;;  %5675 = vmatmul.mubr.msk.bf16.gmra.mxu0 %vm329_vm3, %v6066_v52  ;;  %v778_v20 = vpop.f32.mrf.mxu1  ;;  %5609 = vmatmul.mubr.msk.bf16.gmra.mxu1 %vm329_vm3, %v6065_v56 }
 0x144   : > { %v6649_v30 = vadd.f32 %v1259_v33, %v771_v12  ;;  %5678 = vmatprep.mubr.msk.bf16.mxu0 %vm6141_vm2, %v7615_v1  ;;  %v779_v31 = vadd.f32 %v778_v20, %v6532_v32  ;;  %5612 = vmatprep.mubr.msk.bf16.mxu1 %vm6141_vm2, %v7615_v1  ;;  %v2669_v33 = vld [vmem:[%s6198_s23 + $0xc] sm:$0xf] }
 0x145   : > { %v5508_v36 = vpop.f32.mrf.mxu0  ;;  %v5442_v24 = vpop.f32.mrf.mxu1 }
 0x146   : > { %v2274_v36 = vshll.u32 %v6074_v18, 16 }
 0x147   : > { %v1262_v39 = vpop.f32.mrf.mxu0  ;;  %v781_v44 = vpop.f32.mrf.mxu1 }
 0x148   : > { %v6658_v46 = vadd.f32 %v1262_v39, %v774_v22  ;;  %v782_v50 = vadd.f32 %v781_v44, %v6542_v38  ;;  %v4947_v44 = vcombine.low %v2668_v25, %v2669_v33  ;;  %v6073_v25 = vld [vmem:[%s6198_s23 + $0x254] sm:$0xff]  }
 0x149   : > { %v5509_v40 = vpop.f32.mrf.mxu0  ;;  %v5443_v55 = vpop.f32.mrf.mxu1 }
 0x14a   : > { %v6071_v40 = vld [vmem:[%s6198_s23 + $0x1b8] sm:$0xff]   ;;  %v2794_v33 = vshrl.u32 %v4947_v44, 16 }
 0x14b   : > { %v1267_v45 = vpop.f32.mrf.mxu0  ;;  %5679 = vmatmul.mubr.msk.bf16.gmra.mxu0 %vm329_vm3, %v6068_v62  ;;  %v786_v32 = vpop.f32.mrf.mxu1  ;;  %5613 = vmatmul.mubr.msk.bf16.gmra.mxu1 %vm329_vm3, %v6067_v3  ;;  %v6072_v62 = vld [vmem:[%s6198_s23 + $0x24c] sm:$0xff]  }
 0x14c   : > { %v6663_v60 = vadd.f32 %v1267_v45, %v779_v31  ;;  %5682 = vmatprep.mubr.msk.bf16.mxu0 %vm6141_vm2, %v7615_v1  ;;  %v787_v61 = vadd.f32 %v786_v32, %v6548_v48  ;;  %5616 = vmatprep.mubr.msk.bf16.mxu1 %vm6141_vm2, %v7615_v1  ;;  %v6075_v31 = vld [vmem:[%s6198_s23 + $0x140] sm:$0xff]   ;;  %v2272_v32 = vshrl.u32 %v6074_v18, 16  ;;  %v6076_v18 = vld [vmem:[%s6198_s23 + $0x148] sm:$0xff]  }
 0x14d   : > { %v5512_v2 = vpop.f32.mrf.mxu0  ;;  %v5446_v38 = vpop.f32.mrf.mxu1 }
 0x14f   : > { %v1270_v7 = vpop.f32.mrf.mxu0  ;;  %v789_v12 = vpop.f32.mrf.mxu1 }
 0x150   : > { %v6672_v13 = vadd.f32 %v1270_v7, %v782_v50  ;;  %v790_v15 = vadd.f32 %v789_v12, %v6558_v54  ;;  %v6696_v7 = vld [vmem:[%s6198_s23 + $0x10] sm:$0xff]  }
 0x151   : > { %v5513_v52 = vpop.f32.mrf.mxu0  ;;  %v5447_v56 = vpop.f32.mrf.mxu1 }
 0x153   : > { %v1275_v48 = vpop.f32.mrf.mxu0  ;;  %5683 = vmatmul.mubr.msk.bf16.gmra.mxu0 %vm329_vm3, %v6070_v10  ;;  %v794_v22 = vpop.f32.mrf.mxu1  ;;  %5617 = vmatmul.mubr.msk.bf16.gmra.mxu1 %vm329_vm3, %v6069_v14  ;;  %v2796_v10 = vshll.u32 %v4947_v44, 16 }
 0x154   : > { %v6678_v26 = vadd.f32 %v1275_v48, %v787_v61  ;;  %5686 = vmatprep.mubr.msk.bf16.mxu0 %vm6141_vm2, %v7615_v1  ;;  %v795_v54 = vadd.f32 %v794_v22, %v6564_v0  ;;  %5620 = vmatprep.mubr.msk.bf16.mxu1 %vm6141_vm2, %v7615_v1  ;;  %v2276_v0 = vrot.slane %v2274_v36, 1  ;;  %v2279_v61 = vshll.u32 %v6075_v31, 16  ;;  %v5017_v48 = vld [vmem:[%s7612_s1 + $0xe] sm:$0x3] }
 0x155   : > { %v5516_v20 = vpop.f32.mrf.mxu0  ;;  %v5450_v24 = vpop.f32.mrf.mxu1 }
 0x156   : > { %v2281_v52 = vrot.slane %v2279_v61, 1  ;;  %v2801_v20 = vshll.u32 %v6696_v7, 16 }
 0x157   : > { %v1278_v39 = vpop.f32.mrf.mxu0  ;;  %v797_v3 = vpop.f32.mrf.mxu1 }
 0x158   : > { %v6690_v50 = vadd.f32 %v1278_v39, %v790_v15  ;;  %v798_v55 = vadd.f32 %v797_v3, %v6573_v9  ;;  %v2277_v15 = vor.u32 %v2276_v0, %v2272_v32  ;;  %v3507_v3 = vand.u32 %v5017_v48, %v6177_v4 }
 0x159   : > { %v5517_v45 = vpop.f32.mrf.mxu0  ;;  %v5451_v2 = vpop.f32.mrf.mxu1 }
 0x15a   : > { %v2287_v45 = vshll.u32 %v6076_v18, 16  ;;  %v2803_v2 = vrot.slane %v2801_v20, 1 }
 0x15b   : > { %v1283_v38 = vpop.f32.mrf.mxu0  ;;  %5687 = vmatmul.mubr.msk.bf16.gmra.mxu0 %vm329_vm3, %v6072_v62  ;;  %v802_v12 = vpop.f32.mrf.mxu1  ;;  %5621 = vmatmul.mubr.msk.bf16.gmra.mxu1 %vm329_vm3, %v6071_v40  ;;  %v2282_v62 = vsel %vm990_vm4, %v2277_v15, %v2281_v52  ;;  %v2283_v40 = vshrl.u32 %v6075_v31, 16  ;;  %v6079_v15 = vld [vmem:[%s6198_s23 + $0x150] sm:$0xff]  }
 0x15c   : > { %v6698_v14 = vadd.f32 %v1283_v38, %v795_v54  ;;  %5690 = vmatprep.mubr.msk.bf16.mxu0 %vm6141_vm2, %v7615_v1  ;;  %5696 = vmatprep.mubr.msk.bf16.mxu1 %vm6141_vm2, %v7615_v1  ;;  %v2798_v54 = vrot.slane %v2796_v10, 1  ;;  %v803_v32 = vadd.f32 %v802_v12, %v6429_v27  ;;  %v6723_v10 = vld [vmem:[%s6198_s23 + $0x18] sm:$0xff]   ;;  %v2289_v12 = vrot.slane %v2287_v45, 1 }
 0x15d   : > { %v5520_v9 = vpop.f32.mrf.mxu0  ;;  %v5454_v56 = vpop.f32.mrf.mxu1  ;;  %v2285_v27 = vor.u32 %v2283_v40, %v2281_v52  ;;  %v2809_v52 = vshll.u32 %v6723_v10, 16  ;;  %v2291_v40 = vshrl.u32 %v6076_v18, 16  ;;  %v2295_v45 = vshll.u32 %v6079_v15, 16 }
 0x15e   : > { %v2799_v44 = vor.u32 %v2798_v54, %v2794_v33  ;;  %v5053_v9 = vld [vmem:[%s7612_s1 + $0x10] sm:$0x3] }
 0x15f   : > { %v1286_v22 = vpop.f32.mrf.mxu0  ;;  %v805_v36 = vpop.f32.mrf.mxu1  ;;  %v3806_v20 = vand.u32 %v5053_v9, %v6177_v4  ;;  %v2297_v18 = vrot.slane %v2295_v45, 1 }
 0x160   : > { %v6711_v24 = vadd.f32 %v1286_v22, %v798_v55  ;;  %v806_v56 = vadd.f32 %v805_v36, %v6441_v34 }
 0x161   : > { %v5521_v39 = vpop.f32.mrf.mxu0  ;;  %v5455_v0 = vpop.f32.mrf.mxu1 }
 0x162   : > { %v2805_v39 = vshrl.u32 %v6696_v7, 16  ;;  %v2811_v7 = vrot.slane %v2809_v52, 1 }
 0x163   : > { %v1291_v61 = vpop.f32.mrf.mxu0  ;;  %5691 = vmatmul.mubr.msk.bf16.gmra.mxu0 %vm329_vm3, %v6073_v25  ;;  %v810_v38 = vpop.f32.mrf.mxu1  ;;  %5697 = vmatmul.mubr.msk.bf16.vlgmr.msra.gmra.mxu1 %vm329_vm3, %v2282_v62  ;;  %v2804_v25 = vsel %vm990_vm4, %v2799_v44, %v2803_v2  ;;  %v6745_v44 = vld [vmem:[%s6198_s23 + $0x20] sm:$0xff]  }
 0x164   : > { %v6717_v55 = vadd.f32 %v1291_v61, %v803_v32  ;;  %5766 = vmatprep.mubr.msk.bf16.mxu0 %vm6141_vm2, %v7615_v1  ;;  %5835 = vmatpush3.bf16.msra.mxu1 %v3507_v3  ;;  %v2290_v3 = vsel %vm990_vm4, %v2285_v27, %v2289_v12  ;;  %v811_v34 = vadd.f32 %v810_v38, %v6449_v41  ;;  %v6081_v38 = vld [vmem:[%s6198_s23 + $0x158] sm:$0xff]  }
 0x165   : > { %v5524_v31 = vpop.f32.mrf.mxu0  ;;  %5700 = vmatprep.mubr.msk.bf16.mxu1 %vm6141_vm2, %v7615_v1  ;;  %v5458_v48 = vpop.f32.mrf.mxu1  ;;  %v2807_v4 = vor.u32 %v2805_v39, %v2803_v2  ;;  %v2293_v41 = vor.u32 %v2291_v40, %v2289_v12  ;;  %v2299_v12 = vshrl.u32 %v6079_v15, 16 }
 0x167   : > { %v1294_v22 = vpop.f32.mrf.mxu0  ;;  %v813_v33 = vpop.f32.mrf.mxu1  ;;  %v2812_v2 = vsel %vm990_vm4, %v2807_v4, %v2811_v7  ;;  %v2298_v52 = vsel %vm990_vm4, %v2293_v41, %v2297_v18  ;;  %v6083_v4 = vld [vmem:[%s6198_s23 + $0x160] sm:$0xff]  }
 0x168   : > { %v6733_v54 = vadd.f32 %v1294_v22, %v806_v56  ;;  %v814_v27 = vadd.f32 %v813_v33, %v6463_v47 }
 0x169   : > { %v5525_v62 = vpop.f32.mrf.mxu0  ;;  %v5459_v36 = vpop.f32.mrf.mxu1 }
 0x16a   : > { %v2303_v62 = vshll.u32 %v6081_v38, 16 }
 0x16b   : > { %v1299_v32 = vpop.f32.mrf.mxu0  ;;  %5767 = vmatmul.mubr.msk.bf16.vlgmr.msra.gmra.mxu0 %vm329_vm3, %v2804_v25  ;;  %v818_v0 = vpop.f32.mrf.mxu1  ;;  %5701 = vmatmul.mubr.msk.bf16.gmra.mxu1 %vm329_vm3, %v2290_v3  ;;  %v2813_v25 = vshrl.u32 %v6723_v10, 16 }
 0x16c   : > { %v6741_v61 = vadd.f32 %v1299_v32, %v811_v34  ;;  %5905 = vmatpush3.bf16.msra.mxu0 %v3806_v20  ;;  %5704 = vmatprep.mubr.msk.bf16.mxu1 %vm6141_vm2, %v7615_v1  ;;  %v2817_v20 = vshll.u32 %v6745_v44, 16  ;;  %v819_v47 = vadd.f32 %v818_v0, %v6470_v53  ;;  %v6767_v32 = vld [vmem:[%s6198_s23 + $0x28] sm:$0xff]   ;;  %v2301_v53 = vor.u32 %v2299_v12, %v2297_v18 }
 0x16d   : > { %v5528_v31 = vpop.f32.mrf.mxu0  ;;  %5770 = vmatprep.mubr.msk.bf16.mxu0 %vm6141_vm2, %v7615_v1  ;;  %v5462_v9 = vpop.f32.mrf.mxu1  ;;  %v2815_v34 = vor.u32 %v2813_v25, %v2811_v7  ;;  %v2305_v0 = vrot.slane %v2303_v62, 1  ;;  %v2821_v7 = vshrl.u32 %v6745_v44, 16  ;;  %v2825_v25 = vshll.u32 %v6767_v32, 16 }
 0x16e   : > { %v2819_v36 = vrot.slane %v2817_v20, 1  ;;  %v2307_v18 = vshrl.u32 %v6081_v38, 16 }
 0x16f   : > { %v1302_v56 = vpop.f32.mrf.mxu0  ;;  %v821_v48 = vpop.f32.mrf.mxu1 }
 0x170   : > { %v6753_v22 = vadd.f32 %v1302_v56, %v814_v27  ;;  %v822_v31 = vadd.f32 %v821_v48, %v6481_v58 }
 0x171   : > { %v5529_v39 = vpop.f32.mrf.mxu0  ;;  %v5463_v33 = vpop.f32.mrf.mxu1 }
 0x172   : > { %v2306_v39 = vsel %vm990_vm4, %v2301_v53, %v2305_v0  ;;  %v2823_v33 = vor.u32 %v2821_v7, %v2819_v36 }
 0x173   : > { %v1307_v3 = vpop.f32.mrf.mxu0  ;;  %5771 = vmatmul.mubr.msk.bf16.gmra.mxu0 %vm329_vm3, %v2812_v2  ;;  %v826_v40 = vpop.f32.mrf.mxu1  ;;  %5705 = vmatmul.mubr.msk.bf16.gmra.mxu1 %vm329_vm3, %v2298_v52  ;;  %v2820_v2 = vsel %vm990_vm4, %v2815_v34, %v2819_v36  ;;  %v2311_v52 = vshll.u32 %v6083_v4, 16  ;;  %v6787_v34 = vld [vmem:[%s6198_s23 + $0x30] sm:$0xff]   ;;  %v2829_v36 = vshrl.u32 %v6767_v32, 16 }
 0x174   : > { %v6761_v45 = vadd.f32 %v1307_v3, %v819_v47  ;;  %5774 = vmatprep.mubr.msk.bf16.mxu0 %vm6141_vm2, %v7615_v1  ;;  %5708 = vmatprep.mubr.msk.bf16.mxu1 %vm6141_vm2, %v7615_v1  ;;  %v827_v58 = vadd.f32 %v826_v40, %v6487_v63  ;;  %v2827_v3 = vrot.slane %v2825_v25, 1  ;;  %v2309_v63 = vor.u32 %v2307_v18, %v2305_v0 }
 0x175   : > { %v5532_v15 = vpop.f32.mrf.mxu0  ;;  %v5466_v41 = vpop.f32.mrf.mxu1  ;;  %v2313_v40 = vrot.slane %v2311_v52, 1  ;;  %v2833_v7 = vshll.u32 %v6787_v34, 16  ;;  %v2315_v0 = vshrl.u32 %v6083_v4, 16 }
 0x176   : > { %v6085_v15 = vld [vmem:[%s6198_s23 + $0x168] sm:$0xff]  }
 0x177   : > { %v1310_v27 = vpop.f32.mrf.mxu0  ;;  %v829_v9 = vpop.f32.mrf.mxu1  ;;  %v2319_v18 = vshll.u32 %v6085_v15, 16 }
 0x178   : > { %v6773_v56 = vadd.f32 %v1310_v27, %v822_v31  ;;  %v830_v53 = vadd.f32 %v829_v9, %v6497_v6 }
 0x179   : > { %v5533_v20 = vpop.f32.mrf.mxu0  ;;  %v5467_v48 = vpop.f32.mrf.mxu1 }
 0x17a   : > { %v2828_v20 = vsel %vm990_vm4, %v2823_v33, %v2827_v3  ;;  %v2835_v33 = vrot.slane %v2833_v7, 1 }
 0x17b   : > { %v1315_v12 = vpop.f32.mrf.mxu0  ;;  %5775 = vmatmul.mubr.msk.bf16.gmra.mxu0 %vm329_vm3, %v2820_v2  ;;  %v834_v62 = vpop.f32.mrf.mxu1  ;;  %5709 = vmatmul.mubr.msk.bf16.gmra.mxu1 %vm329_vm3, %v2306_v39  ;;  %v2314_v39 = vsel %vm990_vm4, %v2309_v63, %v2313_v40  ;;  %v6087_v63 = vld [vmem:[%s6198_s23 + $0x170] sm:$0xff]  }
 0x17c   : > { %v6781_v47 = vadd.f32 %v1315_v12, %v827_v58  ;;  %5778 = vmatprep.mubr.msk.bf16.mxu0 %vm6141_vm2, %v7615_v1  ;;  %5712 = vmatprep.mubr.msk.bf16.mxu1 %vm6141_vm2, %v7615_v1  ;;  %v835_v6 = vadd.f32 %v834_v62, %v6503_v11  ;;  %v2831_v12 = vor.u32 %v2829_v36, %v2827_v3  ;;  %v2321_v62 = vrot.slane %v2319_v18, 1 }
 0x17d   : > { %v5536_v38 = vpop.f32.mrf.mxu0  ;;  %v5470_v31 = vpop.f32.mrf.mxu1  ;;  %v2317_v11 = vor.u32 %v2315_v0, %v2313_v40  ;;  %v2837_v3 = vshrl.u32 %v6787_v34, 16  ;;  %v2323_v40 = vshrl.u32 %v6085_v15, 16  ;;  %v2327_v0 = vshll.u32 %v6087_v63, 16 }
 0x17e   : > { %v6807_v38 = vld [vmem:[%s6198_s23 + $0x38] sm:$0xff]  }
 0x17f   : > { %v1318_v41 = vpop.f32.mrf.mxu0  ;;  %v837_v27 = vpop.f32.mrf.mxu1  ;;  %v2841_v36 = vshll.u32 %v6807_v38, 16 }
 0x180   : > { %v6793_v2 = vadd.f32 %v1318_v41, %v830_v53  ;;  %v838_v53 = vadd.f32 %v837_v27, %v6513_v16 }
 0x181   : > { %v5537_v25 = vpop.f32.mrf.mxu0  ;;  %v5471_v9 = vpop.f32.mrf.mxu1 }
 0x183   : > { %v1323_v52 = vpop.f32.mrf.mxu0  ;;  %5779 = vmatmul.mubr.msk.bf16.gmra.mxu0 %vm329_vm3, %v2828_v20  ;;  %v842_v58 = vpop.f32.mrf.mxu1  ;;  %5713 = vmatmul.mubr.msk.bf16.gmra.mxu1 %vm329_vm3, %v2314_v39  ;;  %v2836_v39 = vsel %vm990_vm4, %v2831_v12, %v2835_v33  ;;  %v2839_v12 = vor.u32 %v2837_v3, %v2835_v33  ;;  %v2845_v33 = vshrl.u32 %v6807_v38, 16 }
 0x184   : > { %v6801_v48 = vadd.f32 %v1323_v52, %v835_v6  ;;  %5782 = vmatprep.mubr.msk.bf16.mxu0 %vm6141_vm2, %v7615_v1  ;;  %5716 = vmatprep.mubr.msk.bf16.mxu1 %vm6141_vm2, %v7615_v1  ;;  %v2322_v6 = vsel %vm990_vm4, %v2317_v11, %v2321_v62  ;;  %v843_v16 = vadd.f32 %v842_v58, %v6519_v21  ;;  %v6827_v11 = vld [vmem:[%s6198_s23 + $0x40] sm:$0xff]   ;;  %v2329_v58 = vrot.slane %v2327_v0, 1 }
 0x185   : > { %v5540_v4 = vpop.f32.mrf.mxu0  ;;  %v5474_v31 = vpop.f32.mrf.mxu1  ;;  %v2325_v21 = vor.u32 %v2323_v40, %v2321_v62  ;;  %v2849_v3 = vshll.u32 %v6827_v11, 16  ;;  %v2331_v62 = vshrl.u32 %v6087_v63, 16 }
 0x186   : > { %v2843_v4 = vrot.slane %v2841_v36, 1 }
 0x187   : > { %v1326_v41 = vpop.f32.mrf.mxu0  ;;  %v845_v20 = vpop.f32.mrf.mxu1 }
 0x188   : > { %v6813_v25 = vadd.f32 %v1326_v41, %v838_v53  ;;  %v6089_v53 = vld [vmem:[%s6198_s23 + $0x178] sm:$0xff]   ;;  %v846_v31 = vadd.f32 %v845_v20, %v6529_v28 }
 0x189   : > { %v5541_v7 = vpop.f32.mrf.mxu0  ;;  %v5475_v27 = vpop.f32.mrf.mxu1  ;;  %v2335_v40 = vshll.u32 %v6089_v53, 16 }
 0x18a   : > { %v2330_v27 = vsel %vm990_vm4, %v2325_v21, %v2329_v58  ;;  %v6847_v21 = vld [vmem:[%s6198_s23 + $0x48] sm:$0xff]  }
 0x18b   : > { %v1331_v18 = vpop.f32.mrf.mxu0  ;;  %5783 = vmatmul.mubr.msk.bf16.gmra.mxu0 %vm329_vm3, %v2836_v39  ;;  %v850_v9 = vpop.f32.mrf.mxu1  ;;  %5717 = vmatmul.mubr.msk.bf16.gmra.mxu1 %vm329_vm3, %v2322_v6 }
 0x18c   : > { %v6821_v52 = vadd.f32 %v1331_v18, %v843_v16  ;;  %5786 = vmatprep.mubr.msk.bf16.mxu0 %vm6141_vm2, %v7615_v1  ;;  %5720 = vmatprep.mubr.msk.bf16.mxu1 %vm6141_vm2, %v7615_v1  ;;  %v2844_v16 = vsel %vm990_vm4, %v2839_v12, %v2843_v4  ;;  %v851_v28 = vadd.f32 %v850_v9, %v6535_v35  ;;  %v2337_v9 = vrot.slane %v2335_v40, 1 }
 0x18d   : > { %v5544_v15 = vpop.f32.mrf.mxu0  ;;  %v5478_v41 = vpop.f32.mrf.mxu1  ;;  %v2847_v12 = vor.u32 %v2845_v33, %v2843_v4  ;;  %v2333_v35 = vor.u32 %v2331_v62, %v2329_v58  ;;  %v2853_v4 = vshrl.u32 %v6827_v11, 16  ;;  %v2857_v33 = vshll.u32 %v6847_v21, 16 }
 0x18e   : > { %v6091_v41 = vld [vmem:[%s6198_s23 + $0x180] sm:$0xff]   ;;  %v2339_v58 = vshrl.u32 %v6089_v53, 16 }
 0x18f   : > { %v1334_v39 = vpop.f32.mrf.mxu0  ;;  %v853_v7 = vpop.f32.mrf.mxu1  ;;  %v2343_v62 = vshll.u32 %v6091_v41, 16 }
 0x190   : > { %v6833_v6 = vadd.f32 %v1334_v39, %v846_v31  ;;  %v2851_v31 = vrot.slane %v2849_v3, 1  ;;  %v854_v39 = vadd.f32 %v853_v7, %v6545_v42 }
 0x191   : > { %v5545_v36 = vpop.f32.mrf.mxu0  ;;  %v5479_v20 = vpop.f32.mrf.mxu1 }
 0x192   : > { %v2852_v20 = vsel %vm990_vm4, %v2847_v12, %v2851_v31 }
 0x193   : > { %v1339_v0 = vpop.f32.mrf.mxu0  ;;  %5787 = vmatmul.mubr.msk.bf16.gmra.mxu0 %vm329_vm3, %v2844_v16  ;;  %v858_v18 = vpop.f32.mrf.mxu1  ;;  %5721 = vmatmul.mubr.msk.bf16.gmra.mxu1 %vm329_vm3, %v2330_v27 }
 0x194   : > { %v6841_v15 = vadd.f32 %v1339_v0, %v851_v28  ;;  %5790 = vmatprep.mubr.msk.bf16.mxu0 %vm6141_vm2, %v7615_v1  ;;  %5724 = vmatprep.mubr.msk.bf16.mxu1 %vm6141_vm2, %v7615_v1  ;;  %v2338_v0 = vsel %vm990_vm4, %v2333_v35, %v2337_v9  ;;  %v859_v40 = vadd.f32 %v858_v18, %v6551_v49  ;;  %v6867_v35 = vld [vmem:[%s6198_s23 + $0x50] sm:$0xff]  }
 0x195   : > { %v5548_v63 = vpop.f32.mrf.mxu0  ;;  %v5482_v16 = vpop.f32.mrf.mxu1  ;;  %v2341_v18 = vor.u32 %v2339_v58, %v2337_v9  ;;  %v2347_v58 = vshrl.u32 %v6091_v41, 16 }
 0x196   : > { %v2859_v16 = vrot.slane %v2857_v33, 1 }
 0x197   : > { %v1342_v36 = vpop.f32.mrf.mxu0  ;;  %v861_v28 = vpop.f32.mrf.mxu1 }
 0x198   : > { %v6853_v27 = vadd.f32 %v1342_v36, %v854_v39  ;;  %v2855_v39 = vor.u32 %v2853_v4, %v2851_v31  ;;  %v2345_v36 = vrot.slane %v2343_v62, 1  ;;  %v2861_v4 = vshrl.u32 %v6847_v21, 16 }
 0x199   : > { %v5549_v3 = vpop.f32.mrf.mxu0  ;;  %v5483_v42 = vpop.f32.mrf.mxu1 }
 0x19a   : > { %v862_v3 = vadd.f32 %v861_v28, %v6561_v57  ;;  %v2860_v31 = vsel %vm990_vm4, %v2855_v39, %v2859_v16  ;;  %v2346_v9 = vsel %vm990_vm4, %v2341_v18, %v2345_v36  ;;  %v2863_v39 = vor.u32 %v2861_v4, %v2859_v16 }
 0x19b   : > { %v1347_v7 = vpop.f32.mrf.mxu0  ;;  %5791 = vmatmul.mubr.msk.bf16.gmra.mxu0 %vm329_vm3, %v2852_v20  ;;  %v1598_v12 = vpop.f32.mrf.mxu1  ;;  %5725 = vmatmul.mubr.msk.bf16.gmra.mxu1 %vm329_vm3, %v2338_v0  ;;  %v6093_v20 = vld [vmem:[%s6198_s23 + $0x188] sm:$0xff]   ;;  %v2869_v16 = vshrl.u32 %v6867_v35, 16 }
 0x19c   : > { %v6861_v63 = vadd.f32 %v1347_v7, %v859_v40  ;;  %5794 = vmatprep.mubr.msk.bf16.mxu0 %vm6141_vm2, %v7615_v1  ;;  %v1733_v53 = vadd.f32 %v1598_v12, %v6579_v23  ;;  %5728 = vmatprep.mubr.msk.bf16.mxu1 %vm6141_vm2, %v7615_v1  ;;  %v2865_v23 = vshll.u32 %v6867_v35, 16  ;;  %v2351_v62 = vshll.u32 %v6093_v20, 16 }
 0x19d   : > { %v5552_v49 = vpop.f32.mrf.mxu0  ;;  %v5558_v40 = vpop.f32.mrf.mxu1 }
 0x19e   : > { %v6888_v40 = vld [vmem:[%s6198_s23 + $0x58] sm:$0xff]  }
 0x19f   : > { %v1350_v0 = vpop.f32.mrf.mxu0  ;;  %v1601_v7 = vpop.f32.mrf.mxu1  ;;  %v2873_v4 = vshll.u32 %v6888_v40, 16 }
 0x1a0   : > { %v6874_v42 = vadd.f32 %v1350_v0, %v862_v3  ;;  %v1734_v33 = vadd.f32 %v1601_v7, %v6588_v37  ;;  %v2867_v37 = vrot.slane %v2865_v23, 1  ;;  %v2349_v0 = vor.u32 %v2347_v58, %v2345_v36 }
 0x1a1   : > { %v5553_v12 = vpop.f32.mrf.mxu0  ;;  %v5559_v57 = vpop.f32.mrf.mxu1  ;;  %v2353_v7 = vrot.slane %v2351_v62, 1  ;;  %v2355_v36 = vshrl.u32 %v6093_v20, 16 }
 0x1a3   : > { %v1977_v28 = vpop.f32.mrf.mxu0  ;;  %5795 = vmatmul.mubr.msk.bf16.gmra.mxu0 %vm329_vm3, %v2860_v31  ;;  %v1606_v49 = vpop.f32.mrf.mxu1  ;;  %5729 = vmatmul.mubr.msk.bf16.gmra.mxu1 %vm329_vm3, %v2346_v9  ;;  %v6095_v31 = vld [vmem:[%s6198_s23 + $0x190] sm:$0xff]  }
 0x1a4   : > { %v6882_v3 = vadd.f32 %v1977_v28, %v1733_v53  ;;  %5798 = vmatprep.mubr.msk.bf16.mxu0 %vm6141_vm2, %v7615_v1  ;;  %v1735_v41 = vadd.f32 %v1606_v49, %v6593_v51  ;;  %5732 = vmatprep.mubr.msk.bf16.mxu1 %vm6141_vm2, %v7615_v1  ;;  %v2868_v28 = vsel %vm990_vm4, %v2863_v39, %v2867_v37  ;;  %v2359_v58 = vshll.u32 %v6095_v31, 16 }
 0x1a5   : > { %v5628_v18 = vpop.f32.mrf.mxu0  ;;  %v5562_v53 = vpop.f32.mrf.mxu1  ;;  %v2354_v49 = vsel %vm990_vm4, %v2349_v0, %v2353_v7  ;;  %v2871_v39 = vor.u32 %v2869_v16, %v2867_v37  ;;  %v2877_v37 = vshrl.u32 %v6888_v40, 16 }
 0x1a7   : > { %v1980_v12 = vpop.f32.mrf.mxu0  ;;  %v1609_v57 = vpop.f32.mrf.mxu1 }
 0x1a8   : > { %v6894_v9 = vadd.f32 %v1980_v12, %v1734_v33  ;;  %v1736_v51 = vadd.f32 %v1609_v57, %v6602_v5  ;;  %v2875_v5 = vrot.slane %v2873_v4, 1  ;;  %v6908_v12 = vld [vmem:[%s6198_s23 + $0x60] sm:$0xff]   ;;  %v2357_v57 = vor.u32 %v2355_v36, %v2353_v7 }
 0x1a9   : > { %v5629_v23 = vpop.f32.mrf.mxu0  ;;  %v5563_v62 = vpop.f32.mrf.mxu1  ;;  %v2881_v16 = vshll.u32 %v6908_v12, 16  ;;  %v2363_v7 = vshrl.u32 %v6095_v31, 16 }
 0x1aa   : > { %v6097_v23 = vld [vmem:[%s6198_s23 + $0x198] sm:$0xff]  }
 0x1ab   : > { %v1985_v18 = vpop.f32.mrf.mxu0  ;;  %5799 = vmatmul.mubr.msk.bf16.gmra.mxu0 %vm329_vm3, %v2868_v28  ;;  %v1614_v33 = vpop.f32.mrf.mxu1  ;;  %5733 = vmatmul.mubr.msk.bf16.gmra.mxu1 %vm329_vm3, %v2354_v49  ;;  %v2361_v28 = vrot.slane %v2359_v58, 1  ;;  %v2367_v36 = vshll.u32 %v6097_v23, 16 }
 0x1ac   : > { %v6902_v53 = vadd.f32 %v1985_v18, %v1735_v41  ;;  %5802 = vmatprep.mubr.msk.bf16.mxu0 %vm6141_vm2, %v7615_v1  ;;  %v1737_v20 = vadd.f32 %v1614_v33, %v6607_v17  ;;  %5736 = vmatprep.mubr.msk.bf16.mxu1 %vm6141_vm2, %v7615_v1 }
 0x1ad   : > { %v5632_v0 = vpop.f32.mrf.mxu0  ;;  %v5566_v41 = vpop.f32.mrf.mxu1  ;;  %v2362_v33 = vsel %vm990_vm4, %v2357_v57, %v2361_v28 }
 0x1ae   : > { %7618 = vst [vmem:[#allocation2_spill] sm:$0xff] %v6902_v53  ;;  %v2876_v53 = vsel %vm990_vm4, %v2871_v39, %v2875_v5  ;;  %v2879_v39 = vor.u32 %v2877_v37, %v2875_v5  ;;  %v2885_v5 = vshrl.u32 %v6908_v12, 16 }
 0x1af   : > { %v1988_v62 = vpop.f32.mrf.mxu0  ;;  %v1617_v18 = vpop.f32.mrf.mxu1 }
 0x1b0   : > { %v6914_v49 = vadd.f32 %v1988_v62, %v1736_v51  ;;  %v1738_v17 = vadd.f32 %v1617_v18, %v6616_v29  ;;  %v2883_v29 = vrot.slane %v2881_v16, 1  ;;  %v6928_v62 = vld [vmem:[%s6198_s23 + $0x68] sm:$0xff]   ;;  %v2365_v18 = vor.u32 %v2363_v7, %v2361_v28 }
 0x1b1   : > { %v5633_v4 = vpop.f32.mrf.mxu0  ;;  %v5567_v58 = vpop.f32.mrf.mxu1  ;;  %v2889_v37 = vshll.u32 %v6928_v62, 16  ;;  %v2371_v28 = vshrl.u32 %v6097_v23, 16 }
 0x1b2   : > { %v6099_v4 = vld [vmem:[%s6198_s23 + $0x1a0] sm:$0xff]  }
 0x1b3   : > { %v1993_v0 = vpop.f32.mrf.mxu0  ;;  %5803 = vmatmul.mubr.msk.bf16.gmra.mxu0 %vm329_vm3, %v2876_v53  ;;  %v1622_v51 = vpop.f32.mrf.mxu1  ;;  %5737 = vmatmul.mubr.msk.bf16.gmra.mxu1 %vm329_vm3, %v2362_v33  ;;  %v2369_v53 = vrot.slane %v2367_v36, 1  ;;  %v2375_v7 = vshll.u32 %v6099_v4, 16 }
 0x1b4   : > { %v6922_v41 = vadd.f32 %v1993_v0, %v1737_v20  ;;  %5806 = vmatprep.mubr.msk.bf16.mxu0 %vm6141_vm2, %v7615_v1  ;;  %v1739_v31 = vadd.f32 %v1622_v51, %v6621_v43  ;;  %5740 = vmatprep.mubr.msk.bf16.mxu1 %vm6141_vm2, %v7615_v1 }
 0x1b5   : > { %v5636_v57 = vpop.f32.mrf.mxu0  ;;  %v5570_v20 = vpop.f32.mrf.mxu1  ;;  %v2370_v51 = vsel %vm990_vm4, %v2365_v18, %v2369_v53 }
 0x1b6   : > { %7619 = vst [vmem:[#allocation3_spill] sm:$0xff] %v6922_v41  ;;  %v2884_v41 = vsel %vm990_vm4, %v2879_v39, %v2883_v29  ;;  %v2887_v39 = vor.u32 %v2885_v5, %v2883_v29  ;;  %v2893_v29 = vshrl.u32 %v6928_v62, 16 }
 0x1b7   : > { %v1996_v58 = vpop.f32.mrf.mxu0  ;;  %v1625_v0 = vpop.f32.mrf.mxu1 }
 0x1b8   : > { %v6934_v33 = vadd.f32 %v1996_v58, %v1738_v17  ;;  %v1740_v43 = vadd.f32 %v1625_v0, %v6630_v59  ;;  %v2891_v59 = vrot.slane %v2889_v37, 1  ;;  %v6948_v58 = vld [vmem:[%s6198_s23 + $0x70] sm:$0xff]   ;;  %v2373_v0 = vor.u32 %v2371_v28, %v2369_v53 }
 0x1b9   : > { %v5637_v16 = vpop.f32.mrf.mxu0  ;;  %v5571_v36 = vpop.f32.mrf.mxu1  ;;  %v2897_v5 = vshll.u32 %v6948_v58, 16  ;;  %v2379_v53 = vshrl.u32 %v6099_v4, 16 }
 0x1ba   : > { %v6101_v16 = vld [vmem:[%s6198_s23 + $0x1a8] sm:$0xff]  }
 0x1bb   : > { %v2001_v57 = vpop.f32.mrf.mxu0  ;;  %5807 = vmatmul.mubr.msk.bf16.gmra.mxu0 %vm329_vm3, %v2884_v41  ;;  %v1630_v17 = vpop.f32.mrf.mxu1  ;;  %5741 = vmatmul.mubr.msk.bf16.gmra.mxu1 %vm329_vm3, %v2370_v51  ;;  %v2377_v41 = vrot.slane %v2375_v7, 1  ;;  %v2383_v28 = vshll.u32 %v6101_v16, 16 }
 0x1bc   : > { %v6942_v20 = vadd.f32 %v2001_v57, %v1739_v31  ;;  %5810 = vmatprep.mubr.msk.bf16.mxu0 %vm6141_vm2, %v7615_v1  ;;  %v1741_v23 = vadd.f32 %v1630_v17, %v6635_v8  ;;  %5744 = vmatprep.mubr.msk.bf16.mxu1 %vm6141_vm2, %v7615_v1 }
 0x1bd   : > { %v5640_v18 = vpop.f32.mrf.mxu0  ;;  %v5574_v31 = vpop.f32.mrf.mxu1  ;;  %v2378_v17 = vsel %vm990_vm4, %v2373_v0, %v2377_v41 }
 0x1be   : > { %7620 = vst [vmem:[#allocation4_spill] sm:$0xff] %v6942_v20  ;;  %v2892_v20 = vsel %vm990_vm4, %v2887_v39, %v2891_v59  ;;  %v2895_v39 = vor.u32 %v2893_v29, %v2891_v59  ;;  %v2901_v59 = vshrl.u32 %v6948_v58, 16 }
 0x1bf   : > { %v2004_v36 = vpop.f32.mrf.mxu0  ;;  %v1633_v57 = vpop.f32.mrf.mxu1 }
 0x1c0   : > { %v6954_v51 = vadd.f32 %v2004_v36, %v1740_v43  ;;  %v1742_v8 = vadd.f32 %v1633_v57, %v6644_v19  ;;  %v2899_v19 = vrot.slane %v2897_v5, 1  ;;  %v6968_v36 = vld [vmem:[%s6198_s23 + $0x78] sm:$0xff]   ;;  %v2381_v57 = vor.u32 %v2379_v53, %v2377_v41 }
 0x1c1   : > { %v5641_v37 = vpop.f32.mrf.mxu0  ;;  %v5575_v7 = vpop.f32.mrf.mxu1  ;;  %7622 = vst [vmem:[#allocation6_spill] sm:$0xff] %v6968_v36  ;;  %v2905_v29 = vshll.u32 %v6968_v36, 16  ;;  %v2387_v41 = vshrl.u32 %v6101_v16, 16 }
 0x1c2   : > { %v6103_v37 = vld [vmem:[%s6198_s23 + $0x1b0] sm:$0xff]  }
 0x1c3   : > { %v2009_v18 = vpop.f32.mrf.mxu0  ;;  %5811 = vmatmul.mubr.msk.bf16.gmra.mxu0 %vm329_vm3, %v2892_v20  ;;  %v1638_v43 = vpop.f32.mrf.mxu1  ;;  %5745 = vmatmul.mubr.msk.bf16.gmra.mxu1 %vm329_vm3, %v2378_v17  ;;  %v2385_v20 = vrot.slane %v2383_v28, 1  ;;  %v2391_v53 = vshll.u32 %v6103_v37, 16 }
 0x1c4   : > { %v6962_v31 = vadd.f32 %v2009_v18, %v1741_v23  ;;  %5814 = vmatprep.mubr.msk.bf16.mxu0 %vm6141_vm2, %v7615_v1  ;;  %v1743_v4 = vadd.f32 %v1638_v43, %v6649_v30  ;;  %5748 = vmatprep.mubr.msk.bf16.mxu1 %vm6141_vm2, %v7615_v1 }
 0x1c5   : > { %v5644_v0 = vpop.f32.mrf.mxu0  ;;  %v5578_v23 = vpop.f32.mrf.mxu1  ;;  %v2386_v43 = vsel %vm990_vm4, %v2381_v57, %v2385_v20 }
 0x1c6   : > { %7621 = vst [vmem:[#allocation5_spill] sm:$0xff] %v6962_v31  ;;  %v2900_v31 = vsel %vm990_vm4, %v2895_v39, %v2899_v19  ;;  %v2903_v39 = vor.u32 %v2901_v59, %v2899_v19  ;;  %v2909_v59 = vshrl.u32 %v6968_v36, 16 }
 0x1c7   : > { %v2012_v7 = vpop.f32.mrf.mxu0  ;;  %v1641_v18 = vpop.f32.mrf.mxu1 }
 0x1c8   : > { %v6974_v17 = vadd.f32 %v2012_v7, %v1742_v8  ;;  %v1744_v30 = vadd.f32 %v1641_v18, %v6658_v46  ;;  %v2907_v46 = vrot.slane %v2905_v29, 1  ;;  %v6988_v7 = vld [vmem:[%s6198_s23 + $0x80] sm:$0xff]   ;;  %v2389_v18 = vor.u32 %v2387_v41, %v2385_v20 }
 0x1c9   : > { %v5645_v5 = vpop.f32.mrf.mxu0  ;;  %v5579_v28 = vpop.f32.mrf.mxu1  ;;  %v2913_v29 = vshll.u32 %v6988_v7, 16  ;;  %v2395_v41 = vshrl.u32 %v6103_v37, 16 }
 0x1ca   : > { %v6105_v5 = vld [vmem:[%s6198_s23 + $0x1b8] sm:$0xff]   ;;  %v2908_v19 = vsel %vm990_vm4, %v2903_v39, %v2907_v46  ;;  %v7625_v39 = vmov 0.0   ;;  %v2911_v36 = vor.u32 %v2909_v59, %v2907_v46  ;;  %v2917_v59 = vshrl.u32 %v6988_v7, 16 }
 0x1cb   : > { %v2017_v0 = vpop.f32.mrf.mxu0  ;;  %5815 = vmatmul.mubr.msk.bf16.gmra.mxu0 %vm329_vm3, %v2900_v31  ;;  %v1646_v8 = vpop.f32.mrf.mxu1  ;;  %5749 = vmatmul.mubr.msk.bf16.gmra.mxu1 %vm329_vm3, %v2386_v43  ;;  %v2393_v31 = vrot.slane %v2391_v53, 1  ;;  %v2399_v53 = vshll.u32 %v6105_v5, 16 }
 0x1cc   : > { %v6982_v23 = vadd.f32 %v2017_v0, %v1743_v4  ;;  %5818 = vmatprep.mubr.msk.bf16.mxu0 %vm6141_vm2, %v7615_v1  ;;  %v1745_v16 = vadd.f32 %v1646_v8, %v6663_v60  ;;  %5752 = vmatprep.mubr.msk.bf16.mxu1 %vm6141_vm2, %v7615_v1 }
 0x1cd   : > { %v5648_v57 = vpop.f32.mrf.mxu0  ;;  %v5582_v4 = vpop.f32.mrf.mxu1  ;;  %v2394_v20 = vsel %vm990_vm4, %v2389_v18, %v2393_v31 }
 0x1cf   : > { %v2020_v28 = vpop.f32.mrf.mxu0  ;;  %v1649_v43 = vpop.f32.mrf.mxu1 }
 0x1d0   : > { %v6994_v0 = vadd.f32 %v2020_v28, %v1744_v30  ;;  %v1746_v60 = vadd.f32 %v1649_v43, %v6672_v13  ;;  %v6107_v30 = vld [vmem:[%s6198_s23 + $0x1c0] ss:$0 sps:$4 sm:$0x11]   ;;  %v2915_v13 = vrot.slane %v2913_v29, 1  ;;  %v7009_v43 = vld [vmem:[%s6198_s23 + $0x88] sm:$0xff]  }
 0x1d1   : > { %v5649_v8 = vpop.f32.mrf.mxu0  ;;  %v5583_v57 = vpop.f32.mrf.mxu1 }
 0x1d2   : > { %7623 = vst [vmem:[#allocation7_spill] sm:$0xff] %v6994_v0  ;;  %v2401_v8 = vrot.slane %v2399_v53, 1  ;;  %v2916_v46 = vsel %vm990_vm4, %v2911_v36, %v2915_v13 }
 0x1d3   : > { %v2025_v4 = vpop.f32.mrf.mxu0  ;;  %5819 = vmatmul.mubr.msk.bf16.gmra.mxu0 %vm329_vm3, %v2908_v19  ;;  %v1654_v28 = vpop.f32.mrf.mxu1  ;;  %5753 = vmatmul.mubr.msk.bf16.gmra.mxu1 %vm329_vm3, %v2394_v20  ;;  %v2397_v19 = vor.u32 %v2395_v41, %v2393_v31  ;;  %v2407_v20 = vshll.u32 %v6107_v30, 16  ;;  %v6110_v41 = vld [vmem:[%s6198_s23 + $0xa4] sm:$0xff]  }
 0x1d4   : > { %v7003_v1 = vadd.f32 %v2025_v4, %v1745_v16  ;;  %5822 = vmatprep.mubr.msk.bf16.mxu0 %vm6141_vm2, %v7625_v39  ;;  %v1747_v37 = vadd.f32 %v1654_v28, %v6678_v26  ;;  %5756 = vmatprep.mubr.msk.bf16.mxu1 %vm6141_vm2, %v7625_v39  ;;  %v2403_v4 = vshrl.u32 %v6105_v5, 16  ;;  %v2921_v26 = vshll.u32 %v7009_v43, 16 }
 0x1d5   : > { %v5652_v18 = vpop.f32.mrf.mxu0  ;;  %v5586_v16 = vpop.f32.mrf.mxu1  ;;  %v2402_v31 = vsel %vm990_vm4, %v2397_v19, %v2401_v8  ;;  %v2409_v30 = vrot.slane %v2407_v20, 1 }
 0x1d6   : > { %7624 = vst [vmem:[#allocation8_spill] sm:$0xff] %v7003_v1  ;;  %v7029_v16 = vld [vmem:[%s6198_s23 + $0x90] ss:$0 sps:$4 sm:$0x11]  }
 0x1d7   : > { %v2028_v57 = vpop.f32.mrf.mxu0  ;;  %v1657_v1 = vpop.f32.mrf.mxu1 }
 0x1d8   : > { %v7014_v0 = vadd.f32 %v2028_v57, %v1746_v60  ;;  %v1748_v29 = vadd.f32 %v1657_v1, %v6690_v50  ;;  %v2405_v60 = vor.u32 %v2403_v4, %v2401_v8  ;;  %v2919_v1 = vor.u32 %v2917_v59, %v2915_v13  ;;  %v6111_v8 = vld [vmem:[%s6198_s23 + $0xac] sm:$0xff]  }
 0x1d9   : > { %v5653_v28 = vpop.f32.mrf.mxu0  ;;  %v5587_v53 = vpop.f32.mrf.mxu1  ;;  %v2923_v50 = vrot.slane %v2921_v26, 1  ;;  %v3318_v4 = vshll.u32 %v6110_v41, 16  ;;  %v2925_v59 = vshrl.u32 %v7009_v43, 16  ;;  %v2929_v26 = vshll.u32 %v7029_v16, 16 }
 0x1db   : > { %v2033_v5 = vpop.f32.mrf.mxu0  ;;  %5823 = vmatmul.mubr.msk.bf16.gmra.mxu0 %vm329_vm3, %v2916_v46  ;;  %v1662_v18 = vpop.f32.mrf.mxu1  ;;  %5757 = vmatmul.mubr.msk.bf16.gmra.mxu1 %vm329_vm3, %v2402_v31  ;;  %v2410_v46 = vsel %vm990_vm4, %v2405_v60, %v2409_v30  ;;  %v2924_v13 = vsel %vm990_vm4, %v2919_v1, %v2923_v50  ;;  %v2931_v30 = vrot.slane %v2929_v26, 1 }
 0x1dc   : > { %v7023_v36 = vadd.f32 %v2033_v5, %v1747_v37  ;;  %5826 = vmatprep.mubr.msk.bf16.mxu0 %vm6141_vm2, %v7625_v39  ;;  %v1749_v19 = vadd.f32 %v1662_v18, %v6698_v14  ;;  %5760 = vmatprep.mubr.msk.bf16.mxu1 %vm6141_vm2, %v7625_v39  ;;  %v3316_v5 = vshrl.u32 %v6110_v41, 16  ;;  %v3320_v18 = vrot.slane %v3318_v4, 1 }
 0x1dd   : > { %v5656_v57 = vpop.f32.mrf.mxu0  ;;  %v5590_v20 = vpop.f32.mrf.mxu1 }
 0x1de   : > { %7626 = vst [vmem:[#allocation9_spill] sm:$0xff] %v7023_v36  ;;  %v3323_v57 = vshll.u32 %v6111_v8, 16  ;;  %v3321_v4 = vor.u32 %v3320_v18, %v3316_v5 }
 0x1df   : > { %v2036_v37 = vpop.f32.mrf.mxu0  ;;  %v1665_v28 = vpop.f32.mrf.mxu1 }
 0x1e0   : > { %v7036_v31 = vadd.f32 %v2036_v37, %v1748_v29  ;;  %v1750_v14 = vadd.f32 %v1665_v28, %v6711_v24  ;;  %v2927_v24 = vor.u32 %v2925_v59, %v2923_v50  ;;  %v3325_v37 = vrot.slane %v3323_v57, 1  ;;  %v6112_v28 = vld [vmem:[%s6198_s23 + $0xb4] sm:$0xff]   ;;  %v6129_v50 = vld [vmem:[%s6198_s23 + $0xc] sm:$0xf] }
 0x1e1   : > { %v5657_v53 = vpop.f32.mrf.mxu0  ;;  %v5591_v20 = vpop.f32.mrf.mxu1  ;;  %v3331_v5 = vshll.u32 %v6112_v28, 16 }
 0x1e2   : > { %v2932_v20 = vsel %vm990_vm4, %v2927_v24, %v2931_v30 }
 0x1e3   : > { %v2041_v36 = vpop.f32.mrf.mxu0  ;;  %5827 = vmatmul.mubr.msk.bf16.gmra.mxu0 %vm329_vm3, %v2924_v13  ;;  %v1670_v29 = vpop.f32.mrf.mxu1  ;;  %5761 = vmatmul.mubr.msk.bf16.gmra.mxu1 %vm329_vm3, %v2410_v46  ;;  %v3712_v13 = vld [vmem:[%s6198_s23 + $0x8] sm:$0xe] }
 0x1e4   : > { %v7043_v60 = vadd.f32 %v2041_v36, %v1749_v19  ;;  %5830 = vmatprep.mubr.msk.bf16.mxu0 %vm6141_vm2, %v7625_v39  ;;  %v1751_v41 = vadd.f32 %v1670_v29, %v6717_v55  ;;  %5836 = vmatprep.mubr.msk.bf16.mxu1 %vm6141_vm2, %v7625_v39  ;;  %v5054_v59 = vcombine.low %v3712_v13, %v6129_v50 }
 0x1e5   : > { %v5660_v1 = vpop.f32.mrf.mxu0  ;;  %v5594_v36 = vpop.f32.mrf.mxu1  ;;  %v3326_v29 = vsel %vm990_vm4, %v3321_v4, %v3325_v37 }
 0x1e6   : > { %v3327_v1 = vshrl.u32 %v6111_v8, 16  ;;  %v3719_v24 = vrot.slane %v5054_v59, 1 }
 0x1e7   : > { %v2044_v19 = vpop.f32.mrf.mxu0  ;;  %v1673_v53 = vpop.f32.mrf.mxu1 }
 0x1e8   : > { %v7053_v46 = vadd.f32 %v2044_v19, %v1750_v14  ;;  %v1752_v55 = vadd.f32 %v1673_v53, %v6733_v54  ;;  %v6130_v54 = vld [vmem:[%s6198_s23 + $0x10] sm:$0xff]   ;;  %v3329_v13 = vor.u32 %v3327_v1, %v3325_v37  ;;  %v3333_v19 = vrot.slane %v3331_v5, 1  ;;  %v6114_v53 = vld [vmem:[%s6198_s23 + $0xbc] sm:$0xff]  }
 0x1e9   : > { %v5661_v26 = vpop.f32.mrf.mxu0  ;;  %v5595_v18 = vpop.f32.mrf.mxu1  ;;  %v3720_v30 = vrot.slane %v6130_v54, 1 }
 0x1eb   : > { %v2049_v57 = vpop.f32.mrf.mxu0  ;;  %5831 = vmatmul.mubr.msk.bf16.gmra.mxu0 %vm329_vm3, %v2932_v20  ;;  %v1678_v36 = vpop.f32.mrf.mxu1  ;;  %5837 = vmatmul.mubr.msk.bf16.vlgmr.msra.gmra.mxu1 %vm329_vm3, %v3326_v29  ;;  %v3721_v29 = vsel %vm3718_vm5, %v3719_v24, %v3720_v30 }
 0x1ec   : > { %v7060_v14 = vadd.f32 %v2049_v57, %v1751_v41  ;;  %5906 = vmatprep.mubr.msk.bf16.mxu0 %vm6141_vm2, %v7625_v39  ;;  %v1753_v4 = vadd.f32 %v1678_v36, %v6741_v61  ;;  %5840 = vmatprep.mubr.msk.bf16.mxu1 %vm6141_vm2, %v7625_v39  ;;  %v3334_v61 = vsel %vm990_vm4, %v3329_v13, %v3333_v19  ;;  %v3335_v57 = vshrl.u32 %v6112_v28, 16  ;;  %v6115_v13 = vld [vmem:[%s6198_s23 + $0xc4] sm:$0xff]  }
 0x1ed   : > { %v5664_v8 = vpop.f32.mrf.mxu0  ;;  %v5598_v41 = vpop.f32.mrf.mxu1  ;;  %v3339_v36 = vshll.u32 %v6114_v53, 16 }
 0x1ee   : > { %v3337_v28 = vor.u32 %v3335_v57, %v3333_v19 }
 0x1ef   : > { %v2052_v20 = vpop.f32.mrf.mxu0  ;;  %v1681_v50 = vpop.f32.mrf.mxu1  ;;  %v3341_v8 = vrot.slane %v3339_v36, 1 }
 0x1f0   : > { %v7070_v26 = vadd.f32 %v2052_v20, %v1752_v55  ;;  %v1754_v59 = vadd.f32 %v1681_v50, %v6753_v22  ;;  %v3722_v22 = vrot.slane %v6723_v10, 1 }
 0x1f1   : > { %v5665_v18 = vpop.f32.mrf.mxu0  ;;  %v5599_v54 = vpop.f32.mrf.mxu1  ;;  %v3342_v10 = vsel %vm990_vm4, %v3337_v28, %v3341_v8 }
 0x1f2   : > { %v3347_v54 = vshll.u32 %v6115_v13, 16 }
 0x1f3   : > { %v2057_v37 = vpop.f32.mrf.mxu0  ;;  %5907 = vmatmul.mubr.msk.bf16.vlgmr.msra.gmra.mxu0 %vm329_vm3, %v3721_v29  ;;  %v1686_v1 = vpop.f32.mrf.mxu1  ;;  %5841 = vmatmul.mubr.msk.bf16.gmra.mxu1 %vm329_vm3, %v3334_v61  ;;  %v3723_v29 = vsel %vm3718_vm5, %v3720_v30, %v3722_v22 }
 0x1f4   : > { %v7076_v5 = vadd.f32 %v2057_v37, %v1753_v4  ;;  %5910 = vmatprep.mubr.msk.bf16.mxu0 %vm6141_vm2, %v7625_v39  ;;  %v1755_v55 = vadd.f32 %v1686_v1, %v6761_v45  ;;  %5844 = vmatprep.mubr.msk.bf16.mxu1 %vm6141_vm2, %v7625_v39  ;;  %v3343_v45 = vshrl.u32 %v6114_v53, 16  ;;  %v3349_v36 = vrot.slane %v3347_v54, 1 }
 0x1f5   : > { %v5668_v24 = vpop.f32.mrf.mxu0  ;;  %v5602_v41 = vpop.f32.mrf.mxu1 }
 0x1f6   : > { %v3345_v53 = vor.u32 %v3343_v45, %v3341_v8  ;;  %v6116_v24 = vld [vmem:[%s6198_s23 + $0xcc] sm:$0xff]  }
 0x1f7   : > { %v2060_v20 = vpop.f32.mrf.mxu0  ;;  %v1689_v4 = vpop.f32.mrf.mxu1 }
 0x1f8   : > { %v7086_v50 = vadd.f32 %v2060_v20, %v1754_v59  ;;  %v1756_v18 = vadd.f32 %v1689_v4, %v6773_v56  ;;  %v3724_v56 = vrot.slane %v6745_v44, 1  ;;  %v3350_v44 = vsel %vm990_vm4, %v3345_v53, %v3349_v36 }
 0x1f9   : > { %v5669_v61 = vpop.f32.mrf.mxu0  ;;  %v5603_v37 = vpop.f32.mrf.mxu1 }
 0x1fa   : > { %v3725_v4 = vsel %vm3718_vm5, %v3722_v22, %v3724_v56 }
 0x1fb   : > { %v2065_v1 = vpop.f32.mrf.mxu0  ;;  %5911 = vmatmul.mubr.msk.bf16.gmra.mxu0 %vm329_vm3, %v3723_v29  ;;  %v1694_v19 = vpop.f32.mrf.mxu1  ;;  %5845 = vmatmul.mubr.msk.bf16.gmra.mxu1 %vm329_vm3, %v3342_v10  ;;  %v3355_v10 = vshll.u32 %v6116_v24, 16 }
 0x1fc   : > { %v7092_v57 = vadd.f32 %v2065_v1, %v1755_v55  ;;  %5914 = vmatprep.mubr.msk.bf16.mxu0 %vm6141_vm2, %v7625_v39  ;;  %v1757_v30 = vadd.f32 %v1694_v19, %v6781_v47  ;;  %5848 = vmatprep.mubr.msk.bf16.mxu1 %vm6141_vm2, %v7625_v39  ;;  %v3351_v47 = vshrl.u32 %v6115_v13, 16  ;;  %v6117_v19 = vld [vmem:[%s6198_s23 + $0xd4] sm:$0xff]  }
 0x1fd   : > { %v5672_v59 = vpop.f32.mrf.mxu0  ;;  %v5606_v28 = vpop.f32.mrf.mxu1  ;;  %v3357_v54 = vrot.slane %v3355_v10, 1 }
 0x1fe   : > { %v3353_v13 = vor.u32 %v3351_v47, %v3349_v36 }
 0x1ff   : > { %v2068_v41 = vpop.f32.mrf.mxu0  ;;  %v1697_v55 = vpop.f32.mrf.mxu1 }
 0x200   : > { %v7102_v20 = vadd.f32 %v2068_v41, %v1756_v18  ;;  %v1758_v29 = vadd.f32 %v1697_v55, %v6793_v2  ;;  %v3726_v2 = vrot.slane %v6767_v32, 1  ;;  %v3358_v32 = vsel %vm990_vm4, %v3353_v13, %v3357_v54 }
 0x201   : > { %v5673_v61 = vpop.f32.mrf.mxu0  ;;  %v5607_v37 = vpop.f32.mrf.mxu1 }
 0x202   : > { %v3727_v41 = vsel %vm3718_vm5, %v3724_v56, %v3726_v2  ;;  %v3363_v61 = vshll.u32 %v6117_v19, 16 }
 0x203   : > { %v2073_v1 = vpop.f32.mrf.mxu0  ;;  %5915 = vmatmul.mubr.msk.bf16.gmra.mxu0 %vm329_vm3, %v3725_v4  ;;  %v1702_v8 = vpop.f32.mrf.mxu1  ;;  %5849 = vmatmul.mubr.msk.bf16.gmra.mxu1 %vm329_vm3, %v3350_v44 }
 0x204   : > { %v7108_v45 = vadd.f32 %v2073_v1, %v1757_v30  ;;  %5918 = vmatprep.mubr.msk.bf16.mxu0 %vm6141_vm2, %v7625_v39  ;;  %v1759_v22 = vadd.f32 %v1702_v8, %v6801_v48  ;;  %5852 = vmatprep.mubr.msk.bf16.mxu1 %vm6141_vm2, %v7625_v39  ;;  %v3359_v48 = vshrl.u32 %v6116_v24, 16  ;;  %v3365_v10 = vrot.slane %v3363_v61, 1  ;;  %v6118_v1 = vld [vmem:[%s6198_s23 + $0xdc] sm:$0xff]  }
 0x205   : > { %v5676_v18 = vpop.f32.mrf.mxu0  ;;  %v5610_v59 = vpop.f32.mrf.mxu1 }
 0x206   : > { %v3361_v24 = vor.u32 %v3359_v48, %v3357_v54 }
 0x207   : > { %v2076_v53 = vpop.f32.mrf.mxu0  ;;  %v1705_v30 = vpop.f32.mrf.mxu1 }
 0x208   : > { %v7118_v28 = vadd.f32 %v2076_v53, %v1758_v29  ;;  %v1760_v55 = vadd.f32 %v1705_v30, %v6813_v25  ;;  %v3728_v25 = vrot.slane %v6787_v34, 1  ;;  %v3366_v34 = vsel %vm990_vm4, %v3361_v24, %v3365_v10 }
 0x209   : > { %v5677_v4 = vpop.f32.mrf.mxu0  ;;  %v5611_v44 = vpop.f32.mrf.mxu1 }
 0x20a   : > { %v3729_v59 = vsel %vm3718_vm5, %v3726_v2, %v3728_v25  ;;  %v6119_v44 = vld [vmem:[%s6198_s23 + $0xe4] sm:$0xff]  }
 0x20b   : > { %v2081_v37 = vpop.f32.mrf.mxu0  ;;  %5919 = vmatmul.mubr.msk.bf16.gmra.mxu0 %vm329_vm3, %v3727_v41  ;;  %v1710_v36 = vpop.f32.mrf.mxu1  ;;  %5853 = vmatmul.mubr.msk.bf16.gmra.mxu1 %vm329_vm3, %v3358_v32  ;;  %v3371_v41 = vshll.u32 %v6118_v1, 16 }
 0x20c   : > { %v7124_v47 = vadd.f32 %v2081_v37, %v1759_v22  ;;  %5922 = vmatprep.mubr.msk.bf16.mxu0 %vm6141_vm2, %v7625_v39  ;;  %v1761_v56 = vadd.f32 %v1710_v36, %v6821_v52  ;;  %5856 = vmatprep.mubr.msk.bf16.mxu1 %vm6141_vm2, %v7625_v39  ;;  %v3367_v52 = vshrl.u32 %v6117_v19, 16 }
 0x20d   : > { %v5680_v29 = vpop.f32.mrf.mxu0  ;;  %v5614_v8 = vpop.f32.mrf.mxu1  ;;  %v3373_v61 = vrot.slane %v3371_v41, 1  ;;  %v6120_v41 = vld [vmem:[%s6198_s23 + $0xec] sm:$0xff]  }
 0x20e   : > { %v3369_v19 = vor.u32 %v3367_v52, %v3365_v10 }
 0x20f   : > { %v2084_v18 = vpop.f32.mrf.mxu0  ;;  %v1713_v22 = vpop.f32.mrf.mxu1 }
 0x210   : > { %v7134_v13 = vadd.f32 %v2084_v18, %v1760_v55  ;;  %v1762_v53 = vadd.f32 %v1713_v22, %v6833_v6  ;;  %v3730_v6 = vrot.slane %v6807_v38, 1  ;;  %v3374_v38 = vsel %vm990_vm4, %v3369_v19, %v3373_v61 }
 0x211   : > { %v5681_v30 = vpop.f32.mrf.mxu0  ;;  %v5615_v4 = vpop.f32.mrf.mxu1  ;;  %v3379_v22 = vshll.u32 %v6119_v44, 16 }
 0x212   : > { %v3731_v24 = vsel %vm3718_vm5, %v3728_v25, %v3730_v6 }
 0x213   : > { %v2089_v32 = vpop.f32.mrf.mxu0  ;;  %5923 = vmatmul.mubr.msk.bf16.gmra.mxu0 %vm329_vm3, %v3729_v59  ;;  %v1718_v54 = vpop.f32.mrf.mxu1  ;;  %5857 = vmatmul.mubr.msk.bf16.gmra.mxu1 %vm329_vm3, %v3366_v34  ;;  %v3381_v52 = vrot.slane %v3379_v22, 1 }
 0x214   : > { %v7140_v48 = vadd.f32 %v2089_v32, %v1761_v56  ;;  %5926 = vmatprep.mubr.msk.bf16.mxu0 %vm6141_vm2, %v7625_v39  ;;  %v1763_v2 = vadd.f32 %v1718_v54, %v6841_v15  ;;  %5860 = vmatprep.mubr.msk.bf16.mxu1 %vm6141_vm2, %v7625_v39  ;;  %v3375_v15 = vshrl.u32 %v6118_v1, 16 }
 0x215   : > { %v5684_v55 = vpop.f32.mrf.mxu0  ;;  %v5618_v37 = vpop.f32.mrf.mxu1 }
 0x216   : > { %v3377_v1 = vor.u32 %v3375_v15, %v3373_v61  ;;  %v6121_v15 = vld [vmem:[%s6198_s23 + $0xf4] sm:$0xff]  }
 0x217   : > { %v2092_v36 = vpop.f32.mrf.mxu0  ;;  %v1721_v56 = vpop.f32.mrf.mxu1 }
 0x218   : > { %v7150_v29 = vadd.f32 %v2092_v36, %v1762_v53  ;;  %v1764_v8 = vadd.f32 %v1721_v56, %v6853_v27  ;;  %v3732_v27 = vrot.slane %v6827_v11, 1  ;;  %v3382_v11 = vsel %vm990_vm4, %v3377_v1, %v3381_v52 }
 0x219   : > { %v5685_v18 = vpop.f32.mrf.mxu0  ;;  %v5619_v59 = vpop.f32.mrf.mxu1  ;;  %v3387_v36 = vshll.u32 %v6120_v41, 16 }
 0x21a   : > { %v3733_v55 = vsel %vm3718_vm5, %v3730_v6, %v3732_v27 }
 0x21b   : > { %v2097_v30 = vpop.f32.mrf.mxu0  ;;  %5927 = vmatmul.mubr.msk.bf16.gmra.mxu0 %vm329_vm3, %v3731_v24  ;;  %v1726_v10 = vpop.f32.mrf.mxu1  ;;  %5861 = vmatmul.mubr.msk.bf16.gmra.mxu1 %vm329_vm3, %v3374_v38  ;;  %v3389_v38 = vrot.slane %v3387_v36, 1 }
 0x21c   : > { %v7156_v34 = vadd.f32 %v2097_v30, %v1763_v2  ;;  %5930 = vmatprep.mubr.msk.bf16.mxu0 %vm6141_vm2, %v7625_v39  ;;  %v1765_v25 = vadd.f32 %v1726_v10, %v6861_v63  ;;  %5864 = vmatprep.mubr.msk.bf16.mxu1 %vm6141_vm2, %v7625_v39  ;;  %v3383_v63 = vshrl.u32 %v6119_v44, 16 }
 0x21d   : > { %v5688_v53 = vpop.f32.mrf.mxu0  ;;  %v5622_v4 = vpop.f32.mrf.mxu1 }
 0x21e   : > { %v3385_v44 = vor.u32 %v3383_v63, %v3381_v52  ;;  %v3395_v4 = vshll.u32 %v6121_v15, 16  ;;  %v6122_v63 = vld [vmem:[%s6198_s23 + $0xfc] sm:$0xff]  }
 0x21f   : > { %v2100_v32 = vpop.f32.mrf.mxu0  ;;  %v1729_v54 = vpop.f32.mrf.mxu1 }
 0x220   : > { %v7166_v2 = vadd.f32 %v2100_v32, %v1764_v8  ;;  %v1766_v19 = vadd.f32 %v1729_v54, %v6874_v42  ;;  %v3734_v42 = vrot.slane %v6847_v21, 1  ;;  %v3390_v21 = vsel %vm990_vm4, %v3385_v44, %v3389_v38 }
 0x221   : > { %v5689_v37 = vpop.f32.mrf.mxu0  ;;  %v5623_v56 = vpop.f32.mrf.mxu1 }
 0x223   : > { %v2105_v24 = vpop.f32.mrf.mxu0  ;;  %5931 = vmatmul.mubr.msk.bf16.gmra.mxu0 %vm329_vm3, %v3733_v55  ;;  %v2499_v18 = vpop.f32.mrf.mxu1  ;;  %5865 = vmatmul.mubr.msk.bf16.gmra.mxu1 %vm329_vm3, %v3382_v11  ;;  %v3397_v11 = vrot.slane %v3395_v4, 1  ;;  %v6123_v4 = vld [vmem:[%s6198_s23 + $0x104] sm:$0xff]  }
 0x224   : > { %v7172_v61 = vadd.f32 %v2105_v24, %v1765_v25  ;;  %5934 = vmatprep.mubr.msk.bf16.mxu0 %vm6141_vm2, %v7625_v39  ;;  %v2634_v6 = vadd.f32 %v2499_v18, %v6882_v3  ;;  %5868 = vmatprep.mubr.msk.bf16.mxu1 %vm6141_vm2, %v7625_v39  ;;  %v3735_v25 = vsel %vm3718_vm5, %v3732_v27, %v3734_v42  ;;  %v3391_v3 = vshrl.u32 %v6120_v41, 16  ;;  %v7627_v27 = vld [vmem:[#allocation2_spill] sm:$0xff] }
 0x225   : > { %v5692_v8 = vpop.f32.mrf.mxu0  ;;  %v5698_v22 = vpop.f32.mrf.mxu1 }
 0x226   : > { %v3393_v41 = vor.u32 %v3391_v3, %v3389_v38  ;;  %v3399_v22 = vshrl.u32 %v6121_v15, 16 }
 0x227   : > { %v2108_v59 = vpop.f32.mrf.mxu0  ;;  %v2502_v10 = vpop.f32.mrf.mxu1 }
 0x228   : > { %v7182_v30 = vadd.f32 %v2108_v59, %v1766_v19  ;;  %v2635_v53 = vadd.f32 %v2502_v10, %v6894_v9  ;;  %v3736_v9 = vrot.slane %v6867_v35, 1  ;;  %v3398_v35 = vsel %vm990_vm4, %v3393_v41, %v3397_v11 }
 0x229   : > { %v5693_v1 = vpop.f32.mrf.mxu0  ;;  %v5699_v32 = vpop.f32.mrf.mxu1  ;;  %v3403_v59 = vshll.u32 %v6122_v63, 16  ;;  %v3401_v15 = vor.u32 %v3399_v22, %v3397_v11 }
 0x22b   : > { %v3021_v54 = vpop.f32.mrf.mxu0  ;;  %5935 = vmatmul.mubr.msk.bf16.gmra.mxu0 %vm329_vm3, %v3735_v25  ;;  %v2507_v52 = vpop.f32.mrf.mxu1  ;;  %5869 = vmatmul.mubr.msk.bf16.gmra.mxu1 %vm329_vm3, %v3390_v21  ;;  %v3405_v3 = vrot.slane %v3403_v59, 1  ;;  %v6124_v59 = vld [vmem:[%s6198_s23 + $0x10c] sm:$0xff]  }
 0x22c   : > { %v7188_v55 = vadd.f32 %v3021_v54, %v2634_v6  ;;  %5938 = vmatprep.mubr.msk.bf16.mxu0 %vm6141_vm2, %v7625_v39  ;;  %v2636_v19 = vadd.f32 %v2507_v52, %v7627_v27  ;;  %5872 = vmatprep.mubr.msk.bf16.mxu1 %vm6141_vm2, %v7625_v39  ;;  %v3737_v6 = vsel %vm3718_vm5, %v3734_v42, %v3736_v9  ;;  %v7628_v42 = vld [vmem:[#allocation3_spill] sm:$0xff] }
 0x22d   : > { %v5768_v37 = vpop.f32.mrf.mxu0  ;;  %v5702_v36 = vpop.f32.mrf.mxu1 }
 0x22e   : > { %v3407_v36 = vshrl.u32 %v6122_v63, 16 }
 0x22f   : > { %v3024_v56 = vpop.f32.mrf.mxu0  ;;  %v2510_v24 = vpop.f32.mrf.mxu1 }
 0x230   : > { %v7198_v18 = vadd.f32 %v3024_v56, %v2635_v53  ;;  %v2637_v8 = vadd.f32 %v2510_v24, %v6914_v49  ;;  %v3738_v49 = vrot.slane %v6888_v40, 1  ;;  %v3406_v40 = vsel %vm990_vm4, %v3401_v15, %v3405_v3 }
 0x231   : > { %v5769_v44 = vpop.f32.mrf.mxu0  ;;  %v5703_v10 = vpop.f32.mrf.mxu1  ;;  %v3411_v56 = vshll.u32 %v6123_v4, 16  ;;  %v3409_v63 = vor.u32 %v3407_v36, %v3405_v3 }
 0x233   : > { %v3029_v25 = vpop.f32.mrf.mxu0  ;;  %5939 = vmatmul.mubr.msk.bf16.gmra.mxu0 %vm329_vm3, %v3737_v6  ;;  %v2515_v38 = vpop.f32.mrf.mxu1  ;;  %5873 = vmatmul.mubr.msk.bf16.gmra.mxu1 %vm329_vm3, %v3398_v35  ;;  %v3413_v22 = vrot.slane %v3411_v56, 1  ;;  %v6125_v56 = vld [vmem:[%s6198_s23 + $0x114] sm:$0xff]  }
 0x234   : > { %v7204_v1 = vadd.f32 %v3029_v25, %v2636_v19  ;;  %5942 = vmatprep.mubr.msk.bf16.mxu0 %vm6141_vm2, %v7625_v39  ;;  %v2638_v53 = vadd.f32 %v2515_v38, %v7628_v42  ;;  %5876 = vmatprep.mubr.msk.bf16.mxu1 %vm6141_vm2, %v7625_v39  ;;  %v3739_v19 = vsel %vm3718_vm5, %v3736_v9, %v3738_v49  ;;  %v7629_v9 = vld [vmem:[#allocation4_spill] sm:$0xff] }
 0x235   : > { %v5772_v21 = vpop.f32.mrf.mxu0  ;;  %v5706_v32 = vpop.f32.mrf.mxu1 }
 0x236   : > { %v3415_v32 = vshrl.u32 %v6123_v4, 16 }
 0x237   : > { %v3032_v54 = vpop.f32.mrf.mxu0  ;;  %v2518_v52 = vpop.f32.mrf.mxu1 }
 0x238   : > { %v7214_v27 = vadd.f32 %v3032_v54, %v2637_v8  ;;  %v2639_v37 = vadd.f32 %v2518_v52, %v6934_v33  ;;  %v3740_v33 = vrot.slane %v6908_v12, 1  ;;  %v3414_v12 = vsel %vm990_vm4, %v3409_v63, %v3413_v22 }
 0x239   : > { %v5773_v41 = vpop.f32.mrf.mxu0  ;;  %v5707_v24 = vpop.f32.mrf.mxu1  ;;  %v3419_v54 = vshll.u32 %v6124_v59, 16  ;;  %v3417_v4 = vor.u32 %v3415_v32, %v3413_v22  ;;  %v6126_v32 = vld [vmem:[%s6198_s23 + $0x11c] sm:$0xff]  }
 0x23b   : > { %v3037_v6 = vpop.f32.mrf.mxu0  ;;  %5943 = vmatmul.mubr.msk.bf16.gmra.mxu0 %vm329_vm3, %v3739_v19  ;;  %v2523_v11 = vpop.f32.mrf.mxu1  ;;  %5877 = vmatmul.mubr.msk.bf16.gmra.mxu1 %vm329_vm3, %v3406_v40  ;;  %v3421_v36 = vrot.slane %v3419_v54, 1 }
 0x23c   : > { %v7220_v44 = vadd.f32 %v3037_v6, %v2638_v53  ;;  %5946 = vmatprep.mubr.msk.bf16.mxu0 %vm6141_vm2, %v7625_v39  ;;  %v2640_v8 = vadd.f32 %v2523_v11, %v7629_v9  ;;  %5880 = vmatprep.mubr.msk.bf16.mxu1 %vm6141_vm2, %v7625_v39  ;;  %v3741_v53 = vsel %vm3718_vm5, %v3738_v49, %v3740_v33  ;;  %v7630_v49 = vld [vmem:[#allocation5_spill] sm:$0xff] }
 0x23d   : > { %v5776_v35 = vpop.f32.mrf.mxu0  ;;  %v5710_v10 = vpop.f32.mrf.mxu1 }
 0x23e   : > { %v3423_v10 = vshrl.u32 %v6124_v59, 16 }
 0x23f   : > { %v3040_v25 = vpop.f32.mrf.mxu0  ;;  %v2526_v38 = vpop.f32.mrf.mxu1 }
 0x240   : > { %v7230_v42 = vadd.f32 %v3040_v25, %v2639_v37  ;;  %v2641_v21 = vadd.f32 %v2526_v38, %v6954_v51  ;;  %v3742_v51 = vrot.slane %v6928_v62, 1  ;;  %v3422_v62 = vsel %vm990_vm4, %v3417_v4, %v3421_v36 }
 0x241   : > { %v5777_v15 = vpop.f32.mrf.mxu0  ;;  %v5711_v52 = vpop.f32.mrf.mxu1  ;;  %v3427_v25 = vshll.u32 %v6125_v56, 16  ;;  %v3425_v59 = vor.u32 %v3423_v10, %v3421_v36 }
 0x243   : > { %v3045_v19 = vpop.f32.mrf.mxu0  ;;  %5947 = vmatmul.mubr.msk.bf16.gmra.mxu0 %vm329_vm3, %v3741_v53  ;;  %v2531_v3 = vpop.f32.mrf.mxu1  ;;  %5881 = vmatmul.mubr.msk.bf16.gmra.mxu1 %vm329_vm3, %v3414_v12  ;;  %v3429_v12 = vrot.slane %v3427_v25, 1 }
 0x244   : > { %v7236_v41 = vadd.f32 %v3045_v19, %v2640_v8  ;;  %5950 = vmatprep.mubr.msk.bf16.mxu0 %vm6141_vm2, %v7625_v39  ;;  %v2642_v37 = vadd.f32 %v2531_v3, %v7630_v49  ;;  %5884 = vmatprep.mubr.msk.bf16.mxu1 %vm6141_vm2, %v7625_v39  ;;  %v3743_v8 = vsel %vm3718_vm5, %v3740_v33, %v3742_v51 }
 0x245   : > { %v5780_v40 = vpop.f32.mrf.mxu0  ;;  %v5714_v24 = vpop.f32.mrf.mxu1 }
 0x246   : > { %v3435_v24 = vshll.u32 %v6126_v32, 16 }
 0x247   : > { %v3048_v6 = vpop.f32.mrf.mxu0  ;;  %v2534_v11 = vpop.f32.mrf.mxu1 }
 0x248   : > { %v7246_v9 = vadd.f32 %v3048_v6, %v2641_v21  ;;  %v2643_v35 = vadd.f32 %v2534_v11, %v6974_v17  ;;  %v3744_v17 = vrot.slane %v6948_v58, 1  ;;  %v3430_v58 = vsel %vm990_vm4, %v3425_v59, %v3429_v12 }
 0x249   : > { %v5781_v63 = vpop.f32.mrf.mxu0  ;;  %v5715_v38 = vpop.f32.mrf.mxu1  ;;  %v3437_v25 = vrot.slane %v3435_v24, 1 }
 0x24a   : > { %v3745_v49 = vsel %vm3718_vm5, %v3742_v51, %v3744_v17  ;;  %v7632_v51 = vld [vmem:[#allocation6_spill] sm:$0xff]  ;;  %v7633_v63 = vld [vmem:[#allocation8_spill] sm:$0xff] }
 0x24b   : > { %v3053_v53 = vpop.f32.mrf.mxu0  ;;  %5951 = vmatmul.mubr.msk.bf16.gmra.mxu0 %vm329_vm3, %v3743_v8  ;;  %v2539_v22 = vpop.f32.mrf.mxu1  ;;  %5885 = vmatmul.mubr.msk.bf16.gmra.mxu1 %vm329_vm3, %v3422_v62  ;;  %v6127_v38 = vld [vmem:[%s6198_s23 + $0x124] sm:$0xff]  }
 0x24c   : > { %v7252_v15 = vadd.f32 %v3053_v53, %v2642_v37  ;;  %5954 = vmatprep.mubr.msk.bf16.mxu0 %vm6141_vm2, %v7625_v39  ;;  %v2644_v33 = vadd.f32 %v2539_v22, %v6982_v23  ;;  %5888 = vmatprep.mubr.msk.bf16.mxu1 %vm6141_vm2, %v7625_v39  ;;  %v7631_v37 = vld [vmem:[#allocation7_spill] sm:$0xff]  ;;  %v3431_v23 = vshrl.u32 %v6125_v56, 16 }
 0x24d   : > { %v5784_v21 = vpop.f32.mrf.mxu0  ;;  %v5718_v54 = vpop.f32.mrf.mxu1 }
 0x24e   : > { %v3433_v56 = vor.u32 %v3431_v23, %v3429_v12 }
 0x24f   : > { %v3056_v52 = vpop.f32.mrf.mxu0  ;;  %v2542_v19 = vpop.f32.mrf.mxu1 }
 0x250   : > { %v7262_v3 = vadd.f32 %v3056_v52, %v2643_v35  ;;  %v2645_v40 = vadd.f32 %v2542_v19, %v7631_v37  ;;  %v3746_v35 = vrot.slane %v7632_v51, 1  ;;  %v3438_v19 = vsel %vm990_vm4, %v3433_v56, %v3437_v25 }
 0x251   : > { %v5785_v4 = vpop.f32.mrf.mxu0  ;;  %v5719_v6 = vpop.f32.mrf.mxu1  ;;  %v3443_v37 = vshll.u32 %v6127_v38, 16 }
 0x252   : > { %v3747_v59 = vsel %vm3718_vm5, %v3744_v17, %v3746_v35  ;;  %v7634_v17 = vld [vmem:[#allocation9_spill] sm:$0xff] }
 0x253   : > { %v3061_v11 = vpop.f32.mrf.mxu0  ;;  %5955 = vmatmul.mubr.msk.bf16.gmra.mxu0 %vm329_vm3, %v3745_v49  ;;  %v2547_v36 = vpop.f32.mrf.mxu1  ;;  %5889 = vmatmul.mubr.msk.bf16.gmra.mxu1 %vm329_vm3, %v3430_v58  ;;  %v3439_v49 = vshrl.u32 %v6126_v32, 16  ;;  %v3445_v6 = vrot.slane %v3443_v37, 1 }
 0x254   : > { %v7268_v8 = vadd.f32 %v3061_v11, %v2644_v33  ;;  %5958 = vmatprep.mubr.msk.bf16.mxu0 %vm6141_vm2, %v7625_v39  ;;  %v2646_v62 = vadd.f32 %v2547_v36, %v7633_v63  ;;  %5892 = vmatprep.mubr.msk.bf16.mxu1 %vm6141_vm2, %v7625_v39  ;;  %v6128_v11 = vld [vmem:[%s6198_s23 + $0x12c] ss:$0 sps:$4 sm:$0x11]  }
 0x255   : > { %v5788_v10 = vpop.f32.mrf.mxu0  ;;  %v5722_v53 = vpop.f32.mrf.mxu1  ;;  %v3441_v32 = vor.u32 %v3439_v49, %v3437_v25 }
 0x257   : > { %v3064_v22 = vpop.f32.mrf.mxu0  ;;  %v2550_v33 = vpop.f32.mrf.mxu1 }
 0x258   : > { %v7278_v21 = vadd.f32 %v3064_v22, %v2645_v40  ;;  %v2647_v54 = vadd.f32 %v2550_v33, %v7014_v0  ;;  %v3748_v0 = vrot.slane %v6988_v7, 1  ;;  %v3446_v7 = vsel %vm990_vm4, %v3441_v32, %v3445_v6 }
 0x259   : > { %v5789_v52 = vpop.f32.mrf.mxu0  ;;  %v5723_v4 = vpop.f32.mrf.mxu1  ;;  %v3447_v22 = vshrl.u32 %v6127_v38, 16  ;;  %v3451_v33 = vshll.u32 %v6128_v11, 16 }
 0x25a   : > { %v3749_v10 = vsel %vm3718_vm5, %v3746_v35, %v3748_v0  ;;  %v3750_v35 = vrot.slane %v7009_v43, 1 }
 0x25b   : > { %v3069_v58 = vpop.f32.mrf.mxu0  ;;  %5959 = vmatmul.mubr.msk.bf16.gmra.mxu0 %vm329_vm3, %v3747_v59  ;;  %v2555_v12 = vpop.f32.mrf.mxu1  ;;  %5893 = vmatmul.mubr.msk.bf16.gmra.mxu1 %vm329_vm3, %v3438_v19  ;;  %v3449_v38 = vor.u32 %v3447_v22, %v3445_v6  ;;  %v3453_v49 = vrot.slane %v3451_v33, 1  ;;  %v3752_v6 = vrot.slane %v7029_v16, 1 }
 0x25c   : > { %v7284_v23 = vadd.f32 %v3069_v58, %v2646_v62  ;;  %5962 = vmatprep.mubr.msk.bf16.mxu0 %vm6141_vm2, %v7625_v39  ;;  %v2648_v40 = vadd.f32 %v2555_v12, %v7634_v17  ;;  %5896 = vmatprep.mubr.msk.bf16.mxu1 %vm6141_vm2, %v7625_v39  ;;  %v3751_v17 = vsel %vm3718_vm5, %v3748_v0, %v3750_v35 }
 0x25d   : > { %v5792_v24 = vpop.f32.mrf.mxu0  ;;  %v5726_v36 = vpop.f32.mrf.mxu1  ;;  %v3454_v43 = vsel %vm990_vm4, %v3449_v38, %v3453_v49  ;;  %vm4240_vm4 = vsmask.f32 5392 }
 0x25f   : > { %v3072_v51 = vpop.f32.mrf.mxu0  ;;  %v2558_v63 = vpop.f32.mrf.mxu1 }
 0x260   : > { %v7294_v62 = vadd.f32 %v3072_v51, %v2647_v54  ;;  %v2649_v56 = vadd.f32 %v2558_v63, %v7036_v31 }
 0x261   : > { %v5793_v53 = vpop.f32.mrf.mxu0  ;;  %v5727_v59 = vpop.f32.mrf.mxu1 }
 0x262   : > { %v3753_v53 = vsel %vm3718_vm5, %v3750_v35, %v3752_v6 }
 0x263   : > { %v3077_v52 = vpop.f32.mrf.mxu0  ;;  %5963 = vmatmul.mubr.msk.bf16.gmra.mxu0 %vm329_vm3, %v3749_v10  ;;  %v2563_v25 = vpop.f32.mrf.mxu1  ;;  %5897 = vmatmul.mubr.msk.bf16.gmra.mxu1 %vm329_vm3, %v3446_v7 }
 0x264   : > { %v7300_v19 = vadd.f32 %v3077_v52, %v2648_v40  ;;  %5966 = vmatprep.mubr.msk.bf16.mxu0 %vm6141_vm2, %v7625_v39  ;;  %v2650_v31 = vadd.f32 %v2563_v25, %v7043_v60  ;;  %5900 = vmatprep.mubr.msk.bf16.mxu1 %vm6141_vm2, %v7625_v39 }
 0x265   : > { %v5796_v54 = vpop.f32.mrf.mxu0  ;;  %v5730_v37 = vpop.f32.mrf.mxu1 }
 0x267   : > { %v3080_v4 = vpop.f32.mrf.mxu0  ;;  %v2566_v58 = vpop.f32.mrf.mxu1 }
 0x268   : > { %v7309_v12 = vadd.f32 %v3080_v4, %v2649_v56  ;;  %v2651_v40 = vadd.f32 %v2566_v58, %v7053_v46 }
 0x269   : > { %v5797_v24 = vpop.f32.mrf.mxu0  ;;  %v5731_v32 = vpop.f32.mrf.mxu1 }
 0x26b   : > { %v3085_v60 = vpop.f32.mrf.mxu0  ;;  %5967 = vmatmul.mubr.msk.bf16.gmra.mxu0 %vm329_vm3, %v3751_v17  ;;  %v2571_v11 = vpop.f32.mrf.mxu1  ;;  %5901 = vmatmul.mubr.msk.bf16.gmra.mxu1 %vm329_vm3, %v3454_v43 }
 0x26c   : > { %v7315_v36 = vadd.f32 %v3085_v60, %v2650_v31  ;;  %5970 = vmatprep.mubr.msk.bf16.mxu0 %vm6141_vm2, %v7625_v39  ;;  %v2652_v0 = vadd.f32 %v2571_v11, %v7060_v14  ;;  %vm4220_vm2 = vcmask 1045508  }
 0x26d   : > { %v5800_v46 = vpop.f32.mrf.mxu0  ;;  %v5734_v51 = vpop.f32.mrf.mxu1 }
 0x26f   : > { %v3088_v63 = vpop.f32.mrf.mxu0  ;;  %v2574_v10 = vpop.f32.mrf.mxu1 }
 0x270   : > { %v7322_v56 = vadd.f32 %v3088_v63, %v2651_v40  ;;  %v2653_v7 = vadd.f32 %v2574_v10, %v7070_v26 }
 0x271   : > { %v5801_v22 = vpop.f32.mrf.mxu0  ;;  %v5735_v33 = vpop.f32.mrf.mxu1 }
 0x273   : > { %v3093_v59 = vpop.f32.mrf.mxu0  ;;  %5971 = vmatmul.mubr.msk.bf16.gmra.mxu0 %vm329_vm3, %v3753_v53  ;;  %v2579_v39 = vpop.f32.mrf.mxu1  ;;  %vm7447_vm3 = vmor %vm382_vm1, %vm4220_vm2  ;;  %vm4239_vm1 = vsmask.f32 1280 }
 0x274   : > { %v7327_v52 = vadd.f32 %v3093_v59, %v2652_v0  ;;  %v2654_v16 = vadd.f32 %v2579_v39, %v7076_v5  ;;  %vm7470_vm5 = vmor %vm4239_vm1, %vm4240_vm4 }
 0x275   : > { %v5804_v14 = vpop.f32.mrf.mxu0  ;;  %v5738_v25 = vpop.f32.mrf.mxu1 }
 0x277   : > { %v3096_v31 = vpop.f32.mrf.mxu0  ;;  %v2582_v54 = vpop.f32.mrf.mxu1 }
 0x278   : > { %v7330_v38 = vadd.f32 %v3096_v31, %v2653_v7  ;;  %v2655_v35 = vadd.f32 %v2582_v54, %v7086_v50 }
 0x279   : > { %v5805_v49 = vpop.f32.mrf.mxu0  ;;  %v5739_v26 = vpop.f32.mrf.mxu1 }
 0x27b   : > { %v3101_v37 = vpop.f32.mrf.mxu0  ;;  %v2587_v4 = vpop.f32.mrf.mxu1 }
 0x27c   : > { %v7333_v58 = vadd.f32 %v3101_v37, %v2654_v16  ;;  %v2656_v17 = vadd.f32 %v2587_v4, %v7092_v57 }
 0x27d   : > { %v5808_v40 = vpop.f32.mrf.mxu0  ;;  %v5742_v24 = vpop.f32.mrf.mxu1 }
 0x27f   : > { %v3104_v43 = vpop.f32.mrf.mxu0  ;;  %v2590_v5 = vpop.f32.mrf.mxu1 }
 0x280   : > { %v7336_v32 = vadd.f32 %v3104_v43, %v2655_v35  ;;  %v2657_v60 = vadd.f32 %v2590_v5, %v7102_v20 }
 0x281   : > { %v5809_v11 = vpop.f32.mrf.mxu0  ;;  %v5743_v6 = vpop.f32.mrf.mxu1 }
 0x283   : > { %v3109_v0 = vpop.f32.mrf.mxu0  ;;  %v2595_v50 = vpop.f32.mrf.mxu1 }
 0x284   : > { %v7339_v46 = vadd.f32 %v3109_v0, %v2656_v17  ;;  %v2658_v51 = vadd.f32 %v2595_v50, %v7108_v45 }
 0x285   : > { %v5812_v63 = vpop.f32.mrf.mxu0  ;;  %v5746_v10 = vpop.f32.mrf.mxu1 }
 0x287   : > { %v3112_v53 = vpop.f32.mrf.mxu0  ;;  %v2598_v57 = vpop.f32.mrf.mxu1 }
 0x288   : > { %v7342_v7 = vadd.f32 %v3112_v53, %v2657_v60  ;;  %v2659_v22 = vadd.f32 %v2598_v57, %v7118_v28 }
 0x289   : > { %v5813_v33 = vpop.f32.mrf.mxu0  ;;  %v5747_v59 = vpop.f32.mrf.mxu1 }
 0x28b   : > { %v3117_v39 = vpop.f32.mrf.mxu0  ;;  %v2603_v20 = vpop.f32.mrf.mxu1 }
 0x28c   : > { %v7345_v16 = vadd.f32 %v3117_v39, %v2658_v51  ;;  %v2660_v14 = vadd.f32 %v2603_v20, %v7124_v47 }
 0x28d   : > { %v5816_v25 = vpop.f32.mrf.mxu0  ;;  %v5750_v31 = vpop.f32.mrf.mxu1 }
 0x28f   : > { %v3120_v54 = vpop.f32.mrf.mxu0  ;;  %v2606_v45 = vpop.f32.mrf.mxu1 }
 0x290   : > { %v7348_v35 = vadd.f32 %v3120_v54, %v2659_v22  ;;  %v2661_v49 = vadd.f32 %v2606_v45, %v7134_v13 }
 0x291   : > { %v5817_v26 = vpop.f32.mrf.mxu0  ;;  %v5751_v37 = vpop.f32.mrf.mxu1 }
 0x293   : > { %v3125_v4 = vpop.f32.mrf.mxu0  ;;  %v2611_v28 = vpop.f32.mrf.mxu1 }
 0x294   : > { %v7351_v17 = vadd.f32 %v3125_v4, %v2660_v14  ;;  %v2662_v40 = vadd.f32 %v2611_v28, %v7140_v48 }
 0x295   : > { %v5820_v24 = vpop.f32.mrf.mxu0  ;;  %v5754_v43 = vpop.f32.mrf.mxu1 }
 0x297   : > { %v3128_v5 = vpop.f32.mrf.mxu0  ;;  %v2614_v47 = vpop.f32.mrf.mxu1 }
 0x298   : > { %v7354_v60 = vadd.f32 %v3128_v5, %v2661_v49  ;;  %v2663_v11 = vadd.f32 %v2614_v47, %v7150_v29 }
 0x299   : > { %v5821_v6 = vpop.f32.mrf.mxu0  ;;  %v5755_v0 = vpop.f32.mrf.mxu1 }
 0x29b   : > { %v3133_v50 = vpop.f32.mrf.mxu0  ;;  %v2619_v13 = vpop.f32.mrf.mxu1 }
 0x29c   : > { %v7357_v51 = vadd.f32 %v3133_v50, %v2662_v40  ;;  %v2664_v63 = vadd.f32 %v2619_v13, %v7156_v34 }
 0x29d   : > { %v5824_v10 = vpop.f32.mrf.mxu0  ;;  %v5758_v53 = vpop.f32.mrf.mxu1 }
 0x29f   : > { %v3136_v57 = vpop.f32.mrf.mxu0  ;;  %v2622_v48 = vpop.f32.mrf.mxu1 }
 0x2a0   : > { %v7360_v22 = vadd.f32 %v3136_v57, %v2663_v11  ;;  %v2665_v33 = vadd.f32 %v2622_v48, %v7166_v2 }
 0x2a1   : > { %v5825_v59 = vpop.f32.mrf.mxu0  ;;  %v5759_v39 = vpop.f32.mrf.mxu1 }
 0x2a3   : > { %v3141_v20 = vpop.f32.mrf.mxu0  ;;  %v2627_v29 = vpop.f32.mrf.mxu1 }
 0x2a4   : > { %v7363_v14 = vadd.f32 %v3141_v20, %v2664_v63  ;;  %v2666_v25 = vadd.f32 %v2627_v29, %v7172_v61 }
 0x2a5   : > { %v5828_v31 = vpop.f32.mrf.mxu0  ;;  %v5762_v54 = vpop.f32.mrf.mxu1 }
 0x2a7   : > { %v3144_v45 = vpop.f32.mrf.mxu0  ;;  %v2630_v34 = vpop.f32.mrf.mxu1 }
 0x2a8   : > { %v7366_v49 = vadd.f32 %v3144_v45, %v2665_v33  ;;  %v2667_v26 = vadd.f32 %v2630_v34, %v7182_v30  ;;  %v7377_v30 = vld [vmem:[%s7613_s2] ss:$0 sm:$0xff] }
 0x2a9   : > { %v5829_v37 = vpop.f32.mrf.mxu0  ;;  %v5763_v4 = vpop.f32.mrf.mxu1 }
 0x2ab   : > { %v3149_v28 = vpop.f32.mrf.mxu0  ;;  %v3543_v40 = vpop.f32.mrf.mxu1 }
 0x2ac   : > { %v7369_v2 = vadd.f32 %v3149_v28, %v2666_v25  ;;  %v3678_v6 = vadd.f32 %v3543_v40, %v7188_v55 }
 0x2ad   : > { %v5832_v24 = vpop.f32.mrf.mxu0  ;;  %v5838_v43 = vpop.f32.mrf.mxu1 }
 0x2af   : > { %v3152_v5 = vpop.f32.mrf.mxu0  ;;  %v3546_v61 = vpop.f32.mrf.mxu1 }
 0x2b0   : > { %v7371_v47 = vadd.f32 %v3152_v5, %v2667_v26  ;;  %v3679_v53 = vadd.f32 %v3546_v61, %v7198_v18 }
 0x2b1   : > { %v5833_v11 = vpop.f32.mrf.mxu0  ;;  %v5839_v0 = vpop.f32.mrf.mxu1 }
 0x2b3   : > { %v3842_v50 = vpop.f32.mrf.mxu0  ;;  %v3551_v13 = vpop.f32.mrf.mxu1 }
 0x2b4   : > { %v3977_v63 = vadd.f32 %v3842_v50, %v3678_v6  ;;  %v3680_v29 = vadd.f32 %v3551_v13, %v7204_v1 }
 0x2b5   : > { %v5908_v10 = vpop.f32.mrf.mxu0  ;;  %v5842_v48 = vpop.f32.mrf.mxu1 }
 0x2b6   : > { %v4018_v57 = vadd.f32 %v7377_v30, %v3977_v63 }
 0x2b7   : > { %v3845_v33 = vpop.f32.mrf.mxu0  ;;  %v3554_v39 = vpop.f32.mrf.mxu1 }
 0x2b8   : > { %v4052_v59 = vmax.f32 %v4018_v57, 0.0  ;;  %v3978_v55 = vadd.f32 %v3845_v33, %v3679_v53  ;;  %v3681_v4 = vadd.f32 %v3554_v39, %v7214_v27 }
 0x2b9   : > { %v5909_v20 = vpop.f32.mrf.mxu0  ;;  %v5843_v31 = vpop.f32.mrf.mxu1 }
 0x2ba   : > { %v5148_v18 = vpack.c.bf16 %v4052_v59, %v4052_v59  ;;  %v4019_v25 = vadd.f32 %v7377_v30, %v3978_v55 }
 0x2bb   : > { %v3850_v54 = vpop.f32.mrf.mxu0  ;;  %v3559_v34 = vpop.f32.mrf.mxu1 }
 0x2bc   : > { %4111 = vst.msk [vmem:[%s7385_s16] sm:$0xf] %vm4110_vm6, %v5148_v18  ;;  %v4053_v45 = vmax.f32 %v4019_v25, 0.0  ;;  %v3979_v26 = vadd.f32 %v3850_v54, %v3680_v29  ;;  %v3682_v6 = vadd.f32 %v3559_v34, %v7220_v44 }
 0x2bd   : > { %v5912_v37 = vpop.f32.mrf.mxu0  ;;  %v5846_v24 = vpop.f32.mrf.mxu1 }
 0x2be   : > { %v5149_v28 = vpack.c.bf16 %v4053_v45, %v4053_v45  ;;  %v4020_v40 = vadd.f32 %v7377_v30, %v3979_v26 }
 0x2bf   : > { %v3853_v43 = vpop.f32.mrf.mxu0  ;;  %v3562_v5 = vpop.f32.mrf.mxu1 }
 0x2c0   : > { %4112 = vst.msk [vmem:[%s7385_s16 + $0x4] sm:$0xf] %vm4110_vm6, %v5149_v28  ;;  %v4054_v1 = vmax.f32 %v4020_v40, 0.0  ;;  %v3980_v61 = vadd.f32 %v3853_v43, %v3681_v4  ;;  %v3683_v44 = vadd.f32 %v3562_v5, %v7230_v42 }
 0x2c1   : > { %v5913_v11 = vpop.f32.mrf.mxu0  ;;  %v5847_v13 = vpop.f32.mrf.mxu1 }
 0x2c2   : > { %v5150_v0 = vpack.c.bf16 %v4054_v1, %v4054_v1  ;;  %v4021_v50 = vadd.f32 %v7377_v30, %v3980_v61 }
 0x2c3   : > { %v3858_v63 = vpop.f32.mrf.mxu0  ;;  %v3567_v57 = vpop.f32.mrf.mxu1 }
 0x2c4   : > { %v4125_v10 = vshrl.u32 %v5150_v0, 16  ;;  %v4128_v27 = vshll.u32 %v5150_v0, 16  ;;  %v4055_v53 = vmax.f32 %v4021_v50, 0.0  ;;  %v3981_v48 = vadd.f32 %v3858_v63, %v3682_v6 }
 0x2c5   : > { %v5916_v33 = vpop.f32.mrf.mxu0  ;;  %v5850_v29 = vpop.f32.mrf.mxu1  ;;  %v3684_v42 = vadd.f32 %v3567_v57, %v7236_v41 }
 0x2c6   : > { %v4127_v59 = vrot.slane %v4125_v10, 4  ;;  %v4130_v39 = vrot.slane %v4128_v27, 5  ;;  %v5151_v55 = vpack.c.bf16 %v4055_v53, %v4055_v53  ;;  %v4022_v20 = vadd.f32 %v7377_v30, %v3981_v48 }
 0x2c7   : > { %v3861_v18 = vpop.f32.mrf.mxu0  ;;  %v3570_v34 = vpop.f32.mrf.mxu1 }
 0x2c8   : > { %v4131_v25 = vor.u32 %v4130_v39, %v4127_v59  ;;  %v4134_v31 = vshll.u32 %v5151_v55, 16  ;;  %v4138_v54 = vshrl.u32 %v5151_v55, 16  ;;  %v4056_v45 = vmax.f32 %v4022_v20, 0.0 }
 0x2c9   : > { %v3982_v37 = vadd.f32 %v3861_v18, %v3683_v44  ;;  %v5917_v4 = vpop.f32.mrf.mxu0  ;;  %v5851_v1 = vpop.f32.mrf.mxu1  ;;  %v3685_v41 = vadd.f32 %v3570_v34, %v7246_v9 }
 0x2ca   : > { %v4132_v28 = vrot.slane %v4131_v25, 4  ;;  %v4136_v40 = vrot.slane %v4134_v31, 5  ;;  %v4140_v24 = vrot.slane %v4138_v54, 4  ;;  %v5152_v43 = vpack.c.bf16 %v4056_v45, %v4056_v45 }
 0x2cb   : > { %v4023_v5 = vadd.f32 %v7377_v30, %v3982_v37  ;;  %v3866_v61 = vpop.f32.mrf.mxu0  ;;  %v3575_v50 = vpop.f32.mrf.mxu1 }
 0x2cc   : > { %v4137_v11 = vsel %vm7400_vm9, %v4132_v28, %v4136_v40  ;;  %v4141_v6 = vor.u32 %v4140_v24, %v4136_v40  ;;  %v4144_v0 = vshll.u32 %v5152_v43, 16  ;;  %v3983_v63 = vadd.f32 %v3866_v61, %v3684_v42 }
 0x2cd   : > { %5078 = vst.msk [vmem:[%s7385_s16 + $0x8] sm:$0xf] %vm4110_vm6, %v4137_v11  ;;  %v4057_v13 = vmax.f32 %v4023_v5, 0.0  ;;  %v5920_v10 = vpop.f32.mrf.mxu0  ;;  %v5854_v57 = vpop.f32.mrf.mxu1  ;;  %v5082_v44 = vrot.slane %v5152_v43, 9  ;;  %v3686_v31 = vadd.f32 %v3575_v50, %v7252_v15 }
 0x2ce   : > { %v4142_v27 = vrot.slane %v4141_v6, 4  ;;  %v4146_v53 = vrot.slane %v4144_v0, 5  ;;  %v4024_v33 = vadd.f32 %v7377_v30, %v3983_v63 }
 0x2cf   : > { %v5153_v48 = vpack.c.bf16 %v4057_v13, %v4057_v13  ;;  %v3869_v59 = vpop.f32.mrf.mxu0  ;;  %v3578_v20 = vpop.f32.mrf.mxu1 }
 0x2d0   : > { %v4147_v39 = vsel %vm7400_vm9, %v4142_v27, %v4146_v53  ;;  %v3984_v29 = vadd.f32 %v3869_v59, %v3685_v41  ;;  %v4058_v9 = vmax.f32 %v4024_v33, 0.0  ;;  %v3687_v15 = vadd.f32 %v3578_v20, %v7262_v3 }
 0x2d1   : > { %5079 = vst.msk [vmem:[%s7385_s16 + $0xc] sm:$0xf] %vm4110_vm6, %v4147_v39  ;;  %v4163_v18 = vrot.slane %v5153_v48, 5  ;;  %v5921_v25 = vpop.f32.mrf.mxu0  ;;  %v5855_v45 = vpop.f32.mrf.mxu1 }
 0x2d2   : > { %v4025_v54 = vadd.f32 %v7377_v30, %v3984_v29  ;;  %v5154_v37 = vpack.c.bf16 %v4058_v9, %v4058_v9 }
 0x2d3   : > { %v4164_v34 = vsel %vm7414_vm12, %v5082_v44, %v4163_v18  ;;  %v3874_v4 = vpop.f32.mrf.mxu0  ;;  %v3583_v40 = vpop.f32.mrf.mxu1  ;;  %v4165_v43 = vrot.slane %v4163_v18, 4 }
 0x2d4   : > { %5083 = vst.msk [vmem:[%s7385_s16 + $0x10] sm:$0xf] %vm4110_vm6, %v4164_v34  ;;  %v4059_v28 = vmax.f32 %v4025_v54, 0.0  ;;  %v3985_v24 = vadd.f32 %v3874_v4, %v3686_v31  ;;  %v4166_v1 = vrot.slane %v5154_v37, 5  ;;  %v4182_v42 = vshrl.u32 %v5154_v37, 16 }
 0x2d5   : > { %v4185_v5 = vshll.u32 %v5154_v37, 16  ;;  %v5924_v61 = vpop.f32.mrf.mxu0  ;;  %v5858_v0 = vpop.f32.mrf.mxu1  ;;  %v3688_v9 = vadd.f32 %v3583_v40, %v7268_v8 }
 0x2d6   : > { %v5155_v11 = vpack.c.bf16 %v4059_v28, %v4059_v28  ;;  %v4026_v6 = vadd.f32 %v7377_v30, %v3985_v24  ;;  %v4167_v50 = vsel %vm7414_vm12, %v4165_v43, %v4166_v1  ;;  %v4184_v13 = vrot.slane %v4182_v42, 5 }
 0x2d7   : > { %v4187_v63 = vrot.slane %v4185_v5, 6  ;;  %v3877_v10 = vpop.f32.mrf.mxu0  ;;  %5084 = vst.msk [vmem:[%s7385_s16 + $0x14] sm:$0xf] %vm4110_vm6, %v4167_v50  ;;  %v3586_v57 = vpop.f32.mrf.mxu1 }
 0x2d8   : > { %v4191_v27 = vshrl.u32 %v5155_v11, 16  ;;  %v4194_v53 = vshll.u32 %v5155_v11, 16  ;;  %v4060_v41 = vmax.f32 %v4026_v6, 0.0  ;;  %v3986_v48 = vadd.f32 %v3877_v10, %v3687_v15 }
 0x2d9   : > { %v4188_v3 = vor.u32 %v4187_v63, %v4184_v13  ;;  %v5925_v33 = vpop.f32.mrf.mxu0  ;;  %v5859_v44 = vpop.f32.mrf.mxu1  ;;  %v3689_v5 = vadd.f32 %v3586_v57, %v7278_v21 }
 0x2da   : > { %v4193_v59 = vrot.slane %v4191_v27, 5  ;;  %v4196_v39 = vrot.slane %v4194_v53, 6  ;;  %v5156_v20 = vpack.c.bf16 %v4060_v41, %v4060_v41  ;;  %v4027_v29 = vadd.f32 %v7377_v30, %v3986_v48 }
 0x2db   : > { %v3882_v25 = vpop.f32.mrf.mxu0  ;;  %v4189_v31 = vrot.slane %v4188_v3, 4  ;;  %v3591_v37 = vpop.f32.mrf.mxu1 }
 0x2dc   : > { %v4197_v54 = vor.u32 %v4196_v39, %v4193_v59  ;;  %v4201_v45 = vshrl.u32 %v5156_v20, 16  ;;  %v4204_v34 = vshll.u32 %v5156_v20, 16  ;;  %v4061_v4 = vmax.f32 %v4027_v29, 0.0 }
 0x2dd   : > { %v3987_v28 = vadd.f32 %v3882_v25, %v3688_v9  ;;  %v5928_v24 = vpop.f32.mrf.mxu0  ;;  %v5862_v61 = vpop.f32.mrf.mxu1  ;;  %v5091_v63 = vrot.slane %v5156_v20, 10  ;;  %v3690_v41 = vadd.f32 %v3591_v37, %v7284_v23 }
 0x2de   : > { %v4198_v43 = vsel %vm7435_vm15, %v4189_v31, %v4197_v54  ;;  %v4203_v1 = vrot.slane %v4201_v45, 5  ;;  %v4206_v42 = vrot.slane %v4204_v34, 6  ;;  %v5157_v8 = vpack.c.bf16 %v4061_v4, %v4061_v4 }
 0x2df   : > { %5087 = vst.msk [vmem:[%s7385_s16 + $0x18] sm:$0xf] %vm4110_vm6, %v4198_v43  ;;  %v4028_v40 = vadd.f32 %v7377_v30, %v3987_v28  ;;  %v3885_v15 = vpop.f32.mrf.mxu0  ;;  %v4199_v11 = vrot.slane %v4197_v54, 4  ;;  %v3594_v50 = vpop.f32.mrf.mxu1 }
 0x2e0   : > { %v4207_v6 = vor.u32 %v4206_v42, %v4203_v1  ;;  %v3988_v13 = vadd.f32 %v3885_v15, %v3689_v5  ;;  %v4224_v21 = vrot.slane %v5157_v8, 6  ;;  %v3691_v54 = vadd.f32 %v3594_v50, %v7294_v62 }
 0x2e1   : > { %v4062_v10 = vmax.f32 %v4028_v40, 0.0  ;;  %v5929_v27 = vpop.f32.mrf.mxu0  ;;  %v5863_v48 = vpop.f32.mrf.mxu1 }
 0x2e2   : > { %v4208_v53 = vsel %vm7435_vm15, %v4199_v11, %v4207_v6  ;;  %v4029_v57 = vadd.f32 %v7377_v30, %v3988_v13  ;;  %v4225_v3 = vsel %vm7447_vm3, %v5091_v63, %v4224_v21  ;;  %v4226_v44 = vrot.slane %v4224_v21, 4 }
 0x2e3   : > { %5088 = vst.msk [vmem:[%s7385_s16 + $0x1c] sm:$0xf] %vm4110_vm6, %v4208_v53  ;;  %v5158_v33 = vpack.c.bf16 %v4062_v10, %v4062_v10  ;;  %v3890_v59 = vpop.f32.mrf.mxu0  ;;  %5092 = vst.msk [vmem:[%s7385_s16 + $0x20] sm:$0xf] %vm4110_vm6, %v4225_v3  ;;  %v3599_v20 = vpop.f32.mrf.mxu1 }
 0x2e4   : > { %v4063_v39 = vmax.f32 %v4029_v57, 0.0  ;;  %v3989_v29 = vadd.f32 %v3890_v59, %v3690_v41  ;;  %v3692_v21 = vadd.f32 %v3599_v20, %v7300_v19 }
 0x2e5   : > { %v4227_v9 = vrot.slane %v5158_v33, 6  ;;  %v4243_v25 = vshrl.u32 %v5158_v33, 16  ;;  %v4246_v23 = vshll.u32 %v5158_v33, 16  ;;  %v5932_v31 = vpop.f32.mrf.mxu0  ;;  %v5866_v37 = vpop.f32.mrf.mxu1 }
 0x2e6   : > { %v5159_v45 = vpack.c.bf16 %v4063_v39, %v4063_v39  ;;  %v4030_v34 = vadd.f32 %v7377_v30, %v3989_v29 }
 0x2e7   : > { %v4228_v4 = vsel %vm7447_vm3, %v4226_v44, %v4227_v9  ;;  %v4245_v28 = vrot.slane %v4243_v25, 6  ;;  %v4248_v24 = vrot.slane %v4246_v23, 7  ;;  %v3893_v43 = vpop.f32.mrf.mxu0  ;;  %v3602_v61 = vpop.f32.mrf.mxu1 }
 0x2e8   : > { %5093 = vst.msk [vmem:[%s7385_s16 + $0x24] sm:$0xf] %vm4110_vm6, %v4228_v4  ;;  %v4252_v1 = vshrl.u32 %v5159_v45, 16  ;;  %v4255_v42 = vshll.u32 %v5159_v45, 16  ;;  %v4064_v5 = vmax.f32 %v4030_v34, 0.0  ;;  %v3990_v8 = vadd.f32 %v3893_v43, %v3691_v54 }
 0x2e9   : > { %v4249_v62 = vor.u32 %v4248_v24, %v4245_v28  ;;  %v5933_v40 = vpop.f32.mrf.mxu0  ;;  %v5867_v13 = vpop.f32.mrf.mxu1  ;;  %v3693_v9 = vadd.f32 %v3602_v61, %v7309_v12 }
 0x2ea   : > { %v4254_v15 = vrot.slane %v4252_v1, 6  ;;  %v4257_v11 = vrot.slane %v4255_v42, 7  ;;  %v5160_v6 = vpack.c.bf16 %v4064_v5, %v4064_v5  ;;  %v4031_v50 = vadd.f32 %v7377_v30, %v3990_v8 }
 0x2eb   : > { %v3898_v10 = vpop.f32.mrf.mxu0  ;;  %v4250_v27 = vrot.slane %v4249_v62, 4  ;;  %v3607_v48 = vpop.f32.mrf.mxu1 }
 0x2ec   : > { %v4258_v53 = vor.u32 %v4257_v11, %v4254_v15  ;;  %v4262_v41 = vshrl.u32 %v5160_v6, 16  ;;  %v4265_v57 = vshll.u32 %v5160_v6, 16  ;;  %v4065_v3 = vmax.f32 %v4031_v50, 0.0 }
 0x2ed   : > { %v3991_v33 = vadd.f32 %v3898_v10, %v3692_v21  ;;  %v5936_v59 = vpop.f32.mrf.mxu0  ;;  %v5870_v25 = vpop.f32.mrf.mxu1  ;;  %v5100_v4 = vrot.slane %v5160_v6, 11  ;;  %v3694_v1 = vadd.f32 %v3607_v48, %v7315_v36 }
 0x2ee   : > { %v4259_v39 = vsel %vm7470_vm5, %v4250_v27, %v4258_v53  ;;  %v4264_v29 = vrot.slane %v4262_v41, 6  ;;  %v4267_v44 = vrot.slane %v4265_v57, 7  ;;  %v5161_v19 = vpack.c.bf16 %v4065_v3, %v4065_v3 }
 0x2ef   : > { %5096 = vst.msk [vmem:[%s7385_s16 + $0x28] sm:$0xf] %vm4110_vm6, %v4259_v39  ;;  %v4032_v20 = vadd.f32 %v7377_v30, %v3991_v33  ;;  %v3901_v23 = vpop.f32.mrf.mxu0  ;;  %v4260_v31 = vrot.slane %v4258_v53, 4  ;;  %v3610_v34 = vpop.f32.mrf.mxu1 }
 0x2f0   : > { %v4268_v54 = vor.u32 %v4267_v44, %v4264_v29  ;;  %v3992_v37 = vadd.f32 %v3901_v23, %v3693_v9  ;;  %v4285_v12 = vrot.slane %v5161_v19, 7  ;;  %v3695_v36 = vadd.f32 %v3610_v34, %v7322_v56 }
 0x2f1   : > { %v4066_v28 = vmax.f32 %v4032_v20, 0.0  ;;  %v5937_v24 = vpop.f32.mrf.mxu0  ;;  %v5871_v5 = vpop.f32.mrf.mxu1 }
 0x2f2   : > { %v4269_v43 = vsel %vm7470_vm5, %v4260_v31, %v4268_v54  ;;  %v4033_v42 = vadd.f32 %v7377_v30, %v3992_v37  ;;  %v4286_v61 = vsel %vm7482_vm8, %v5100_v4, %v4285_v12  ;;  %v4287_v6 = vrot.slane %v4285_v12, 4 }
 0x2f3   : > { %5097 = vst.msk [vmem:[%s7385_s16 + $0x2c] sm:$0xf] %vm4110_vm6, %v4269_v43  ;;  %v5162_v8 = vpack.c.bf16 %v4066_v28, %v4066_v28  ;;  %v3906_v62 = vpop.f32.mrf.mxu0  ;;  %5101 = vst.msk [vmem:[%s7385_s16 + $0x30] sm:$0xf] %vm4110_vm6, %v4286_v61  ;;  %v3615_v15 = vpop.f32.mrf.mxu1 }
 0x2f4   : > { %v4067_v40 = vmax.f32 %v4033_v42, 0.0  ;;  %v3993_v11 = vadd.f32 %v3906_v62, %v3694_v1  ;;  %v3696_v20 = vadd.f32 %v3615_v15, %v7327_v52 }
 0x2f5   : > { %v4288_v50 = vrot.slane %v5162_v8, 7  ;;  %v5940_v13 = vpop.f32.mrf.mxu0  ;;  %v5874_v27 = vpop.f32.mrf.mxu1  ;;  %v4304_v57 = vshrl.u32 %v5162_v8, 16 }
 0x2f6   : > { %v5163_v21 = vpack.c.bf16 %v4067_v40, %v4067_v40  ;;  %v4034_v10 = vadd.f32 %v7377_v30, %v3993_v11 }
 0x2f7   : > { %v4289_v53 = vsel %vm7482_vm8, %v4287_v6, %v4288_v50  ;;  %v3909_v41 = vpop.f32.mrf.mxu0  ;;  %v3618_v33 = vpop.f32.mrf.mxu1  ;;  %v5105_v31 = vrot.slane %v4304_v57, 11 }
 0x2f8   : > { %5102 = vst.msk [vmem:[%s7385_s16 + $0x34] sm:$0xf] %vm4110_vm6, %v4289_v53  ;;  %v4309_v48 = vshrl.u32 %v5163_v21, 16  ;;  %v4068_v3 = vmax.f32 %v4034_v10, 0.0  ;;  %v3994_v59 = vadd.f32 %v3909_v41, %v3695_v36  ;;  %v4312_v56 = vshll.u32 %v5163_v21, 16 }
 0x2f9   : > { %v5941_v39 = vpop.f32.mrf.mxu0  ;;  %v5875_v25 = vpop.f32.mrf.mxu1  ;;  %v3697_v42 = vadd.f32 %v3618_v33, %v7330_v38 }
 0x2fa   : > { %v4311_v29 = vrot.slane %v4309_v48, 7  ;;  %v5164_v44 = vpack.c.bf16 %v4068_v3, %v4068_v3  ;;  %v4035_v9 = vadd.f32 %v7377_v30, %v3994_v59 }
 0x2fb   : > { %v3914_v23 = vpop.f32.mrf.mxu0  ;;  %v3623_v37 = vpop.f32.mrf.mxu1 }
 0x2fc   : > { %v4314_v54 = vor.u32 %v4312_v56, %v4311_v29  ;;  %v4318_v34 = vshrl.u32 %v5164_v44, 16  ;;  %v4069_v4 = vmax.f32 %v4035_v9, 0.0  ;;  %v3995_v12 = vadd.f32 %v3914_v23, %v3696_v20 }
 0x2fd   : > { %v5944_v28 = vpop.f32.mrf.mxu0  ;;  %v4321_v1 = vshll.u32 %v5164_v44, 16  ;;  %v5878_v5 = vpop.f32.mrf.mxu1  ;;  %v4316_v62 = vrot.slane %v4311_v29, 4  ;;  %v3698_v13 = vadd.f32 %v3623_v37, %v7333_v58 }
 0x2fe   : > { %v4315_v24 = vsel %vm7504_vm11, %v5105_v31, %v4314_v54  ;;  %v4320_v43 = vrot.slane %v4318_v34, 7  ;;  %v5165_v52 = vpack.c.bf16 %v4069_v4, %v4069_v4  ;;  %v4036_v61 = vadd.f32 %v7377_v30, %v3995_v12 }
 0x2ff   : > { %5106 = vst.msk [vmem:[%s7385_s16 + $0x38] sm:$0xf] %vm4110_vm6, %v4315_v24  ;;  %v3917_v8 = vpop.f32.mrf.mxu0  ;;  %v3626_v15 = vpop.f32.mrf.mxu1 }
 0x300   : > { %v4323_v40 = vor.u32 %v4321_v1, %v4320_v43  ;;  %v3996_v11 = vadd.f32 %v3917_v8, %v3697_v42  ;;  %5110 = vst.msk [vmem:[%s7385_s16 + $0x40] sm:$0xf] %vm4110_vm6, %v5165_v52  ;;  %v4070_v6 = vmax.f32 %v4036_v61, 0.0  ;;  %v3699_v3 = vadd.f32 %v3626_v15, %v7336_v32 }
 0x301   : > { %v5945_v50 = vpop.f32.mrf.mxu0  ;;  %v5879_v21 = vpop.f32.mrf.mxu1 }
 0x302   : > { %v4324_v38 = vsel %vm7504_vm11, %v4316_v62, %v4323_v40  ;;  %v4037_v36 = vadd.f32 %v7377_v30, %v3996_v11  ;;  %v5166_v10 = vpack.c.bf16 %v4070_v6, %v4070_v6 }
 0x303   : > { %5107 = vst.msk [vmem:[%s7385_s16 + $0x3c] sm:$0xf] %vm4110_vm6, %v4324_v38  ;;  %v3922_v27 = vpop.f32.mrf.mxu0  ;;  %v3631_v41 = vpop.f32.mrf.mxu1 }
 0x304   : > { %v4071_v53 = vmax.f32 %v4037_v36, 0.0  ;;  %v3997_v57 = vadd.f32 %v3922_v27, %v3698_v13  ;;  %5111 = vst.msk [vmem:[%s7385_s16 + $0x44] sm:$0xf] %vm4110_vm6, %v5166_v10  ;;  %v3700_v4 = vadd.f32 %v3631_v41, %v7339_v46 }
 0x305   : > { %v5948_v48 = vpop.f32.mrf.mxu0  ;;  %v5882_v39 = vpop.f32.mrf.mxu1 }
 0x306   : > { %v5167_v33 = vpack.c.bf16 %v4071_v53, %v4071_v53  ;;  %v4038_v59 = vadd.f32 %v7377_v30, %v3997_v57 }
 0x307   : > { %v3925_v58 = vpop.f32.mrf.mxu0  ;;  %v3634_v9 = vpop.f32.mrf.mxu1 }
 0x308   : > { %v4348_v29 = vshrl.u32 %v5167_v33, 16  ;;  %v4351_v56 = vshll.u32 %v5167_v33, 16  ;;  %v4072_v44 = vmax.f32 %v4038_v59, 0.0  ;;  %v3998_v25 = vadd.f32 %v3925_v58, %v3699_v3 }
 0x309   : > { %v5949_v20 = vpop.f32.mrf.mxu0  ;;  %v5883_v37 = vpop.f32.mrf.mxu1  ;;  %v3701_v15 = vadd.f32 %v3634_v9, %v7342_v7 }
 0x30a   : > { %v4350_v23 = vrot.slane %v4348_v29, 4  ;;  %v4353_v31 = vrot.slane %v4351_v56, 5  ;;  %v5168_v54 = vpack.c.bf16 %v4072_v44, %v4072_v44  ;;  %v4039_v34 = vadd.f32 %v7377_v30, %v3998_v25 }
 0x30b   : > { %v3930_v32 = vpop.f32.mrf.mxu0  ;;  %v3639_v1 = vpop.f32.mrf.mxu1 }
 0x30c   : > { %v4354_v12 = vor.u32 %v4353_v31, %v4350_v23  ;;  %v4357_v28 = vshll.u32 %v5168_v54, 16  ;;  %v4361_v24 = vshrl.u32 %v5168_v54, 16  ;;  %v4073_v43 = vmax.f32 %v4039_v34, 0.0 }
 0x30d   : > { %v3999_v42 = vadd.f32 %v3930_v32, %v3700_v4  ;;  %v5952_v5 = vpop.f32.mrf.mxu0  ;;  %v5886_v40 = vpop.f32.mrf.mxu1  ;;  %v3702_v41 = vadd.f32 %v3639_v1, %v7345_v16 }
 0x30e   : > { %v4355_v52 = vrot.slane %v4354_v12, 4  ;;  %v4359_v61 = vrot.slane %v4357_v28, 5  ;;  %v4363_v8 = vrot.slane %v4361_v24, 4  ;;  %v5169_v62 = vpack.c.bf16 %v4073_v43, %v4073_v43 }
 0x30f   : > { %v4040_v11 = vadd.f32 %v7377_v30, %v3999_v42  ;;  %v3933_v6 = vpop.f32.mrf.mxu0  ;;  %v3642_v13 = vpop.f32.mrf.mxu1 }
 0x310   : > { %v4360_v46 = vsel %vm7400_vm9, %v4355_v52, %v4359_v61  ;;  %v4364_v50 = vor.u32 %v4363_v8, %v4359_v61  ;;  %v4367_v38 = vshll.u32 %v5169_v62, 16  ;;  %v4000_v21 = vadd.f32 %v3933_v6, %v3701_v15 }
 0x311   : > { %5115 = vst.msk [vmem:[%s7385_s16 + $0x48] sm:$0xf] %vm4110_vm6, %v4360_v46  ;;  %v4074_v36 = vmax.f32 %v4040_v11, 0.0  ;;  %v5953_v10 = vpop.f32.mrf.mxu0  ;;  %v5887_v7 = vpop.f32.mrf.mxu1  ;;  %v5119_v58 = vrot.slane %v5169_v62, 9  ;;  %v3703_v9 = vadd.f32 %v3642_v13, %v7348_v35 }
 0x312   : > { %v4365_v27 = vrot.slane %v4364_v50, 4  ;;  %v4369_v53 = vrot.slane %v4367_v38, 5  ;;  %v4041_v48 = vadd.f32 %v7377_v30, %v4000_v21 }
 0x313   : > { %v5170_v57 = vpack.c.bf16 %v4074_v36, %v4074_v36  ;;  %v3938_v3 = vpop.f32.mrf.mxu0  ;;  %v3647_v59 = vpop.f32.mrf.mxu1 }
 0x314   : > { %v4370_v33 = vsel %vm7400_vm9, %v4365_v27, %v4369_v53  ;;  %v4001_v39 = vadd.f32 %v3938_v3, %v3702_v41  ;;  %v4075_v56 = vmax.f32 %v4041_v48, 0.0  ;;  %v3704_v35 = vadd.f32 %v3647_v59, %v7351_v17 }
 0x315   : > { %5116 = vst.msk [vmem:[%s7385_s16 + $0x4c] sm:$0xf] %vm4110_vm6, %v4370_v33  ;;  %v4383_v29 = vrot.slane %v5170_v57, 5  ;;  %v5956_v44 = vpop.f32.mrf.mxu0  ;;  %v5890_v25 = vpop.f32.mrf.mxu1 }
 0x316   : > { %v4042_v16 = vadd.f32 %v7377_v30, %v4001_v39  ;;  %v5171_v23 = vpack.c.bf16 %v4075_v56, %v4075_v56 }
 0x317   : > { %v4384_v20 = vsel %vm7414_vm12, %v5119_v58, %v4383_v29  ;;  %v3941_v31 = vpop.f32.mrf.mxu0  ;;  %v3650_v54 = vpop.f32.mrf.mxu1  ;;  %v4385_v37 = vrot.slane %v4383_v29, 4 }
 0x318   : > { %5120 = vst.msk [vmem:[%s7385_s16 + $0x50] sm:$0xf] %vm4110_vm6, %v4384_v20  ;;  %v4076_v26 = vmax.f32 %v4042_v16, 0.0  ;;  %v4002_v34 = vadd.f32 %v3941_v31, %v3703_v9  ;;  %v4386_v4 = vrot.slane %v5171_v23, 5  ;;  %v4399_v32 = vshrl.u32 %v5171_v23, 16 }
 0x319   : > { %v4402_v12 = vshll.u32 %v5171_v23, 16  ;;  %v5957_v28 = vpop.f32.mrf.mxu0  ;;  %v5891_v1 = vpop.f32.mrf.mxu1  ;;  %v3705_v55 = vadd.f32 %v3650_v54, %v7354_v60 }
 0x31a   : > { %v5172_v24 = vpack.c.bf16 %v4076_v26, %v4076_v26  ;;  %v4043_v43 = vadd.f32 %v7377_v30, %v4002_v34  ;;  %v4387_v42 = vsel %vm7414_vm12, %v4385_v37, %v4386_v4  ;;  %v4401_v5 = vrot.slane %v4399_v32, 5 }
 0x31b   : > { %v4404_v52 = vrot.slane %v4402_v12, 6  ;;  %v3946_v61 = vpop.f32.mrf.mxu0  ;;  %5121 = vst.msk [vmem:[%s7385_s16 + $0x54] sm:$0xf] %vm4110_vm6, %v4387_v42  ;;  %v3655_v15 = vpop.f32.mrf.mxu1 }
 0x31c   : > { %v4408_v8 = vshrl.u32 %v5172_v24, 16  ;;  %v4411_v62 = vshll.u32 %v5172_v24, 16  ;;  %v4077_v40 = vmax.f32 %v4043_v43, 0.0  ;;  %v4003_v11 = vadd.f32 %v3946_v61, %v3704_v35 }
 0x31d   : > { %v4405_v6 = vor.u32 %v4404_v52, %v4401_v5  ;;  %v5960_v46 = vpop.f32.mrf.mxu0  ;;  %v5894_v36 = vpop.f32.mrf.mxu1  ;;  %v3706_v58 = vadd.f32 %v3655_v15, %v7357_v51 }
 0x31e   : > { %v4410_v17 = vrot.slane %v4408_v8, 5  ;;  %v4413_v50 = vrot.slane %v4411_v62, 6  ;;  %v5173_v38 = vpack.c.bf16 %v4077_v40, %v4077_v40  ;;  %v4044_v13 = vadd.f32 %v7377_v30, %v4003_v11 }
 0x31f   : > { %v3949_v21 = vpop.f32.mrf.mxu0  ;;  %v4406_v10 = vrot.slane %v4405_v6, 4  ;;  %v3658_v7 = vpop.f32.mrf.mxu1 }
 0x320   : > { %v4414_v27 = vor.u32 %v4413_v50, %v4410_v17  ;;  %v4418_v53 = vshrl.u32 %v5173_v38, 16  ;;  %v4421_v41 = vshll.u32 %v5173_v38, 16  ;;  %v4078_v57 = vmax.f32 %v4044_v13, 0.0 }
 0x321   : > { %v4004_v48 = vadd.f32 %v3949_v21, %v3705_v55  ;;  %v5961_v3 = vpop.f32.mrf.mxu0  ;;  %v5895_v29 = vpop.f32.mrf.mxu1  ;;  %v5128_v23 = vrot.slane %v5173_v38, 10  ;;  %v3707_v34 = vadd.f32 %v3658_v7, %v7360_v22 }
 0x322   : > { %v4415_v33 = vsel %vm7435_vm15, %v4406_v10, %v4414_v27  ;;  %v4420_v59 = vrot.slane %v4418_v53, 5  ;;  %v4423_v39 = vrot.slane %v4421_v41, 6  ;;  %v5174_v60 = vpack.c.bf16 %v4078_v57, %v4078_v57 }
 0x323   : > { %5124 = vst.msk [vmem:[%s7385_s16 + $0x58] sm:$0xf] %vm4110_vm6, %v4415_v33  ;;  %v4045_v56 = vadd.f32 %v7377_v30, %v4004_v48  ;;  %v3954_v44 = vpop.f32.mrf.mxu0  ;;  %v4416_v9 = vrot.slane %v4414_v27, 4  ;;  %v3663_v25 = vpop.f32.mrf.mxu1 }
 0x324   : > { %v4424_v16 = vor.u32 %v4423_v39, %v4420_v59  ;;  %v4005_v20 = vadd.f32 %v3954_v44, %v3706_v58  ;;  %v4438_v31 = vrot.slane %v5174_v60, 6  ;;  %v3708_v52 = vadd.f32 %v3663_v25, %v7363_v14 }
 0x325   : > { %v4079_v26 = vmax.f32 %v4045_v56, 0.0  ;;  %v5964_v54 = vpop.f32.mrf.mxu0  ;;  %v5898_v4 = vpop.f32.mrf.mxu1 }
 0x326   : > { %v4425_v51 = vsel %vm7435_vm15, %v4416_v9, %v4424_v16  ;;  %v4046_v37 = vadd.f32 %v7377_v30, %v4005_v20  ;;  %v4439_v32 = vsel %vm7447_vm3, %v5128_v23, %v4438_v31  ;;  %v4440_v18 = vrot.slane %v4438_v31, 4 }
 0x327   : > { %5125 = vst.msk [vmem:[%s7385_s16 + $0x5c] sm:$0xf] %vm4110_vm6, %v4425_v51  ;;  %v5175_v12 = vpack.c.bf16 %v4079_v26, %v4079_v26  ;;  %v3957_v28 = vpop.f32.mrf.mxu0  ;;  %5129 = vst.msk [vmem:[%s7385_s16 + $0x60] sm:$0xf] %vm4110_vm6, %v4439_v32  ;;  %v3666_v24 = vpop.f32.mrf.mxu1 }
 0x328   : > { %v4080_v35 = vmax.f32 %v4046_v37, 0.0  ;;  %v4006_v43 = vadd.f32 %v3957_v28, %v3707_v34  ;;  %v3709_v0 = vadd.f32 %v3666_v24, %v7366_v49 }
 0x329   : > { %v4441_v1 = vrot.slane %v5175_v12, 6  ;;  %v4454_v42 = vshrl.u32 %v5175_v12, 16  ;;  %v4457_v22 = vshll.u32 %v5175_v12, 16  ;;  %v5965_v5 = vpop.f32.mrf.mxu0  ;;  %v5899_v62 = vpop.f32.mrf.mxu1 }
 0x32a   : > { %v5176_v61 = vpack.c.bf16 %v4080_v35, %v4080_v35  ;;  %v4047_v8 = vadd.f32 %v7377_v30, %v4006_v43 }
 0x32b   : > { %v4442_v40 = vsel %vm7447_vm3, %v4440_v18, %v4441_v1  ;;  %v4456_v15 = vrot.slane %v4454_v42, 6  ;;  %v4459_v11 = vrot.slane %v4457_v22, 7  ;;  %v3962_v6 = vpop.f32.mrf.mxu0  ;;  %v3671_v38 = vpop.f32.mrf.mxu1 }
 0x32c   : > { %5130 = vst.msk [vmem:[%s7385_s16 + $0x64] sm:$0xf] %vm4110_vm6, %v4442_v40  ;;  %v4463_v46 = vshrl.u32 %v5176_v61, 16  ;;  %v4466_v17 = vshll.u32 %v5176_v61, 16  ;;  %v4081_v50 = vmax.f32 %v4047_v8, 0.0  ;;  %v4007_v13 = vadd.f32 %v3962_v6, %v3708_v52 }
 0x32d   : > { %v4460_v36 = vor.u32 %v4459_v11, %v4456_v15  ;;  %v5968_v55 = vpop.f32.mrf.mxu0  ;;  %v5902_v53 = vpop.f32.mrf.mxu1  ;;  %v3710_v44 = vadd.f32 %v3671_v38, %v7369_v2 }
 0x32e   : > { %v4465_v14 = vrot.slane %v4463_v46, 6  ;;  %v4468_v21 = vrot.slane %v4466_v17, 7  ;;  %v5177_v10 = vpack.c.bf16 %v4081_v50, %v4081_v50  ;;  %v4048_v27 = vadd.f32 %v7377_v30, %v4007_v13 }
 0x32f   : > { %v3965_v41 = vpop.f32.mrf.mxu0  ;;  %v4461_v7 = vrot.slane %v4460_v36, 4  ;;  %v3674_v33 = vpop.f32.mrf.mxu1 }
 0x330   : > { %v4469_v57 = vor.u32 %v4468_v21, %v4465_v14  ;;  %v4473_v48 = vshrl.u32 %v5177_v10, 16  ;;  %v4476_v3 = vshll.u32 %v5177_v10, 16  ;;  %v4082_v59 = vmax.f32 %v4048_v27, 0.0 }
 0x331   : > { %v4008_v39 = vadd.f32 %v3965_v41, %v3709_v0  ;;  %v5969_v58 = vpop.f32.mrf.mxu0  ;;  %v5903_v9 = vpop.f32.mrf.mxu1  ;;  %v5137_v26 = vrot.slane %v5177_v10, 11  ;;  %v3711_v2 = vadd.f32 %v3674_v33, %v7371_v47 }
 0x332   : > { %v4470_v29 = vsel %vm7470_vm5, %v4461_v7, %v4469_v57  ;;  %v4475_v60 = vrot.slane %v4473_v48, 6  ;;  %v4478_v56 = vrot.slane %v4476_v3, 7  ;;  %v5178_v49 = vpack.c.bf16 %v4082_v59, %v4082_v59 }
 0x333   : > { %5133 = vst.msk [vmem:[%s7385_s16 + $0x68] sm:$0xf] %vm4110_vm6, %v4470_v29  ;;  %v4049_v16 = vadd.f32 %v7377_v30, %v4008_v39  ;;  %v3970_v25 = vpop.f32.mrf.mxu0  ;;  %v4471_v20 = vrot.slane %v4469_v57, 4 }
 0x334   : > { %v4479_v23 = vor.u32 %v4478_v56, %v4475_v60  ;;  %v4009_v31 = vadd.f32 %v3970_v25, %v3710_v44  ;;  %v4493_v54 = vrot.slane %v5178_v49, 7 }
 0x335   : > { %v4083_v51 = vmax.f32 %v4049_v16, 0.0  ;;  %v5972_v34 = vpop.f32.mrf.mxu0 }
 0x336   : > { %v4480_v37 = vsel %vm7470_vm5, %v4471_v20, %v4479_v23  ;;  %v4050_v4 = vadd.f32 %v7377_v30, %v4009_v31  ;;  %v4494_v32 = vsel %vm7482_vm8, %v5137_v26, %v4493_v54  ;;  %v4495_v43 = vrot.slane %v4493_v54, 4 }
 0x337   : > { %5134 = vst.msk [vmem:[%s7385_s16 + $0x6c] sm:$0xf] %vm4110_vm6, %v4480_v37  ;;  %v5179_v12 = vpack.c.bf16 %v4083_v51, %v4083_v51  ;;  %v3973_v28 = vpop.f32.mrf.mxu0  ;;  %5138 = vst.msk [vmem:[%s7385_s16 + $0x70] sm:$0xf] %vm4110_vm6, %v4494_v32 }
 0x338   : > { %v4084_v35 = vmax.f32 %v4050_v4, 0.0  ;;  %v4010_v24 = vadd.f32 %v3973_v28, %v3711_v2 }
 0x339   : > { %v4496_v18 = vrot.slane %v5179_v12, 7  ;;  %v5973_v63 = vpop.f32.mrf.mxu0  ;;  %v4509_v22 = vshrl.u32 %v5179_v12, 16 }
 0x33a   : > { %v5180_v1 = vpack.c.bf16 %v4084_v35, %v4084_v35  ;;  %v4051_v47 = vadd.f32 %v7377_v30, %v4010_v24 }
 0x33b   : > { %v4497_v42 = vsel %vm7482_vm8, %v4495_v43, %v4496_v18  ;;  %v5142_v40 = vrot.slane %v4509_v22, 11 }
 0x33c   : > { %5139 = vst.msk [vmem:[%s7385_s16 + $0x74] sm:$0xf] %vm4110_vm6, %v4497_v42  ;;  %v4514_v5 = vshrl.u32 %v5180_v1, 16  ;;  %v4085_v52 = vmax.f32 %v4051_v47, 0.0  ;;  %v4517_v8 = vshll.u32 %v5180_v1, 16 }
 0x33e   : > { %v4516_v61 = vrot.slane %v4514_v5, 7  ;;  %v5181_v62 = vpack.c.bf16 %v4085_v52, %v4085_v52 }
 0x340   : > { %v4519_v15 = vor.u32 %v4517_v8, %v4516_v61  ;;  %v4523_v11 = vshrl.u32 %v5181_v62, 16  ;;  %v4526_v30 = vshll.u32 %v5181_v62, 16  ;;  %v4521_v45 = vrot.slane %v4516_v61, 4 }
 0x342   : > { %v4520_v6 = vsel %vm7504_vm11, %v5142_v40, %v4519_v15  ;;  %v4525_v46 = vrot.slane %v4523_v11, 7 }
 0x343   : > { %5143 = vst.msk [vmem:[%s7385_s16 + $0x78] sm:$0xf] %vm4110_vm6, %v4520_v6 }
 0x344   : > { %v4528_v17 = vor.u32 %v4526_v30, %v4525_v46 }
 0x346   : > { %v4529_v50 = vsel %vm7504_vm11, %v4521_v45, %v4528_v17 }
 0x347   : > { %5144 = vst.msk [vmem:[%s7385_s16 + $0x7c] sm:$0xf] %vm4110_vm6, %v4529_v50 }
 0x348 PF: > { %s13_s12 = sadd.s32 1, %s6137_s12  }
 0x349   : > { %p10_p4 = scmp.ge.s32.totalorder %s13_s12, 4  }
 0x34b   :  { %12 = sbr.rel (!%p10_p4) target bundleno = 1 (0x1), region = 88 }

// kernel: extended_mask2former_forward.12
= control target key start
LH: loop header
LB: loop body
LE: loop exit
PB: predicated region body
PF: predicated region fallthrough
CT: control target
= control target key end

     0   :  { %s747_s18 = smov 0   ;;  %s822_s0 = inlined_call_operand.vmem [shape: bf16[2,64,32], index: 0, kind: input, shape index: {}]   ;;  %s823_s1 = inlined_call_operand.vmem [shape: bf16[32,32], index: 1, kind: input, shape index: {}]   ;;  %s824_s2 = inlined_call_operand.vmem [shape: f32[1,32], index: 2, kind: input, shape index: {}]   ;;  %s825_s3 = inlined_call_operand.vmem [shape: bf16[2,16,32], index: 3, kind: input, shape index: {}]   ;;  %s826_s4 = inlined_call_operand.vmem [shape: bf16[64,16], index: 4, kind: input, shape index: {}]   ;;  %s827_s5 = inlined_call_operand.vmem [shape: bf16[2,64,32], index: 5, kind: output, shape index: {}]  }
   0x1 LB: > { %s605_s19 = sadd.s32 4294967295, %s715_s18   ;;  %p609_p0 = scmp.ge.s32.totalorder %s715_s18, 1  ;;  %s715_s18 = sphi %s747_s18, %s15_s18  }
   0x2   : > { %p197_p1 = scmp.lt.s32.totalorder %s715_s18, 3 }
   0x4   : > { %p198_p2 = pnand %p609_p0, %p197_p1 }
   0x5   : > { %p230_p3 = scmp.lt.s32.totalorder (!%p198_p2), %s605_s19, 1 }
   0x6   : > { %201 = sbr.rel (%p198_p2) target bundleno = 234 (0xea), region = 40 }
   0xb   : > { %v698_v0 = vld [vmem:[%s823_s1 + $0x8] sm:$0xff]   ;;  %v699_v1 = vld [vmem:[%s823_s1] sm:$0xff]   ;;  %s829_s19 = smov (!%p230_p3, %s605_s19), 1  ;;  %vm411_vm0 = vcmask 130048   ;;  %vm297_vm1 = vcmask 261120   ;;  %v707_v6 = vld [vmem:[%s826_s4 + $0x10] sm:$0xff]  }
   0xc   : > { %668 = vmatprep.subr.bf16.mxu0 %v698_v0  ;;  %v703_v2 = vld [vmem:[%s826_s4] sm:$0xff]   ;;  %s646_s26 = sshll.u32 %s829_s19, 5  ;;  %s647_s27 = sshll.u32 %s829_s19, 3  ;;  %v704_v4 = vld [vmem:[%s826_s4 + $0x8] sm:$0xff]   ;;  %v708_v10 = vld [vmem:[%s826_s4 + $0x18] sm:$0xff]   ;;  %vm529_vm2 = vcmask 257024  }
   0xd   : > { %669 = vmatpush3.bf16.msra.mxu0 %v698_v0  ;;  %682 = vmatprep.mubr.msk.bf16.mxu1 %vm411_vm0, %v703_v2  ;;  %s234_s30 = scalar_lea.vmem %s822_s0, %s646_s26  ;;  %s239_s8 = scalar_lea.vmem %s825_s3, %s647_s27  ;;  %v616_v11 = vld [vmem:[%s824_s2] ss:$0 sm:$0xff] }
   0xe   : > { %670 = vmatprep.subr.bf16.mxu0 %v699_v1  ;;  %v700_v3 = vld [vmem:[%s239_s8] sm:$0xff]   ;;  %v702_v7 = vld [vmem:[%s234_s30 + $0x8] sm:$0xff]   ;;  %v705_v8 = vld [vmem:[%s234_s30 + $0x10] sm:$0xff]   ;;  %s801_s21 = scalar_lea.vmem %s827_s5, %s646_s26 }
   0xf   : > { %v701_v5 = vld [vmem:[%s234_s30] sm:$0xff]   ;;  %680 = vmatprep.subr.bf16.mxu1 %v700_v3  ;;  %v706_v9 = vld [vmem:[%s234_s30 + $0x18] sm:$0xff]  }
  0x10   : > { %672 = vmatprep.mubr.msk.bf16.mxu0 %vm297_vm1, %v701_v5  ;;  %681 = vmatpush3.bf16.msra.mxu1 %v700_v3 }
  0x11   : > { %671 = vmatpush3.bf16.msra.mxu0 %v699_v1 }
  0x13   : > { %683 = vmatmul.mubr.msk.bf16.vlgmr.msra.gmra.mxu1 %vm411_vm0, %v704_v4 }
  0x14   : > { %673 = vmatmul.mubr.msk.bf16.vlgmr.msra.gmra.mxu0 %vm297_vm1, %v702_v7  ;;  %686 = vmatprep.mubr.msk.bf16.mxu1 %vm411_vm0, %v707_v6 }
  0x15   : > { %676 = vmatprep.mubr.msk.bf16.mxu0 %vm297_vm1, %v705_v8 }
  0x1b   : > { %687 = vmatmul.mubr.msk.bf16.gmra.mxu1 %vm411_vm0, %v708_v10 }
  0x1c   : > { %677 = vmatmul.mubr.msk.bf16.gmra.mxu0 %vm297_vm1, %v706_v9 }
  0xd3   : > { %v684_v15 = vpop.f32.mrf.mxu1 }
  0xd4   : > { %v674_v12 = vpop.f32.mrf.mxu0 }
  0xd5   : > { %v353_v13 = vadd.f32 %v674_v12, %v616_v11  ;;  %v458_v19 = vpop.f32.mrf.mxu1 }
  0xd6   : > { %v344_v14 = vpop.f32.mrf.mxu0 }
  0xd7   : > { %v345_v16 = vadd.f32 %v616_v11, %v344_v14  ;;  %v491_v17 = vadd.f32 %v684_v15, %v353_v13  ;;  %v685_v24 = vpop.f32.mrf.mxu1 }
  0xd8   : > { %v675_v18 = vpop.f32.mrf.mxu0 }
  0xd9   : > { %v651_v20 = vpack.c.bf16 %v491_v17, %v491_v17  ;;  %v356_v21 = vadd.f32 %v675_v18, %v616_v11  ;;  %v489_v22 = vadd.f32 %v458_v19, %v345_v16  ;;  %v461_v29 = vpop.f32.mrf.mxu1 }
  0xda   : > { %v347_v23 = vpop.f32.mrf.mxu0 }
  0xdb   : > { %532 = vst.msk [vmem:[%s801_s21 + $0x8] sm:$0xf] %vm529_vm2, %v651_v20  ;;  %v649_v25 = vpack.c.bf16 %v489_v22, %v489_v22  ;;  %v348_v26 = vadd.f32 %v616_v11, %v347_v23  ;;  %v492_v27 = vadd.f32 %v685_v24, %v356_v21  ;;  %v688_v34 = vpop.f32.mrf.mxu1 }
  0xdc   : > { %v678_v28 = vpop.f32.mrf.mxu0 }
  0xdd   : > { %530 = vst.msk [vmem:[%s801_s21] sm:$0xf] %vm529_vm2, %v649_v25  ;;  %v652_v30 = vpack.c.bf16 %v492_v27, %v492_v27  ;;  %v369_v31 = vadd.f32 %v678_v28, %v616_v11  ;;  %v490_v32 = vadd.f32 %v461_v29, %v348_v26  ;;  %v474_v39 = vpop.f32.mrf.mxu1 }
  0xde   : > { %v360_v33 = vpop.f32.mrf.mxu0 }
  0xdf   : > { %533 = vst.msk [vmem:[%s801_s21 + $0xc] sm:$0xf] %vm529_vm2, %v652_v30  ;;  %v650_v35 = vpack.c.bf16 %v490_v32, %v490_v32  ;;  %v361_v36 = vadd.f32 %v616_v11, %v360_v33  ;;  %v495_v37 = vadd.f32 %v688_v34, %v369_v31  ;;  %v689_v44 = vpop.f32.mrf.mxu1 }
  0xe0   : > { %v679_v38 = vpop.f32.mrf.mxu0 }
  0xe1   : > { %531 = vst.msk [vmem:[%s801_s21 + $0x4] sm:$0xf] %vm529_vm2, %v650_v35  ;;  %v655_v40 = vpack.c.bf16 %v495_v37, %v495_v37  ;;  %v372_v41 = vadd.f32 %v679_v38, %v616_v11  ;;  %v493_v42 = vadd.f32 %v474_v39, %v361_v36  ;;  %v477_v48 = vpop.f32.mrf.mxu1 }
  0xe2   : > { %v363_v43 = vpop.f32.mrf.mxu0 }
  0xe3   : > { %536 = vst.msk [vmem:[%s801_s21 + $0x18] sm:$0xf] %vm529_vm2, %v655_v40  ;;  %v653_v45 = vpack.c.bf16 %v493_v42, %v493_v42  ;;  %v364_v46 = vadd.f32 %v616_v11, %v363_v43  ;;  %v496_v47 = vadd.f32 %v689_v44, %v372_v41 }
  0xe5   : > { %534 = vst.msk [vmem:[%s801_s21 + $0x10] sm:$0xf] %vm529_vm2, %v653_v45  ;;  %v656_v49 = vpack.c.bf16 %v496_v47, %v496_v47  ;;  %v494_v50 = vadd.f32 %v477_v48, %v364_v46 }
  0xe7   : > { %537 = vst.msk [vmem:[%s801_s21 + $0x1c] sm:$0xf] %vm529_vm2, %v656_v49  ;;  %v654_v51 = vpack.c.bf16 %v494_v50, %v494_v50 }
  0xe9   : > { %535 = vst.msk [vmem:[%s801_s21 + $0x14] sm:$0xf] %vm529_vm2, %v654_v51 }
  0xea PF: > { %s15_s18 = sadd.s32 1, %s715_s18  }
  0xeb   : > { %p12_p4 = scmp.ge.s32.totalorder %s15_s18, 4  }
  0xed   :  { %14 = sbr.rel (!%p12_p4) target bundleno = 1 (0x1), region = 73 }

// kernel: extended_mask2former_forward.14
= control target key start
LH: loop header
LB: loop body
LE: loop exit
PB: predicated region body
PF: predicated region fallthrough
CT: control target
= control target key end

     0   :  { %s1090_s12 = smov 0   ;;  %s1092_s13 = smov 0   ;;  %s1273_s0 = inlined_call_operand.vmem [shape: bf16[512,32], index: 0, kind: input, shape index: {}]   ;;  %s1274_s1 = inlined_call_operand.vmem [shape: bf16[32,16], index: 1, kind: input, shape index: {}]   ;;  %s1275_s2 = inlined_call_operand.vmem [shape: f32[1,16], index: 2, kind: input, shape index: {}]   ;;  %s1276_s3 = inlined_call_operand.vmem [shape: bf16[512,16], index: 3, kind: output, shape index: {}]  }
   0x1   :  { %s1094_s14 = smov 0  }
   0x2 LB: > { %s25_s15 = sadd.s32 1, %s1064_s13  ;;  %p840_p0 = scmp.ge.s32.totalorder %s1068_s14, 1  ;;  %s1068_s14 = sphi %s1094_s14, %s13_s14   ;;  %s1064_s13 = sphi %s1092_s13, %s1278_s13   ;;  %s1060_s12 = sphi %s1090_s12, %s1277_s12  }
   0x3   : > { %p27_p1 = scmp.ge.s32.totalorder %s25_s15, 2  ;;  %p169_p2 = scmp.lt.s32.totalorder %s1068_s14, 3 }
   0x5   : > { %s1280_s15 = smov (%p27_p1, %s25_s15), 0  ;;  %p170_p3 = pnand %p840_p0, %p169_p2 }
   0x6   : > { %s841_s18 = sshll.u32 (!%p170_p3), %s1060_s12, 5 }
   0x7   : > { %173 = sbr.rel (%p170_p3) target bundleno = 249 (0xf9), region = 32  ;;  %p204_p4 = scmp.lt.s32.totalorder (!%p170_p3), %s841_s18, 63 }
   0xc   : > { %v1028_v0 = vld [vmem:[%s1274_s1 + $0x8] sm:$0xff]   ;;  %v1029_v1 = vld [vmem:[%s1274_s1] sm:$0xff]   ;;  %s1282_s18 = smov (!%p204_p4, %s841_s18), 63  ;;  %vm361_vm0 = vcmask 261120   ;;  %vm699_vm1 = vcmask 125952  }
   0xd   : > { %964 = vmatprep.subr.bf16.mxu0 %v1028_v0  ;;  %1000 = vmatprep.subr.bf16.mxu1 %v1028_v0  ;;  %s842_s21 = sshll.u32 %s1282_s18, 2  ;;  %v1159_v18 = vld [vmem:[%s1275_s2] ss:$0 sm:$0xff] }
   0xe   : > { %965 = vmatpush3.bf16.msra.mxu0 %v1028_v0  ;;  %1002 = vmatpush3.bf16.msra.mxu1 %v1028_v0  ;;  %s1122_s24 = scalar_lea.vmem %s1273_s0, %s842_s21  ;;  %s1167_s29 = scalar_lea.vmem %s1276_s3, %s842_s21 }
   0xf   : > { %966 = vmatprep.subr.bf16.mxu0 %v1029_v1  ;;  %1001 = vmatprep.subr.bf16.mxu1 %v1029_v1  ;;  %v1030_v2 = vld [vmem:[%s1122_s24] sm:$0xff]   ;;  %v1032_v4 = vld [vmem:[%s1122_s24 + $0x8] sm:$0xff]   ;;  %v1034_v6 = vld [vmem:[%s1122_s24 + $0x10] sm:$0xff]  }
  0x10   : > { %v1031_v3 = vld [vmem:[%s1122_s24 + $0x40] sm:$0xff]   ;;  %968 = vmatprep.mubr.msk.bf16.mxu0 %vm361_vm0, %v1030_v2  ;;  %v1033_v5 = vld [vmem:[%s1122_s24 + $0x48] sm:$0xff]   ;;  %v1035_v7 = vld [vmem:[%s1122_s24 + $0x50] sm:$0xff]  }
  0x11   : > { %984 = vmatprep.mubr.msk.bf16.mxu1 %vm361_vm0, %v1031_v3  ;;  %v1036_v8 = vld [vmem:[%s1122_s24 + $0x18] sm:$0xff]   ;;  %v1038_v10 = vld [vmem:[%s1122_s24 + $0x20] sm:$0xff]   ;;  %v1040_v12 = vld [vmem:[%s1122_s24 + $0x28] sm:$0xff]  }
  0x12   : > { %967 = vmatpush3.bf16.msra.mxu0 %v1029_v1  ;;  %1003 = vmatpush3.bf16.msra.mxu1 %v1029_v1  ;;  %v1037_v9 = vld [vmem:[%s1122_s24 + $0x58] sm:$0xff]   ;;  %v1039_v11 = vld [vmem:[%s1122_s24 + $0x60] sm:$0xff]   ;;  %v1041_v13 = vld [vmem:[%s1122_s24 + $0x68] sm:$0xff]  }
  0x13   : > { %v1042_v14 = vld [vmem:[%s1122_s24 + $0x30] sm:$0xff]   ;;  %v1044_v16 = vld [vmem:[%s1122_s24 + $0x38] sm:$0xff]  }
  0x14   : > { %v1043_v15 = vld [vmem:[%s1122_s24 + $0x70] sm:$0xff]   ;;  %v1045_v17 = vld [vmem:[%s1122_s24 + $0x78] sm:$0xff]  }
  0x15   : > { %969 = vmatmul.mubr.msk.bf16.vlgmr.msra.gmra.mxu0 %vm361_vm0, %v1032_v4  ;;  %985 = vmatmul.mubr.msk.bf16.vlgmr.msra.gmra.mxu1 %vm361_vm0, %v1033_v5 }
  0x16   : > { %972 = vmatprep.mubr.msk.bf16.mxu0 %vm361_vm0, %v1034_v6  ;;  %988 = vmatprep.mubr.msk.bf16.mxu1 %vm361_vm0, %v1035_v7 }
  0x1d   : > { %973 = vmatmul.mubr.msk.bf16.gmra.mxu0 %vm361_vm0, %v1036_v8  ;;  %989 = vmatmul.mubr.msk.bf16.gmra.mxu1 %vm361_vm0, %v1037_v9 }
  0x1e   : > { %976 = vmatprep.mubr.msk.bf16.mxu0 %vm361_vm0, %v1038_v10  ;;  %992 = vmatprep.mubr.msk.bf16.mxu1 %vm361_vm0, %v1039_v11 }
  0x25   : > { %977 = vmatmul.mubr.msk.bf16.gmra.mxu0 %vm361_vm0, %v1040_v12  ;;  %993 = vmatmul.mubr.msk.bf16.gmra.mxu1 %vm361_vm0, %v1041_v13 }
  0x26   : > { %980 = vmatprep.mubr.msk.bf16.mxu0 %vm361_vm0, %v1042_v14  ;;  %996 = vmatprep.mubr.msk.bf16.mxu1 %vm361_vm0, %v1043_v15 }
  0x2d   : > { %981 = vmatmul.mubr.msk.bf16.gmra.mxu0 %vm361_vm0, %v1044_v16  ;;  %997 = vmatmul.mubr.msk.bf16.gmra.mxu1 %vm361_vm0, %v1045_v17 }
  0xd5   : > { %v970_v19 = vpop.f32.mrf.mxu0  ;;  %v986_v21 = vpop.f32.mrf.mxu1 }
  0xd6   : > { %v453_v20 = vadd.f32 %v970_v19, %v1159_v18  ;;  %v517_v22 = vadd.f32 %v986_v21, %v1159_v18 }
  0xd7   : > { %v444_v23 = vpop.f32.mrf.mxu0  ;;  %v508_v26 = vpop.f32.mrf.mxu1 }
  0xd8   : > { %v916_v24 = vpack.c.bf16 %v453_v20, %v453_v20  ;;  %v445_v25 = vadd.f32 %v1159_v18, %v444_v23  ;;  %v932_v27 = vpack.c.bf16 %v517_v22, %v517_v22  ;;  %v509_v28 = vadd.f32 %v1159_v18, %v508_v26 }
  0xd9   : > { %v971_v29 = vpop.f32.mrf.mxu0  ;;  %v987_v32 = vpop.f32.mrf.mxu1 }
  0xda   : > { %702 = vst.msk [vmem:[%s1167_s29 + $0x8] sm:$0xf] %vm699_vm1, %v916_v24  ;;  %v914_v30 = vpack.c.bf16 %v445_v25, %v445_v25  ;;  %v456_v31 = vadd.f32 %v971_v29, %v1159_v18  ;;  %718 = vst.msk [vmem:[%s1167_s29 + $0x48] sm:$0xf] %vm699_vm1, %v932_v27  ;;  %v930_v33 = vpack.c.bf16 %v509_v28, %v509_v28 }
  0xdb   : > { %v520_v34 = vadd.f32 %v987_v32, %v1159_v18  ;;  %v447_v35 = vpop.f32.mrf.mxu0  ;;  %v511_v38 = vpop.f32.mrf.mxu1 }
  0xdc   : > { %700 = vst.msk [vmem:[%s1167_s29] sm:$0xf] %vm699_vm1, %v914_v30  ;;  %v917_v36 = vpack.c.bf16 %v456_v31, %v456_v31  ;;  %v448_v37 = vadd.f32 %v1159_v18, %v447_v35  ;;  %716 = vst.msk [vmem:[%s1167_s29 + $0x40] sm:$0xf] %vm699_vm1, %v930_v33  ;;  %v512_v40 = vadd.f32 %v1159_v18, %v511_v38 }
  0xdd   : > { %v933_v39 = vpack.c.bf16 %v520_v34, %v520_v34  ;;  %v974_v41 = vpop.f32.mrf.mxu0  ;;  %v990_v44 = vpop.f32.mrf.mxu1 }
  0xde   : > { %703 = vst.msk [vmem:[%s1167_s29 + $0xc] sm:$0xf] %vm699_vm1, %v917_v36  ;;  %v915_v42 = vpack.c.bf16 %v448_v37, %v448_v37  ;;  %v469_v43 = vadd.f32 %v974_v41, %v1159_v18  ;;  %v931_v45 = vpack.c.bf16 %v512_v40, %v512_v40  ;;  %v533_v46 = vadd.f32 %v990_v44, %v1159_v18 }
  0xdf   : > { %719 = vst.msk [vmem:[%s1167_s29 + $0x4c] sm:$0xf] %vm699_vm1, %v933_v39  ;;  %v460_v47 = vpop.f32.mrf.mxu0  ;;  %v524_v50 = vpop.f32.mrf.mxu1 }
  0xe0   : > { %701 = vst.msk [vmem:[%s1167_s29 + $0x4] sm:$0xf] %vm699_vm1, %v915_v42  ;;  %v920_v48 = vpack.c.bf16 %v469_v43, %v469_v43  ;;  %v461_v49 = vadd.f32 %v1159_v18, %v460_v47  ;;  %717 = vst.msk [vmem:[%s1167_s29 + $0x44] sm:$0xf] %vm699_vm1, %v931_v45  ;;  %v936_v51 = vpack.c.bf16 %v533_v46, %v533_v46 }
  0xe1   : > { %v525_v52 = vadd.f32 %v1159_v18, %v524_v50  ;;  %v975_v53 = vpop.f32.mrf.mxu0  ;;  %v991_v56 = vpop.f32.mrf.mxu1 }
  0xe2   : > { %706 = vst.msk [vmem:[%s1167_s29 + $0x18] sm:$0xf] %vm699_vm1, %v920_v48  ;;  %v918_v54 = vpack.c.bf16 %v461_v49, %v461_v49  ;;  %v472_v55 = vadd.f32 %v975_v53, %v1159_v18  ;;  %722 = vst.msk [vmem:[%s1167_s29 + $0x58] sm:$0xf] %vm699_vm1, %v936_v51  ;;  %v536_v58 = vadd.f32 %v991_v56, %v1159_v18 }
  0xe3   : > { %v934_v57 = vpack.c.bf16 %v525_v52, %v525_v52  ;;  %v463_v59 = vpop.f32.mrf.mxu0  ;;  %v527_v62 = vpop.f32.mrf.mxu1 }
  0xe4   : > { %704 = vst.msk [vmem:[%s1167_s29 + $0x10] sm:$0xf] %vm699_vm1, %v918_v54  ;;  %v921_v60 = vpack.c.bf16 %v472_v55, %v472_v55  ;;  %v464_v61 = vadd.f32 %v1159_v18, %v463_v59  ;;  %v937_v63 = vpack.c.bf16 %v536_v58, %v536_v58  ;;  %v528_v0 = vadd.f32 %v1159_v18, %v527_v62 }
  0xe5   : > { %720 = vst.msk [vmem:[%s1167_s29 + $0x50] sm:$0xf] %vm699_vm1, %v934_v57  ;;  %v978_v1 = vpop.f32.mrf.mxu0  ;;  %v994_v4 = vpop.f32.mrf.mxu1 }
  0xe6   : > { %707 = vst.msk [vmem:[%s1167_s29 + $0x1c] sm:$0xf] %vm699_vm1, %v921_v60  ;;  %v919_v2 = vpack.c.bf16 %v464_v61, %v464_v61  ;;  %v485_v3 = vadd.f32 %v978_v1, %v1159_v18  ;;  %723 = vst.msk [vmem:[%s1167_s29 + $0x5c] sm:$0xf] %vm699_vm1, %v937_v63  ;;  %v935_v5 = vpack.c.bf16 %v528_v0, %v528_v0 }
  0xe7   : > { %v549_v6 = vadd.f32 %v994_v4, %v1159_v18  ;;  %v476_v7 = vpop.f32.mrf.mxu0  ;;  %v540_v10 = vpop.f32.mrf.mxu1 }
  0xe8   : > { %705 = vst.msk [vmem:[%s1167_s29 + $0x14] sm:$0xf] %vm699_vm1, %v919_v2  ;;  %v924_v8 = vpack.c.bf16 %v485_v3, %v485_v3  ;;  %v477_v9 = vadd.f32 %v1159_v18, %v476_v7  ;;  %721 = vst.msk [vmem:[%s1167_s29 + $0x54] sm:$0xf] %vm699_vm1, %v935_v5  ;;  %v541_v12 = vadd.f32 %v1159_v18, %v540_v10 }
  0xe9   : > { %v940_v11 = vpack.c.bf16 %v549_v6, %v549_v6  ;;  %v979_v13 = vpop.f32.mrf.mxu0  ;;  %v995_v16 = vpop.f32.mrf.mxu1 }
  0xea   : > { %710 = vst.msk [vmem:[%s1167_s29 + $0x28] sm:$0xf] %vm699_vm1, %v924_v8  ;;  %v922_v14 = vpack.c.bf16 %v477_v9, %v477_v9  ;;  %v488_v15 = vadd.f32 %v979_v13, %v1159_v18  ;;  %v938_v17 = vpack.c.bf16 %v541_v12, %v541_v12  ;;  %v552_v19 = vadd.f32 %v995_v16, %v1159_v18 }
  0xeb   : > { %726 = vst.msk [vmem:[%s1167_s29 + $0x68] sm:$0xf] %vm699_vm1, %v940_v11  ;;  %v479_v20 = vpop.f32.mrf.mxu0  ;;  %v543_v23 = vpop.f32.mrf.mxu1 }
  0xec   : > { %708 = vst.msk [vmem:[%s1167_s29 + $0x20] sm:$0xf] %vm699_vm1, %v922_v14  ;;  %v925_v21 = vpack.c.bf16 %v488_v15, %v488_v15  ;;  %v480_v22 = vadd.f32 %v1159_v18, %v479_v20  ;;  %724 = vst.msk [vmem:[%s1167_s29 + $0x60] sm:$0xf] %vm699_vm1, %v938_v17  ;;  %v941_v24 = vpack.c.bf16 %v552_v19, %v552_v19 }
  0xed   : > { %v544_v25 = vadd.f32 %v1159_v18, %v543_v23  ;;  %v982_v26 = vpop.f32.mrf.mxu0  ;;  %v998_v29 = vpop.f32.mrf.mxu1 }
  0xee   : > { %711 = vst.msk [vmem:[%s1167_s29 + $0x2c] sm:$0xf] %vm699_vm1, %v925_v21  ;;  %v923_v27 = vpack.c.bf16 %v480_v22, %v480_v22  ;;  %v501_v28 = vadd.f32 %v982_v26, %v1159_v18  ;;  %727 = vst.msk [vmem:[%s1167_s29 + $0x6c] sm:$0xf] %vm699_vm1, %v941_v24  ;;  %v565_v31 = vadd.f32 %v998_v29, %v1159_v18 }
  0xef   : > { %v939_v30 = vpack.c.bf16 %v544_v25, %v544_v25  ;;  %v492_v32 = vpop.f32.mrf.mxu0  ;;  %v556_v35 = vpop.f32.mrf.mxu1 }
  0xf0   : > { %709 = vst.msk [vmem:[%s1167_s29 + $0x24] sm:$0xf] %vm699_vm1, %v923_v27  ;;  %v928_v33 = vpack.c.bf16 %v501_v28, %v501_v28  ;;  %v493_v34 = vadd.f32 %v1159_v18, %v492_v32  ;;  %v944_v36 = vpack.c.bf16 %v565_v31, %v565_v31  ;;  %v557_v37 = vadd.f32 %v1159_v18, %v556_v35 }
  0xf1   : > { %725 = vst.msk [vmem:[%s1167_s29 + $0x64] sm:$0xf] %vm699_vm1, %v939_v30  ;;  %v983_v38 = vpop.f32.mrf.mxu0  ;;  %v999_v41 = vpop.f32.mrf.mxu1 }
  0xf2   : > { %714 = vst.msk [vmem:[%s1167_s29 + $0x38] sm:$0xf] %vm699_vm1, %v928_v33  ;;  %v926_v39 = vpack.c.bf16 %v493_v34, %v493_v34  ;;  %v504_v40 = vadd.f32 %v983_v38, %v1159_v18  ;;  %730 = vst.msk [vmem:[%s1167_s29 + $0x78] sm:$0xf] %vm699_vm1, %v944_v36  ;;  %v942_v42 = vpack.c.bf16 %v557_v37, %v557_v37 }
  0xf3   : > { %v568_v43 = vadd.f32 %v999_v41, %v1159_v18  ;;  %v495_v44 = vpop.f32.mrf.mxu0  ;;  %v559_v47 = vpop.f32.mrf.mxu1 }
  0xf4   : > { %712 = vst.msk [vmem:[%s1167_s29 + $0x30] sm:$0xf] %vm699_vm1, %v926_v39  ;;  %v929_v45 = vpack.c.bf16 %v504_v40, %v504_v40  ;;  %v496_v46 = vadd.f32 %v1159_v18, %v495_v44  ;;  %728 = vst.msk [vmem:[%s1167_s29 + $0x70] sm:$0xf] %vm699_vm1, %v942_v42  ;;  %v560_v49 = vadd.f32 %v1159_v18, %v559_v47 }
  0xf5   : > { %v945_v48 = vpack.c.bf16 %v568_v43, %v568_v43 }
  0xf6   : > { %715 = vst.msk [vmem:[%s1167_s29 + $0x3c] sm:$0xf] %vm699_vm1, %v929_v45  ;;  %v927_v50 = vpack.c.bf16 %v496_v46, %v496_v46  ;;  %v943_v51 = vpack.c.bf16 %v560_v49, %v560_v49 }
  0xf7   : > { %731 = vst.msk [vmem:[%s1167_s29 + $0x7c] sm:$0xf] %vm699_vm1, %v945_v48 }
  0xf8   : > { %713 = vst.msk [vmem:[%s1167_s29 + $0x34] sm:$0xf] %vm699_vm1, %v927_v50  ;;  %729 = vst.msk [vmem:[%s1167_s29 + $0x74] sm:$0xf] %vm699_vm1, %v943_v51 }
  0xf9 PF: > { %s13_s14 = sadd.s32 1, %s1068_s14   ;;  %s1277_s12 = smov %s1064_s13 }
  0xfa   : > { %p10_p5 = scmp.ge.s32.totalorder %s13_s14, 4   ;;  %s1278_s13 = smov %s1280_s15 }
  0xfc   :  { %12 = sbr.rel (!%p10_p5) target bundleno = 2 (0x2), region = 68 }

// kernel: extended_mask2former_forward.13
= control target key start
LH: loop header
LB: loop body
LE: loop exit
PB: predicated region body
PF: predicated region fallthrough
CT: control target
= control target key end

     0   :  { %s1554_s18 = smov 0   ;;  %s1789_s0 = inlined_call_operand.vmem [shape: bf16[2,256,32], index: 0, kind: input, shape index: {}]   ;;  %s1790_s1 = inlined_call_operand.vmem [shape: bf16[32,32], index: 1, kind: input, shape index: {}]   ;;  %s1791_s2 = inlined_call_operand.vmem [shape: f32[1,32], index: 2, kind: input, shape index: {}]   ;;  %s1792_s3 = inlined_call_operand.vmem [shape: bf16[2,64,32], index: 3, kind: input, shape index: {}]   ;;  %s1793_s4 = inlined_call_operand.vmem [shape: bf16[256,64], index: 4, kind: input, shape index: {}]   ;;  %s1794_s5 = inlined_call_operand.vmem [shape: bf16[2,256,32], index: 5, kind: output, shape index: {}]  }
   0x1 LB: > { %s1205_s19 = sadd.s32 4294967295, %s1522_s18   ;;  %p1209_p0 = scmp.ge.s32.totalorder %s1522_s18, 1  ;;  %s1522_s18 = sphi %s1554_s18, %s15_s18  }
   0x2   : > { %p197_p1 = scmp.lt.s32.totalorder %s1522_s18, 3 }
   0x4   : > { %p198_p2 = pnand %p1209_p0, %p197_p1 }
   0x5   : > { %p230_p3 = scmp.lt.s32.totalorder (!%p198_p2), %s1205_s19, 1 }
   0x6   : > { %201 = sbr.rel (%p198_p2) target bundleno = 291 (0x123), region = 40 }
   0xb   : > { %v1478_v0 = vld [vmem:[%s1790_s1 + $0x8] sm:$0xff]   ;;  %v1480_v1 = vld [vmem:[%s1790_s1] sm:$0xff]   ;;  %s1796_s19 = smov (!%p230_p3, %s1205_s19), 1  ;;  %vm735_vm0 = vcmask 523264   ;;  %vm381_vm1 = vcmask 261120   ;;  %v1491_v13 = vld [vmem:[%s1793_s4 + $0x10] sm:$0xff]  }
   0xc   : > { %1394 = vmatprep.subr.bf16.mxu0 %v1478_v0  ;;  %v1487_v2 = vld [vmem:[%s1793_s4] sm:$0xff]   ;;  %s1321_s26 = sshll.u32 %s1796_s19, 7  ;;  %s1322_s27 = sshll.u32 %s1796_s19, 5  ;;  %v1489_v12 = vld [vmem:[%s1793_s4 + $0x8] sm:$0xff]   ;;  %v1493_v16 = vld [vmem:[%s1793_s4 + $0x18] sm:$0xff]   ;;  %vm1105_vm2 = vcmask 257024  }
   0xd   : > { %1395 = vmatpush3.bf16.msra.mxu0 %v1478_v0  ;;  %1438 = vmatprep.mubr.msk.bf16.mxu1 %vm735_vm0, %v1487_v2  ;;  %s1581_s30 = scalar_lea.vmem %s1789_s0, %s1321_s26  ;;  %s239_s8 = scalar_lea.vmem %s1792_s3, %s1322_s27  ;;  %v1495_v17 = vld [vmem:[%s1793_s4 + $0x20] sm:$0xff]   ;;  %v1497_v20 = vld [vmem:[%s1793_s4 + $0x28] sm:$0xff]   ;;  %v1499_v21 = vld [vmem:[%s1793_s4 + $0x30] sm:$0xff]  }
   0xe   : > { %1396 = vmatprep.subr.bf16.mxu0 %v1480_v1  ;;  %v1479_v3 = vld [vmem:[%s239_s8 + $0x18] sm:$0xff]   ;;  %v1481_v4 = vld [vmem:[%s239_s8 + $0x10] sm:$0xff]   ;;  %v1482_v5 = vld [vmem:[%s1581_s30] sm:$0xff]   ;;  %s1690_s23 = scalar_lea.vmem %s1794_s5, %s1321_s26 }
   0xf   : > { %1430 = vmatprep.subr.bf16.mxu1 %v1479_v3  ;;  %v1483_v6 = vld [vmem:[%s1581_s30 + $0x8] sm:$0xff]   ;;  %1398 = vmatprep.mubr.msk.bf16.mxu0 %vm381_vm1, %v1482_v5  ;;  %v1486_v8 = vld [vmem:[%s1581_s30 + $0x10] sm:$0xff]   ;;  %v1485_v9 = vld [vmem:[%s239_s8] sm:$0xff]  }
  0x10   : > { %1431 = vmatpush3.bf16.msra.mxu1 %v1479_v3  ;;  %v1484_v7 = vld [vmem:[%s239_s8 + $0x8] sm:$0xff]   ;;  %v1488_v10 = vld [vmem:[%s1581_s30 + $0x18] sm:$0xff]   ;;  %v1490_v11 = vld [vmem:[%s1581_s30 + $0x20] sm:$0xff]  }
  0x11   : > { %1397 = vmatpush3.bf16.msra.mxu0 %v1480_v1  ;;  %1432 = vmatprep.subr.bf16.mxu1 %v1481_v4  ;;  %v1492_v14 = vld [vmem:[%s1581_s30 + $0x28] sm:$0xff]   ;;  %v1494_v15 = vld [vmem:[%s1581_s30 + $0x30] sm:$0xff]   ;;  %v1496_v18 = vld [vmem:[%s1581_s30 + $0x38] sm:$0xff]  }
  0x12   : > { %v1498_v19 = vld [vmem:[%s1581_s30 + $0x40] sm:$0xff]   ;;  %v1500_v22 = vld [vmem:[%s1581_s30 + $0x48] sm:$0xff]   ;;  %v1502_v23 = vld [vmem:[%s1581_s30 + $0x50] sm:$0xff]  }
  0x13   : > { %v1501_v24 = vld [vmem:[%s1793_s4 + $0x38] sm:$0xff]   ;;  %v1503_v25 = vld [vmem:[%s1793_s4 + $0x40] sm:$0xff]   ;;  %v1505_v28 = vld [vmem:[%s1793_s4 + $0x48] sm:$0xff]  }
  0x14   : > { %1399 = vmatmul.mubr.msk.bf16.vlgmr.msra.gmra.mxu0 %vm381_vm1, %v1483_v6  ;;  %1433 = vmatpush3.bf16.msra.mxu1 %v1481_v4  ;;  %v1504_v26 = vld [vmem:[%s1581_s30 + $0x58] sm:$0xff]   ;;  %v1506_v27 = vld [vmem:[%s1581_s30 + $0x60] sm:$0xff]   ;;  %v1507_v29 = vld [vmem:[%s1793_s4 + $0x50] sm:$0xff]  }
  0x15   : > { %1434 = vmatprep.subr.bf16.mxu1 %v1484_v7  ;;  %1402 = vmatprep.mubr.msk.bf16.mxu0 %vm381_vm1, %v1486_v8  ;;  %v1508_v30 = vld [vmem:[%s1581_s30 + $0x68] sm:$0xff]   ;;  %v1510_v31 = vld [vmem:[%s1581_s30 + $0x70] sm:$0xff]   ;;  %v1509_v32 = vld [vmem:[%s1793_s4 + $0x58] sm:$0xff]  }
  0x16   : > { %v1511_v33 = vld [vmem:[%s1793_s4 + $0x60] sm:$0xff]   ;;  %v1512_v34 = vld [vmem:[%s1581_s30 + $0x78] sm:$0xff]   ;;  %v1513_v35 = vld [vmem:[%s1793_s4 + $0x68] sm:$0xff]  }
  0x17   : > { %v1514_v36 = vld [vmem:[%s1793_s4 + $0x70] sm:$0xff]   ;;  %v1515_v37 = vld [vmem:[%s1793_s4 + $0x78] sm:$0xff]   ;;  %v1681_v42 = vld [vmem:[%s1791_s2] ss:$0 sm:$0xff] }
  0x18   : > { %1435 = vmatpush3.bf16.msra.mxu1 %v1484_v7 }
  0x19   : > { %1436 = vmatprep.subr.bf16.mxu1 %v1485_v9 }
  0x1c   : > { %1403 = vmatmul.mubr.msk.bf16.gmra.mxu0 %vm381_vm1, %v1488_v10  ;;  %1437 = vmatpush3.bf16.msra.mxu1 %v1485_v9 }
  0x1d   : > { %1406 = vmatprep.mubr.msk.bf16.mxu0 %vm381_vm1, %v1490_v11 }
  0x1f   : > { %1439 = vmatmul.mubr.msk.bf16.vlgmr.msra.gmra.mxu1 %vm735_vm0, %v1489_v12 }
  0x20   : > { %1442 = vmatprep.mubr.msk.bf16.mxu1 %vm735_vm0, %v1491_v13 }
  0x24   : > { %1407 = vmatmul.mubr.msk.bf16.gmra.mxu0 %vm381_vm1, %v1492_v14 }
  0x25   : > { %1410 = vmatprep.mubr.msk.bf16.mxu0 %vm381_vm1, %v1494_v15 }
  0x27   : > { %1443 = vmatmul.mubr.msk.bf16.gmra.mxu1 %vm735_vm0, %v1493_v16 }
  0x28   : > { %1446 = vmatprep.mubr.msk.bf16.mxu1 %vm735_vm0, %v1495_v17 }
  0x2c   : > { %1411 = vmatmul.mubr.msk.bf16.gmra.mxu0 %vm381_vm1, %v1496_v18 }
  0x2d   : > { %1414 = vmatprep.mubr.msk.bf16.mxu0 %vm381_vm1, %v1498_v19 }
  0x2f   : > { %1447 = vmatmul.mubr.msk.bf16.gmra.mxu1 %vm735_vm0, %v1497_v20 }
  0x30   : > { %1450 = vmatprep.mubr.msk.bf16.mxu1 %vm735_vm0, %v1499_v21 }
  0x34   : > { %1415 = vmatmul.mubr.msk.bf16.gmra.mxu0 %vm381_vm1, %v1500_v22 }
  0x35   : > { %1418 = vmatprep.mubr.msk.bf16.mxu0 %vm381_vm1, %v1502_v23 }
  0x37   : > { %1451 = vmatmul.mubr.msk.bf16.gmra.mxu1 %vm735_vm0, %v1501_v24 }
  0x38   : > { %1454 = vmatprep.mubr.msk.bf16.mxu1 %vm735_vm0, %v1503_v25 }
  0x3c   : > { %1419 = vmatmul.mubr.msk.bf16.gmra.mxu0 %vm381_vm1, %v1504_v26 }
  0x3d   : > { %1422 = vmatprep.mubr.msk.bf16.mxu0 %vm381_vm1, %v1506_v27 }
  0x3f   : > { %1455 = vmatmul.mubr.msk.bf16.gmra.mxu1 %vm735_vm0, %v1505_v28 }
  0x40   : > { %1458 = vmatprep.mubr.msk.bf16.mxu1 %vm735_vm0, %v1507_v29 }
  0x44   : > { %1423 = vmatmul.mubr.msk.bf16.gmra.mxu0 %vm381_vm1, %v1508_v30 }
  0x45   : > { %1426 = vmatprep.mubr.msk.bf16.mxu0 %vm381_vm1, %v1510_v31 }
  0x47   : > { %1459 = vmatmul.mubr.msk.bf16.gmra.mxu1 %vm735_vm0, %v1509_v32 }
  0x48   : > { %1462 = vmatprep.mubr.msk.bf16.mxu1 %vm735_vm0, %v1511_v33 }
  0x4c   : > { %1427 = vmatmul.mubr.msk.bf16.gmra.mxu0 %vm381_vm1, %v1512_v34 }
  0x4f   : > { %1463 = vmatmul.mubr.msk.bf16.gmra.mxu1 %vm735_vm0, %v1513_v35 }
  0x50   : > { %1466 = vmatprep.mubr.msk.bf16.mxu1 %vm735_vm0, %v1514_v36 }
  0x57   : > { %1467 = vmatmul.mubr.msk.bf16.gmra.mxu1 %vm735_vm0, %v1515_v37 }
  0xd4   : > { %v1400_v38 = vpop.f32.mrf.mxu0 }
  0xd5   : > { %v473_v44 = vadd.f32 %v1400_v38, %v1681_v42 }
  0xd6   : > { %v464_v39 = vpop.f32.mrf.mxu0 }
  0xd7   : > { %v465_v48 = vadd.f32 %v1681_v42, %v464_v39 }
  0xd8   : > { %v1401_v40 = vpop.f32.mrf.mxu0 }
  0xd9   : > { %v476_v52 = vadd.f32 %v1401_v40, %v1681_v42 }
  0xda   : > { %v467_v41 = vpop.f32.mrf.mxu0 }
  0xdb   : > { %v468_v57 = vadd.f32 %v1681_v42, %v467_v41 }
  0xdc   : > { %v1404_v43 = vpop.f32.mrf.mxu0 }
  0xdd   : > { %v489_v58 = vadd.f32 %v1404_v43, %v1681_v42 }
  0xde   : > { %v480_v45 = vpop.f32.mrf.mxu0 }
  0xdf   : > { %v1440_v47 = vpop.f32.mrf.mxu1  ;;  %v481_v3 = vadd.f32 %v1681_v42, %v480_v45 }
  0xe0   : > { %v1405_v46 = vpop.f32.mrf.mxu0  ;;  %v947_v49 = vadd.f32 %v1440_v47, %v473_v44 }
  0xe1   : > { %v818_v51 = vpop.f32.mrf.mxu1  ;;  %v492_v8 = vadd.f32 %v1405_v46, %v1681_v42 }
  0xe2   : > { %v483_v50 = vpop.f32.mrf.mxu0  ;;  %v1326_v53 = vpack.c.bf16 %v947_v49, %v947_v49  ;;  %v945_v54 = vadd.f32 %v818_v51, %v465_v48 }
  0xe3   : > { %v1441_v56 = vpop.f32.mrf.mxu1  ;;  %v484_v13 = vadd.f32 %v1681_v42, %v483_v50 }
  0xe4   : > { %v1408_v55 = vpop.f32.mrf.mxu0  ;;  %1108 = vst.msk [vmem:[%s1690_s23 + $0x8] sm:$0xf] %vm1105_vm2, %v1326_v53  ;;  %v1324_v59 = vpack.c.bf16 %v945_v54, %v945_v54  ;;  %v948_v60 = vadd.f32 %v1441_v56, %v476_v52 }
  0xe5   : > { %v821_v62 = vpop.f32.mrf.mxu1  ;;  %v505_v14 = vadd.f32 %v1408_v55, %v1681_v42 }
  0xe6   : > { %v496_v61 = vpop.f32.mrf.mxu0  ;;  %1106 = vst.msk [vmem:[%s1690_s23] sm:$0xf] %vm1105_vm2, %v1324_v59  ;;  %v1327_v63 = vpack.c.bf16 %v948_v60, %v948_v60  ;;  %v946_v0 = vadd.f32 %v821_v62, %v468_v57 }
  0xe7   : > { %v1444_v2 = vpop.f32.mrf.mxu1  ;;  %v497_v23 = vadd.f32 %v1681_v42, %v496_v61 }
  0xe8   : > { %v1409_v1 = vpop.f32.mrf.mxu0  ;;  %1109 = vst.msk [vmem:[%s1690_s23 + $0xc] sm:$0xf] %vm1105_vm2, %v1327_v63  ;;  %v1325_v4 = vpack.c.bf16 %v946_v0, %v946_v0  ;;  %v951_v5 = vadd.f32 %v1444_v2, %v489_v58 }
  0xe9   : > { %v834_v7 = vpop.f32.mrf.mxu1  ;;  %v508_v28 = vadd.f32 %v1409_v1, %v1681_v42 }
  0xea   : > { %v499_v6 = vpop.f32.mrf.mxu0  ;;  %1107 = vst.msk [vmem:[%s1690_s23 + $0x4] sm:$0xf] %vm1105_vm2, %v1325_v4  ;;  %v1330_v9 = vpack.c.bf16 %v951_v5, %v951_v5  ;;  %v949_v10 = vadd.f32 %v834_v7, %v481_v3 }
  0xeb   : > { %v1445_v12 = vpop.f32.mrf.mxu1  ;;  %v500_v33 = vadd.f32 %v1681_v42, %v499_v6 }
  0xec   : > { %v1412_v11 = vpop.f32.mrf.mxu0  ;;  %1112 = vst.msk [vmem:[%s1690_s23 + $0x18] sm:$0xf] %vm1105_vm2, %v1330_v9  ;;  %v1328_v15 = vpack.c.bf16 %v949_v10, %v949_v10  ;;  %v952_v16 = vadd.f32 %v1445_v12, %v492_v8 }
  0xed   : > { %v837_v18 = vpop.f32.mrf.mxu1  ;;  %v521_v34 = vadd.f32 %v1412_v11, %v1681_v42 }
  0xee   : > { %v512_v17 = vpop.f32.mrf.mxu0  ;;  %1110 = vst.msk [vmem:[%s1690_s23 + $0x10] sm:$0xf] %vm1105_vm2, %v1328_v15  ;;  %v1331_v19 = vpack.c.bf16 %v952_v16, %v952_v16  ;;  %v950_v20 = vadd.f32 %v837_v18, %v484_v13 }
  0xef   : > { %v1448_v22 = vpop.f32.mrf.mxu1  ;;  %v513_v44 = vadd.f32 %v1681_v42, %v512_v17 }
  0xf0   : > { %v1413_v21 = vpop.f32.mrf.mxu0  ;;  %1113 = vst.msk [vmem:[%s1690_s23 + $0x1c] sm:$0xf] %vm1105_vm2, %v1331_v19  ;;  %v1329_v24 = vpack.c.bf16 %v950_v20, %v950_v20  ;;  %v955_v25 = vadd.f32 %v1448_v22, %v505_v14 }
  0xf1   : > { %v850_v27 = vpop.f32.mrf.mxu1  ;;  %v524_v49 = vadd.f32 %v1413_v21, %v1681_v42 }
  0xf2   : > { %v515_v26 = vpop.f32.mrf.mxu0  ;;  %1111 = vst.msk [vmem:[%s1690_s23 + $0x14] sm:$0xf] %vm1105_vm2, %v1329_v24  ;;  %v1334_v29 = vpack.c.bf16 %v955_v25, %v955_v25  ;;  %v953_v30 = vadd.f32 %v850_v27, %v497_v23 }
  0xf3   : > { %v1449_v32 = vpop.f32.mrf.mxu1  ;;  %v516_v54 = vadd.f32 %v1681_v42, %v515_v26 }
  0xf4   : > { %v1416_v31 = vpop.f32.mrf.mxu0  ;;  %1116 = vst.msk [vmem:[%s1690_s23 + $0x28] sm:$0xf] %vm1105_vm2, %v1334_v29  ;;  %v1332_v35 = vpack.c.bf16 %v953_v30, %v953_v30  ;;  %v956_v36 = vadd.f32 %v1449_v32, %v508_v28 }
  0xf5   : > { %v853_v38 = vpop.f32.mrf.mxu1  ;;  %v537_v55 = vadd.f32 %v1416_v31, %v1681_v42 }
  0xf6   : > { %v528_v37 = vpop.f32.mrf.mxu0  ;;  %1114 = vst.msk [vmem:[%s1690_s23 + $0x20] sm:$0xf] %vm1105_vm2, %v1332_v35  ;;  %v1335_v39 = vpack.c.bf16 %v956_v36, %v956_v36  ;;  %v954_v40 = vadd.f32 %v853_v38, %v500_v33 }
  0xf7   : > { %v1452_v43 = vpop.f32.mrf.mxu1  ;;  %v529_v0 = vadd.f32 %v1681_v42, %v528_v37 }
  0xf8   : > { %v1417_v41 = vpop.f32.mrf.mxu0  ;;  %1117 = vst.msk [vmem:[%s1690_s23 + $0x2c] sm:$0xf] %vm1105_vm2, %v1335_v39  ;;  %v1333_v45 = vpack.c.bf16 %v954_v40, %v954_v40  ;;  %v959_v46 = vadd.f32 %v1452_v43, %v521_v34 }
  0xf9   : > { %v866_v48 = vpop.f32.mrf.mxu1  ;;  %v540_v5 = vadd.f32 %v1417_v41, %v1681_v42 }
  0xfa   : > { %v531_v47 = vpop.f32.mrf.mxu0  ;;  %1115 = vst.msk [vmem:[%s1690_s23 + $0x24] sm:$0xf] %vm1105_vm2, %v1333_v45  ;;  %v1338_v50 = vpack.c.bf16 %v959_v46, %v959_v46  ;;  %v957_v51 = vadd.f32 %v866_v48, %v513_v44 }
  0xfb   : > { %v1453_v53 = vpop.f32.mrf.mxu1  ;;  %v532_v10 = vadd.f32 %v1681_v42, %v531_v47 }
  0xfc   : > { %v1420_v52 = vpop.f32.mrf.mxu0  ;;  %1120 = vst.msk [vmem:[%s1690_s23 + $0x38] sm:$0xf] %vm1105_vm2, %v1338_v50  ;;  %v1336_v56 = vpack.c.bf16 %v957_v51, %v957_v51  ;;  %v960_v57 = vadd.f32 %v1453_v53, %v524_v49 }
  0xfd   : > { %v869_v59 = vpop.f32.mrf.mxu1  ;;  %v553_v11 = vadd.f32 %v1420_v52, %v1681_v42 }
  0xfe   : > { %v544_v58 = vpop.f32.mrf.mxu0  ;;  %1118 = vst.msk [vmem:[%s1690_s23 + $0x30] sm:$0xf] %vm1105_vm2, %v1336_v56  ;;  %v1339_v60 = vpack.c.bf16 %v960_v57, %v960_v57  ;;  %v958_v61 = vadd.f32 %v869_v59, %v516_v54 }
  0xff   : > { %v1456_v63 = vpop.f32.mrf.mxu1  ;;  %v545_v20 = vadd.f32 %v1681_v42, %v544_v58 }
 0x100   : > { %v1421_v62 = vpop.f32.mrf.mxu0  ;;  %1121 = vst.msk [vmem:[%s1690_s23 + $0x3c] sm:$0xf] %vm1105_vm2, %v1339_v60  ;;  %v1337_v1 = vpack.c.bf16 %v958_v61, %v958_v61  ;;  %v963_v2 = vadd.f32 %v1456_v63, %v537_v55 }
 0x101   : > { %v882_v4 = vpop.f32.mrf.mxu1  ;;  %v556_v25 = vadd.f32 %v1421_v62, %v1681_v42 }
 0x102   : > { %v547_v3 = vpop.f32.mrf.mxu0  ;;  %1119 = vst.msk [vmem:[%s1690_s23 + $0x34] sm:$0xf] %vm1105_vm2, %v1337_v1  ;;  %v1342_v6 = vpack.c.bf16 %v963_v2, %v963_v2  ;;  %v961_v7 = vadd.f32 %v882_v4, %v529_v0 }
 0x103   : > { %v1457_v9 = vpop.f32.mrf.mxu1  ;;  %v548_v29 = vadd.f32 %v1681_v42, %v547_v3 }
 0x104   : > { %v1424_v8 = vpop.f32.mrf.mxu0  ;;  %1124 = vst.msk [vmem:[%s1690_s23 + $0x48] sm:$0xf] %vm1105_vm2, %v1342_v6  ;;  %v1340_v12 = vpack.c.bf16 %v961_v7, %v961_v7  ;;  %v964_v13 = vadd.f32 %v1457_v9, %v540_v5 }
 0x105   : > { %v885_v15 = vpop.f32.mrf.mxu1  ;;  %v569_v30 = vadd.f32 %v1424_v8, %v1681_v42 }
 0x106   : > { %v560_v14 = vpop.f32.mrf.mxu0  ;;  %1122 = vst.msk [vmem:[%s1690_s23 + $0x40] sm:$0xf] %vm1105_vm2, %v1340_v12  ;;  %v1343_v16 = vpack.c.bf16 %v964_v13, %v964_v13  ;;  %v962_v17 = vadd.f32 %v885_v15, %v532_v10 }
 0x107   : > { %v1460_v19 = vpop.f32.mrf.mxu1  ;;  %v561_v38 = vadd.f32 %v1681_v42, %v560_v14 }
 0x108   : > { %v1425_v18 = vpop.f32.mrf.mxu0  ;;  %1125 = vst.msk [vmem:[%s1690_s23 + $0x4c] sm:$0xf] %vm1105_vm2, %v1343_v16  ;;  %v1341_v21 = vpack.c.bf16 %v962_v17, %v962_v17  ;;  %v967_v22 = vadd.f32 %v1460_v19, %v553_v11 }
 0x109   : > { %v898_v23 = vpop.f32.mrf.mxu1  ;;  %v572_v44 = vadd.f32 %v1425_v18, %v1681_v42 }
 0x10a   : > { %v563_v24 = vpop.f32.mrf.mxu0  ;;  %1123 = vst.msk [vmem:[%s1690_s23 + $0x44] sm:$0xf] %vm1105_vm2, %v1341_v21  ;;  %v1346_v26 = vpack.c.bf16 %v967_v22, %v967_v22  ;;  %v965_v27 = vadd.f32 %v898_v23, %v545_v20 }
 0x10b   : > { %v1461_v28 = vpop.f32.mrf.mxu1  ;;  %v564_v48 = vadd.f32 %v1681_v42, %v563_v24 }
 0x10c   : > { %1128 = vst.msk [vmem:[%s1690_s23 + $0x58] sm:$0xf] %vm1105_vm2, %v1346_v26  ;;  %v1344_v31 = vpack.c.bf16 %v965_v27, %v965_v27  ;;  %v968_v32 = vadd.f32 %v1461_v28, %v556_v25  ;;  %v1428_v34 = vpop.f32.mrf.mxu0 }
 0x10d   : > { %v901_v33 = vpop.f32.mrf.mxu1  ;;  %v585_v49 = vadd.f32 %v1428_v34, %v1681_v42 }
 0x10e   : > { %1126 = vst.msk [vmem:[%s1690_s23 + $0x50] sm:$0xf] %vm1105_vm2, %v1344_v31  ;;  %v1347_v35 = vpack.c.bf16 %v968_v32, %v968_v32  ;;  %v966_v36 = vadd.f32 %v901_v33, %v548_v29  ;;  %v576_v41 = vpop.f32.mrf.mxu0 }
 0x10f   : > { %v1464_v37 = vpop.f32.mrf.mxu1  ;;  %v577_v57 = vadd.f32 %v1681_v42, %v576_v41 }
 0x110   : > { %1129 = vst.msk [vmem:[%s1690_s23 + $0x5c] sm:$0xf] %vm1105_vm2, %v1347_v35  ;;  %v1345_v39 = vpack.c.bf16 %v966_v36, %v966_v36  ;;  %v971_v40 = vadd.f32 %v1464_v37, %v569_v30  ;;  %v1429_v52 = vpop.f32.mrf.mxu0 }
 0x111   : > { %v914_v43 = vpop.f32.mrf.mxu1  ;;  %v588_v62 = vadd.f32 %v1429_v52, %v1681_v42 }
 0x112   : > { %1127 = vst.msk [vmem:[%s1690_s23 + $0x54] sm:$0xf] %vm1105_vm2, %v1345_v39  ;;  %v1350_v45 = vpack.c.bf16 %v971_v40, %v971_v40  ;;  %v969_v46 = vadd.f32 %v914_v43, %v561_v38  ;;  %v579_v60 = vpop.f32.mrf.mxu0 }
 0x113   : > { %v1465_v47 = vpop.f32.mrf.mxu1  ;;  %v580_v2 = vadd.f32 %v1681_v42, %v579_v60 }
 0x114   : > { %1132 = vst.msk [vmem:[%s1690_s23 + $0x68] sm:$0xf] %vm1105_vm2, %v1350_v45  ;;  %v1348_v50 = vpack.c.bf16 %v969_v46, %v969_v46  ;;  %v972_v51 = vadd.f32 %v1465_v47, %v572_v44 }
 0x115   : > { %v917_v53 = vpop.f32.mrf.mxu1 }
 0x116   : > { %1130 = vst.msk [vmem:[%s1690_s23 + $0x60] sm:$0xf] %vm1105_vm2, %v1348_v50  ;;  %v1351_v54 = vpack.c.bf16 %v972_v51, %v972_v51  ;;  %v970_v55 = vadd.f32 %v917_v53, %v564_v48 }
 0x117   : > { %v1468_v56 = vpop.f32.mrf.mxu1 }
 0x118   : > { %1133 = vst.msk [vmem:[%s1690_s23 + $0x6c] sm:$0xf] %vm1105_vm2, %v1351_v54  ;;  %v1349_v58 = vpack.c.bf16 %v970_v55, %v970_v55  ;;  %v975_v59 = vadd.f32 %v1468_v56, %v585_v49 }
 0x119   : > { %v930_v61 = vpop.f32.mrf.mxu1 }
 0x11a   : > { %1131 = vst.msk [vmem:[%s1690_s23 + $0x64] sm:$0xf] %vm1105_vm2, %v1349_v58  ;;  %v1354_v63 = vpack.c.bf16 %v975_v59, %v975_v59  ;;  %v973_v0 = vadd.f32 %v930_v61, %v577_v57 }
 0x11b   : > { %v1469_v1 = vpop.f32.mrf.mxu1 }
 0x11c   : > { %1136 = vst.msk [vmem:[%s1690_s23 + $0x78] sm:$0xf] %vm1105_vm2, %v1354_v63  ;;  %v1352_v3 = vpack.c.bf16 %v973_v0, %v973_v0  ;;  %v976_v4 = vadd.f32 %v1469_v1, %v588_v62 }
 0x11d   : > { %v933_v5 = vpop.f32.mrf.mxu1 }
 0x11e   : > { %1134 = vst.msk [vmem:[%s1690_s23 + $0x70] sm:$0xf] %vm1105_vm2, %v1352_v3  ;;  %v1355_v6 = vpack.c.bf16 %v976_v4, %v976_v4  ;;  %v974_v7 = vadd.f32 %v933_v5, %v580_v2 }
 0x120   : > { %1137 = vst.msk [vmem:[%s1690_s23 + $0x7c] sm:$0xf] %vm1105_vm2, %v1355_v6  ;;  %v1353_v8 = vpack.c.bf16 %v974_v7, %v974_v7 }
 0x122   : > { %1135 = vst.msk [vmem:[%s1690_s23 + $0x74] sm:$0xf] %vm1105_vm2, %v1353_v8 }
 0x123 PF: > { %s15_s18 = sadd.s32 1, %s1522_s18  }
 0x124   : > { %p12_p4 = scmp.ge.s32.totalorder %s15_s18, 4  }
 0x126   :  { %14 = sbr.rel (!%p12_p4) target bundleno = 1 (0x1), region = 73 }

// kernel: extended_mask2former_forward.15
= control target key start
LH: loop header
LB: loop body
LE: loop exit
PB: predicated region body
PF: predicated region fallthrough
CT: control target
= control target key end

     0   :  { %s3463_s21 = smov 0   ;;  %s3919_s0 = inlined_call_operand.vmem [shape: f32[8,32], index: 0, kind: input, shape index: {}]   ;;  %s3920_s1 = inlined_call_operand.vmem [shape: bf16[2,16,32], index: 1, kind: input, shape index: {}]   ;;  %s3921_s2 = inlined_call_operand.vmem [shape: bf16[2,256,16], index: 2, kind: input, shape index: {}]   ;;  %s3922_s3 = inlined_call_operand.vmem [shape: f32[24,128], index: 3, kind: input, shape index: {}]   ;;  %s3923_s4 = inlined_call_operand.vmem [shape: bf16[32,32], index: 4, kind: input, shape index: {}]   ;;  %s3924_s5 = inlined_call_operand.vmem [shape: bf16[32,64], index: 5, kind: input, shape index: {}]   ;;  %s3925_s6 = inlined_call_operand.vmem [shape: bf16[32,32], index: 6, kind: input, shape index: {}]   ;;  %s3926_s7 = inlined_call_operand.vmem [shape: bf16[32,96], index: 7, kind: input, shape index: {}]   ;;  %s3927_s8 = inlined_call_operand.vmem [shape: bf16[32,32], index: 8, kind: input, shape index: {}]   ;;  %s3928_s9 = inlined_call_operand.vmem [shape: bf16[32,64], index: 9, kind: input, shape index: {}]   ;;  %s3929_s10 = inlined_call_operand.vmem [shape: bf16[64,32], index: 10, kind: input, shape index: {}]   ;;  %s3930_s11 = inlined_call_operand.vmem [shape: bf16[32,6], index: 11, kind: input, shape index: {}]   ;;  %s3931_s12 = inlined_call_operand.vmem [shape: bf16[32,32], index: 12, kind: input, shape index: {}]   ;;  %s3932_s13 = inlined_call_operand.vmem [shape: bf16[32,32], index: 13, kind: input, shape index: {}]   ;;  %s3933_s14 = inlined_call_operand.vmem [shape: bf16[32,16], index: 14, kind: input, shape index: {}]   ;;  %s3934_s15 = inlined_call_operand.vmem [shape: f32[2,8,6], index: 15, kind: output, shape index: {0}]   ;;  %s3935_s16 = inlined_call_operand.vmem [shape: f32[2,8,256], index: 16, kind: output, shape index: {1}]  }
   0x1   :  { %3938 = sst [smem:[#allocation2_spill]] %s3919_s0 }
   0x2 LB: > { %s2833_s22 = sadd.s32 4294967295, %s3363_s21   ;;  %p2837_p0 = scmp.ge.s32.totalorder %s3363_s21, 1  ;;  %s3363_s21 = sphi %s3463_s21, %s27_s21  }
   0x3   : > { %p475_p1 = scmp.lt.s32.totalorder %s3363_s21, 3 }
   0x5   : > { %p476_p2 = pnand %p2837_p0, %p475_p1 }
   0x6   : > { %s3939_s29 = sld [smem:[#allocation2_spill]] (!%p476_p2)  ;;  %p534_p3 = scmp.lt.s32.totalorder (!%p476_p2), %s2833_s22, 1 }
   0x7   : > { %479 = sbr.rel (%p476_p2) target bundleno = 7074 (0x1ba2), region = 80  ;;  %s3367_s19 = smov (!%p476_p2), 120  }
   0x8   : > { %s3369_s23 = smov (!%p476_p2), 88   ;;  %s3370_s24 = smov (!%p476_p2), 112  }
   0x9   : > { %s3371_s30 = smov (!%p476_p2), 80   ;;  %s3372_s0 = smov (!%p476_p2), 104  }
   0xa   : > { %s3937_s26 = smov (!%p476_p2), 72   ;;  %s3940_s27 = smov (!%p476_p2), 72  }
   0xb   : > { %s3377_s18 = smov (!%p476_p2), 40  }
   0xc   : > { %v3282_v0 = vld [vmem:[%s3923_s4 + $0x8] sm:$0xff]   ;;  %v3365_v1 = vmov 0.0   ;;  %v3283_v2 = vld [vmem:[%s3923_s4] sm:$0xff]   ;;  %vm3366_vm0 = vmmov 0   ;;  %vm579_vm1 = vcmask 261120   ;;  %s3943_s22 = smov (!%p534_p3, %s2833_s22), 1 }
   0xd   : > { %3033 = vmatprep.subr.bf16.mxu1 %v3365_v1  ;;  %3061 = vmatprep.subr.bf16.mxu0 %v3365_v1  ;;  %v3484_v3 = vld [vmem:[%s3939_s29] sm:$0xff]  ;;  %v3284_v5 = vld [vmem:[%s3924_s5 + $0x8] sm:$0xff]   ;;  %s3936_s17 = sshll.u32 %s3943_s22, 3  ;;  %s2936_s25 = sshll.u32 %s3943_s22, 7  ;;  %vm695_vm2 = vcmask 64512   ;;  %vm743_vm3 = vcmask 130048  }
   0xe   : > { %3034 = vmatpush3.bf16.msra.mxu1 %v3282_v0  ;;  %3037 = vmatprep.mubr.msk.bf16.mxu1 %vm3366_vm0, %v3365_v1  ;;  %v561_v4 = vpack.c.bf16 %v3484_v3, %v3484_v3  ;;  %s538_s20 = scalar_lea.vmem %s3920_s1, %s3936_s17  ;;  %v3285_v6 = vld [vmem:[%s3924_s5] sm:$0xff]   ;;  %s3515_s28 = scalar_lea.vmem %s3921_s2, %s2936_s25  ;;  %vm920_vm4 = vcmask 1043456   ;;  %vm2198_vm5 = vcmask 523264   ;;  %vm2333_vm6 = vcmask 48128  }
   0xf   : > { %3035 = vmatprep.subr.bf16.mxu1 %v3365_v1  ;;  %3063 = vmatprep.mubr.msk.bf16.mxu0 %vm3366_vm0, %v3365_v1  ;;  %v3286_v7 = vld [vmem:[%s538_s20] sm:$0xff]   ;;  %s3368_s20 = smov 96   ;;  %s3374_s17 = smov 64  }
  0x10   : > { %v2849_v13 = vld [vmem:[%s3922_s3 + $0x1] ss:$0 sm:$0xff]  ;;  %v2845_v15 = vld [vmem:[%s3922_s3] ss:$0 sm:$0xff]  ;;  %v915_v54 = vld [vmem:[%s3925_s6 + $0x4] sm:$0xf] }
  0x11   : > { %v922_v55 = vsel %vm920_vm4, %v915_v54, 0  ;;  %v803_v59 = vld [vmem:[%s3925_s6] sm:$0xf] }
  0x12   : > { %3036 = vmatpush3.bf16.msra.mxu1 %v3283_v2  ;;  %v968_v62 = vsel %vm920_vm4, %v803_v59, 0 }
  0x13   : > { %3041 = vmatprep.subr.bf16.mxu1 %v3365_v1 }
  0x15   : > { %3038 = vmatmul.mubr.msk.bf16.vlgmr.msra.gmra.mxu1 %vm579_vm1, %v561_v4 }
  0x16   : > { %3042 = vmatpush3.bf16.msra.mxu1 %v3284_v5  ;;  %3045 = vmatprep.mubr.msk.bf16.mxu1 %vm3366_vm0, %v3365_v1 }
  0x17   : > { %3043 = vmatprep.subr.bf16.mxu1 %v3365_v1 }
  0x1a   : > { %3044 = vmatpush3.bf16.msra.mxu1 %v3285_v6 }
  0x1b   : > { %3049 = vmatprep.subr.bf16.mxu1 %v3365_v1 }
  0x1d   : > { %3046 = vmatmul.mubr.msk.bf16.vlgmr.msra.gmra.mxu1 %vm579_vm1, %v3286_v7 }
  0x1e   : > { %3051 = vmatprep.mubr.msk.bf16.mxu1 %vm3366_vm0, %v3365_v1 }
  0xd5   : > { %v617_v8 = vpop.f32.mrf.mxu1 }
  0xd6   : > { %v618_v20 = vadd.f32 %v2845_v15, %v617_v8 }
  0xd7   : > { %v3039_v9 = vpop.f32.mrf.mxu1 }
  0xd8   : > { %v3532_v23 = vpack.c.bf16 %v618_v20, %v618_v20 }
  0xd9   : > { %v620_v10 = vpop.f32.mrf.mxu1 }
  0xdb   : > { %v3040_v11 = vpop.f32.mrf.mxu1 }
  0xdd   : > { %v686_v12 = vpop.f32.mrf.mxu1 }
  0xde   : > { %v687_v17 = vadd.f32 %v2849_v13, %v686_v12 }
  0xdf   : > { %v3047_v14 = vpop.f32.mrf.mxu1 }
  0xe1   : > { %v689_v16 = vpop.f32.mrf.mxu1 }
  0xe2   : > { %v690_v18 = vadd.f32 %v2849_v13, %v689_v16 }
  0xe3   : > { %v3048_v19 = vpop.f32.mrf.mxu1 }
  0xe4   : > { %v3526_v21 = vpack.c.bf16 %v690_v18, %v687_v17 }
  0xe6   : > { %808 = vrot.lane.b32.xlu0 %v3526_v21, %s3367_s19  ;;  %v700_v22 = vsel %vm695_vm2, %v3526_v21, 0 }
  0xe7   : > { %3050 = vmatpush3.bf16.xpose.msra.mxu1 %v700_v22 }
  0xe8   : > { %3055 = vmatprep.subr.bf16.mxu1 %v3365_v1 }
  0xea   : > { %806 = vrot.lane.b32.xlu0 %v3532_v23, %s3367_s19 }
  0xee   : > { %3052 = vmatmul.mubr.msk.bf16.vlgmr.msra.gmra.mxu1 %vm695_vm2, %v3532_v23 }
  0xef   : > { %3057 = vmatprep.mubr.msk.bf16.mxu1 %vm3366_vm0, %v3365_v1 }
 0x158   : > { %v809_v24 = vpop.permute.xlu0 %808 }
 0x159   : > { %v814_v25 = vsel %vm695_vm2, %v809_v24, 0 }
 0x15a   : > { %3062 = vmatpush3.bf16.xpose.msra.mxu0 %v814_v25 }
 0x15b   : > { %3073 = vmatprep.subr.bf16.mxu0 %v3365_v1 }
 0x15c   : > { %v807_v26 = vpop.permute.xlu0 %806 }
 0x161   : > { %3064 = vmatmul.mubr.msk.bf16.vlgmr.msra.gmra.mxu0 %vm695_vm2, %v807_v26 }
 0x162   : > { %3075 = vmatprep.mubr.msk.bf16.mxu0 %vm3366_vm0, %v3365_v1  ;;  %3074 = vmatpush3.bf16.msra.mxu0 %v922_v55 }
 0x163   : > { %3085 = vmatprep.subr.bf16.mxu0 %v3365_v1 }
 0x1ae   : > { %v736_v27 = vpop.f32.mrf.mxu1 }
 0x1af   : > { %v742_v28 = vmul.f32 0.35355338, %v736_v27 }
 0x1b0   : > { %v3053_v29 = vpop.f32.mrf.mxu1 }
 0x1b1   : > { %v744_v30 = vsel %vm743_vm3, %v742_v28, -inf }
 0x1b2   : > { %745 = vmax.xlane.f32.xlu1 %v744_v30  ;;  %v739_v31 = vpop.f32.mrf.mxu1 }
 0x1b4   : > { %v3054_v32 = vpop.f32.mrf.mxu1 }
 0x221   : > { %v850_v33 = vpop.f32.mrf.mxu0 }
 0x222   : > { %v856_v34 = vmul.f32 0.35355338, %v850_v33 }
 0x223   : > { %v3065_v35 = vpop.f32.mrf.mxu0 }
 0x224   : > { %v857_v36 = vsel %vm743_vm3, %v856_v34, -inf }
 0x225   : > { %v853_v37 = vpop.f32.mrf.mxu0  ;;  %858 = vmax.xlane.f32.xlu1 %v857_v36 }
 0x227   : > { %v3066_v38 = vpop.f32.mrf.mxu0 }
 0x236   : > { %757 = vrot.lane.b32.xlu1 %v3526_v21, %s3368_s20 }
 0x23b   : > { %v746_v39 = vpop.xlane.xlu1 %745 }
 0x23c   : > { %v747_v40 = vsub.f32 %v742_v28, %v746_v39 }
 0x23e   : > { %v748_v41 = vmul.f32 1.442695, %v747_v40 }
 0x240   : > { %3319 = vpow2.f32 %v748_v41 }
 0x24d   : > { %v3320_v42 = vpop.eup %3319 }
 0x24e   : > { %v750_v43 = vsel %vm743_vm3, %v3320_v42, 0.0 }
 0x24f   : > { %751 = vadd.xlane.f32.xlu0 %v750_v43 }
 0x2ae   : > { %v859_v44 = vpop.xlane.xlu1 %858 }
 0x2af   : > { %v860_v45 = vsub.f32 %v856_v34, %v859_v44 }
 0x2b1   : > { %v861_v46 = vmul.f32 1.442695, %v860_v45 }
 0x2b2   : > { %v758_v47 = vpop.permute.xlu1 %757 }
 0x2b3   : > { %3321 = vpow2.f32 %v861_v46  ;;  %3056 = vmatpush3.bf16.msra.mxu1 %v758_v47 }
 0x2b4   : > { %3067 = vmatprep.subr.bf16.mxu1 %v3365_v1 }
 0x2c0   : > { %v3322_v48 = vpop.eup %3321 }
 0x2c1   : > { %v863_v49 = vsel %vm743_vm3, %v3322_v48, 0.0 }
 0x2c2   : > { %864 = vadd.xlane.f32.xlu1 %v863_v49 }
 0x2d3   : > { %869 = vrot.lane.b32.xlu1 %v3526_v21, %s3369_s23 }
 0x2d7   : > { %1012 = vrot.lane.b32.xlu1 %v3526_v21, %s3370_s24 }
 0x2d8   : > { %v752_v50 = vpop.xlane.xlu0 %751 }
 0x2d9   : > { %3323 = vrcp.f32 %v752_v50 }
 0x2db   : > { %1010 = vrot.lane.b32.xlu1 %v3532_v23, %s3370_s24 }
 0x2e6   : > { %v3324_v51 = vpop.eup %3323 }
 0x2e7   : > { %v754_v52 = vmul.f32 %v3324_v51, %v3320_v42  ;;  %v1119_v42 = vld [vmem:[%s3925_s6 + $0x8] sm:$0xf] }
 0x2e8   : > { %v1125_v43 = vsel %vm920_vm4, %v1119_v42, 0 }
 0x2e9   : > { %v755_v53 = vpack.c.bf16 %v754_v52, %v754_v52 }
 0x2eb   : > { %3058 = vmatmul.mubr.msk.bf16.vlgmr.msra.gmra.mxu1 %vm743_vm3, %v755_v53 }
 0x2ec   : > { %3069 = vmatprep.mubr.msk.bf16.mxu1 %vm3366_vm0, %v3365_v1 }
 0x34b   : > { %v865_v56 = vpop.xlane.xlu1 %864 }
 0x34c   : > { %3325 = vrcp.f32 %v865_v56 }
 0x34f   : > { %v870_v57 = vpop.permute.xlu1 %869 }
 0x350   : > { %3068 = vmatpush3.bf16.msra.mxu1 %v870_v57 }
 0x351   : > { %3079 = vmatprep.subr.bf16.mxu1 %v3365_v1 }
 0x353   : > { %v1013_v6 = vpop.permute.xlu1 %1012 }
 0x354   : > { %v1018_v10 = vsel %vm695_vm2, %v1013_v6, 0 }
 0x357   : > { %v1011_v13 = vpop.permute.xlu1 %1010 }
 0x359   : > { %v3326_v58 = vpop.eup %3325 }
 0x35a   : > { %v867_v60 = vmul.f32 %v3326_v58, %v3322_v48 }
 0x35c   : > { %v868_v61 = vpack.c.bf16 %v867_v60, %v867_v60 }
 0x35e   : > { %3070 = vmatmul.mubr.msk.bf16.vlgmr.msra.gmra.mxu1 %vm743_vm3, %v868_v61 }
 0x35f   : > { %3080 = vmatpush3.bf16.msra.mxu1 %v968_v62  ;;  %3081 = vmatprep.mubr.msk.bf16.mxu1 %vm3366_vm0, %v3365_v1 }
 0x360   : > { %3091 = vmatprep.subr.bf16.mxu1 %v3365_v1 }
 0x3ab   : > { %v797_v63 = vpop.f32.mrf.mxu1 }
 0x3ac   : > { %v804_v0 = vpack.c.bf16 %v797_v63, %v797_v63 }
 0x3ad   : > { %v3059_v2 = vpop.f32.mrf.mxu1 }
 0x3ae   : > { %3082 = vmatmul.mubr.msk.bf16.vlgmr.msra.gmra.mxu1 %vm695_vm2, %v804_v0  ;;  %v1277_v0 = vld [vmem:[%s3925_s6 + $0xc] sm:$0xf] }
 0x3af   : > { %v800_v4 = vpop.f32.mrf.mxu1  ;;  %3093 = vmatprep.mubr.msk.bf16.mxu1 %vm3366_vm0, %v3365_v1  ;;  %v1283_v2 = vsel %vm920_vm4, %v1277_v0, 0 }
 0x3b1   : > { %v3060_v5 = vpop.f32.mrf.mxu1 }
 0x41e   : > { %v909_v7 = vpop.f32.mrf.mxu1 }
 0x41f   : > { %v916_v8 = vpack.c.bf16 %v909_v7, %v909_v7 }
 0x420   : > { %v3071_v9 = vpop.f32.mrf.mxu1 }
 0x421   : > { %3076 = vmatmul.mubr.msk.bf16.vlgmr.msra.gmra.mxu0 %vm695_vm2, %v916_v8 }
 0x422   : > { %3086 = vmatpush3.bf16.xpose.msra.mxu0 %v1018_v10  ;;  %v912_v11 = vpop.f32.mrf.mxu1  ;;  %3087 = vmatprep.mubr.msk.bf16.mxu0 %vm3366_vm0, %v3365_v1 }
 0x423   : > { %3097 = vmatprep.subr.bf16.mxu0 %v3365_v1 }
 0x424   : > { %v3072_v12 = vpop.f32.mrf.mxu1 }
 0x429   : > { %3088 = vmatmul.mubr.msk.bf16.vlgmr.msra.gmra.mxu0 %vm695_vm2, %v1011_v13 }
 0x42a   : > { %3099 = vmatprep.mubr.msk.bf16.mxu0 %vm3366_vm0, %v3365_v1  ;;  %3098 = vmatpush3.bf16.msra.mxu0 %v1125_v43 }
 0x42b   : > { %3109 = vmatprep.subr.bf16.mxu0 %v3365_v1 }
 0x46e   : > { %v3587_v14 = vpop.f32.mrf.mxu1 }
 0x470   : > { %v3083_v15 = vpop.f32.mrf.mxu1 }
 0x472   : > { %v1007_v16 = vpop.f32.mrf.mxu1 }
 0x473   : > { %v2866_v16 = vld [vmem:[%s3922_s3 + $0x2] ss:$0 sm:$0xff] }
 0x474   : > { %v3084_v17 = vpop.f32.mrf.mxu1 }
 0x4e1   : > { %v3589_v18 = vpop.f32.mrf.mxu0 }
 0x4e2   : > { %v1005_v60 = vadd.f32 %v3587_v14, %v3589_v18 }
 0x4e3   : > { %v3077_v19 = vpop.f32.mrf.mxu0 }
 0x4e5   : > { %v961_v20 = vpop.f32.mrf.mxu0 }
 0x4e7   : > { %v3078_v22 = vpop.f32.mrf.mxu0 }
 0x4e9   : > { %v1054_v24 = vpop.f32.mrf.mxu0 }
 0x4ea   : > { %v1060_v25 = vmul.f32 0.35355338, %v1054_v24 }
 0x4eb   : > { %v3089_v26 = vpop.f32.mrf.mxu0 }
 0x4ec   : > { %v1061_v27 = vsel %vm743_vm3, %v1060_v25, -inf }
 0x4ed   : > { %1062 = vmax.xlane.f32.xlu0 %v1061_v27  ;;  %v1057_v28 = vpop.f32.mrf.mxu0 }
 0x4ef   : > { %v3090_v29 = vpop.f32.mrf.mxu0 }
 0x503   : > { %1073 = vrot.lane.b32.xlu0 %v3526_v21, %s3371_s30 }
 0x507   : > { %1170 = vrot.lane.b32.xlu0 %v3526_v21, %s3372_s0 }
 0x50b   : > { %1168 = vrot.lane.b32.xlu0 %v3532_v23, %s3372_s0 }
 0x576   : > { %v1063_v30 = vpop.xlane.xlu0 %1062 }
 0x577   : > { %v1064_v31 = vsub.f32 %v1060_v25, %v1063_v30 }
 0x579   : > { %v1065_v32 = vmul.f32 1.442695, %v1064_v31  ;;  %v3287_v31 = vld [vmem:[%s3926_s7 + $0x8] sm:$0xff]  }
 0x57a   : > { %v1074_v33 = vpop.permute.xlu0 %1073 }
 0x57b   : > { %3327 = vpow2.f32 %v1065_v32  ;;  %3092 = vmatpush3.bf16.msra.mxu1 %v1074_v33 }
 0x57c   : > { %3103 = vmatprep.subr.bf16.mxu1 %v3365_v1 }
 0x57e   : > { %v1171_v39 = vpop.permute.xlu0 %1170 }
 0x57f   : > { %v1176_v23 = vsel %vm695_vm2, %v1171_v39, 0 }
 0x582   : > { %v1169_v41 = vpop.permute.xlu0 %1168 }
 0x588   : > { %v3328_v34 = vpop.eup %3327 }
 0x589   : > { %v1067_v35 = vsel %vm743_vm3, %v3328_v34, 0.0 }
 0x58a   : > { %1068 = vadd.xlane.f32.xlu1 %v1067_v35 }
 0x613   : > { %v1069_v36 = vpop.xlane.xlu1 %1068 }
 0x614   : > { %3329 = vrcp.f32 %v1069_v36  ;;  %v2867_v36 = vld [vmem:[%s3922_s3 + $0xb] ss:$0 sm:$0xff] }
 0x621   : > { %v3330_v37 = vpop.eup %3329 }
 0x622   : > { %v1071_v38 = vmul.f32 %v3330_v37, %v3328_v34 }
 0x624   : > { %v1072_v40 = vpack.c.bf16 %v1071_v38, %v1071_v38  ;;  %v2868_v38 = vld [vmem:[%s3922_s3 + $0xc] ss:$0 sm:$0xff] }
 0x626   : > { %3094 = vmatmul.mubr.msk.bf16.vlgmr.msra.gmra.mxu1 %vm743_vm3, %v1072_v40 }
 0x627   : > { %3104 = vmatpush3.bf16.xpose.msra.mxu1 %v1176_v23  ;;  %3105 = vmatprep.mubr.msk.bf16.mxu1 %vm3366_vm0, %v3365_v1 }
 0x628   : > { %3115 = vmatprep.subr.bf16.mxu1 %v3365_v1 }
 0x62e   : > { %3106 = vmatmul.mubr.msk.bf16.vlgmr.msra.gmra.mxu1 %vm695_vm2, %v1169_v41  ;;  %v2869_v41 = vld [vmem:[%s3922_s3 + $0x3] ss:$0 sm:$0xff] }
 0x62f   : > { %3117 = vmatprep.mubr.msk.bf16.mxu1 %vm3366_vm0, %v3365_v1  ;;  %3116 = vmatpush3.bf16.msra.mxu1 %v1283_v2 }
 0x630   : > { %3129 = vmatprep.subr.bf16.mxu1 %v3365_v1 }
 0x6e6   : > { %v1113_v44 = vpop.f32.mrf.mxu1 }
 0x6e7   : > { %v1120_v45 = vpack.c.bf16 %v1113_v44, %v1113_v44 }
 0x6e8   : > { %v3095_v46 = vpop.f32.mrf.mxu1 }
 0x6e9   : > { %3100 = vmatmul.mubr.msk.bf16.vlgmr.msra.gmra.mxu0 %vm695_vm2, %v1120_v45 }
 0x6ea   : > { %v1116_v47 = vpop.f32.mrf.mxu1  ;;  %3111 = vmatprep.mubr.msk.bf16.mxu0 %vm3366_vm0, %v3365_v1 }
 0x6ec   : > { %v3096_v48 = vpop.f32.mrf.mxu1 }
 0x6ee   : > { %v1212_v49 = vpop.f32.mrf.mxu1 }
 0x6ef   : > { %v1218_v50 = vmul.f32 0.35355338, %v1212_v49 }
 0x6f0   : > { %v3107_v51 = vpop.f32.mrf.mxu1 }
 0x6f1   : > { %v1219_v52 = vsel %vm743_vm3, %v1218_v50, -inf }
 0x6f2   : > { %1220 = vmax.xlane.f32.xlu0 %v1219_v52  ;;  %v1215_v53 = vpop.f32.mrf.mxu1 }
 0x6f4   : > { %v3108_v54 = vpop.f32.mrf.mxu1 }
 0x77b   : > { %v1221_v55 = vpop.xlane.xlu0 %1220 }
 0x77c   : > { %v1222_v56 = vsub.f32 %v1218_v50, %v1221_v55 }
 0x77e   : > { %v1223_v57 = vmul.f32 1.442695, %v1222_v56 }
 0x780   : > { %3331 = vpow2.f32 %v1223_v57 }
 0x78d   : > { %v3332_v58 = vpop.eup %3331 }
 0x78e   : > { %v1225_v59 = vsel %vm743_vm3, %v3332_v58, 0.0 }
 0x78f   : > { %1226 = vadd.xlane.f32.xlu1 %v1225_v59 }
 0x7a0   : > { %1231 = vrot.lane.b32.xlu1 %v3526_v21, %s3937_s26  ;;  %s3376_s26 = smov 48  }
 0x7a9   : > { %v1161_v61 = vpop.f32.mrf.mxu0 }
 0x7aa   : > { %v1167_v62 = vadd.f32 %v1161_v61, %v1005_v60 }
 0x7ab   : > { %v3101_v63 = vpop.f32.mrf.mxu0 }
 0x7ad   : > { %v1164_v4 = vpop.f32.mrf.mxu0 }
 0x7af   : > { %v3102_v5 = vpop.f32.mrf.mxu0 }
 0x818   : > { %v1227_v6 = vpop.xlane.xlu1 %1226 }
 0x819   : > { %3333 = vrcp.f32 %v1227_v6 }
 0x81c   : > { %v1232_v21 = vpop.permute.xlu1 %1231 }
 0x81d   : > { %3110 = vmatpush3.bf16.msra.mxu0 %v1232_v21 }
 0x81e   : > { %3121 = vmatprep.subr.bf16.mxu0 %v3365_v1 }
 0x826   : > { %v3334_v7 = vpop.eup %3333 }
 0x827   : > { %v1229_v8 = vmul.f32 %v3334_v7, %v3332_v58 }
 0x829   : > { %v1230_v9 = vpack.c.bf16 %v1229_v8, %v1229_v8 }
 0x82b   : > { %3112 = vmatmul.mubr.msk.bf16.vlgmr.msra.gmra.mxu0 %vm743_vm3, %v1230_v9 }
 0x82c   : > { %3125 = vmatprep.mubr.msk.bf16.mxu0 %vm3366_vm0, %v3365_v1  ;;  %3122 = vmatpush3.bf16.msra.mxu0 %v3287_v31 }
 0x82d   : > { %3123 = vmatprep.subr.bf16.mxu0 %v3365_v1 }
 0x8eb   : > { %v1271_v10 = vpop.f32.mrf.mxu0 }
 0x8ec   : > { %v1278_v11 = vpack.c.bf16 %v1271_v10, %v1271_v10 }
 0x8ed   : > { %v3113_v12 = vpop.f32.mrf.mxu0 }
 0x8ee   : > { %3118 = vmatmul.mubr.msk.bf16.vlgmr.msra.gmra.mxu1 %vm695_vm2, %v1278_v11 }
 0x8ef   : > { %v1274_v13 = vpop.f32.mrf.mxu0  ;;  %3131 = vmatprep.mubr.msk.bf16.mxu1 %vm3366_vm0, %v3365_v1 }
 0x8f1   : > { %v3114_v14 = vpop.f32.mrf.mxu0 }
 0x9ae   : > { %v1319_v15 = vpop.f32.mrf.mxu1 }
 0x9af   : > { %v1325_v17 = vadd.f32 %v1319_v15, %v1167_v62 }
 0x9b0   : > { %v3119_v18 = vpop.f32.mrf.mxu1 }
 0x9b1   : > { %v1331_v19 = vadd.f32 %v2866_v16, %v1325_v17 }
 0x9b2   : > { %v1322_v20 = vpop.f32.mrf.mxu1 }
 0x9b3   : > { %v1332_v22 = vadd.f32 %v1331_v19, %v3484_v3  ;;  %v3288_v3 = vld [vmem:[%s3926_s7] sm:$0xff]  }
 0x9b4   : > { %v3120_v24 = vpop.f32.mrf.mxu1  ;;  %3124 = vmatpush3.bf16.msra.mxu0 %v3288_v3 }
 0x9b5   : > { %v1333_v25 = vsel %vm579_vm1, %v1332_v22, 0.0  ;;  %3135 = vmatprep.subr.bf16.mxu0 %v3365_v1 }
 0x9b6   : > { %1334 = vadd.xlane.f32.xlu1 %v1333_v25 }
 0xa3f   : > { %v1335_v26 = vpop.xlane.xlu1 %1334 }
 0xa40   : > { %v1337_v27 = vmul.f32 0.03125, %v1335_v26  ;;  %v1535_v26 = vld [vmem:[%s3927_s8] sm:$0xf] }
 0xa42   : > { %v1338_v28 = vsub.f32 %v1332_v22, %v1337_v27  ;;  %v1700_v27 = vsel %vm920_vm4, %v1535_v26, 0 }
 0xa44   : > { %v1339_v29 = vmul.f32 %v1338_v28, %v1338_v28 }
 0xa46   : > { %v1340_v30 = vsel %vm579_vm1, %v1339_v29, 0.0 }
 0xa47   : > { %1341 = vadd.xlane.f32.xlu0 %v1340_v30 }
 0xad0   : > { %v1342_v32 = vpop.xlane.xlu0 %1341 }
 0xad1   : > { %v1343_v33 = vmul.f32 0.03125, %v1342_v32 }
 0xad3   : > { %v1344_v34 = vadd.f32 1e-05, %v1343_v33 }
 0xad5   : > { %3335 = vrsqrt.f32 %v1344_v34 }
 0xae2   : > { %v3336_v35 = vpop.eup %3335 }
 0xae3   : > { %v1346_v37 = vmul.f32 %v3336_v35, %v1338_v28  ;;  %v1648_v28 = vld [vmem:[%s3927_s8 + $0x4] sm:$0xf] }
 0xae4   : > { %v1654_v29 = vsel %vm920_vm4, %v1648_v28, 0 }
 0xae5   : > { %v1352_v39 = vmul.f32 %v2867_v36, %v1346_v37 }
 0xae7   : > { %v3654_v40 = vadd.f32 %v2868_v38, %v1352_v39 }
 0xae9   : > { %v1363_v23 = vpack.c.bf16 %v3654_v40, %v3654_v40 }
 0xaeb   : > { %3126 = vmatmul.mubr.msk.bf16.vlgmr.msra.gmra.mxu0 %vm579_vm1, %v1363_v23 }
 0xaec   : > { %3137 = vmatprep.mubr.msk.bf16.mxu0 %vm3366_vm0, %v3365_v1 }
 0xbab   : > { %v1418_v42 = vpop.f32.mrf.mxu0 }
 0xbac   : > { %v1419_v43 = vadd.f32 %v2869_v41, %v1418_v42 }
 0xbad   : > { %v3127_v44 = vpop.f32.mrf.mxu0 }
 0xbae   : > { %v3664_v45 = vpack.c.bf16 %v1419_v43, %v1419_v43 }
 0xbaf   : > { %v1421_v46 = vpop.f32.mrf.mxu0 }
 0xbb0   : > { %1426 = vrot.lane.b32.xlu0 %v3664_v45, %s3368_s20 }
 0xbb1   : > { %v3128_v47 = vpop.f32.mrf.mxu0 }
 0xbb4   : > { %1539 = vrot.lane.b32.xlu0 %v3664_v45, %s3369_s23 }
 0xbb8   : > { %1537 = vrot.lane.b32.xlu0 %v3664_v45, %s3367_s19  ;;  %s3375_s19 = smov 56  }
 0xc22   : > { %v1427_v48 = vpop.permute.xlu0 %1426 }
 0xc23   : > { %v1432_v49 = vsel %vm695_vm2, %v1427_v48, 0 }
 0xc24   : > { %3130 = vmatpush3.bf16.xpose.msra.mxu1 %v1432_v49 }
 0xc25   : > { %3141 = vmatprep.subr.bf16.mxu1 %v3365_v1 }
 0xc26   : > { %v1540_v50 = vpop.permute.xlu0 %1539 }
 0xc27   : > { %v1545_v51 = vsel %vm695_vm2, %v1540_v50, 0 }
 0xc2a   : > { %v1538_v52 = vpop.permute.xlu0 %1537 }
 0xc2b   : > { %3132 = vmatmul.mubr.msk.bf16.vlgmr.msra.gmra.mxu1 %vm695_vm2, %v3664_v45 }
 0xc2c   : > { %3142 = vmatpush3.bf16.xpose.msra.mxu1 %v1545_v51  ;;  %3143 = vmatprep.mubr.msk.bf16.mxu1 %vm3366_vm0, %v3365_v1 }
 0xc2d   : > { %3153 = vmatprep.subr.bf16.mxu1 %v3365_v1 }
 0xc33   : > { %3144 = vmatmul.mubr.msk.bf16.vlgmr.msra.gmra.mxu1 %vm695_vm2, %v1538_v52 }
 0xc34   : > { %3155 = vmatprep.mubr.msk.bf16.mxu1 %vm3366_vm0, %v3365_v1  ;;  %3154 = vmatpush3.bf16.msra.mxu1 %v1654_v29 }
 0xc35   : > { %3165 = vmatprep.subr.bf16.mxu1 %v3365_v1 }
 0xceb   : > { %v1468_v53 = vpop.f32.mrf.mxu1 }
 0xcec   : > { %v1474_v54 = vmul.f32 0.35355338, %v1468_v53 }
 0xced   : > { %v3133_v55 = vpop.f32.mrf.mxu1 }
 0xcee   : > { %v1475_v56 = vsel %vm695_vm2, %v1474_v54, -inf }
 0xcef   : > { %1476 = vmax.xlane.f32.xlu1 %v1475_v56  ;;  %v1471_v57 = vpop.f32.mrf.mxu1 }
 0xcf1   : > { %v3134_v58 = vpop.f32.mrf.mxu1 }
 0xcf3   : > { %v1581_v59 = vpop.f32.mrf.mxu1 }
 0xcf4   : > { %v1587_v60 = vmul.f32 0.35355338, %v1581_v59 }
 0xcf5   : > { %v3145_v61 = vpop.f32.mrf.mxu1 }
 0xcf6   : > { %v1588_v62 = vsel %vm695_vm2, %v1587_v60, -inf }
 0xcf7   : > { %1589 = vmax.xlane.f32.xlu0 %v1588_v62  ;;  %v1584_v63 = vpop.f32.mrf.mxu1 }
 0xcf9   : > { %v3146_v0 = vpop.f32.mrf.mxu1 }
 0xd00   : > { %1487 = vrot.lane.b32.xlu1 %v3664_v45, %s3374_s17 }
 0xd0d   : > { %1742 = vrot.lane.b32.xlu0 %v3664_v45, %s3370_s24 }
 0xd78   : > { %v1477_v2 = vpop.xlane.xlu1 %1476 }
 0xd79   : > { %v1478_v4 = vsub.f32 %v1474_v54, %v1477_v2 }
 0xd7b   : > { %v1479_v5 = vmul.f32 1.442695, %v1478_v4 }
 0xd7c   : > { %v1488_v6 = vpop.permute.xlu1 %1487 }
 0xd7d   : > { %3337 = vpow2.f32 %v1479_v5  ;;  %v1493_v21 = vsel %vm920_vm4, %v1488_v6, 0 }
 0xd7e   : > { %3136 = vmatpush3.bf16.msra.mxu0 %v1493_v21 }
 0xd7f   : > { %3147 = vmatprep.subr.bf16.mxu0 %v3365_v1 }
 0xd80   : > { %v1590_v7 = vpop.xlane.xlu0 %1589 }
 0xd81   : > { %v1591_v8 = vsub.f32 %v1587_v60, %v1590_v7 }
 0xd83   : > { %v1592_v9 = vmul.f32 1.442695, %v1591_v8 }
 0xd84   : > { %v1743_v41 = vpop.permute.xlu0 %1742 }
 0xd85   : > { %3339 = vpow2.f32 %v1592_v9  ;;  %v1853_v9 = vld [vmem:[%s3927_s8 + $0x8] sm:$0xf] }
 0xd8a   : > { %v3338_v10 = vpop.eup %3337 }
 0xd8b   : > { %v1481_v11 = vsel %vm695_vm2, %v3338_v10, 0.0 }
 0xd8c   : > { %1482 = vadd.xlane.f32.xlu1 %v1481_v11 }
 0xd92   : > { %v3340_v12 = vpop.eup %3339 }
 0xd93   : > { %v1594_v13 = vsel %vm695_vm2, %v3340_v12, 0.0 }
 0xd94   : > { %1595 = vadd.xlane.f32.xlu1 %v1594_v13 }
 0xda5   : > { %1600 = vrot.lane.b32.xlu1 %v3664_v45, %s3375_s19 }
 0xda9   : > { %1744 = vrot.lane.b32.xlu1 %v3664_v45, %s3371_s30  ;;  %s3941_s30 = sshll.u32 %s3943_s22, 3 }
 0xe15   : > { %v1483_v14 = vpop.xlane.xlu1 %1482 }
 0xe16   : > { %3341 = vrcp.f32 %v1483_v14 }
 0xe1d   : > { %v1596_v15 = vpop.xlane.xlu1 %1595 }
 0xe1e   : > { %3343 = vrcp.f32 %v1596_v15 }
 0xe21   : > { %v1601_v18 = vpop.permute.xlu1 %1600 }
 0xe22   : > { %v1606_v20 = vsel %vm920_vm4, %v1601_v18, 0 }
 0xe23   : > { %v3342_v16 = vpop.eup %3341 }
 0xe24   : > { %v1485_v17 = vmul.f32 %v3342_v16, %v3338_v10  ;;  %v1859_v10 = vsel %vm920_vm4, %v1853_v9, 0  ;;  %v3292_v9 = vld [vmem:[%s3929_s10 + $0x10] sm:$0xff]  }
 0xe25   : > { %v1745_v34 = vpop.permute.xlu1 %1744 }
 0xe26   : > { %v1486_v19 = vpack.c.bf16 %v1485_v17, %v1485_v17  ;;  %v1750_v38 = vsel %vm695_vm2, %v1745_v34, 0 }
 0xe28   : > { %3138 = vmatmul.mubr.msk.bf16.vlgmr.msra.gmra.mxu0 %vm695_vm2, %v1486_v19 }
 0xe29   : > { %3148 = vmatpush3.bf16.msra.mxu0 %v1606_v20  ;;  %3149 = vmatprep.mubr.msk.bf16.mxu0 %vm3366_vm0, %v3365_v1 }
 0xe2a   : > { %3159 = vmatprep.subr.bf16.mxu0 %v3365_v1 }
 0xe2b   : > { %v3344_v22 = vpop.eup %3343 }
 0xe2c   : > { %v1598_v24 = vmul.f32 %v3344_v22, %v3340_v12 }
 0xe2e   : > { %v1599_v25 = vpack.c.bf16 %v1598_v24, %v1598_v24 }
 0xe30   : > { %3150 = vmatmul.mubr.msk.bf16.vlgmr.msra.gmra.mxu0 %vm695_vm2, %v1599_v25 }
 0xe31   : > { %3161 = vmatprep.mubr.msk.bf16.mxu0 %vm3366_vm0, %v3365_v1  ;;  %3160 = vmatpush3.bf16.msra.mxu0 %v1700_v27 }
 0xe32   : > { %3171 = vmatprep.subr.bf16.mxu0 %v3365_v1 }
 0xee8   : > { %v1529_v30 = vpop.f32.mrf.mxu0 }
 0xee9   : > { %v1536_v31 = vpack.c.bf16 %v1529_v30, %v1529_v30 }
 0xeea   : > { %v3139_v3 = vpop.f32.mrf.mxu0 }
 0xeeb   : > { %3162 = vmatmul.mubr.msk.bf16.vlgmr.msra.gmra.mxu0 %vm695_vm2, %v1536_v31 }
 0xeec   : > { %v1532_v32 = vpop.f32.mrf.mxu0  ;;  %3173 = vmatprep.mubr.msk.bf16.mxu0 %vm3366_vm0, %v3365_v1 }
 0xeee   : > { %v3140_v33 = vpop.f32.mrf.mxu0 }
 0xef0   : > { %v1642_v35 = vpop.f32.mrf.mxu0 }
 0xef1   : > { %v1649_v36 = vpack.c.bf16 %v1642_v35, %v1642_v35 }
 0xef2   : > { %v3151_v37 = vpop.f32.mrf.mxu0 }
 0xef3   : > { %3156 = vmatmul.mubr.msk.bf16.vlgmr.msra.gmra.mxu1 %vm695_vm2, %v1649_v36 }
 0xef4   : > { %3166 = vmatpush3.bf16.xpose.msra.mxu1 %v1750_v38  ;;  %v1645_v39 = vpop.f32.mrf.mxu0  ;;  %3167 = vmatprep.mubr.msk.bf16.mxu1 %vm3366_vm0, %v3365_v1 }
 0xef5   : > { %3177 = vmatprep.subr.bf16.mxu1 %v3365_v1 }
 0xef6   : > { %v3152_v23 = vpop.f32.mrf.mxu0 }
 0xefb   : > { %3168 = vmatmul.mubr.msk.bf16.vlgmr.msra.gmra.mxu1 %vm695_vm2, %v1743_v41 }
 0xefc   : > { %3179 = vmatprep.mubr.msk.bf16.mxu1 %vm3366_vm0, %v3365_v1  ;;  %3178 = vmatpush3.bf16.msra.mxu1 %v1859_v10  ;;  %v3293_v10 = vld [vmem:[%s3929_s10 + $0x8] sm:$0xff]  }
 0xefd   : > { %3189 = vmatprep.subr.bf16.mxu1 %v3365_v1 }
 0xfab   : > { %v1736_v42 = vpop.f32.mrf.mxu0 }
 0xfad   : > { %v3163_v43 = vpop.f32.mrf.mxu0 }
 0xfaf   : > { %v1739_v44 = vpop.f32.mrf.mxu0 }
 0xfb1   : > { %v3164_v46 = vpop.f32.mrf.mxu0 }
 0xfb3   : > { %v1690_v47 = vpop.f32.mrf.mxu1 }
 0xfb4   : > { %v3724_v48 = vadd.f32 %v1736_v42, %v1690_v47  ;;  %v2885_v47 = vld [vmem:[%s3922_s3 + $0x4] ss:$0 sm:$0xff] }
 0xfb5   : > { %v3157_v49 = vpop.f32.mrf.mxu1 }
 0xfb7   : > { %v1693_v50 = vpop.f32.mrf.mxu1 }
 0xfb9   : > { %v3158_v51 = vpop.f32.mrf.mxu1 }
 0xfbb   : > { %v1786_v52 = vpop.f32.mrf.mxu1 }
 0xfbc   : > { %v1792_v53 = vmul.f32 0.35355338, %v1786_v52 }
 0xfbd   : > { %v3169_v54 = vpop.f32.mrf.mxu1 }
 0xfbe   : > { %v1793_v55 = vsel %vm695_vm2, %v1792_v53, -inf }
 0xfbf   : > { %1794 = vmax.xlane.f32.xlu1 %v1793_v55  ;;  %v1789_v56 = vpop.f32.mrf.mxu1 }
 0xfc1   : > { %v3170_v57 = vpop.f32.mrf.mxu1 }
 0xfd0   : > { %1805 = vrot.lane.b32.xlu1 %v3664_v45, %s3376_s26 }
 0xfd4   : > { %1902 = vrot.lane.b32.xlu1 %v3664_v45, %s3372_s0  ;;  %s547_s0 = scalar_lea.vmem %s3934_s15, %s3941_s30 }
0x1048   : > { %v1795_v58 = vpop.xlane.xlu1 %1794 }
0x1049   : > { %v1796_v59 = vsub.f32 %v1792_v53, %v1795_v58 }
0x104b   : > { %v1797_v60 = vmul.f32 1.442695, %v1796_v59 }
0x104c   : > { %v1806_v61 = vpop.permute.xlu1 %1805 }
0x104d   : > { %3345 = vpow2.f32 %v1797_v60  ;;  %v1811_v62 = vsel %vm920_vm4, %v1806_v61, 0  ;;  %v3289_v60 = vld [vmem:[%s3928_s9 + $0x8] sm:$0xff]  }
0x104e   : > { %3172 = vmatpush3.bf16.msra.mxu0 %v1811_v62 }
0x104f   : > { %3183 = vmatprep.subr.bf16.mxu0 %v3365_v1 }
0x1050   : > { %v1903_v8 = vpop.permute.xlu1 %1902 }
0x105a   : > { %v3346_v63 = vpop.eup %3345 }
0x105b   : > { %v1799_v0 = vsel %vm695_vm2, %v3346_v63, 0.0 }
0x105c   : > { %1800 = vadd.xlane.f32.xlu0 %v1799_v0 }
0x1072   : > { %1904 = vrot.lane.b32.xlu0 %v3664_v45, %s3940_s27 }
0x10e5   : > { %v1801_v2 = vpop.xlane.xlu0 %1800 }
0x10e6   : > { %3347 = vrcp.f32 %v1801_v2  ;;  %v2886_v2 = vld [vmem:[%s3922_s3 + $0xd] ss:$0 sm:$0xff] }
0x10e9   : > { %v1905_v6 = vpop.permute.xlu0 %1904 }
0x10ea   : > { %v1910_v7 = vsel %vm695_vm2, %v1905_v6, 0 }
0x10f3   : > { %v3348_v4 = vpop.eup %3347 }
0x10f4   : > { %v1803_v5 = vmul.f32 %v3348_v4, %v3346_v63 }
0x10f6   : > { %v1804_v21 = vpack.c.bf16 %v1803_v5, %v1803_v5  ;;  %v2887_v5 = vld [vmem:[%s3922_s3 + $0xe] ss:$0 sm:$0xff] }
0x10f8   : > { %3174 = vmatmul.mubr.msk.bf16.vlgmr.msra.gmra.mxu0 %vm695_vm2, %v1804_v21 }
0x10f9   : > { %3184 = vmatpush3.bf16.xpose.msra.mxu0 %v1910_v7  ;;  %3185 = vmatprep.mubr.msk.bf16.mxu0 %vm3366_vm0, %v3365_v1  ;;  %v3291_v7 = vld [vmem:[%s3929_s10 + $0x18] sm:$0xff]  }
0x10fa   : > { %3195 = vmatprep.subr.bf16.mxu0 %v3365_v1 }
0x1100   : > { %3186 = vmatmul.mubr.msk.bf16.vlgmr.msra.gmra.mxu0 %vm695_vm2, %v1903_v8 }
0x1101   : > { %3197 = vmatprep.mubr.msk.bf16.mxu0 %vm3366_vm0, %v3365_v1 }
0x11b8   : > { %v1847_v11 = vpop.f32.mrf.mxu0 }
0x11b9   : > { %v1854_v12 = vpack.c.bf16 %v1847_v11, %v1847_v11  ;;  %v3294_v11 = vld [vmem:[%s3929_s10] sm:$0xff]  }
0x11ba   : > { %v3175_v13 = vpop.f32.mrf.mxu0 }
0x11bb   : > { %3180 = vmatmul.mubr.msk.bf16.vlgmr.msra.gmra.mxu1 %vm695_vm2, %v1854_v12  ;;  %v2888_v12 = vld [vmem:[%s3922_s3 + $0x5] ss:$0 sm:$0xff] }
0x11bc   : > { %v1850_v14 = vpop.f32.mrf.mxu0  ;;  %3191 = vmatprep.mubr.msk.bf16.mxu1 %vm3366_vm0, %v3365_v1 }
0x11be   : > { %v3176_v15 = vpop.f32.mrf.mxu0 }
0x11c0   : > { %v1946_v16 = vpop.f32.mrf.mxu0 }
0x11c1   : > { %v1952_v17 = vmul.f32 0.35355338, %v1946_v16 }
0x11c2   : > { %v3187_v18 = vpop.f32.mrf.mxu0 }
0x11c3   : > { %v1953_v19 = vsel %vm695_vm2, %v1952_v17, -inf }
0x11c4   : > { %1954 = vmax.xlane.f32.xlu1 %v1953_v19  ;;  %v1949_v20 = vpop.f32.mrf.mxu0 }
0x11c5   : > { %v2892_v20 = vld [vmem:[%s3922_s3 + $0x6] ss:$0 sm:$0xff] }
0x11c6   : > { %v3188_v22 = vpop.f32.mrf.mxu0 }
0x11d5   : > { %1965 = vrot.lane.b32.xlu1 %v3664_v45, %s3377_s18  ;;  %v2013_v45 = vld [vmem:[%s3927_s8 + $0xc] sm:$0xf] }
0x11d6   : > { %v2019_v33 = vsel %vm920_vm4, %v2013_v45, 0 }
0x11d7   : > { %3196 = vmatpush3.bf16.msra.mxu0 %v2019_v33  ;;  %v3295_v33 = vld [vmem:[%s3930_s11 + $0x8] sm:$0xff]  }
0x11d8   : > { %3237 = vmatprep.subr.bf16.mxu0 %v3365_v1 }
0x124d   : > { %v1955_v24 = vpop.xlane.xlu1 %1954 }
0x124e   : > { %v1956_v25 = vsub.f32 %v1952_v17, %v1955_v24 }
0x1250   : > { %v1957_v26 = vmul.f32 1.442695, %v1956_v25 }
0x1251   : > { %v1966_v27 = vpop.permute.xlu1 %1965 }
0x1252   : > { %3349 = vpow2.f32 %v1957_v26  ;;  %v1971_v28 = vsel %vm920_vm4, %v1966_v27, 0 }
0x1253   : > { %3190 = vmatpush3.bf16.msra.mxu1 %v1971_v28 }
0x1254   : > { %3201 = vmatprep.subr.bf16.mxu1 %v3365_v1 }
0x125f   : > { %v3350_v29 = vpop.eup %3349 }
0x1260   : > { %v1959_v30 = vsel %vm695_vm2, %v3350_v29, 0.0 }
0x1261   : > { %1960 = vadd.xlane.f32.xlu0 %v1959_v30 }
0x127b   : > { %v1895_v31 = vpop.f32.mrf.mxu1 }
0x127c   : > { %v1901_v3 = vadd.f32 %v1895_v31, %v3724_v48 }
0x127d   : > { %v3181_v32 = vpop.f32.mrf.mxu1 }
0x127f   : > { %v1898_v34 = vpop.f32.mrf.mxu1 }
0x1280   : > { %v3296_v34 = vld [vmem:[%s3930_s11] sm:$0xff]  }
0x1281   : > { %v3182_v35 = vpop.f32.mrf.mxu1 }
0x12ea   : > { %v1961_v36 = vpop.xlane.xlu0 %1960 }
0x12eb   : > { %3351 = vrcp.f32 %v1961_v36 }
0x12f8   : > { %v3352_v37 = vpop.eup %3351 }
0x12f9   : > { %v1963_v38 = vmul.f32 %v3352_v37, %v3350_v29 }
0x12fb   : > { %v1964_v39 = vpack.c.bf16 %v1963_v38, %v1963_v38 }
0x12fd   : > { %3192 = vmatmul.mubr.msk.bf16.vlgmr.msra.gmra.mxu1 %vm695_vm2, %v1964_v39  ;;  %v2898_v39 = vld [vmem:[%s3922_s3 + $0xf] ss:$0 sm:$0xff] }
0x12fe   : > { %3205 = vmatprep.mubr.msk.bf16.mxu1 %vm3366_vm0, %v3365_v1  ;;  %3202 = vmatpush3.bf16.msra.mxu1 %v3289_v60 }
0x12ff   : > { %3203 = vmatprep.subr.bf16.mxu1 %v3365_v1 }
0x13bd   : > { %v2007_v23 = vpop.f32.mrf.mxu1 }
0x13be   : > { %v2014_v41 = vpack.c.bf16 %v2007_v23, %v2007_v23 }
0x13bf   : > { %v3193_v42 = vpop.f32.mrf.mxu1 }
0x13c0   : > { %3198 = vmatmul.mubr.msk.bf16.vlgmr.msra.gmra.mxu0 %vm695_vm2, %v2014_v41  ;;  %v2899_v41 = vld [vmem:[%s3922_s3 + $0x10] ss:$0 sm:$0xff] }
0x13c1   : > { %v2010_v43 = vpop.f32.mrf.mxu1  ;;  %3241 = vmatprep.mubr.msk.bf16.mxu0 %vm3366_vm0, %v3365_v1 }
0x13c3   : > { %v3194_v44 = vpop.f32.mrf.mxu1 }
0x13c4   : > { %v3297_v44 = vld [vmem:[%s3931_s12 + $0x8] sm:$0xff]  }
0x1480   : > { %v2055_v46 = vpop.f32.mrf.mxu0 }
0x1481   : > { %v2061_v48 = vadd.f32 %v2055_v46, %v1901_v3 }
0x1482   : > { %v3199_v49 = vpop.f32.mrf.mxu0 }
0x1483   : > { %v2067_v50 = vadd.f32 %v2885_v47, %v2061_v48  ;;  %v3298_v47 = vld [vmem:[%s3931_s12] sm:$0xff]   ;;  %v3299_v48 = vld [vmem:[%s3932_s13 + $0x8] sm:$0xff]  }
0x1484   : > { %v2058_v51 = vpop.f32.mrf.mxu0  ;;  %3238 = vmatpush3.bf16.msra.mxu0 %v3299_v48  ;;  %v3300_v49 = vld [vmem:[%s3932_s13] sm:$0xff]  }
0x1485   : > { %v2068_v52 = vadd.f32 %v2067_v50, %v3654_v40  ;;  %v3290_v40 = vld [vmem:[%s3928_s9] sm:$0xff]   ;;  %3239 = vmatprep.subr.bf16.mxu0 %v3365_v1 }
0x1486   : > { %v3200_v53 = vpop.f32.mrf.mxu0  ;;  %3204 = vmatpush3.bf16.msra.mxu1 %v3290_v40  ;;  %v2900_v50 = vld [vmem:[%s3922_s3 + $0x7] ss:$0 sm:$0xff] }
0x1487   : > { %v2069_v54 = vsel %vm579_vm1, %v2068_v52, 0.0  ;;  %3209 = vmatprep.subr.bf16.mxu1 %v3365_v1 }
0x1488   : > { %2070 = vadd.xlane.f32.xlu0 %v2069_v54  ;;  %3240 = vmatpush3.bf16.msra.mxu0 %v3300_v49 }
0x1511   : > { %v2071_v55 = vpop.xlane.xlu0 %2070 }
0x1512   : > { %v2072_v56 = vmul.f32 0.03125, %v2071_v55 }
0x1514   : > { %v2073_v57 = vsub.f32 %v2068_v52, %v2072_v56  ;;  %v2904_v56 = vld [vmem:[%s3922_s3 + $0x8] ss:$0 sm:$0xff] }
0x1516   : > { %v2074_v58 = vmul.f32 %v2073_v57, %v2073_v57 }
0x1518   : > { %v2075_v59 = vsel %vm579_vm1, %v2074_v58, 0.0 }
0x1519   : > { %2076 = vadd.xlane.f32.xlu0 %v2075_v59 }
0x15a2   : > { %v2077_v61 = vpop.xlane.xlu0 %2076 }
0x15a3   : > { %v2078_v62 = vmul.f32 0.03125, %v2077_v61 }
0x15a5   : > { %v2079_v63 = vadd.f32 1e-05, %v2078_v62 }
0x15a7   : > { %3353 = vrsqrt.f32 %v2079_v63  ;;  %v3301_v63 = vld [vmem:[%s3933_s14 + $0x8] sm:$0xff]  }
0x15b4   : > { %v3354_v0 = vpop.eup %3353 }
0x15b5   : > { %v2081_v4 = vmul.f32 %v3354_v0, %v2073_v57  ;;  %v3302_v0 = vld [vmem:[%s3933_s14] sm:$0xff]  }
0x15b7   : > { %v2087_v6 = vmul.f32 %v2886_v2, %v2081_v4  ;;  %v3303_v2 = vld [vmem:[%s3515_s28 + $0x78] sm:$0xff]  }
0x15b8   : > { %v3304_v4 = vld [vmem:[%s3515_s28 + $0x38] sm:$0xff]   ;;  %3253 = vmatprep.subr.msk.bf16.mxu0 %vm743_vm3, %v3303_v2 }
0x15b9   : > { %v2093_v21 = vadd.f32 %v2887_v5, %v2087_v6  ;;  %v3305_v5 = vld [vmem:[%s3515_s28 + $0x70] sm:$0xff]   ;;  %v2666_v6 = vsel %vm743_vm3, %v3304_v4, 0 }
0x15bb   : > { %v2098_v8 = vpack.c.bf16 %v2093_v21, %v2093_v21 }
0x15bd   : > { %3206 = vmatmul.mubr.msk.bf16.vlgmr.msra.gmra.mxu1 %vm579_vm1, %v2098_v8  ;;  %v3308_v8 = vld [vmem:[%s3515_s28 + $0x28] sm:$0xff]  }
0x15be   : > { %3210 = vmatpush3.bf16.msra.mxu1 %v3291_v7  ;;  %3217 = vmatprep.mubr.msk.bf16.mxu1 %vm3366_vm0, %v3365_v1  ;;  %v3307_v7 = vld [vmem:[%s3515_s28 + $0x68] sm:$0xff]  }
0x15bf   : > { %3211 = vmatprep.subr.bf16.mxu1 %v3365_v1 }
0x15c2   : > { %3212 = vmatpush3.bf16.msra.mxu1 %v3292_v9  ;;  %v2660_v9 = vsel %vm743_vm3, %v3308_v8, 0 }
0x15c3   : > { %3213 = vmatprep.subr.bf16.mxu1 %v3365_v1 }
0x15c6   : > { %3214 = vmatpush3.bf16.msra.mxu1 %v3293_v10  ;;  %v3309_v10 = vld [vmem:[%s3515_s28 + $0x60] sm:$0xff]  }
0x15c7   : > { %3215 = vmatprep.subr.bf16.mxu1 %v3365_v1 }
0x15ca   : > { %3216 = vmatpush3.bf16.msra.mxu1 %v3294_v11  ;;  %v3310_v11 = vld [vmem:[%s3515_s28 + $0x20] sm:$0xff]  }
0x15cb   : > { %3221 = vmatprep.subr.bf16.mxu1 %v3365_v1 }
0x167d   : > { %v2153_v13 = vpop.f32.mrf.mxu1 }
0x167e   : > { %v2154_v14 = vadd.f32 %v2888_v12, %v2153_v13  ;;  %v2657_v12 = vsel %vm743_vm3, %v3310_v11, 0  ;;  %v3311_v13 = vld [vmem:[%s3515_s28 + $0x58] sm:$0xff]  }
0x167f   : > { %v3207_v15 = vpop.f32.mrf.mxu1 }
0x1680   : > { %v2159_v16 = vmax.f32 %v2154_v14, 0.0  ;;  %v3312_v14 = vld [vmem:[%s3515_s28 + $0x18] sm:$0xff]  }
0x1681   : > { %v2156_v17 = vpop.f32.mrf.mxu1  ;;  %v2654_v15 = vsel %vm743_vm3, %v3312_v14, 0 }
0x1682   : > { %v2168_v18 = vpack.c.bf16 %v2159_v16, %v2159_v16  ;;  %v3313_v16 = vld [vmem:[%s3515_s28 + $0x50] sm:$0xff]  }
0x1683   : > { %v3208_v19 = vpop.f32.mrf.mxu1  ;;  %v3314_v17 = vld [vmem:[%s3515_s28 + $0x10] sm:$0xff]  }
0x1684   : > { %3218 = vmatmul.mubr.msk.bf16.vlgmr.msra.gmra.mxu1 %vm2198_vm5, %v2168_v18  ;;  %v2651_v18 = vsel %vm743_vm3, %v3314_v17, 0  ;;  %v3315_v19 = vld [vmem:[%s3515_s28 + $0x48] sm:$0xff]  }
0x1685   : > { %3225 = vmatprep.mubr.msk.bf16.mxu1 %vm3366_vm0, %v3365_v1  ;;  %3222 = vmatpush3.bf16.msra.mxu1 %v3295_v33  ;;  %v2912_v33 = vld [vmem:[%s3922_s3 + $0xa] ss:$0 sm:$0xff] }
0x1686   : > { %3223 = vmatprep.subr.bf16.mxu1 %v3365_v1 }
0x1689   : > { %3224 = vmatpush3.bf16.msra.mxu1 %v3296_v34 }
0x168a   : > { %3229 = vmatprep.subr.bf16.mxu1 %v3365_v1 }
0x1744   : > { %v2236_v22 = vpop.f32.mrf.mxu1 }
0x1745   : > { %v2237_v24 = vadd.f32 %v2892_v20, %v2236_v22  ;;  %v3316_v20 = vld [vmem:[%s3515_s28 + $0x8] sm:$0xff]  }
0x1746   : > { %v3219_v25 = vpop.f32.mrf.mxu1  ;;  %v2648_v22 = vsel %vm743_vm3, %v3316_v20, 0 }
0x1747   : > { %v2242_v26 = vadd.f32 %v2237_v24, %v2093_v21  ;;  %v3317_v24 = vld [vmem:[%s3515_s28 + $0x40] sm:$0xff]  }
0x1748   : > { %v2239_v27 = vpop.f32.mrf.mxu1  ;;  %v3318_v25 = vld [vmem:[%s3515_s28] sm:$0xff]  }
0x1749   : > { %v2243_v28 = vsel %vm579_vm1, %v2242_v26, 0.0  ;;  %v2908_v27 = vld [vmem:[%s3922_s3 + $0x9] ss:$0 sm:$0xff] }
0x174a   : > { %2244 = vadd.xlane.f32.xlu1 %v2243_v28  ;;  %v3220_v29 = vpop.f32.mrf.mxu1 }
0x17d3   : > { %v2245_v30 = vpop.xlane.xlu1 %2244 }
0x17d4   : > { %v2246_v31 = vmul.f32 0.03125, %v2245_v30 }
0x17d6   : > { %v2247_v3 = vsub.f32 %v2242_v26, %v2246_v31  ;;  %v2645_v26 = vsel %vm743_vm3, %v3318_v25, 0 }
0x17d8   : > { %v2248_v32 = vmul.f32 %v2247_v3, %v2247_v3 }
0x17da   : > { %v2249_v45 = vsel %vm579_vm1, %v2248_v32, 0.0 }
0x17db   : > { %2250 = vadd.xlane.f32.xlu0 %v2249_v45 }
0x1864   : > { %v2251_v35 = vpop.xlane.xlu0 %2250 }
0x1865   : > { %v2252_v36 = vmul.f32 0.03125, %v2251_v35 }
0x1867   : > { %v2253_v37 = vadd.f32 1e-05, %v2252_v36 }
0x1869   : > { %3355 = vrsqrt.f32 %v2253_v37 }
0x1876   : > { %v3356_v38 = vpop.eup %3355 }
0x1877   : > { %v2255_v23 = vmul.f32 %v3356_v38, %v2247_v3 }
0x1879   : > { %v2261_v42 = vmul.f32 %v2898_v39, %v2255_v23 }
0x187b   : > { %v2267_v43 = vadd.f32 %v2899_v41, %v2261_v42 }
0x187d   : > { %v2272_v46 = vpack.c.bf16 %v2267_v43, %v2267_v43 }
0x187f   : > { %3226 = vmatmul.mubr.msk.bf16.vlgmr.msra.gmra.mxu1 %vm579_vm1, %v2272_v46 }
0x1880   : > { %3230 = vmatpush3.bf16.msra.mxu1 %v3297_v44  ;;  %3233 = vmatprep.mubr.msk.bf16.mxu1 %vm3366_vm0, %v3365_v1 }
0x1881   : > { %3231 = vmatprep.subr.bf16.mxu1 %v3365_v1 }
0x1884   : > { %3232 = vmatpush3.bf16.msra.mxu1 %v3298_v47 }
0x1885   : > { %3245 = vmatprep.subr.bf16.mxu1 %v3365_v1 }
0x1887   : > { %3234 = vmatmul.mubr.msk.bf16.vlgmr.msra.gmra.mxu1 %vm579_vm1, %v2272_v46 }
0x1888   : > { %3249 = vmatprep.mubr.msk.bf16.mxu1 %vm3366_vm0, %v3365_v1  ;;  %3246 = vmatpush3.bf16.msra.mxu1 %v3301_v63 }
0x1889   : > { %3247 = vmatprep.subr.bf16.mxu1 %v3365_v1  ;;  %v3306_v1 = vld [vmem:[%s3515_s28 + $0x30] sm:$0xff]   ;;  %s2937_s28 = sshll.u32 %s3943_s22, 4 }
0x188a   : > { %v2663_v21 = vsel %vm743_vm3, %v3306_v1, 0  ;;  %s552_s29 = scalar_lea.vmem %s3935_s16, %s2937_s28 }
0x188c   : > { %3248 = vmatpush3.bf16.msra.mxu1 %v3302_v0 }
0x193f   : > { %v2327_v51 = vpop.f32.mrf.mxu1 }
0x1940   : > { %v2328_v52 = vadd.f32 %v2900_v50, %v2327_v51 }
0x1941   : > { %v3227_v53 = vpop.f32.mrf.mxu1 }
0x1942   : > { %2334 = vst.msk [vmem:[%s547_s0] sm:$0xff] %vm2333_vm6, %v2328_v52 }
0x1943   : > { %v2330_v54 = vpop.f32.mrf.mxu1 }
0x1945   : > { %v3228_v55 = vpop.f32.mrf.mxu1 }
0x1947   : > { %v2390_v57 = vpop.f32.mrf.mxu1 }
0x1948   : > { %v2391_v58 = vadd.f32 %v2904_v56, %v2390_v57 }
0x1949   : > { %v3235_v59 = vpop.f32.mrf.mxu1 }
0x194a   : > { %v2396_v60 = vmax.f32 %v2391_v58, 0.0 }
0x194b   : > { %v2393_v40 = vpop.f32.mrf.mxu1 }
0x194c   : > { %v2401_v61 = vpack.c.bf16 %v2396_v60, %v2396_v60 }
0x194d   : > { %v3236_v62 = vpop.f32.mrf.mxu1 }
0x194e   : > { %3242 = vmatmul.mubr.msk.bf16.vlgmr.msra.gmra.mxu0 %vm579_vm1, %v2401_v61 }
0x194f   : > { %3016 = vmatpush3.bf16.xpose.msra.mxu0 %v2666_v6 }
0x1950   : > { %3254 = vmatprep.subr.msk.bf16.mxu0 %vm743_vm3, %v3305_v5 }
0x1957   : > { %3018 = vmatpush3.bf16.xpose.msra.mxu0 %v2663_v21 }
0x1958   : > { %3255 = vmatprep.subr.msk.bf16.mxu0 %vm743_vm3, %v3307_v7 }
0x195f   : > { %3020 = vmatpush3.bf16.xpose.msra.mxu0 %v2660_v9 }
0x1960   : > { %3256 = vmatprep.subr.msk.bf16.mxu0 %vm743_vm3, %v3309_v10 }
0x1967   : > { %3022 = vmatpush3.bf16.xpose.msra.mxu0 %v2657_v12 }
0x1968   : > { %3257 = vmatprep.subr.msk.bf16.mxu0 %vm743_vm3, %v3311_v13 }
0x196f   : > { %3024 = vmatpush3.bf16.xpose.msra.mxu0 %v2654_v15 }
0x1970   : > { %3258 = vmatprep.subr.msk.bf16.mxu0 %vm743_vm3, %v3313_v16 }
0x1977   : > { %3026 = vmatpush3.bf16.xpose.msra.mxu0 %v2651_v18 }
0x1978   : > { %3259 = vmatprep.subr.msk.bf16.mxu0 %vm743_vm3, %v3315_v19 }
0x197f   : > { %3028 = vmatpush3.bf16.xpose.msra.mxu0 %v2648_v22 }
0x1980   : > { %3260 = vmatprep.subr.msk.bf16.mxu0 %vm743_vm3, %v3317_v24 }
0x1987   : > { %3030 = vmatpush3.bf16.xpose.msra.mxu0 %v2645_v26 }
0x1a0e   : > { %v2456_v28 = vpop.f32.mrf.mxu0 }
0x1a0f   : > { %v2457_v29 = vadd.f32 %v2908_v27, %v2456_v28 }
0x1a10   : > { %v3243_v30 = vpop.f32.mrf.mxu0 }
0x1a11   : > { %v2462_v31 = vmax.f32 %v2457_v29, 0.0 }
0x1a12   : > { %v2459_v3 = vpop.f32.mrf.mxu0 }
0x1a13   : > { %v2467_v32 = vpack.c.bf16 %v2462_v31, %v2462_v31 }
0x1a14   : > { %v3244_v45 = vpop.f32.mrf.mxu0 }
0x1a15   : > { %3250 = vmatmul.mubr.msk.bf16.vlgmr.msra.gmra.mxu1 %vm579_vm1, %v2467_v32 }
0x1ad5   : > { %v2522_v34 = vpop.f32.mrf.mxu1 }
0x1ad6   : > { %v2523_v35 = vadd.f32 %v2912_v33, %v2522_v34 }
0x1ad7   : > { %v3251_v36 = vpop.f32.mrf.mxu1 }
0x1ad8   : > { %v2528_v37 = vpack.c.bf16 %v2523_v35, %v2523_v35 }
0x1ad9   : > { %v2525_v38 = vpop.f32.mrf.mxu1 }
0x1ada   : > { %3031 = vmatprep.mubr.msk.bf16.mxu0 %vm743_vm3, %v2528_v37 }
0x1adb   : > { %v3252_v39 = vpop.f32.mrf.mxu1  ;;  %3032 = vmatmul.mubr.msk.bf16.vlgmr.msra.gmra.mxu0 %vm743_vm3, %v2528_v37 }
0x1b9b   : > { %v2726_v23 = vpop.f32.mrf.mxu0 }
0x1b9c   : > { %2733 = vst [vmem:[%s552_s29] sm:$0xff] %v2726_v23 }
0x1b9d   : > { %v2728_v41 = vpop.f32.mrf.mxu0 }
0x1b9e   : > { %2734 = vst [vmem:[%s552_s29 + $0x8] sm:$0xff] %v2728_v41 }
0x1b9f   : > { %v2730_v42 = vpop.f32.mrf.mxu0 }
0x1ba1   : > { %v2731_v43 = vpop.f32.mrf.mxu0 }
0x1ba2 PF: > { %s27_s21 = sadd.s32 1, %s3363_s21  }
0x1ba3   : > { %p24_p4 = scmp.ge.s32.totalorder %s27_s21, 4  }
0x1ba5   :  { %26 = sbr.rel (!%p24_p4) target bundleno = 2 (0x2), region = 125 }

</bundles_post_ra>
